<compile_context>
chip_gen: v6e
topology: v6e:2x2x1
jax: 0.10.0
libtpu: 0.0.40
codegen_flags: <defaults>
</compile_context>

<pallas_src>
import functools
import numpy as np
import jax
import jax.numpy as jnp
from jax.experimental import pallas as pl
from jax.experimental.pallas import tpu as pltpu

_INV_SQRT2 = 0.7071067811865476


# ------------------------------ tiling helpers ------------------------------

def _row_tile(M, max_tile=1024):
    """Pick a large row tile; pad rows if nothing nice divides M."""
    for t in (1024, 512, 256, 128):
        if M % t == 0:
            return t, 0
    if M <= max_tile:
        pad = (-M) % 8
        return M + pad, pad
    return 256, (-M) % 256


def _pick_window_batch(n_windows, n_mask, S, max_rows=2048):
    """Largest multiple of n_mask dividing n_windows with bw*S <= max_rows."""
    k_max = n_windows // n_mask
    best = 1
    for k in range(1, k_max + 1):
        if k_max % k == 0 and (k * n_mask) * S <= max_rows:
            best = k
    return best * n_mask


def _pick_temporal_block(Mt, Nf, max_rows=4096):
    """Block of bt columns (multiple of 8) dividing the padded Mt."""
    pad0 = (-Mt) % 8
    Mp = Mt + pad0
    best = min(8, Mp)
    bt = 8
    while bt <= Mp:
        if Mp % bt == 0 and bt * Nf <= max_rows:
            best = bt
        bt += 8
    return best, Mp - Mt


# ----------------------------- Pallas kernels -------------------------------

def _ln_kernel(x_ref, g_ref, b_ref, o_ref, *, eps):
    x = x_ref[...].astype(jnp.float32)
    mu = jnp.mean(x, axis=-1, keepdims=True)
    var = jnp.mean((x - mu) ** 2, axis=-1, keepdims=True)
    y = (x - mu) * jax.lax.rsqrt(var + eps)
    o_ref[...] = (y * g_ref[...] + b_ref[...]).astype(o_ref.dtype)


def _res_ln_mlp_kernel(a_ref, r_ref, g_ref, b_ref, w1_ref, b1_ref, w2_ref, b2_ref,
                       o_ref, *, eps):
    # s = a + r ; out = s + MLP(LN(s))    (residual add fused into this kernel)
    s = a_ref[...].astype(jnp.float32) + r_ref[...].astype(jnp.float32)
    mu = jnp.mean(s, axis=-1, keepdims=True)
    var = jnp.mean((s - mu) ** 2, axis=-1, keepdims=True)
    y = (s - mu) * jax.lax.rsqrt(var + eps) * g_ref[...] + b_ref[...]
    h = jnp.dot(y, w1_ref[...], preferred_element_type=jnp.float32) + b1_ref[...]
    h = 0.5 * h * (1.0 + jax.lax.erf(h * _INV_SQRT2))          # exact GELU
    out = s + jnp.dot(h, w2_ref[...], preferred_element_type=jnp.float32) + b2_ref[...]
    o_ref[...] = out.astype(o_ref.dtype)


def _win_attn_kernel(x_ref, g_ref, b_ref, wq_ref, wk_ref, wv_ref,
                     bq_ref, bk_ref, bv_ref, wo_ref, bo_ref, bias_ref, o_ref,
                     *, n_heads, scale, clamp_min, fuse_ln, eps, n_mask):
    """Fused (optional LN) + QKV + windowed MHA (+bias/mask) + out-proj.

    Processes `bw` windows per grid step; QKV and proj are big (bw*S, C)
    matmuls, the attention core is a per-head batched einsum over windows.
    """
    bw, S, C = x_ref.shape
    hd = C // n_heads
    x = x_ref[...].astype(jnp.float32).reshape(bw * S, C)
    if fuse_ln:
        mu = jnp.mean(x, axis=-1, keepdims=True)
        var = jnp.mean((x - mu) ** 2, axis=-1, keepdims=True)
        x = (x - mu) * jax.lax.rsqrt(var + eps) * g_ref[...] + b_ref[...]

    q2 = (jnp.dot(x, wq_ref[...], preferred_element_type=jnp.float32) + bq_ref[...]) * scale
    k2 = jnp.dot(x, wk_ref[...], preferred_element_type=jnp.float32) + bk_ref[...]
    v2 = jnp.dot(x, wv_ref[...], preferred_element_type=jnp.float32) + bv_ref[...]
    q3 = q2.reshape(bw, S, C)
    k3 = k2.reshape(bw, S, C)
    v3 = v2.reshape(bw, S, C)

    bias = bias_ref[...].astype(jnp.float32)            # (n_mask, heads, S, S)

    head_outs = []
    for h in range(n_heads):                            # small static unroll
        sl = slice(h * hd, (h + 1) * hd)
        qh, kh, vh = q3[:, :, sl], k3[:, :, sl], v3[:, :, sl]
        s = jnp.einsum('bqd,bkd->bqk', qh, kh,
                       preferred_element_type=jnp.float32)          # (bw,S,S)
        if n_mask == 1:
            s = s + bias[0, h]
        else:
            s = (s.reshape(bw // n_mask, n_mask, S, S)
                 + bias[:, h][None]).reshape(bw, S, S)
        s = s - jnp.max(s, axis=-1, keepdims=True)
        e = jnp.exp(s)
        p = e * pl.reciprocal(jnp.sum(e, axis=-1, keepdims=True), approx=True)
        if clamp_min is not None:
            p = jnp.maximum(p, clamp_min)               # torch.clamp(attn, min=1e-8)
        head_outs.append(jnp.einsum('bqk,bkd->bqd', p, vh,
                                    preferred_element_type=jnp.float32))
    out = jnp.concatenate(head_outs, axis=-1).reshape(bw * S, C)
    y = jnp.dot(out, wo_ref[...], preferred_element_type=jnp.float32) + bo_ref[...]
    o_ref[...] = y.reshape(bw, S, C).astype(o_ref.dtype)


def _temporal_attn_kernel(x_ref, g_ref, b_ref, wq_ref, wk_ref, wv_ref,
                          bq_ref, bk_ref, bv_ref, wo_ref, bo_ref, o_ref,
                          *, n_heads, scale, eps):
    """Fused LN + QKV + temporal MHA (over Nf frames) + out-proj.

    Input block is (Nf, bt, D): the heavy matmuls run over Nf*bt rows, the
    tiny Nf x Nf attention core is cheap VPU work (no bias, no clamp).
    """
    Nf, bt, D = x_ref.shape
    hd = D // n_heads
    x = x_ref[...].astype(jnp.float32).reshape(Nf * bt, D)
    mu = jnp.mean(x, axis=-1, keepdims=True)
    var = jnp.mean((x - mu) ** 2, axis=-1, keepdims=True)
    xn = (x - mu) * jax.lax.rsqrt(var + eps) * g_ref[...] + b_ref[...]

    q2 = (jnp.dot(xn, wq_ref[...], preferred_element_type=jnp.float32) + bq_ref[...]) * scale
    k2 = jnp.dot(xn, wk_ref[...], preferred_element_type=jnp.float32) + bk_ref[...]
    v2 = jnp.dot(xn, wv_ref[...], preferred_element_type=jnp.float32) + bv_ref[...]
    q3 = q2.reshape(Nf, bt, D)
    k3 = k2.reshape(Nf, bt, D)
    v3 = v2.reshape(Nf, bt, D)

    frame_heads = [[None] * n_heads for _ in range(Nf)]
    for h in range(n_heads):
        sl = slice(h * hd, (h + 1) * hd)
        qh = [q3[i, :, sl] for i in range(Nf)]           # each (bt, hd)
        kh = [k3[i, :, sl] for i in range(Nf)]
        vh = [v3[i, :, sl] for i in range(Nf)]
        # scores[i][j]: (bt, 1) row-wise dot products
        s = [[jnp.sum(qh[i] * kh[j], axis=-1, keepdims=True) for j in range(Nf)]
             for i in range(Nf)]
        for i in range(Nf):
            m = s[i][0]
            for j in range(1, Nf):
                m = jnp.maximum(m, s[i][j])
            es = [jnp.exp(s[i][j] - m) for j in range(Nf)]
            den = es[0]
            for j in range(1, Nf):
                den = den + es[j]
            inv = pl.reciprocal(den, approx=True)
            acc = (es[0] * inv) * vh[0]
            for j in range(1, Nf):
                acc = acc + (es[j] * inv) * vh[j]
            frame_heads[i][h] = acc                      # (bt, hd)

    rows = [jnp.concatenate(frame_heads[i], axis=-1) for i in range(Nf)]   # (bt, D)
    y = jnp.concatenate(rows, axis=0)                                       # (Nf*bt, D)
    o = jnp.dot(y, wo_ref[...], preferred_element_type=jnp.float32) + bo_ref[...]
    o_ref[...] = o.reshape(Nf, bt, D).astype(o_ref.dtype)


# ----------------------------- Pallas wrappers ------------------------------

def layernorm_pallas(x2d, gamma, beta, eps=1e-6):
    M, D = x2d.shape
    tm, pad = _row_tile(M)
    xp = jnp.pad(x2d, ((0, pad), (0, 0))) if pad else x2d
    Mp = M + pad
    out = pl.pallas_call(
        functools.partial(_ln_kernel, eps=eps),
        out_shape=jax.ShapeDtypeStruct((Mp, D), x2d.dtype),
        grid=(Mp // tm,),
        in_specs=[pl.BlockSpec((tm, D), lambda i: (i, 0)),
                  pl.BlockSpec((1, D), lambda i: (0, 0)),
                  pl.BlockSpec((1, D), lambda i: (0, 0))],
        out_specs=pl.BlockSpec((tm, D), lambda i: (i, 0)),
        compiler_params=pltpu.CompilerParams(dimension_semantics=("parallel",)),
    )(xp, gamma.reshape(1, D), beta.reshape(1, D))
    return out[:M] if pad else out


def res_ln_mlp_pallas(a2d, r2d, gamma, beta, w1, b1, w2, b2, eps=1e-6):
    M, D = a2d.shape
    Hh = w1.shape[1]
    tm, pad = _row_tile(M)
    if pad:
        a2d = jnp.pad(a2d, ((0, pad), (0, 0)))
        r2d = jnp.pad(r2d, ((0, pad), (0, 0)))
    Mp = M + pad
    out = pl.pallas_call(
        functools.partial(_res_ln_mlp_kernel, eps=eps),
        out_shape=jax.ShapeDtypeStruct((Mp, D), a2d.dtype),
        grid=(Mp // tm,),
        in_specs=[pl.BlockSpec((tm, D), lambda i: (i, 0)),
                  pl.BlockSpec((tm, D), lambda i: (i, 0)),
                  pl.BlockSpec((1, D), lambda i: (0, 0)),
                  pl.BlockSpec((1, D), lambda i: (0, 0)),
                  pl.BlockSpec((D, Hh), lambda i: (0, 0)),
                  pl.BlockSpec((1, Hh), lambda i: (0, 0)),
                  pl.BlockSpec((Hh, D), lambda i: (0, 0)),
                  pl.BlockSpec((1, D), lambda i: (0, 0))],
        out_specs=pl.BlockSpec((tm, D), lambda i: (i, 0)),
        compiler_params=pltpu.CompilerParams(dimension_semantics=("parallel",)),
    )(a2d, r2d, gamma.reshape(1, D), beta.reshape(1, D),
      w1, b1.reshape(1, Hh), w2, b2.reshape(1, D))
    return out[:M] if pad else out


def window_attention_pallas(xw, gamma, beta, wqkv, bqkv, wproj, bproj, biasmask,
                            n_heads, scale, clamp_min, fuse_ln):
    B_, S, C = xw.shape
    n_mask = biasmask.shape[0]
    bw = _pick_window_batch(B_, n_mask, S)
    wq, wk, wv = jnp.split(wqkv, 3, axis=1)
    bq, bk, bv = jnp.split(bqkv, 3)
    row = lambda v: v.reshape(1, -1)
    kern = functools.partial(_win_attn_kernel, n_heads=n_heads, scale=scale,
                             clamp_min=clamp_min, fuse_ln=fuse_ln, eps=1e-6,
                             n_mask=n_mask)
    return pl.pallas_call(
        kern,
        out_shape=jax.ShapeDtypeStruct((B_, S, C), xw.dtype),
        grid=(B_ // bw,),
        in_specs=[pl.BlockSpec((bw, S, C), lambda i: (i, 0, 0)),
                  pl.BlockSpec((1, C), lambda i: (0, 0)),
                  pl.BlockSpec((1, C), lambda i: (0, 0)),
                  pl.BlockSpec((C, C), lambda i: (0, 0)),
                  pl.BlockSpec((C, C), lambda i: (0, 0)),
                  pl.BlockSpec((C, C), lambda i: (0, 0)),
                  pl.BlockSpec((1, C), lambda i: (0, 0)),
                  pl.BlockSpec((1, C), lambda i: (0, 0)),
                  pl.BlockSpec((1, C), lambda i: (0, 0)),
                  pl.BlockSpec((C, C), lambda i: (0, 0)),
                  pl.BlockSpec((1, C), lambda i: (0, 0)),
                  pl.BlockSpec((n_mask, n_heads, S, S), lambda i: (0, 0, 0, 0))],
        out_specs=pl.BlockSpec((bw, S, C), lambda i: (i, 0, 0)),
        compiler_params=pltpu.CompilerParams(dimension_semantics=("parallel",)),
    )(xw, row(gamma), row(beta), wq, wk, wv, row(bq), row(bk), row(bv),
      wproj, row(bproj), biasmask)


def temporal_attention_pallas(xt, gamma, beta, w_in, b_in, w_out, b_out,
                              n_heads, scale):
    Nf, Mt, D = xt.shape
    bt, pad = _pick_temporal_block(Mt, Nf)
    xp = jnp.pad(xt, ((0, 0), (0, pad), (0, 0))) if pad else xt
    Mp = Mt + pad
    wq, wk, wv = jnp.split(w_in, 3, axis=1)
    bq, bk, bv = jnp.split(b_in, 3)
    row = lambda v: v.reshape(1, -1)
    kern = functools.partial(_temporal_attn_kernel, n_heads=n_heads, scale=scale,
                             eps=1e-6)
    out = pl.pallas_call(
        kern,
        out_shape=jax.ShapeDtypeStruct((Nf, Mp, D), xt.dtype),
        grid=(Mp // bt,),
        in_specs=[pl.BlockSpec((Nf, bt, D), lambda i: (0, i, 0)),
                  pl.BlockSpec((1, D), lambda i: (0, 0)),
                  pl.BlockSpec((1, D), lambda i: (0, 0)),
                  pl.BlockSpec((D, D), lambda i: (0, 0)),
                  pl.BlockSpec((D, D), lambda i: (0, 0)),
                  pl.BlockSpec((D, D), lambda i: (0, 0)),
                  pl.BlockSpec((1, D), lambda i: (0, 0)),
                  pl.BlockSpec((1, D), lambda i: (0, 0)),
                  pl.BlockSpec((1, D), lambda i: (0, 0)),
                  pl.BlockSpec((D, D), lambda i: (0, 0)),
                  pl.BlockSpec((1, D), lambda i: (0, 0))],
        out_specs=pl.BlockSpec((Nf, bt, D), lambda i: (0, i, 0)),
        compiler_params=pltpu.CompilerParams(dimension_semantics=("parallel",)),
    )(xp, row(gamma), row(beta), wq, wk, wv, row(bq), row(bk), row(bv),
      w_out, row(b_out))
    return out[:, :Mt, :] if pad else out


# ------------------------ pure-JAX reference (checking) ---------------------

def _ref_ln(x, g, b, eps=1e-6):
    mu = x.mean(-1, keepdims=True)
    var = ((x - mu) ** 2).mean(-1, keepdims=True)
    return (x - mu) / jnp.sqrt(var + eps) * g + b


def _ref_res_ln_mlp(a, r, g, b, w1, b1, w2, b2):
    s = a + r
    y = _ref_ln(s, g, b)
    h = y @ w1 + b1
    h = 0.5 * h * (1.0 + jax.lax.erf(h * _INV_SQRT2))
    return s + (h @ w2 + b2)


def _ref_win_attn(xw, gamma, beta, wqkv, bqkv, wproj, bproj, biasmask,
                  n_heads, scale, clamp_min, fuse_ln):
    B_, S, C = xw.shape
    hd = C // n_heads
    x = xw.reshape(-1, C)
    if fuse_ln:
        x = _ref_ln(x, gamma, beta)
    qkv = x @ wqkv + bqkv
    qkv = qkv.reshape(B_, S, 3, n_heads, hd).transpose(2, 0, 3, 1, 4)
    q, k, v = qkv[0] * scale, qkv[1], qkv[2]
    attn = jnp.einsum('bhqd,bhkd->bhqk', q, k)
    n_mask = biasmask.shape[0]
    attn = (attn.reshape(B_ // n_mask, n_mask, n_heads, S, S)
            + biasmask[None]).reshape(B_, n_heads, S, S)
    attn = jax.nn.softmax(attn, axis=-1)
    if clamp_min is not None:
        attn = jnp.maximum(attn, clamp_min)
    out = jnp.einsum('bhqk,bhkd->bhqd', attn, v).transpose(0, 2, 1, 3).reshape(B_, S, C)
    return out @ wproj + bproj


def _ref_temporal_attn(xt, gamma, beta, w_in, b_in, w_out, b_out, n_heads, scale):
    Nf, Mt, D = xt.shape
    hd = D // n_heads
    xn = _ref_ln(xt.reshape(-1, D), gamma, beta).reshape(Nf, Mt, D)
    qkv = xn @ w_in + b_in
    q = (qkv[..., :D] * scale).reshape(Nf, Mt, n_heads, hd)
    k = qkv[..., D:2 * D].reshape(Nf, Mt, n_heads, hd)
    v = qkv[..., 2 * D:].reshape(Nf, Mt, n_heads, hd)
    attn = jnp.einsum('imhd,jmhd->mhij', q, k)
    p = jax.nn.softmax(attn, axis=-1)
    o = jnp.einsum('mhij,jmhd->imhd', p, v).reshape(Nf, Mt, D)
    return o @ w_out + b_out


IMPL_PALLAS = dict(ln=layernorm_pallas, win_attn=window_attention_pallas,
                   temporal_attn=temporal_attention_pallas,
                   res_ln_mlp=res_ln_mlp_pallas)
IMPL_REF = dict(ln=_ref_ln, win_attn=_ref_win_attn,
                temporal_attn=_ref_temporal_attn, res_ln_mlp=_ref_res_ln_mlp)


# ------------------------------ model forward -------------------------------

def swin_block_forward(x, p, H, W, n_heads, window_size, shift_size, impl):
    Bn, L, C = x.shape
    ws, shift = window_size, shift_size
    if min(H, W) <= ws:
        shift = 0
        ws = min(H, W)
    shortcut = x
    pad_b = (ws - H % ws) % ws
    pad_r = (ws - W % ws) % ws
    fuse_ln = not (pad_b or pad_r)
    if fuse_ln:
        xn = x.reshape(Bn, H, W, C)                         # LN fused into attention
    else:
        # Padding present: normalize first so padded tokens stay exactly zero.
        xn = impl['ln'](x.reshape(-1, C), p['ln1_g'], p['ln1_b']).reshape(Bn, H, W, C)
        xn = jnp.pad(xn, ((0, 0), (0, pad_b), (0, pad_r), (0, 0)))
    Hp, Wp = H + pad_b, W + pad_r
    if shift > 0:
        xn = jnp.roll(xn, shift=(-shift, -shift), axis=(1, 2))
    nH, nW_ = Hp // ws, Wp // ws
    S = ws * ws
    xw = xn.reshape(Bn, nH, ws, nW_, ws, C).transpose(0, 1, 3, 2, 4, 5).reshape(-1, S, C)

    if shift > 0 and p['attn_mask'] is not None:
        biasmask = p['rel_bias'][None] + p['attn_mask'][:, None]   # (nW, heads, S, S)
    else:
        biasmask = p['rel_bias'][None]                             # (1, heads, S, S)

    scale = (C // n_heads) ** -0.5
    aw = impl['win_attn'](xw, p['ln1_g'], p['ln1_b'], p['qkv_w'], p['qkv_b'],
                          p['proj_w'], p['proj_b'], biasmask.astype(x.dtype),
                          n_heads, scale, 1e-8, fuse_ln)

    xr = aw.reshape(Bn, nH, nW_, ws, ws, C).transpose(0, 1, 3, 2, 4, 5).reshape(Bn, Hp, Wp, C)
    if shift > 0:
        xr = jnp.roll(xr, shift=(shift, shift), axis=(1, 2))
    if pad_b or pad_r:
        xr = xr[:, :H, :W, :]
    xr = xr.reshape(Bn, H * W, C)

    # fused: s = shortcut + attn_out ; out = s + MLP(LN(s))
    out = impl['res_ln_mlp'](shortcut.reshape(-1, C), xr.reshape(-1, C),
                             p['ln2_g'], p['ln2_b'],
                             p['fc1_w'], p['fc1_b'], p['fc2_w'], p['fc2_b'])
    return out.reshape(Bn, L, C)


def spatio_temporal_swin_block(x, params, H, W, n_heads, window_size, impl):
    B, Nf, T, D = x.shape
    residual = x
    xs = x.reshape(B * Nf, T, D)
    xs = swin_block_forward(xs, params['sb1'], H, W, n_heads, window_size, 0, impl)
    xs = swin_block_forward(xs, params['sb2'], H, W, n_heads, window_size,
                            window_size // 2, impl)
    x = residual + xs.reshape(B, Nf, T, D)

    residual = x
    xt = jnp.transpose(x, (1, 0, 2, 3)).reshape(Nf, B * T, D)      # (Nf, B*T, D)
    scale = (D // n_heads) ** -0.5
    at = impl['temporal_attn'](xt, params['ln_t_g'], params['ln_t_b'],
                               params['t_inproj_w'], params['t_inproj_b'],
                               params['t_outproj_w'], params['t_outproj_b'],
                               n_heads, scale)
    at = jnp.transpose(at.reshape(Nf, B, T, D), (1, 0, 2, 3))       # (B, Nf, T, D)

    # fused: s = residual + temporal_attn ; out = s + FFN(LN(s))
    out = impl['res_ln_mlp'](residual.reshape(-1, D), at.reshape(-1, D),
                             params['ln_f_g'], params['ln_f_b'],
                             params['f_fc1_w'], params['f_fc1_b'],
                             params['f_fc2_w'], params['f_fc2_b'])
    return out.reshape(B, Nf, T, D)


# ------------------------------ parameter init ------------------------------

def _trunc_normal(key, shape, std=0.02):
    return jax.random.truncated_normal(key, -2.0, 2.0, shape, jnp.float32) * std


def _relative_position_index(ws):
    coords = np.stack(np.meshgrid(np.arange(ws), np.arange(ws), indexing='ij'))
    cf = coords.reshape(2, -1)
    rel = cf[:, :, None] - cf[:, None, :]
    rel = rel.transpose(1, 2, 0).copy()
    rel[:, :, 0] += ws - 1
    rel[:, :, 1] += ws - 1
    rel[:, :, 0] *= 2 * ws - 1
    return rel.sum(-1)                                          # (ws*ws, ws*ws)


def _build_attn_mask(H, W, ws, shift):
    img_mask = np.zeros((1, H, W, 1), np.float32)
    slices = (slice(0, -ws), slice(-ws, -shift), slice(-shift, None))
    cnt = 0
    for hs in slices:
        for wsl in slices:
            img_mask[:, hs, wsl, :] = cnt
            cnt += 1
    mw = img_mask.reshape(1, H // ws, ws, W // ws, ws, 1).transpose(0, 1, 3, 2, 4, 5)
    mw = mw.reshape(-1, ws * ws)
    am = mw[:, None, :] - mw[:, :, None]
    return np.where(am != 0, -100.0, 0.0).astype(np.float32)    # (nW, N, N)


def init_spatial_block_params(key, dim, hidden, n_heads, H, W, window_size, shift_size):
    ws, shift = window_size, shift_size
    if min(H, W) <= ws:
        shift = 0
        ws = min(H, W)
    Ntok = ws * ws
    k = jax.random.split(key, 5)
    table = _trunc_normal(k[0], ((2 * ws - 1) * (2 * ws - 1), n_heads))
    idx = _relative_position_index(ws)
    rel_bias = table[idx.reshape(-1)].reshape(Ntok, Ntok, n_heads).transpose(2, 0, 1)
    attn_mask = jnp.asarray(_build_attn_mask(H, W, ws, shift)) if shift > 0 else None
    return dict(
        ln1_g=jnp.ones((dim,), jnp.float32), ln1_b=jnp.zeros((dim,), jnp.float32),
        qkv_w=_trunc_normal(k[1], (dim, 3 * dim)), qkv_b=jnp.zeros((3 * dim,), jnp.float32),
        proj_w=_trunc_normal(k[2], (dim, dim)), proj_b=jnp.zeros((dim,), jnp.float32),
        rel_bias=rel_bias, attn_mask=attn_mask,
        ln2_g=jnp.ones((dim,), jnp.float32), ln2_b=jnp.zeros((dim,), jnp.float32),
        fc1_w=_trunc_normal(k[3], (dim, hidden)), fc1_b=jnp.zeros((hidden,), jnp.float32),
        fc2_w=_trunc_normal(k[4], (hidden, dim)), fc2_b=jnp.zeros((dim,), jnp.float32),
    )


def init_params(key, dim, hidden, n_heads, H, W, window_size):
    k = jax.random.split(key, 8)
    return {
        'sb1': init_spatial_block_params(k[0], dim, hidden, n_heads, H, W, window_size, 0),
        'sb2': init_spatial_block_params(k[1], dim, hidden, n_heads, H, W, window_size,
                                         window_size // 2),
        'ln_t_g': jnp.ones((dim,), jnp.float32), 'ln_t_b': jnp.zeros((dim,), jnp.float32),
        't_inproj_w': _trunc_normal(k[2], (dim, 3 * dim)),
        't_inproj_b': jnp.zeros((3 * dim,), jnp.float32),
        't_outproj_w': _trunc_normal(k[3], (dim, dim)),
        't_outproj_b': jnp.zeros((dim,), jnp.float32),
        'ln_f_g': jnp.ones((dim,), jnp.float32), 'ln_f_b': jnp.zeros((dim,), jnp.float32),
        'f_fc1_w': _trunc_normal(k[4], (dim, hidden)), 'f_fc1_b': jnp.zeros((hidden,), jnp.float32),
        'f_fc2_w': _trunc_normal(k[5], (hidden, dim)), 'f_fc2_b': jnp.zeros((dim,), jnp.float32),
    }


# ------------------------------------ main -----------------------------------

if __name__ == "__main__":
    B, Nf, H, W = 2, 2, 8, 8            # batch, frames, spatial resolution
    D, n_heads, window_size = 32, 4, 4  # dim, heads, swin window
    hidden = int(D * 4.0)               # mlp_ratio = 4.0
    T = H * W                           # tokens per frame

    key = jax.random.PRNGKey(0)
    kx, kp = jax.random.split(key)
    x = jax.random.normal(kx, (B, Nf, T, D), jnp.float32)
    params = init_params(kp, D, hidden, n_heads, H, W, window_size)

    out = spatio_temporal_swin_block(x, params, H, W, n_heads, window_size, IMPL_PALLAS)
    out = jax.block_until_ready(out)

    ref = spatio_temporal_swin_block(x, params, H, W, n_heads, window_size, IMPL_REF)
    ref = jax.block_until_ready(ref)

    assert out.shape == (B, Nf, T, D)
    assert bool(jnp.all(jnp.isfinite(out)))
    err = float(jnp.max(jnp.abs(out - ref)))
    assert err < 2e-3, f"max abs error vs pure-JAX reference: {err}"
    print("KERNEL_OK")
</pallas_src>

<mosaic_0001>
module attributes {stable_mosaic.version = 11 : i64} {
  func.func @_win_attn_kernel(%arg0: i32, %arg1: memref<16x16x32xf32, #tpu.memory_space<vmem>>, %arg2: memref<1x32xf32, #tpu.memory_space<vmem>>, %arg3: memref<1x32xf32, #tpu.memory_space<vmem>>, %arg4: memref<32x32xf32, #tpu.memory_space<vmem>>, %arg5: memref<32x32xf32, #tpu.memory_space<vmem>>, %arg6: memref<32x32xf32, #tpu.memory_space<vmem>>, %arg7: memref<1x32xf32, #tpu.memory_space<vmem>>, %arg8: memref<1x32xf32, #tpu.memory_space<vmem>>, %arg9: memref<1x32xf32, #tpu.memory_space<vmem>>, %arg10: memref<32x32xf32, #tpu.memory_space<vmem>>, %arg11: memref<1x32xf32, #tpu.memory_space<vmem>>, %arg12: memref<1x4x16x16xf32, #tpu.memory_space<vmem>>, %arg13: memref<16x16x32xf32, #tpu.memory_space<vmem>>) attributes {dimension_semantics = [#tpu.dimension_semantics<parallel>], iteration_bounds = array<i64: 1>, scalar_prefetch = 0 : i64, scratch_operands = 0 : i64, tpu.core_type = #tpu.core_type<tc>, window_params = [{transform_indices = @transform_0, window_bounds = array<i64: 16, 16, 32>}, {pipeline_mode = #tpu.pipeline_mode<synchronous>, transform_indices = @transform_1, window_bounds = array<i64: 1, 32>}, {pipeline_mode = #tpu.pipeline_mode<synchronous>, transform_indices = @transform_2, window_bounds = array<i64: 1, 32>}, {pipeline_mode = #tpu.pipeline_mode<synchronous>, transform_indices = @transform_3, window_bounds = array<i64: 32, 32>}, {pipeline_mode = #tpu.pipeline_mode<synchronous>, transform_indices = @transform_4, window_bounds = array<i64: 32, 32>}, {pipeline_mode = #tpu.pipeline_mode<synchronous>, transform_indices = @transform_5, window_bounds = array<i64: 32, 32>}, {pipeline_mode = #tpu.pipeline_mode<synchronous>, transform_indices = @transform_6, window_bounds = array<i64: 1, 32>}, {pipeline_mode = #tpu.pipeline_mode<synchronous>, transform_indices = @transform_7, window_bounds = array<i64: 1, 32>}, {pipeline_mode = #tpu.pipeline_mode<synchronous>, transform_indices = @transform_8, window_bounds = array<i64: 1, 32>}, {pipeline_mode = #tpu.pipeline_mode<synchronous>, transform_indices = @transform_9, window_bounds = array<i64: 32, 32>}, {pipeline_mode = #tpu.pipeline_mode<synchronous>, transform_indices = @transform_10, window_bounds = array<i64: 1, 32>}, {pipeline_mode = #tpu.pipeline_mode<synchronous>, transform_indices = @transform_11, window_bounds = array<i64: 1, 4, 16, 16>}, {transform_indices = @transform_12, window_bounds = array<i64: 16, 16, 32>}]} {
    %c0 = arith.constant 0 : index
    %c0_0 = arith.constant 0 : index
    %c0_1 = arith.constant 0 : index
    %0 = vector.load %arg1[%c0, %c0_0, %c0_1] : memref<16x16x32xf32, #tpu.memory_space<vmem>>, vector<16x16x32xf32>
    %1 = vector.shape_cast %0 : vector<16x16x32xf32> to vector<256x32xf32>
    %cst = arith.constant dense<0.000000e+00> : vector<256xf32>
    %2 = vector.multi_reduction <add>, %1, %cst [1] : vector<256x32xf32> to vector<256xf32>
    %3 = vector.shape_cast %2 : vector<256xf32> to vector<256x1xf32>
    %cst_2 = arith.constant 3.200000e+01 : f32
    %4 = vector.broadcast %cst_2 : f32 to vector<256x1xf32>
    %5 = arith.divf %3, %4 : vector<256x1xf32>
    %6 = vector.broadcast %5 : vector<256x1xf32> to vector<256x32xf32>
    %7 = arith.subf %1, %6 : vector<256x32xf32>
    %8 = arith.mulf %7, %7 : vector<256x32xf32>
    %cst_3 = arith.constant dense<0.000000e+00> : vector<256xf32>
    %9 = vector.multi_reduction <add>, %8, %cst_3 [1] : vector<256x32xf32> to vector<256xf32>
    %10 = vector.shape_cast %9 : vector<256xf32> to vector<256x1xf32>
    %cst_4 = arith.constant 3.200000e+01 : f32
    %11 = vector.broadcast %cst_4 : f32 to vector<256x1xf32>
    %12 = arith.divf %10, %11 : vector<256x1xf32>
    %13 = vector.broadcast %5 : vector<256x1xf32> to vector<256x32xf32>
    %14 = arith.subf %1, %13 : vector<256x32xf32>
    %cst_5 = arith.constant 9.99999997E-7 : f32
    %15 = vector.broadcast %cst_5 : f32 to vector<256x1xf32>
    %16 = arith.addf %12, %15 : vector<256x1xf32>
    %17 = math.rsqrt %16 : vector<256x1xf32>
    %18 = vector.broadcast %17 : vector<256x1xf32> to vector<256x32xf32>
    %19 = arith.mulf %14, %18 : vector<256x32xf32>
    %c0_6 = arith.constant 0 : index
    %c0_7 = arith.constant 0 : index
    %20 = vector.load %arg2[%c0_6, %c0_7] : memref<1x32xf32, #tpu.memory_space<vmem>>, vector<1x32xf32>
    %21 = vector.broadcast %20 : vector<1x32xf32> to vector<256x32xf32>
    %22 = arith.mulf %19, %21 : vector<256x32xf32>
    %c0_8 = arith.constant 0 : index
    %c0_9 = arith.constant 0 : index
    %23 = vector.load %arg3[%c0_8, %c0_9] : memref<1x32xf32, #tpu.memory_space<vmem>>, vector<1x32xf32>
    %24 = vector.broadcast %23 : vector<1x32xf32> to vector<256x32xf32>
    %25 = arith.addf %22, %24 : vector<256x32xf32>
    %c0_10 = arith.constant 0 : index
    %c0_11 = arith.constant 0 : index
    %26 = vector.load %arg4[%c0_10, %c0_11] : memref<32x32xf32, #tpu.memory_space<vmem>>, vector<32x32xf32>
    %cst_12 = arith.constant dense<0.000000e+00> : vector<256x32xf32>
    %27 = tpu.matmul %25, %26, %cst_12 {dimension_numbers = #tpu.dot_dimension_numbers<[1], [0], [0], [1], [0, 0, 1, 1], [], []>} : vector<256x32xf32>, vector<32x32xf32>, vector<256x32xf32> -> vector<256x32xf32>
    %c0_13 = arith.constant 0 : index
    %c0_14 = arith.constant 0 : index
    %28 = vector.load %arg7[%c0_13, %c0_14] : memref<1x32xf32, #tpu.memory_space<vmem>>, vector<1x32xf32>
    %29 = vector.broadcast %28 : vector<1x32xf32> to vector<256x32xf32>
    %30 = arith.addf %27, %29 : vector<256x32xf32>
    %cst_15 = arith.constant 0.353553385 : f32
    %31 = vector.broadcast %cst_15 : f32 to vector<256x32xf32>
    %32 = arith.mulf %30, %31 : vector<256x32xf32>
    %c0_16 = arith.constant 0 : index
    %c0_17 = arith.constant 0 : index
    %33 = vector.load %arg5[%c0_16, %c0_17] : memref<32x32xf32, #tpu.memory_space<vmem>>, vector<32x32xf32>
    %cst_18 = arith.constant dense<0.000000e+00> : vector<256x32xf32>
    %34 = tpu.matmul %25, %33, %cst_18 {dimension_numbers = #tpu.dot_dimension_numbers<[1], [0], [0], [1], [0, 0, 1, 1], [], []>} : vector<256x32xf32>, vector<32x32xf32>, vector<256x32xf32> -> vector<256x32xf32>
    %c0_19 = arith.constant 0 : index
    %c0_20 = arith.constant 0 : index
    %35 = vector.load %arg8[%c0_19, %c0_20] : memref<1x32xf32, #tpu.memory_space<vmem>>, vector<1x32xf32>
    %36 = vector.broadcast %35 : vector<1x32xf32> to vector<256x32xf32>
    %37 = arith.addf %34, %36 : vector<256x32xf32>
    %c0_21 = arith.constant 0 : index
    %c0_22 = arith.constant 0 : index
    %38 = vector.load %arg6[%c0_21, %c0_22] : memref<32x32xf32, #tpu.memory_space<vmem>>, vector<32x32xf32>
    %cst_23 = arith.constant dense<0.000000e+00> : vector<256x32xf32>
    %39 = tpu.matmul %25, %38, %cst_23 {dimension_numbers = #tpu.dot_dimension_numbers<[1], [0], [0], [1], [0, 0, 1, 1], [], []>} : vector<256x32xf32>, vector<32x32xf32>, vector<256x32xf32> -> vector<256x32xf32>
    %c0_24 = arith.constant 0 : index
    %c0_25 = arith.constant 0 : index
    %40 = vector.load %arg9[%c0_24, %c0_25] : memref<1x32xf32, #tpu.memory_space<vmem>>, vector<1x32xf32>
    %41 = vector.broadcast %40 : vector<1x32xf32> to vector<256x32xf32>
    %42 = arith.addf %39, %41 : vector<256x32xf32>
    %43 = vector.shape_cast %32 : vector<256x32xf32> to vector<16x16x32xf32>
    %44 = vector.shape_cast %37 : vector<256x32xf32> to vector<16x16x32xf32>
    %45 = vector.shape_cast %42 : vector<256x32xf32> to vector<16x16x32xf32>
    %c0_26 = arith.constant 0 : index
    %c0_27 = arith.constant 0 : index
    %c0_28 = arith.constant 0 : index
    %c0_29 = arith.constant 0 : index
    %46 = vector.load %arg12[%c0_26, %c0_27, %c0_28, %c0_29] : memref<1x4x16x16xf32, #tpu.memory_space<vmem>>, vector<1x4x16x16xf32>
    %47 = vector.extract_strided_slice %43 {offsets = [0, 0, 0], sizes = [16, 16, 8], strides = [1, 1, 1]} : vector<16x16x32xf32> to vector<16x16x8xf32>
    %48 = vector.extract_strided_slice %44 {offsets = [0, 0, 0], sizes = [16, 16, 8], strides = [1, 1, 1]} : vector<16x16x32xf32> to vector<16x16x8xf32>
    %49 = vector.extract_strided_slice %45 {offsets = [0, 0, 0], sizes = [16, 16, 8], strides = [1, 1, 1]} : vector<16x16x32xf32> to vector<16x16x8xf32>
    "tpu.trace_start"() <{level = 10 : i32, message = "bqd,bkd->bqk"}> : () -> ()
    %cst_30 = arith.constant dense<0.000000e+00> : vector<16x16x16xf32>
    %50 = tpu.matmul %47, %48, %cst_30 {dimension_numbers = #tpu.dot_dimension_numbers<[2], [2], [1], [1], [0, 0, 0, 1, 1, 1], [0], [0]>} : vector<16x16x8xf32>, vector<16x16x8xf32>, vector<16x16x16xf32> -> vector<16x16x16xf32>
    "tpu.trace_stop"() : () -> ()
    %51 = vector.extract_strided_slice %46 {offsets = [0, 0, 0, 0], sizes = [1, 1, 16, 16], strides = [1, 1, 1, 1]} : vector<1x4x16x16xf32> to vector<1x1x16x16xf32>
    %52 = vector.shape_cast %51 : vector<1x1x16x16xf32> to vector<16x16xf32>
    %53 = vector.shape_cast %52 : vector<16x16xf32> to vector<1x16x16xf32>
    %54 = vector.broadcast %53 : vector<1x16x16xf32> to vector<16x16x16xf32>
    %55 = arith.addf %50, %54 : vector<16x16x16xf32>
    %cst_31 = arith.constant dense<0xFF800000> : vector<16x16xf32>
    %56 = vector.multi_reduction <maximumf>, %55, %cst_31 [2] : vector<16x16x16xf32> to vector<16x16xf32>
    %57 = vector.shape_cast %56 : vector<16x16xf32> to vector<16x16x1xf32>
    %58 = vector.broadcast %57 : vector<16x16x1xf32> to vector<16x16x16xf32>
    %59 = arith.subf %55, %58 : vector<16x16x16xf32>
    %60 = math.exp %59 : vector<16x16x16xf32>
    %cst_32 = arith.constant dense<0.000000e+00> : vector<16x16xf32>
    %61 = vector.multi_reduction <add>, %60, %cst_32 [2] : vector<16x16x16xf32> to vector<16x16xf32>
    %62 = vector.shape_cast %61 : vector<16x16xf32> to vector<16x16x1xf32>
    %63 = tpu.reciprocal %62 {approx = true} : vector<16x16x1xf32> -> vector<16x16x1xf32>
    %64 = vector.broadcast %63 : vector<16x16x1xf32> to vector<16x16x16xf32>
    %65 = arith.mulf %60, %64 : vector<16x16x16xf32>
    %cst_33 = arith.constant 9.99999993E-9 : f32
    %66 = vector.broadcast %cst_33 : f32 to vector<16x16x16xf32>
    %67 = arith.maximumf %65, %66 : vector<16x16x16xf32>
    "tpu.trace_start"() <{level = 10 : i32, message = "bqk,bkd->bqd"}> : () -> ()
    %cst_34 = arith.constant dense<0.000000e+00> : vector<16x16x8xf32>
    %68 = tpu.matmul %67, %49, %cst_34 {dimension_numbers = #tpu.dot_dimension_numbers<[2], [1], [1], [2], [0, 0, 0, 1, 1, 2], [0], [0]>} : vector<16x16x16xf32>, vector<16x16x8xf32>, vector<16x16x8xf32> -> vector<16x16x8xf32>
    "tpu.trace_stop"() : () -> ()
    %69 = vector.extract_strided_slice %43 {offsets = [0, 0, 8], sizes = [16, 16, 8], strides = [1, 1, 1]} : vector<16x16x32xf32> to vector<16x16x8xf32>
    %70 = vector.extract_strided_slice %44 {offsets = [0, 0, 8], sizes = [16, 16, 8], strides = [1, 1, 1]} : vector<16x16x32xf32> to vector<16x16x8xf32>
    %71 = vector.extract_strided_slice %45 {offsets = [0, 0, 8], sizes = [16, 16, 8], strides = [1, 1, 1]} : vector<16x16x32xf32> to vector<16x16x8xf32>
    "tpu.trace_start"() <{level = 10 : i32, message = "bqd,bkd->bqk"}> : () -> ()
    %cst_35 = arith.constant dense<0.000000e+00> : vector<16x16x16xf32>
    %72 = tpu.matmul %69, %70, %cst_35 {dimension_numbers = #tpu.dot_dimension_numbers<[2], [2], [1], [1], [0, 0, 0, 1, 1, 1], [0], [0]>} : vector<16x16x8xf32>, vector<16x16x8xf32>, vector<16x16x16xf32> -> vector<16x16x16xf32>
    "tpu.trace_stop"() : () -> ()
    %73 = vector.extract_strided_slice %46 {offsets = [0, 1, 0, 0], sizes = [1, 1, 16, 16], strides = [1, 1, 1, 1]} : vector<1x4x16x16xf32> to vector<1x1x16x16xf32>
    %74 = vector.shape_cast %73 : vector<1x1x16x16xf32> to vector<16x16xf32>
    %75 = vector.shape_cast %74 : vector<16x16xf32> to vector<1x16x16xf32>
    %76 = vector.broadcast %75 : vector<1x16x16xf32> to vector<16x16x16xf32>
    %77 = arith.addf %72, %76 : vector<16x16x16xf32>
    %cst_36 = arith.constant dense<0xFF800000> : vector<16x16xf32>
    %78 = vector.multi_reduction <maximumf>, %77, %cst_36 [2] : vector<16x16x16xf32> to vector<16x16xf32>
    %79 = vector.shape_cast %78 : vector<16x16xf32> to vector<16x16x1xf32>
    %80 = vector.broadcast %79 : vector<16x16x1xf32> to vector<16x16x16xf32>
    %81 = arith.subf %77, %80 : vector<16x16x16xf32>
    %82 = math.exp %81 : vector<16x16x16xf32>
    %cst_37 = arith.constant dense<0.000000e+00> : vector<16x16xf32>
    %83 = vector.multi_reduction <add>, %82, %cst_37 [2] : vector<16x16x16xf32> to vector<16x16xf32>
    %84 = vector.shape_cast %83 : vector<16x16xf32> to vector<16x16x1xf32>
    %85 = tpu.reciprocal %84 {approx = true} : vector<16x16x1xf32> -> vector<16x16x1xf32>
    %86 = vector.broadcast %85 : vector<16x16x1xf32> to vector<16x16x16xf32>
    %87 = arith.mulf %82, %86 : vector<16x16x16xf32>
    %cst_38 = arith.constant 9.99999993E-9 : f32
    %88 = vector.broadcast %cst_38 : f32 to vector<16x16x16xf32>
    %89 = arith.maximumf %87, %88 : vector<16x16x16xf32>
    "tpu.trace_start"() <{level = 10 : i32, message = "bqk,bkd->bqd"}> : () -> ()
    %cst_39 = arith.constant dense<0.000000e+00> : vector<16x16x8xf32>
    %90 = tpu.matmul %89, %71, %cst_39 {dimension_numbers = #tpu.dot_dimension_numbers<[2], [1], [1], [2], [0, 0, 0, 1, 1, 2], [0], [0]>} : vector<16x16x16xf32>, vector<16x16x8xf32>, vector<16x16x8xf32> -> vector<16x16x8xf32>
    "tpu.trace_stop"() : () -> ()
    %91 = vector.extract_strided_slice %43 {offsets = [0, 0, 16], sizes = [16, 16, 8], strides = [1, 1, 1]} : vector<16x16x32xf32> to vector<16x16x8xf32>
    %92 = vector.extract_strided_slice %44 {offsets = [0, 0, 16], sizes = [16, 16, 8], strides = [1, 1, 1]} : vector<16x16x32xf32> to vector<16x16x8xf32>
    %93 = vector.extract_strided_slice %45 {offsets = [0, 0, 16], sizes = [16, 16, 8], strides = [1, 1, 1]} : vector<16x16x32xf32> to vector<16x16x8xf32>
    "tpu.trace_start"() <{level = 10 : i32, message = "bqd,bkd->bqk"}> : () -> ()
    %cst_40 = arith.constant dense<0.000000e+00> : vector<16x16x16xf32>
    %94 = tpu.matmul %91, %92, %cst_40 {dimension_numbers = #tpu.dot_dimension_numbers<[2], [2], [1], [1], [0, 0, 0, 1, 1, 1], [0], [0]>} : vector<16x16x8xf32>, vector<16x16x8xf32>, vector<16x16x16xf32> -> vector<16x16x16xf32>
    "tpu.trace_stop"() : () -> ()
    %95 = vector.extract_strided_slice %46 {offsets = [0, 2, 0, 0], sizes = [1, 1, 16, 16], strides = [1, 1, 1, 1]} : vector<1x4x16x16xf32> to vector<1x1x16x16xf32>
    %96 = vector.shape_cast %95 : vector<1x1x16x16xf32> to vector<16x16xf32>
    %97 = vector.shape_cast %96 : vector<16x16xf32> to vector<1x16x16xf32>
    %98 = vector.broadcast %97 : vector<1x16x16xf32> to vector<16x16x16xf32>
    %99 = arith.addf %94, %98 : vector<16x16x16xf32>
    %cst_41 = arith.constant dense<0xFF800000> : vector<16x16xf32>
    %100 = vector.multi_reduction <maximumf>, %99, %cst_41 [2] : vector<16x16x16xf32> to vector<16x16xf32>
    %101 = vector.shape_cast %100 : vector<16x16xf32> to vector<16x16x1xf32>
    %102 = vector.broadcast %101 : vector<16x16x1xf32> to vector<16x16x16xf32>
    %103 = arith.subf %99, %102 : vector<16x16x16xf32>
    %104 = math.exp %103 : vector<16x16x16xf32>
    %cst_42 = arith.constant dense<0.000000e+00> : vector<16x16xf32>
    %105 = vector.multi_reduction <add>, %104, %cst_42 [2] : vector<16x16x16xf32> to vector<16x16xf32>
    %106 = vector.shape_cast %105 : vector<16x16xf32> to vector<16x16x1xf32>
    %107 = tpu.reciprocal %106 {approx = true} : vector<16x16x1xf32> -> vector<16x16x1xf32>
    %108 = vector.broadcast %107 : vector<16x16x1xf32> to vector<16x16x16xf32>
    %109 = arith.mulf %104, %108 : vector<16x16x16xf32>
    %cst_43 = arith.constant 9.99999993E-9 : f32
    %110 = vector.broadcast %cst_43 : f32 to vector<16x16x16xf32>
    %111 = arith.maximumf %109, %110 : vector<16x16x16xf32>
    "tpu.trace_start"() <{level = 10 : i32, message = "bqk,bkd->bqd"}> : () -> ()
    %cst_44 = arith.constant dense<0.000000e+00> : vector<16x16x8xf32>
    %112 = tpu.matmul %111, %93, %cst_44 {dimension_numbers = #tpu.dot_dimension_numbers<[2], [1], [1], [2], [0, 0, 0, 1, 1, 2], [0], [0]>} : vector<16x16x16xf32>, vector<16x16x8xf32>, vector<16x16x8xf32> -> vector<16x16x8xf32>
    "tpu.trace_stop"() : () -> ()
    %113 = vector.extract_strided_slice %43 {offsets = [0, 0, 24], sizes = [16, 16, 8], strides = [1, 1, 1]} : vector<16x16x32xf32> to vector<16x16x8xf32>
    %114 = vector.extract_strided_slice %44 {offsets = [0, 0, 24], sizes = [16, 16, 8], strides = [1, 1, 1]} : vector<16x16x32xf32> to vector<16x16x8xf32>
    %115 = vector.extract_strided_slice %45 {offsets = [0, 0, 24], sizes = [16, 16, 8], strides = [1, 1, 1]} : vector<16x16x32xf32> to vector<16x16x8xf32>
    "tpu.trace_start"() <{level = 10 : i32, message = "bqd,bkd->bqk"}> : () -> ()
    %cst_45 = arith.constant dense<0.000000e+00> : vector<16x16x16xf32>
    %116 = tpu.matmul %113, %114, %cst_45 {dimension_numbers = #tpu.dot_dimension_numbers<[2], [2], [1], [1], [0, 0, 0, 1, 1, 1], [0], [0]>} : vector<16x16x8xf32>, vector<16x16x8xf32>, vector<16x16x16xf32> -> vector<16x16x16xf32>
    "tpu.trace_stop"() : () -> ()
    %117 = vector.extract_strided_slice %46 {offsets = [0, 3, 0, 0], sizes = [1, 1, 16, 16], strides = [1, 1, 1, 1]} : vector<1x4x16x16xf32> to vector<1x1x16x16xf32>
    %118 = vector.shape_cast %117 : vector<1x1x16x16xf32> to vector<16x16xf32>
    %119 = vector.shape_cast %118 : vector<16x16xf32> to vector<1x16x16xf32>
    %120 = vector.broadcast %119 : vector<1x16x16xf32> to vector<16x16x16xf32>
    %121 = arith.addf %116, %120 : vector<16x16x16xf32>
    %cst_46 = arith.constant dense<0xFF800000> : vector<16x16xf32>
    %122 = vector.multi_reduction <maximumf>, %121, %cst_46 [2] : vector<16x16x16xf32> to vector<16x16xf32>
    %123 = vector.shape_cast %122 : vector<16x16xf32> to vector<16x16x1xf32>
    %124 = vector.broadcast %123 : vector<16x16x1xf32> to vector<16x16x16xf32>
    %125 = arith.subf %121, %124 : vector<16x16x16xf32>
    %126 = math.exp %125 : vector<16x16x16xf32>
    %cst_47 = arith.constant dense<0.000000e+00> : vector<16x16xf32>
    %127 = vector.multi_reduction <add>, %126, %cst_47 [2] : vector<16x16x16xf32> to vector<16x16xf32>
    %128 = vector.shape_cast %127 : vector<16x16xf32> to vector<16x16x1xf32>
    %129 = tpu.reciprocal %128 {approx = true} : vector<16x16x1xf32> -> vector<16x16x1xf32>
    %130 = vector.broadcast %129 : vector<16x16x1xf32> to vector<16x16x16xf32>
    %131 = arith.mulf %126, %130 : vector<16x16x16xf32>
    %cst_48 = arith.constant 9.99999993E-9 : f32
    %132 = vector.broadcast %cst_48 : f32 to vector<16x16x16xf32>
    %133 = arith.maximumf %131, %132 : vector<16x16x16xf32>
    "tpu.trace_start"() <{level = 10 : i32, message = "bqk,bkd->bqd"}> : () -> ()
    %cst_49 = arith.constant dense<0.000000e+00> : vector<16x16x8xf32>
    %134 = tpu.matmul %133, %115, %cst_49 {dimension_numbers = #tpu.dot_dimension_numbers<[2], [1], [1], [2], [0, 0, 0, 1, 1, 2], [0], [0]>} : vector<16x16x16xf32>, vector<16x16x8xf32>, vector<16x16x8xf32> -> vector<16x16x8xf32>
    "tpu.trace_stop"() : () -> ()
    %135 = tpu.concatenate %68, %90, %112, %134 in 2 : vector<16x16x8xf32>, vector<16x16x8xf32>, vector<16x16x8xf32>, vector<16x16x8xf32> -> vector<16x16x32xf32>
    %136 = vector.shape_cast %135 : vector<16x16x32xf32> to vector<256x32xf32>
    %c0_50 = arith.constant 0 : index
    %c0_51 = arith.constant 0 : index
    %137 = vector.load %arg10[%c0_50, %c0_51] : memref<32x32xf32, #tpu.memory_space<vmem>>, vector<32x32xf32>
    %cst_52 = arith.constant dense<0.000000e+00> : vector<256x32xf32>
    %138 = tpu.matmul %136, %137, %cst_52 {dimension_numbers = #tpu.dot_dimension_numbers<[1], [0], [0], [1], [0, 0, 1, 1], [], []>} : vector<256x32xf32>, vector<32x32xf32>, vector<256x32xf32> -> vector<256x32xf32>
    %c0_53 = arith.constant 0 : index
    %c0_54 = arith.constant 0 : index
    %139 = vector.load %arg11[%c0_53, %c0_54] : memref<1x32xf32, #tpu.memory_space<vmem>>, vector<1x32xf32>
    %140 = vector.broadcast %139 : vector<1x32xf32> to vector<256x32xf32>
    %141 = arith.addf %138, %140 : vector<256x32xf32>
    %142 = vector.shape_cast %141 : vector<256x32xf32> to vector<16x16x32xf32>
    %c0_55 = arith.constant 0 : index
    %c0_56 = arith.constant 0 : index
    %c0_57 = arith.constant 0 : index
    %143 = vector.load %arg13[%c0_55, %c0_56, %c0_57] : memref<16x16x32xf32, #tpu.memory_space<vmem>>, vector<16x16x32xf32>
    tpu.vector_store %arg13[%c0_55, %c0_56, %c0_57], %142 {strides = array<i32>} : memref<16x16x32xf32, #tpu.memory_space<vmem>>, vector<16x16x32xf32>,
    return
  }
  func.func @transform_0(%arg0: i32) -> (i32, i32, i32) {
    %c0_i32 = arith.constant 0 : i32
    %c0_i32_0 = arith.constant 0 : i32
    %c0_i32_1 = arith.constant 0 : i32
    return %arg0, %c0_i32, %c0_i32_0 : i32, i32, i32
  }
  func.func @transform_1(%arg0: i32) -> (i32, i32) {
    %c0_i32 = arith.constant 0 : i32
    %c0_i32_0 = arith.constant 0 : i32
    %c0_i32_1 = arith.constant 0 : i32
    return %c0_i32, %c0_i32_0 : i32, i32
  }
  func.func @transform_2(%arg0: i32) -> (i32, i32) {
    %c0_i32 = arith.constant 0 : i32
    %c0_i32_0 = arith.constant 0 : i32
    %c0_i32_1 = arith.constant 0 : i32
    return %c0_i32, %c0_i32_0 : i32, i32
  }
  func.func @transform_3(%arg0: i32) -> (i32, i32) {
    %c0_i32 = arith.constant 0 : i32
    %c0_i32_0 = arith.constant 0 : i32
    %c0_i32_1 = arith.constant 0 : i32
    return %c0_i32, %c0_i32_0 : i32, i32
  }
  func.func @transform_4(%arg0: i32) -> (i32, i32) {
    %c0_i32 = arith.constant 0 : i32
    %c0_i32_0 = arith.constant 0 : i32
    %c0_i32_1 = arith.constant 0 : i32
    return %c0_i32, %c0_i32_0 : i32, i32
  }
  func.func @transform_5(%arg0: i32) -> (i32, i32) {
    %c0_i32 = arith.constant 0 : i32
    %c0_i32_0 = arith.constant 0 : i32
    %c0_i32_1 = arith.constant 0 : i32
    return %c0_i32, %c0_i32_0 : i32, i32
  }
  func.func @transform_6(%arg0: i32) -> (i32, i32) {
    %c0_i32 = arith.constant 0 : i32
    %c0_i32_0 = arith.constant 0 : i32
    %c0_i32_1 = arith.constant 0 : i32
    return %c0_i32, %c0_i32_0 : i32, i32
  }
  func.func @transform_7(%arg0: i32) -> (i32, i32) {
    %c0_i32 = arith.constant 0 : i32
    %c0_i32_0 = arith.constant 0 : i32
    %c0_i32_1 = arith.constant 0 : i32
    return %c0_i32, %c0_i32_0 : i32, i32
  }
  func.func @transform_8(%arg0: i32) -> (i32, i32) {
    %c0_i32 = arith.constant 0 : i32
    %c0_i32_0 = arith.constant 0 : i32
    %c0_i32_1 = arith.constant 0 : i32
    return %c0_i32, %c0_i32_0 : i32, i32
  }
  func.func @transform_9(%arg0: i32) -> (i32, i32) {
    %c0_i32 = arith.constant 0 : i32
    %c0_i32_0 = arith.constant 0 : i32
    %c0_i32_1 = arith.constant 0 : i32
    return %c0_i32, %c0_i32_0 : i32, i32
  }
  func.func @transform_10(%arg0: i32) -> (i32, i32) {
    %c0_i32 = arith.constant 0 : i32
    %c0_i32_0 = arith.constant 0 : i32
    %c0_i32_1 = arith.constant 0 : i32
    return %c0_i32, %c0_i32_0 : i32, i32
  }
  func.func @transform_11(%arg0: i32) -> (i32, i32, i32, i32) {
    %c0_i32 = arith.constant 0 : i32
    %c0_i32_0 = arith.constant 0 : i32
    %c0_i32_1 = arith.constant 0 : i32
    %c0_i32_2 = arith.constant 0 : i32
    %c0_i32_3 = arith.constant 0 : i32
    return %c0_i32, %c0_i32_0, %c0_i32_1, %c0_i32_2 : i32, i32, i32, i32
  }
  func.func @transform_12(%arg0: i32) -> (i32, i32, i32) {
    %c0_i32 = arith.constant 0 : i32
    %c0_i32_0 = arith.constant 0 : i32
    %c0_i32_1 = arith.constant 0 : i32
    return %arg0, %c0_i32, %c0_i32_0 : i32, i32, i32
  }
}

</mosaic_0001>

<bundles_post_ra>
// kernel: tpu_custom_call.1
= control target key start
LH: loop header
LB: loop body
LE: loop exit
PB: predicated region body
PF: predicated region fallthrough
CT: control target
= control target key end

     0   :  { %17 = vsyncpa [#allocation3], 0  ;;  %s23640_s0 = inlined_call_operand.hbm [shape: f32[16,16,32], index: 0, kind: input, shape index: {}]   ;;  %s23641_s1 = inlined_call_operand.vmem [shape: f32[1,32], index: 1, kind: input, shape index: {}]   ;;  %s23642_s2 = inlined_call_operand.vmem [shape: f32[1,32], index: 2, kind: input, shape index: {}]   ;;  %s23643_s3 = inlined_call_operand.hbm [shape: f32[32,32], index: 3, kind: input, shape index: {}]   ;;  %s23644_s4 = inlined_call_operand.hbm [shape: f32[32,32], index: 4, kind: input, shape index: {}]   ;;  %s23645_s5 = inlined_call_operand.hbm [shape: f32[32,32], index: 5, kind: input, shape index: {}]   ;;  %s23646_s6 = inlined_call_operand.vmem [shape: f32[1,32], index: 6, kind: input, shape index: {}]   ;;  %s23647_s7 = inlined_call_operand.vmem [shape: f32[1,32], index: 7, kind: input, shape index: {}]   ;;  %s23648_s8 = inlined_call_operand.vmem [shape: f32[1,32], index: 8, kind: input, shape index: {}]   ;;  %s23649_s9 = inlined_call_operand.hbm [shape: f32[32,32], index: 9, kind: input, shape index: {}]   ;;  %s23650_s10 = inlined_call_operand.vmem [shape: f32[1,32], index: 10, kind: input, shape index: {}]   ;;  %s23651_s11 = inlined_call_operand.hbm [shape: f32[1,4,16,16], index: 11, kind: input, shape index: {}]   ;;  %s23652_s12 = inlined_call_operand.hbm [shape: f32[16,16,32], index: 12, kind: output, shape index: {}]  }
   0x1   :  { %18 = vsyncpa [#allocation6], 0 }
   0x2   :  { %19 = vsyncpa [#allocation9], 0 }
   0x3   :  { %20 = vsyncpa [#allocation12], 0 }
   0x4   :  { %21 = vsyncpa [#allocation4], 0  ;;  %s18206_s21 = smov [#allocation5]   ;;  %s18207_s23 = smov [#allocation8]  }
   0x5   :  { %s43_s22 = sshll.u32 %s18206_s21, 4  ;;  %s67_s24 = sshll.u32 %s18207_s23, 4  ;;  %s44_s22 = int_to_ptr.vmem [resolvable:$true] %s43_s22  ;;  %s68_s24 = int_to_ptr.vmem [resolvable:$true] %s67_s24 }
   0x6   :  { %s18064_s25 = scalar_lea.vmem %s44_s22, 512  ;;  %p18069_p1 = scmp.lt.s32.totalorder %s44_s22, %s44_s22 }
   0x7   :  { %p18065_p0 = scmp.ne.s32.totalorder %s44_s22, %s18064_s25  ;;  %p18070_p2 = scmp.lt.s32.totalorder %s18064_s25, %s18064_s25 }
   0x9   :  { %p18071_p3 = por %p18070_p2, %p18069_p1 }
   0xb   :  { %p18072_p4 = pnand %p18071_p3, %p18065_p0 }
   0xd   :  { %18075 = shalt.err (!%p18072_p4)
}
   0xe   :  { %s18208_s26 = smov 128   ;;  %s18209_s27 = smov 8  }
   0xf   :  { %49 = dma.hbm_to_vmem [thread:$0]  %s23643_s3, 512, %s44_s22, [#allocation6], %s18208_s26, %s18208_s26, %s18209_s27  }
  0x10   :  { %s18084_s30 = scalar_lea.vmem %s68_s24, 512  ;;  %p18089_p6 = scmp.lt.s32.totalorder %s68_s24, %s68_s24 }
  0x11   :  { %p18085_p5 = scmp.ne.s32.totalorder %s68_s24, %s18084_s30  ;;  %p18090_p7 = scmp.lt.s32.totalorder %s18084_s30, %s18084_s30 }
  0x13   :  { %p18091_p8 = por %p18090_p7, %p18089_p6 }
  0x15   :  { %p18092_p9 = pnand %p18091_p8, %p18085_p5 }
  0x17   :  { %18095 = shalt.err (!%p18092_p9)
}
  0x18   :  { %73 = dma.hbm_to_vmem [thread:$0]  %s23645_s5, 512, %s68_s24, [#allocation9], %s18208_s26, %s18208_s26, %s18209_s27  }
  0x19   :  { %s18210_s15 = smov [#allocation2]   ;;  %s18211_s17 = smov [#allocation7]  }
  0x1a   :  { %s27_s16 = sshll.u32 %s18210_s15, 4  ;;  %s55_s18 = sshll.u32 %s18211_s17, 4  ;;  %s28_s16 = int_to_ptr.vmem [resolvable:$true] %s27_s16  ;;  %s56_s18 = int_to_ptr.vmem [resolvable:$true] %s55_s18 }
  0x1b   :  { %s18104_s3 = scalar_lea.vmem %s28_s16, 4096  ;;  %p18109_p11 = scmp.lt.s32.totalorder %s28_s16, %s28_s16 }
  0x1c   :  { %p18105_p10 = scmp.ne.s32.totalorder %s28_s16, %s18104_s3  ;;  %p18110_p12 = scmp.lt.s32.totalorder %s18104_s3, %s18104_s3 }
  0x1e   :  { %p18111_p13 = por %p18110_p12, %p18109_p11 }
  0x20   :  { %p18112_p0 = pnand %p18111_p13, %p18105_p10 }
  0x22   :  { %18115 = shalt.err (!%p18112_p0)
}
  0x23   :  { %33 = dma.hbm_to_vmem [thread:$0]  %s23640_s0, 4096, %s28_s16, [#allocation3], %s18208_s26, %s18208_s26, %s18209_s27  }
  0x24   :  { %s18124_s5 = scalar_lea.vmem %s56_s18, 512  ;;  %p18129_p2 = scmp.lt.s32.totalorder %s56_s18, %s56_s18 }
  0x25   :  { %p18125_p1 = scmp.ne.s32.totalorder %s56_s18, %s18124_s5  ;;  %p18130_p3 = scmp.lt.s32.totalorder %s18124_s5, %s18124_s5 }
  0x27   :  { %p18131_p4 = por %p18130_p3, %p18129_p2 }
  0x29   :  { %p18132_p5 = pnand %p18131_p4, %p18125_p1 }
  0x2b   :  { %18135 = shalt.err (!%p18132_p5)
}
  0x2c   :  { %61 = dma.hbm_to_vmem [thread:$0]  %s23644_s4, 512, %s56_s18, [#allocation6], %s18208_s26, %s18208_s26, %s18209_s27  }
  0x2d   :  { %s18212_s23 = smov [#allocation10]   ;;  %s18213_s25 = smov [#allocation11]  }
  0x2e   :  { %s85_s24 = sshll.u32 %s18212_s23, 4  ;;  %s99_s28 = sshll.u32 %s18213_s25, 4  ;;  %s86_s24 = int_to_ptr.vmem [resolvable:$true] %s85_s24  ;;  %s100_s28 = int_to_ptr.vmem [resolvable:$true] %s99_s28 }
  0x2f   :  { %s18144_s0 = scalar_lea.vmem %s86_s24, 512  ;;  %p18149_p7 = scmp.lt.s32.totalorder %s86_s24, %s86_s24 }
  0x30   :  { %p18145_p6 = scmp.ne.s32.totalorder %s86_s24, %s18144_s0  ;;  %p18150_p8 = scmp.lt.s32.totalorder %s18144_s0, %s18144_s0 }
  0x32   :  { %p18151_p9 = por %p18150_p8, %p18149_p7 }
  0x34   :  { %p18152_p10 = pnand %p18151_p9, %p18145_p6 }
  0x36   :  { %18155 = shalt.err (!%p18152_p10)
}
  0x37   :  { %91 = dma.hbm_to_vmem [thread:$0]  %s23649_s9, 512, %s86_s24, [#allocation9], %s18208_s26, %s18208_s26, %s18209_s27  }
  0x38   :  { %s18164_s4 = scalar_lea.vmem %s100_s28, 1024  ;;  %p18169_p12 = scmp.lt.s32.totalorder %s100_s28, %s100_s28 }
  0x39   :  { %p18165_p11 = scmp.ne.s32.totalorder %s100_s28, %s18164_s4  ;;  %p18170_p13 = scmp.lt.s32.totalorder %s18164_s4, %s18164_s4 }
  0x3b   :  { %p18171_p0 = por %p18170_p13, %p18169_p12 }
  0x3d   :  { %p18172_p1 = pnand %p18171_p0, %p18165_p11 }
  0x3f   :  { %18175 = shalt.err (!%p18172_p1)
}
  0x40   :  { %105 = dma.hbm_to_vmem [thread:$0]  %s23651_s11, 1024, %s100_s28, [#allocation12], %s18208_s26, %s18208_s26, %s18209_s27  }
  0x41   :  { %18196 = dma.done.wait [#allocation3], 4096  }
  0x42   :  { %18197 = vsyncadd [#allocation3], 4294963200 }
  0x43   :  { %18198 = dma.done.wait [#allocation6], 1024  }
  0x44   :  { %18199 = vsyncadd [#allocation6], 4294966272 }
  0x45   :  { %18200 = dma.done.wait [#allocation9], 1024  }
  0x46   :  { %18201 = vsyncadd [#allocation9], 4294966272 }
  0x47   :  { %18202 = dma.done.wait [#allocation12], 1024  }
  0x48   :  { %18203 = vsyncadd [#allocation12], 4294966272  ;;  %vm156_vm0 = vcmask 261120   ;;  %v18321_v0 = vld [vmem:[#allocation2 + $0x80] sm:$0xff]  ;;  %v18323_v1 = vld [vmem:[#allocation2 + $0x90] sm:$0xff]  ;;  %vm1496_vm1 = vcmask 64512  }
  0x49   :  { %v18325_v2 = vld [vmem:[#allocation2 + $0x88] sm:$0xff]  ;;  %v205_v3 = vsel %vm156_vm0, %v18321_v0, 0.0  ;;  %v211_v4 = vsel %vm156_vm0, %v18323_v1, 0.0  ;;  %v18331_v5 = vld [vmem:[#allocation2 + $0x98] sm:$0xff]  ;;  %v18337_v8 = vld [vmem:[#allocation2 + $0xa0] sm:$0xff]  ;;  %vm2889_vm2 = vcmask 130048  }
  0x4a   :  { %206 = vadd.xlane.f32.xlu0 %v205_v3  ;;  %212 = vadd.xlane.f32.xlu1 %v211_v4  ;;  %v208_v6 = vsel %vm156_vm0, %v18325_v2, 0.0  ;;  %v214_v7 = vsel %vm156_vm0, %v18331_v5, 0.0  ;;  %v18339_v9 = vld [vmem:[#allocation2 + $0xa8] sm:$0xff]  ;;  %v217_v10 = vsel %vm156_vm0, %v18337_v8, 0.0  ;;  %v18345_v12 = vld [vmem:[#allocation2 + $0xb0] sm:$0xff]  ;;  %v18347_v13 = vld [vmem:[#allocation2 + $0xb8] sm:$0xff] }
  0x4b   :  { %v220_v11 = vsel %vm156_vm0, %v18339_v9, 0.0  ;;  %v223_v14 = vsel %vm156_vm0, %v18345_v12, 0.0  ;;  %v226_v15 = vsel %vm156_vm0, %v18347_v13, 0.0  ;;  %v18353_v16 = vld [vmem:[#allocation2 + $0xc0] sm:$0xff]  ;;  %v18355_v17 = vld [vmem:[#allocation2 + $0xc8] sm:$0xff]  ;;  %v18361_v20 = vld [vmem:[#allocation2 + $0xd0] sm:$0xff] }
  0x4c   :  { %v229_v18 = vsel %vm156_vm0, %v18353_v16, 0.0  ;;  %v232_v19 = vsel %vm156_vm0, %v18355_v17, 0.0  ;;  %v18363_v21 = vld [vmem:[#allocation2 + $0xd8] sm:$0xff]  ;;  %v235_v22 = vsel %vm156_vm0, %v18361_v20, 0.0  ;;  %v18369_v24 = vld [vmem:[#allocation2 + $0xe0] sm:$0xff]  ;;  %v18371_v25 = vld [vmem:[#allocation2 + $0xe8] sm:$0xff] }
  0x4d   :  { %v238_v23 = vsel %vm156_vm0, %v18363_v21, 0.0  ;;  %v241_v26 = vsel %vm156_vm0, %v18369_v24, 0.0  ;;  %v244_v27 = vsel %vm156_vm0, %v18371_v25, 0.0  ;;  %v18377_v28 = vld [vmem:[#allocation2 + $0xf0] sm:$0xff]  ;;  %v18379_v29 = vld [vmem:[#allocation2 + $0xf8] sm:$0xff]  ;;  %v18385_v32 = vld [vmem:[#allocation2] sm:$0xff] }
  0x4e   :  { %209 = vadd.xlane.f32.xlu0 %v208_v6  ;;  %215 = vadd.xlane.f32.xlu1 %v214_v7  ;;  %v247_v30 = vsel %vm156_vm0, %v18377_v28, 0.0  ;;  %v250_v31 = vsel %vm156_vm0, %v18379_v29, 0.0  ;;  %v18387_v33 = vld [vmem:[#allocation2 + $0x8] sm:$0xff]  ;;  %v157_v34 = vsel %vm156_vm0, %v18385_v32, 0.0  ;;  %v18393_v36 = vld [vmem:[#allocation2 + $0x10] sm:$0xff]  ;;  %v18395_v37 = vld [vmem:[#allocation2 + $0x18] sm:$0xff] }
  0x4f   :  { %v160_v35 = vsel %vm156_vm0, %v18387_v33, 0.0  ;;  %v163_v38 = vsel %vm156_vm0, %v18393_v36, 0.0  ;;  %v166_v39 = vsel %vm156_vm0, %v18395_v37, 0.0  ;;  %v18401_v40 = vld [vmem:[#allocation2 + $0x20] sm:$0xff]  ;;  %v18403_v41 = vld [vmem:[#allocation2 + $0x28] sm:$0xff]  ;;  %v18409_v44 = vld [vmem:[#allocation2 + $0x30] sm:$0xff] }
  0x50   :  { %v169_v42 = vsel %vm156_vm0, %v18401_v40, 0.0  ;;  %v172_v43 = vsel %vm156_vm0, %v18403_v41, 0.0  ;;  %v18411_v45 = vld [vmem:[#allocation2 + $0x38] sm:$0xff]  ;;  %v175_v46 = vsel %vm156_vm0, %v18409_v44, 0.0  ;;  %v18417_v48 = vld [vmem:[#allocation2 + $0x40] sm:$0xff]  ;;  %v18419_v49 = vld [vmem:[#allocation2 + $0x48] sm:$0xff] }
  0x51   :  { %v178_v47 = vsel %vm156_vm0, %v18411_v45, 0.0  ;;  %v181_v50 = vsel %vm156_vm0, %v18417_v48, 0.0  ;;  %v184_v51 = vsel %vm156_vm0, %v18419_v49, 0.0  ;;  %v18425_v52 = vld [vmem:[#allocation2 + $0x50] sm:$0xff]  ;;  %v18427_v53 = vld [vmem:[#allocation2 + $0x58] sm:$0xff]  ;;  %v18433_v56 = vld [vmem:[#allocation2 + $0x60] sm:$0xff] }
  0x52   :  { %218 = vadd.xlane.f32.xlu0 %v217_v10  ;;  %221 = vadd.xlane.f32.xlu1 %v220_v11  ;;  %v187_v54 = vsel %vm156_vm0, %v18425_v52, 0.0  ;;  %v190_v55 = vsel %vm156_vm0, %v18427_v53, 0.0  ;;  %v18435_v57 = vld [vmem:[#allocation2 + $0x68] sm:$0xff]  ;;  %v193_v58 = vsel %vm156_vm0, %v18433_v56, 0.0  ;;  %v18441_v60 = vld [vmem:[#allocation2 + $0x70] sm:$0xff]  ;;  %v18443_v61 = vld [vmem:[#allocation2 + $0x78] sm:$0xff] }
  0x53   :  { %v196_v59 = vsel %vm156_vm0, %v18435_v57, 0.0  ;;  %v199_v62 = vsel %vm156_vm0, %v18441_v60, 0.0  ;;  %v202_v63 = vsel %vm156_vm0, %v18443_v61, 0.0  ;;  %s18216_s5 = smov 104   ;;  %s18217_s21 = smov 16   ;;  %vm14746_vm3 = vcmask 195584  }
  0x54   :  { %s18218_s22 = smov 24  }
  0x56   :  { %224 = vadd.xlane.f32.xlu0 %v223_v14  ;;  %227 = vadd.xlane.f32.xlu1 %v226_v15 }
  0x5a   :  { %230 = vadd.xlane.f32.xlu0 %v229_v18  ;;  %233 = vadd.xlane.f32.xlu1 %v232_v19 }
  0x5e   :  { %236 = vadd.xlane.f32.xlu0 %v235_v22  ;;  %239 = vadd.xlane.f32.xlu1 %v238_v23 }
  0x62   :  { %242 = vadd.xlane.f32.xlu0 %v241_v26  ;;  %245 = vadd.xlane.f32.xlu1 %v244_v27 }
  0x66   :  { %248 = vadd.xlane.f32.xlu0 %v247_v30  ;;  %251 = vadd.xlane.f32.xlu1 %v250_v31 }
  0x6a   :  { %158 = vadd.xlane.f32.xlu0 %v157_v34  ;;  %161 = vadd.xlane.f32.xlu1 %v160_v35 }
  0x6e   :  { %164 = vadd.xlane.f32.xlu0 %v163_v38  ;;  %167 = vadd.xlane.f32.xlu1 %v166_v39 }
  0x72   :  { %170 = vadd.xlane.f32.xlu0 %v169_v42  ;;  %173 = vadd.xlane.f32.xlu1 %v172_v43 }
  0x76   :  { %176 = vadd.xlane.f32.xlu0 %v175_v46  ;;  %179 = vadd.xlane.f32.xlu1 %v178_v47 }
  0x7a   :  { %182 = vadd.xlane.f32.xlu0 %v181_v50  ;;  %185 = vadd.xlane.f32.xlu1 %v184_v51 }
  0x7e   :  { %188 = vadd.xlane.f32.xlu0 %v187_v54  ;;  %191 = vadd.xlane.f32.xlu1 %v190_v55 }
  0x82   :  { %194 = vadd.xlane.f32.xlu0 %v193_v58  ;;  %197 = vadd.xlane.f32.xlu1 %v196_v59 }
  0x86   :  { %200 = vadd.xlane.f32.xlu0 %v199_v62  ;;  %203 = vadd.xlane.f32.xlu1 %v202_v63 }
  0xd3   :  { %v207_v3 = vpop.xlane.xlu0 %206  ;;  %v213_v4 = vpop.xlane.xlu1 %212 }
  0xd4   :  { %v270_v6 = vmul.f32 0.03125, %v207_v3  ;;  %v272_v7 = vmul.f32 0.03125, %v213_v4 }
  0xd6   :  { %v18450_v10 = vsub.f32 %v18321_v0, %v270_v6  ;;  %v18453_v11 = vsub.f32 %v18323_v1, %v272_v7 }
  0xd7   :  { %v210_v14 = vpop.xlane.xlu0 %209  ;;  %v216_v15 = vpop.xlane.xlu1 %215 }
  0xd8   :  { %v271_v18 = vmul.f32 0.03125, %v210_v14  ;;  %v273_v19 = vmul.f32 0.03125, %v216_v15  ;;  %v334_v22 = vmul.f32 %v18450_v10, %v18450_v10  ;;  %v336_v23 = vmul.f32 %v18453_v11, %v18453_v11 }
  0xda   :  { %v18460_v26 = vsub.f32 %v18325_v2, %v271_v18  ;;  %v18463_v27 = vsub.f32 %v18331_v5, %v273_v19  ;;  %v398_v0 = vsel %vm156_vm0, %v334_v22, 0.0  ;;  %v404_v31 = vsel %vm156_vm0, %v336_v23, 0.0 }
  0xdb   :  { %v219_v1 = vpop.xlane.xlu0 %218  ;;  %399 = vadd.xlane.f32.xlu0 %v398_v0  ;;  %v222_v30 = vpop.xlane.xlu1 %221 }
  0xdc   :  { %v274_v34 = vmul.f32 0.03125, %v219_v1  ;;  %v275_v35 = vmul.f32 0.03125, %v222_v30  ;;  %v335_v38 = vmul.f32 %v18460_v26, %v18460_v26  ;;  %v337_v39 = vmul.f32 %v18463_v27, %v18463_v27 }
  0xde   :  { %v18472_v2 = vsub.f32 %v18337_v8, %v274_v34  ;;  %v18475_v5 = vsub.f32 %v18339_v9, %v275_v35  ;;  %v401_v42 = vsel %vm156_vm0, %v335_v38, 0.0  ;;  %v407_v47 = vsel %vm156_vm0, %v337_v39, 0.0 }
  0xdf   :  { %v225_v43 = vpop.xlane.xlu0 %224  ;;  %402 = vadd.xlane.f32.xlu1 %v401_v42  ;;  %405 = vadd.xlane.f32.xlu0 %v404_v31  ;;  %v228_v46 = vpop.xlane.xlu1 %227 }
  0xe0   :  { %v276_v50 = vmul.f32 0.03125, %v225_v43  ;;  %v277_v51 = vmul.f32 0.03125, %v228_v46  ;;  %v338_v54 = vmul.f32 %v18472_v2, %v18472_v2  ;;  %v339_v8 = vmul.f32 %v18475_v5, %v18475_v5 }
  0xe2   :  { %v18484_v55 = vsub.f32 %v18345_v12, %v276_v50  ;;  %v18487_v9 = vsub.f32 %v18347_v13, %v277_v51  ;;  %v410_v58 = vsel %vm156_vm0, %v338_v54, 0.0  ;;  %v413_v63 = vsel %vm156_vm0, %v339_v8, 0.0 }
  0xe3   :  { %v231_v59 = vpop.xlane.xlu0 %230  ;;  %408 = vadd.xlane.f32.xlu1 %v407_v47  ;;  %411 = vadd.xlane.f32.xlu0 %v410_v58  ;;  %v234_v62 = vpop.xlane.xlu1 %233 }
  0xe4   :  { %v278_v3 = vmul.f32 0.03125, %v231_v59  ;;  %v279_v4 = vmul.f32 0.03125, %v234_v62  ;;  %v340_v6 = vmul.f32 %v18484_v55, %v18484_v55  ;;  %v341_v12 = vmul.f32 %v18487_v9, %v18487_v9 }
  0xe6   :  { %v18496_v7 = vsub.f32 %v18353_v16, %v278_v3  ;;  %v18499_v13 = vsub.f32 %v18355_v17, %v279_v4  ;;  %v416_v14 = vsel %vm156_vm0, %v340_v6, 0.0  ;;  %v419_v19 = vsel %vm156_vm0, %v341_v12, 0.0 }
  0xe7   :  { %v237_v15 = vpop.xlane.xlu0 %236  ;;  %414 = vadd.xlane.f32.xlu1 %v413_v63  ;;  %417 = vadd.xlane.f32.xlu0 %v416_v14  ;;  %v240_v18 = vpop.xlane.xlu1 %239 }
  0xe8   :  { %v280_v22 = vmul.f32 0.03125, %v237_v15  ;;  %v281_v23 = vmul.f32 0.03125, %v240_v18  ;;  %v342_v0 = vmul.f32 %v18496_v7, %v18496_v7  ;;  %v343_v16 = vmul.f32 %v18499_v13, %v18499_v13 }
  0xea   :  { %v18508_v1 = vsub.f32 %v18361_v20, %v280_v22  ;;  %v18511_v17 = vsub.f32 %v18363_v21, %v281_v23  ;;  %v422_v30 = vsel %vm156_vm0, %v342_v0, 0.0  ;;  %v425_v35 = vsel %vm156_vm0, %v343_v16, 0.0 }
  0xeb   :  { %v243_v31 = vpop.xlane.xlu0 %242  ;;  %420 = vadd.xlane.f32.xlu1 %v419_v19  ;;  %423 = vadd.xlane.f32.xlu0 %v422_v30  ;;  %v246_v34 = vpop.xlane.xlu1 %245 }
  0xec   :  { %v282_v38 = vmul.f32 0.03125, %v243_v31  ;;  %v283_v39 = vmul.f32 0.03125, %v246_v34  ;;  %v344_v42 = vmul.f32 %v18508_v1, %v18508_v1  ;;  %v345_v20 = vmul.f32 %v18511_v17, %v18511_v17  ;;  %v655_v31 = vld [vmem:[#allocation5 + $0x18] sm:$0xff] }
  0xed   :  { %17457 = vmatprep.subr.mxu1 %v655_v31  ;;  %16337 = vmatprep.subr.mxu0 %v655_v31 }
  0xee   :  { %v18520_v43 = vsub.f32 %v18369_v24, %v282_v38  ;;  %v18523_v21 = vsub.f32 %v18371_v25, %v283_v39  ;;  %v428_v46 = vsel %vm156_vm0, %v344_v42, 0.0  ;;  %v431_v51 = vsel %vm156_vm0, %v345_v20, 0.0  ;;  %v654_v20 = vld [vmem:[#allocation5 + $0x10] sm:$0xff]  ;;  %17461 = vmatpush3.msra.mxu1 %v655_v31  ;;  %16338 = vmatpush3.msra.mxu0 %v655_v31 }
  0xef   :  { %v249_v47 = vpop.xlane.xlu0 %248  ;;  %426 = vadd.xlane.f32.xlu1 %v425_v35  ;;  %429 = vadd.xlane.f32.xlu0 %v428_v46  ;;  %v252_v50 = vpop.xlane.xlu1 %251 }
  0xf0   :  { %v284_v54 = vmul.f32 0.03125, %v249_v47  ;;  %v285_v8 = vmul.f32 0.03125, %v252_v50  ;;  %v346_v58 = vmul.f32 %v18520_v43, %v18520_v43  ;;  %v347_v24 = vmul.f32 %v18523_v21, %v18523_v21  ;;  %17458 = vmatprep.subr.mxu1 %v654_v20  ;;  %v653_v50 = vld [vmem:[#allocation5 + $0x8] sm:$0xff]  ;;  %16339 = vmatprep.subr.mxu0 %v654_v20 }
  0xf1   :  { %17462 = vmatpush3.msra.mxu1 %v654_v20  ;;  %16340 = vmatpush3.msra.mxu0 %v654_v20 }
  0xf2   :  { %v18532_v59 = vsub.f32 %v18377_v28, %v284_v54  ;;  %v18535_v25 = vsub.f32 %v18379_v29, %v285_v8  ;;  %v434_v62 = vsel %vm156_vm0, %v346_v58, 0.0  ;;  %v437_v3 = vsel %vm156_vm0, %v347_v24, 0.0  ;;  %17459 = vmatprep.subr.mxu1 %v653_v50  ;;  %16341 = vmatprep.subr.mxu0 %v653_v50 }
  0xf3   :  { %432 = vadd.xlane.f32.xlu1 %v431_v51  ;;  %435 = vadd.xlane.f32.xlu0 %v434_v62  ;;  %v159_v63 = vpop.xlane.xlu0 %158  ;;  %v162_v4 = vpop.xlane.xlu1 %161 }
  0xf4   :  { %v254_v6 = vmul.f32 0.03125, %v159_v63  ;;  %v255_v12 = vmul.f32 0.03125, %v162_v4  ;;  %v348_v14 = vmul.f32 %v18532_v59, %v18532_v59  ;;  %v349_v28 = vmul.f32 %v18535_v25, %v18535_v25  ;;  %v652_v63 = vld [vmem:[#allocation5] sm:$0xff]  ;;  %17463 = vmatpush3.msra.mxu1 %v653_v50  ;;  %16342 = vmatpush3.msra.mxu0 %v653_v50 }
  0xf5   :  { %17460 = vmatprep.subr.mxu1 %v652_v63  ;;  %16343 = vmatprep.subr.mxu0 %v652_v63 }
  0xf6   :  { %v18544_v15 = vsub.f32 %v18385_v32, %v254_v6  ;;  %v18547_v29 = vsub.f32 %v18387_v33, %v255_v12  ;;  %v440_v18 = vsel %vm156_vm0, %v348_v14, 0.0  ;;  %v443_v22 = vsel %vm156_vm0, %v349_v28, 0.0  ;;  %17464 = vmatpush3.msra.mxu1 %v652_v63  ;;  %16344 = vmatpush3.msra.mxu0 %v652_v63 }
  0xf7   :  { %438 = vadd.xlane.f32.xlu1 %v437_v3  ;;  %441 = vadd.xlane.f32.xlu0 %v440_v18  ;;  %v165_v19 = vpop.xlane.xlu0 %164  ;;  %v168_v23 = vpop.xlane.xlu1 %167 }
  0xf8   :  { %v256_v0 = vmul.f32 0.03125, %v165_v19  ;;  %v257_v16 = vmul.f32 0.03125, %v168_v23  ;;  %v318_v30 = vmul.f32 %v18544_v15, %v18544_v15  ;;  %v319_v32 = vmul.f32 %v18547_v29, %v18547_v29 }
  0xfa   :  { %v18556_v33 = vsub.f32 %v18393_v36, %v256_v0  ;;  %v18559_v34 = vsub.f32 %v18395_v37, %v257_v16  ;;  %v350_v35 = vsel %vm156_vm0, %v318_v30, 0.0  ;;  %v353_v39 = vsel %vm156_vm0, %v319_v32, 0.0 }
  0xfb   :  { %444 = vadd.xlane.f32.xlu1 %v443_v22  ;;  %351 = vadd.xlane.f32.xlu0 %v350_v35  ;;  %v171_v38 = vpop.xlane.xlu0 %170  ;;  %v174_v42 = vpop.xlane.xlu1 %173 }
  0xfc   :  { %v258_v46 = vmul.f32 0.03125, %v171_v38  ;;  %v259_v47 = vmul.f32 0.03125, %v174_v42  ;;  %v320_v36 = vmul.f32 %v18556_v33, %v18556_v33  ;;  %v321_v37 = vmul.f32 %v18559_v34, %v18559_v34 }
  0xfe   :  { %v18568_v51 = vsub.f32 %v18401_v40, %v258_v46  ;;  %v18571_v54 = vsub.f32 %v18403_v41, %v259_v47  ;;  %v356_v8 = vsel %vm156_vm0, %v320_v36, 0.0  ;;  %v359_v24 = vsel %vm156_vm0, %v321_v37, 0.0 }
  0xff   :  { %354 = vadd.xlane.f32.xlu1 %v353_v39  ;;  %357 = vadd.xlane.f32.xlu0 %v356_v8  ;;  %v177_v58 = vpop.xlane.xlu0 %176  ;;  %v180_v62 = vpop.xlane.xlu1 %179 }
 0x100   :  { %v260_v3 = vmul.f32 0.03125, %v177_v58  ;;  %v261_v4 = vmul.f32 0.03125, %v180_v62  ;;  %v322_v40 = vmul.f32 %v18568_v51, %v18568_v51  ;;  %v323_v41 = vmul.f32 %v18571_v54, %v18571_v54 }
 0x102   :  { %v18580_v6 = vsub.f32 %v18409_v44, %v260_v3  ;;  %v18583_v12 = vsub.f32 %v18411_v45, %v261_v4  ;;  %v362_v14 = vsel %vm156_vm0, %v322_v40, 0.0  ;;  %v365_v18 = vsel %vm156_vm0, %v323_v41, 0.0 }
 0x103   :  { %360 = vadd.xlane.f32.xlu1 %v359_v24  ;;  %363 = vadd.xlane.f32.xlu0 %v362_v14  ;;  %v183_v28 = vpop.xlane.xlu0 %182  ;;  %v186_v19 = vpop.xlane.xlu1 %185 }
 0x104   :  { %v262_v22 = vmul.f32 0.03125, %v183_v28  ;;  %v263_v23 = vmul.f32 0.03125, %v186_v19  ;;  %v324_v0 = vmul.f32 %v18580_v6, %v18580_v6  ;;  %v325_v44 = vmul.f32 %v18583_v12, %v18583_v12 }
 0x106   :  { %v18592_v45 = vsub.f32 %v18417_v48, %v262_v22  ;;  %v18595_v16 = vsub.f32 %v18419_v49, %v263_v23  ;;  %v368_v30 = vsel %vm156_vm0, %v324_v0, 0.0  ;;  %v371_v31 = vsel %vm156_vm0, %v325_v44, 0.0  ;;  %v18644_v44 = vld [vmem:[#allocation8 + $0x18] sm:$0xff] }
 0x107   :  { %366 = vadd.xlane.f32.xlu1 %v365_v18  ;;  %369 = vadd.xlane.f32.xlu0 %v368_v30  ;;  %v189_v32 = vpop.xlane.xlu0 %188  ;;  %v192_v35 = vpop.xlane.xlu1 %191 }
 0x108   :  { %v264_v38 = vmul.f32 0.03125, %v189_v32  ;;  %v265_v39 = vmul.f32 0.03125, %v192_v35  ;;  %v326_v42 = vmul.f32 %v18592_v45, %v18592_v45  ;;  %v327_v48 = vmul.f32 %v18595_v16, %v18595_v16  ;;  %16449 = vmatprep.subr.mxu0 %v18644_v44 }
 0x10a   :  { %v18604_v20 = vsub.f32 %v18425_v52, %v264_v38  ;;  %v18607_v49 = vsub.f32 %v18427_v53, %v265_v39  ;;  %v374_v46 = vsel %vm156_vm0, %v326_v42, 0.0  ;;  %v377_v36 = vsel %vm156_vm0, %v327_v48, 0.0 }
 0x10b   :  { %372 = vadd.xlane.f32.xlu1 %v371_v31  ;;  %375 = vadd.xlane.f32.xlu0 %v374_v46  ;;  %v195_v47 = vpop.xlane.xlu0 %194  ;;  %v198_v37 = vpop.xlane.xlu1 %197 }
 0x10c   :  { %v266_v50 = vmul.f32 0.03125, %v195_v47  ;;  %v267_v8 = vmul.f32 0.03125, %v198_v37  ;;  %v328_v58 = vmul.f32 %v18604_v20, %v18604_v20  ;;  %v329_v52 = vmul.f32 %v18607_v49, %v18607_v49 }
 0x10e   :  { %v18616_v24 = vsub.f32 %v18433_v56, %v266_v50  ;;  %v18619_v53 = vsub.f32 %v18435_v57, %v267_v8  ;;  %v380_v62 = vsel %vm156_vm0, %v328_v58, 0.0  ;;  %v383_v3 = vsel %vm156_vm0, %v329_v52, 0.0 }
 0x10f   :  { %378 = vadd.xlane.f32.xlu1 %v377_v36  ;;  %381 = vadd.xlane.f32.xlu0 %v380_v62  ;;  %v201_v63 = vpop.xlane.xlu0 %200  ;;  %v204_v4 = vpop.xlane.xlu1 %203 }
 0x110   :  { %v268_v40 = vmul.f32 0.03125, %v201_v63  ;;  %v269_v41 = vmul.f32 0.03125, %v204_v4  ;;  %v330_v14 = vmul.f32 %v18616_v24, %v18616_v24  ;;  %v331_v56 = vmul.f32 %v18619_v53, %v18619_v53 }
 0x112   :  { %v18628_v28 = vsub.f32 %v18441_v60, %v268_v40  ;;  %v18631_v57 = vsub.f32 %v18443_v61, %v269_v41  ;;  %v386_v18 = vsel %vm156_vm0, %v330_v14, 0.0  ;;  %v389_v19 = vsel %vm156_vm0, %v331_v56, 0.0  ;;  %v18641_v61 = vld [vmem:[#allocation7 + $0x18] sm:$0xff] }
 0x113   :  { %384 = vadd.xlane.f32.xlu1 %v383_v3  ;;  %387 = vadd.xlane.f32.xlu0 %v386_v18 }
 0x114   :  { %v332_v22 = vmul.f32 %v18628_v28, %v18628_v28  ;;  %v333_v23 = vmul.f32 %v18631_v57, %v18631_v57  ;;  %16393 = vmatprep.subr.mxu1 %v18641_v61 }
 0x116   :  { %v392_v0 = vsel %vm156_vm0, %v332_v22, 0.0  ;;  %v395_v60 = vsel %vm156_vm0, %v333_v23, 0.0  ;;  %v18650_v22 = vld [vmem:[%s23641_s1] ss:$0 sm:$0xff] }
 0x117   :  { %390 = vadd.xlane.f32.xlu1 %v389_v19  ;;  %393 = vadd.xlane.f32.xlu0 %v392_v0 }
 0x11b   :  { %396 = vadd.xlane.f32.xlu1 %v395_v60 }
 0x164   :  { %v400_v30 = vpop.xlane.xlu0 %399 }
 0x165   :  { %v462_v32 = vmul.f32 0.03125, %v400_v30 }
 0x167   :  { %v494_v31 = vadd.f32 1e-06, %v462_v32 }
 0x168   :  { %v403_v35 = vpop.xlane.xlu1 %402  ;;  %v406_v38 = vpop.xlane.xlu0 %405 }
 0x169   :  { %17479 = vrsqrt.f32 %v494_v31  ;;  %v463_v39 = vmul.f32 0.03125, %v403_v35  ;;  %v464_v42 = vmul.f32 0.03125, %v406_v38  ;;  %v18656_v31 = vld [vmem:[%s23642_s2] ss:$0 sm:$0xff] }
 0x16b   :  { %v495_v48 = vadd.f32 1e-06, %v463_v39  ;;  %v496_v46 = vadd.f32 1e-06, %v464_v42 }
 0x16c   :  { %v409_v47 = vpop.xlane.xlu1 %408  ;;  %v412_v36 = vpop.xlane.xlu0 %411 }
 0x16d   :  { %17481 = vrsqrt.f32 %v495_v48  ;;  %v465_v37 = vmul.f32 0.03125, %v409_v47  ;;  %v466_v50 = vmul.f32 0.03125, %v412_v36 }
 0x16e   :  { %17483 = vrsqrt.f32 %v496_v46 }
 0x16f   :  { %v497_v8 = vadd.f32 1e-06, %v465_v37  ;;  %v498_v58 = vadd.f32 1e-06, %v466_v50 }
 0x170   :  { %v415_v52 = vpop.xlane.xlu1 %414  ;;  %v418_v62 = vpop.xlane.xlu0 %417 }
 0x171   :  { %17485 = vrsqrt.f32 %v497_v8  ;;  %v467_v63 = vmul.f32 0.03125, %v415_v52  ;;  %v468_v3 = vmul.f32 0.03125, %v418_v62 }
 0x172   :  { %17487 = vrsqrt.f32 %v498_v58 }
 0x173   :  { %v499_v4 = vadd.f32 1e-06, %v467_v63  ;;  %v500_v40 = vadd.f32 1e-06, %v468_v3 }
 0x174   :  { %v421_v41 = vpop.xlane.xlu1 %420  ;;  %v424_v14 = vpop.xlane.xlu0 %423 }
 0x175   :  { %17489 = vrsqrt.f32 %v499_v4  ;;  %v469_v56 = vmul.f32 0.03125, %v421_v41  ;;  %v470_v18 = vmul.f32 0.03125, %v424_v14 }
 0x176   :  { %v17480_v19 = vpop.eup %17479  ;;  %17491 = vrsqrt.f32 %v500_v40 }
 0x177   :  { %v501_v23 = vadd.f32 1e-06, %v469_v56  ;;  %v502_v0 = vadd.f32 1e-06, %v470_v18  ;;  %v558_v60 = vmul.f32 %v17480_v19, %v18450_v10 }
 0x178   :  { %v427_v30 = vpop.xlane.xlu1 %426  ;;  %v430_v32 = vpop.xlane.xlu0 %429 }
 0x179   :  { %17493 = vrsqrt.f32 %v501_v23  ;;  %v471_v35 = vmul.f32 0.03125, %v427_v30  ;;  %v472_v38 = vmul.f32 0.03125, %v430_v32  ;;  %v597_v39 = vmul.f32 %v18650_v22, %v558_v60  ;;  %v1018_v23 = vld [vmem:[#allocation7 + $0x10] sm:$0xff] }
 0x17a   :  { %v17482_v42 = vpop.eup %17481  ;;  %17495 = vrsqrt.f32 %v502_v0 }
 0x17b   :  { %v17484_v48 = vpop.eup %17483  ;;  %v503_v46 = vadd.f32 1e-06, %v471_v35  ;;  %v504_v47 = vadd.f32 1e-06, %v472_v38  ;;  %v18660_v36 = vadd.f32 %v18656_v31, %v597_v39  ;;  %v559_v10 = vmul.f32 %v17482_v42, %v18460_v26  ;;  %v1017_v35 = vld [vmem:[#allocation7 + $0x8] sm:$0xff] }
 0x17c   :  { %v433_v37 = vpop.xlane.xlu1 %432  ;;  %v436_v50 = vpop.xlane.xlu0 %435  ;;  %v560_v8 = vmul.f32 %v17484_v48, %v18453_v11 }
 0x17d   :  { %17497 = vrsqrt.f32 %v503_v46  ;;  %v473_v58 = vmul.f32 0.03125, %v433_v37  ;;  %v474_v52 = vmul.f32 0.03125, %v436_v50  ;;  %16369 = vmatprep.mubr.msk.f32.mxu1 %vm156_vm0, %v18660_v36  ;;  %v598_v62 = vmul.f32 %v18650_v22, %v559_v10  ;;  %v1016_v50 = vld [vmem:[#allocation7] sm:$0xff] }
 0x17e   :  { %v17486_v63 = vpop.eup %17485  ;;  %17499 = vrsqrt.f32 %v504_v47  ;;  %v599_v3 = vmul.f32 %v18650_v22, %v560_v8 }
 0x17f   :  { %v17488_v4 = vpop.eup %17487  ;;  %v505_v40 = vadd.f32 1e-06, %v473_v58  ;;  %v506_v41 = vadd.f32 1e-06, %v474_v52  ;;  %v18669_v26 = vadd.f32 %v18656_v31, %v598_v62  ;;  %v561_v11 = vmul.f32 %v17486_v63, %v18463_v27 }
 0x180   :  { %v439_v14 = vpop.xlane.xlu1 %438  ;;  %v442_v56 = vpop.xlane.xlu0 %441  ;;  %v18673_v18 = vadd.f32 %v18656_v31, %v599_v3  ;;  %v562_v19 = vmul.f32 %v17488_v4, %v18472_v2 }
 0x181   :  { %17501 = vrsqrt.f32 %v505_v40  ;;  %v475_v0 = vmul.f32 0.03125, %v439_v14  ;;  %v476_v60 = vmul.f32 0.03125, %v442_v56  ;;  %16370 = vmatmul.mubr.msk.f32.vlgmr.msra.gmra.mxu1 %vm156_vm0, %v18669_v26  ;;  %v600_v30 = vmul.f32 %v18650_v22, %v561_v11 }
 0x182   :  { %v17490_v32 = vpop.eup %17489  ;;  %17503 = vrsqrt.f32 %v506_v41  ;;  %16372 = vmatprep.mubr.msk.f32.mxu1 %vm156_vm0, %v18673_v18  ;;  %v601_v27 = vmul.f32 %v18650_v22, %v562_v19  ;;  %16394 = vmatpush3.msra.mxu1 %v18641_v61 }
 0x183   :  { %v17492_v2 = vpop.eup %17491  ;;  %v507_v38 = vadd.f32 1e-06, %v475_v0  ;;  %v508_v39 = vadd.f32 1e-06, %v476_v60  ;;  %v18684_v42 = vadd.f32 %v18656_v31, %v600_v30  ;;  %v563_v48 = vmul.f32 %v17490_v32, %v18475_v5  ;;  %16395 = vmatprep.subr.mxu1 %v1018_v23 }
 0x184   :  { %v445_v46 = vpop.xlane.xlu1 %444  ;;  %v352_v47 = vpop.xlane.xlu0 %351  ;;  %v18688_v10 = vadd.f32 %v18656_v31, %v601_v27  ;;  %v564_v37 = vmul.f32 %v17492_v2, %v18484_v55  ;;  %16396 = vmatpush3.msra.mxu1 %v1018_v23 }
 0x185   :  { %17505 = vrsqrt.f32 %v507_v38  ;;  %v477_v61 = vmul.f32 0.03125, %v445_v46  ;;  %v446_v8 = vmul.f32 0.03125, %v352_v47  ;;  %16373 = vmatmul.mubr.msk.f32.gmra.mxu1 %vm156_vm0, %v18684_v42  ;;  %v602_v58 = vmul.f32 %v18650_v22, %v563_v48  ;;  %16397 = vmatprep.subr.mxu1 %v1017_v35 }
 0x186   :  { %v17494_v5 = vpop.eup %17493  ;;  %17507 = vrsqrt.f32 %v508_v39  ;;  %16375 = vmatprep.mubr.msk.f32.mxu1 %vm156_vm0, %v18688_v10  ;;  %v603_v52 = vmul.f32 %v18650_v22, %v564_v37  ;;  %16398 = vmatpush3.msra.mxu1 %v1017_v35 }
 0x187   :  { %v17496_v55 = vpop.eup %17495  ;;  %v509_v62 = vadd.f32 1e-06, %v477_v61  ;;  %v478_v63 = vadd.f32 1e-06, %v446_v8  ;;  %v18698_v3 = vadd.f32 %v18656_v31, %v602_v58  ;;  %v565_v4 = vmul.f32 %v17494_v5, %v18487_v9  ;;  %16399 = vmatprep.subr.mxu1 %v1016_v50 }
 0x188   :  { %v355_v40 = vpop.xlane.xlu1 %354  ;;  %v358_v41 = vpop.xlane.xlu0 %357  ;;  %v18702_v11 = vadd.f32 %v18656_v31, %v603_v52  ;;  %v566_v14 = vmul.f32 %v17496_v55, %v18496_v7  ;;  %16400 = vmatpush3.msra.mxu1 %v1016_v50 }
 0x189   :  { %17509 = vrsqrt.f32 %v509_v62  ;;  %v447_v56 = vmul.f32 0.03125, %v355_v40  ;;  %v448_v19 = vmul.f32 0.03125, %v358_v41  ;;  %16376 = vmatmul.mubr.msk.f32.gmra.mxu1 %vm156_vm0, %v18698_v3  ;;  %v604_v23 = vmul.f32 %v18650_v22, %v565_v4 }
 0x18a   :  { %v17498_v0 = vpop.eup %17497  ;;  %17511 = vrsqrt.f32 %v478_v63  ;;  %16378 = vmatprep.mubr.msk.f32.mxu1 %vm156_vm0, %v18702_v11  ;;  %v605_v9 = vmul.f32 %v18650_v22, %v566_v14 }
 0x18b   :  { %v17500_v60 = vpop.eup %17499  ;;  %v479_v30 = vadd.f32 1e-06, %v447_v56  ;;  %v480_v32 = vadd.f32 1e-06, %v448_v19  ;;  %v18712_v7 = vadd.f32 %v18656_v31, %v604_v23  ;;  %v567_v27 = vmul.f32 %v17498_v0, %v18499_v13 }
 0x18c   :  { %v361_v35 = vpop.xlane.xlu1 %360  ;;  %v364_v2 = vpop.xlane.xlu0 %363  ;;  %v18716_v38 = vadd.f32 %v18656_v31, %v605_v9  ;;  %v568_v39 = vmul.f32 %v17500_v60, %v18508_v1 }
 0x18d   :  { %17513 = vrsqrt.f32 %v479_v30  ;;  %v449_v48 = vmul.f32 0.03125, %v361_v35  ;;  %v450_v46 = vmul.f32 0.03125, %v364_v2  ;;  %16379 = vmatmul.mubr.msk.f32.gmra.mxu1 %vm156_vm0, %v18712_v7  ;;  %v606_v47 = vmul.f32 %v18650_v22, %v567_v27 }
 0x18e   :  { %v17502_v37 = vpop.eup %17501  ;;  %17515 = vrsqrt.f32 %v480_v32  ;;  %16381 = vmatprep.mubr.msk.f32.mxu1 %vm156_vm0, %v18716_v38  ;;  %v607_v13 = vmul.f32 %v18650_v22, %v568_v39 }
 0x18f   :  { %v17504_v50 = vpop.eup %17503  ;;  %v481_v61 = vadd.f32 1e-06, %v449_v48  ;;  %v482_v8 = vadd.f32 1e-06, %v450_v46  ;;  %v18726_v1 = vadd.f32 %v18656_v31, %v606_v47  ;;  %v569_v58 = vmul.f32 %v17502_v37, %v18511_v17 }
 0x190   :  { %v367_v5 = vpop.xlane.xlu1 %366  ;;  %v370_v52 = vpop.xlane.xlu0 %369  ;;  %v18730_v55 = vadd.f32 %v18656_v31, %v607_v13  ;;  %v570_v62 = vmul.f32 %v17504_v50, %v18520_v43 }
 0x191   :  { %17517 = vrsqrt.f32 %v481_v61  ;;  %v451_v63 = vmul.f32 0.03125, %v367_v5  ;;  %v452_v4 = vmul.f32 0.03125, %v370_v52  ;;  %16382 = vmatmul.mubr.msk.f32.gmra.mxu1 %vm156_vm0, %v18726_v1  ;;  %v608_v40 = vmul.f32 %v18650_v22, %v569_v58 }
 0x192   :  { %v17506_v41 = vpop.eup %17505  ;;  %17519 = vrsqrt.f32 %v482_v8  ;;  %16384 = vmatprep.mubr.msk.f32.mxu1 %vm156_vm0, %v18730_v55  ;;  %v609_v17 = vmul.f32 %v18650_v22, %v570_v62 }
 0x193   :  { %v17508_v14 = vpop.eup %17507  ;;  %v483_v56 = vadd.f32 1e-06, %v451_v63  ;;  %v484_v19 = vadd.f32 1e-06, %v452_v4  ;;  %v18740_v43 = vadd.f32 %v18656_v31, %v608_v40  ;;  %v571_v23 = vmul.f32 %v17506_v41, %v18523_v21 }
 0x194   :  { %v373_v0 = vpop.xlane.xlu1 %372  ;;  %v376_v9 = vpop.xlane.xlu0 %375  ;;  %v18744_v60 = vadd.f32 %v18656_v31, %v609_v17  ;;  %v572_v30 = vmul.f32 %v17508_v14, %v18532_v59 }
 0x195   :  { %17521 = vrsqrt.f32 %v483_v56  ;;  %v453_v32 = vmul.f32 0.03125, %v373_v0  ;;  %v454_v27 = vmul.f32 0.03125, %v376_v9  ;;  %16385 = vmatmul.mubr.msk.f32.gmra.mxu1 %vm156_vm0, %v18740_v43  ;;  %v610_v35 = vmul.f32 %v18650_v22, %v571_v23 }
 0x196   :  { %v17510_v2 = vpop.eup %17509  ;;  %17523 = vrsqrt.f32 %v484_v19  ;;  %16387 = vmatprep.mubr.msk.f32.mxu1 %vm156_vm0, %v18744_v60  ;;  %v611_v21 = vmul.f32 %v18650_v22, %v572_v30 }
 0x197   :  { %v17512_v39 = vpop.eup %17511  ;;  %v485_v48 = vadd.f32 1e-06, %v453_v32  ;;  %v486_v46 = vadd.f32 1e-06, %v454_v27  ;;  %v18754_v59 = vadd.f32 %v18656_v31, %v610_v35  ;;  %v573_v47 = vmul.f32 %v17510_v2, %v18535_v25 }
 0x198   :  { %v379_v37 = vpop.xlane.xlu1 %378  ;;  %v382_v13 = vpop.xlane.xlu0 %381  ;;  %v18758_v50 = vadd.f32 %v18656_v31, %v611_v21  ;;  %v542_v61 = vmul.f32 %v17512_v39, %v18544_v15 }
 0x199   :  { %17525 = vrsqrt.f32 %v485_v48  ;;  %v455_v8 = vmul.f32 0.03125, %v379_v37  ;;  %v456_v58 = vmul.f32 0.03125, %v382_v13  ;;  %16388 = vmatmul.mubr.msk.f32.gmra.mxu1 %vm156_vm0, %v18754_v59  ;;  %v612_v5 = vmul.f32 %v18650_v22, %v573_v47  ;;  %v1254_v13 = vld [vmem:[#allocation8 + $0x10] sm:$0xff] }
 0x19a   :  { %v17514_v52 = vpop.eup %17513  ;;  %17527 = vrsqrt.f32 %v486_v46  ;;  %16390 = vmatprep.mubr.msk.f32.mxu1 %vm156_vm0, %v18758_v50  ;;  %v581_v25 = vmul.f32 %v18650_v22, %v542_v61 }
 0x19b   :  { %v17516_v62 = vpop.eup %17515  ;;  %v487_v63 = vadd.f32 1e-06, %v455_v8  ;;  %v488_v4 = vadd.f32 1e-06, %v456_v58  ;;  %v18768_v15 = vadd.f32 %v18656_v31, %v612_v5  ;;  %v543_v40 = vmul.f32 %v17514_v52, %v18547_v29 }
 0x19c   :  { %v385_v41 = vpop.xlane.xlu1 %384  ;;  %v388_v17 = vpop.xlane.xlu0 %387  ;;  %v18772_v14 = vadd.f32 %v18656_v31, %v581_v25  ;;  %v544_v56 = vmul.f32 %v17516_v62, %v18556_v33 }
 0x19d   :  { %17529 = vrsqrt.f32 %v487_v63  ;;  %v457_v19 = vmul.f32 0.03125, %v385_v41  ;;  %v458_v23 = vmul.f32 0.03125, %v388_v17  ;;  %16391 = vmatmul.mubr.msk.f32.gmra.mxu1 %vm156_vm0, %v18768_v15  ;;  %v582_v0 = vmul.f32 %v18650_v22, %v543_v40 }
 0x19e   :  { %v17518_v9 = vpop.eup %17517  ;;  %17531 = vrsqrt.f32 %v488_v4  ;;  %16345 = vmatprep.mubr.msk.f32.mxu0 %vm156_vm0, %v18772_v14  ;;  %16401 = vmatprep.mubr.msk.f32.mxu1 %vm156_vm0, %v18772_v14  ;;  %v583_v29 = vmul.f32 %v18650_v22, %v544_v56 }
 0x19f   :  { %v17520_v30 = vpop.eup %17519  ;;  %v489_v33 = vadd.f32 1e-06, %v457_v19  ;;  %v490_v32 = vadd.f32 1e-06, %v458_v23  ;;  %v18784_v27 = vadd.f32 %v18656_v31, %v582_v0  ;;  %v545_v35 = vmul.f32 %v17518_v9, %v18559_v34 }
 0x1a0   :  { %v391_v2 = vpop.xlane.xlu1 %390  ;;  %v394_v21 = vpop.xlane.xlu0 %393  ;;  %v18788_v39 = vadd.f32 %v18656_v31, %v583_v29  ;;  %v546_v48 = vmul.f32 %v17520_v30, %v18568_v51  ;;  %v1252_v29 = vld [vmem:[#allocation8] sm:$0xff] }
 0x1a1   :  { %17533 = vrsqrt.f32 %v489_v33  ;;  %v459_v46 = vmul.f32 0.03125, %v391_v2  ;;  %v460_v47 = vmul.f32 0.03125, %v394_v21  ;;  %16346 = vmatmul.mubr.msk.f32.vlgmr.msra.gmra.mxu0 %vm156_vm0, %v18784_v27  ;;  %16402 = vmatmul.mubr.msk.f32.vlgmr.msra.gmra.mxu1 %vm156_vm0, %v18784_v27  ;;  %v584_v37 = vmul.f32 %v18650_v22, %v545_v35 }
 0x1a2   :  { %v17522_v34 = vpop.eup %17521  ;;  %17535 = vrsqrt.f32 %v490_v32  ;;  %16348 = vmatprep.mubr.msk.f32.mxu0 %vm156_vm0, %v18788_v39  ;;  %16404 = vmatprep.mubr.msk.f32.mxu1 %vm156_vm0, %v18788_v39  ;;  %v585_v51 = vmul.f32 %v18650_v22, %v546_v48 }
 0x1a3   :  { %v17524_v61 = vpop.eup %17523  ;;  %v491_v8 = vadd.f32 1e-06, %v459_v46  ;;  %v492_v58 = vadd.f32 1e-06, %v460_v47  ;;  %v18802_v5 = vadd.f32 %v18656_v31, %v584_v37  ;;  %v547_v52 = vmul.f32 %v17522_v34, %v18571_v54  ;;  %16450 = vmatpush3.msra.mxu0 %v18644_v44  ;;  %v1253_v54 = vld [vmem:[#allocation8 + $0x8] sm:$0xff] }
 0x1a4   :  { %v397_v25 = vpop.xlane.xlu1 %396  ;;  %v18807_v62 = vadd.f32 %v18656_v31, %v585_v51  ;;  %v548_v63 = vmul.f32 %v17524_v61, %v18580_v6  ;;  %16451 = vmatprep.subr.mxu0 %v1254_v13 }
 0x1a5   :  { %17537 = vrsqrt.f32 %v491_v8  ;;  %v461_v4 = vmul.f32 0.03125, %v397_v25  ;;  %16349 = vmatmul.mubr.msk.f32.gmra.mxu0 %vm156_vm0, %v18802_v5  ;;  %16405 = vmatmul.mubr.msk.f32.gmra.mxu1 %vm156_vm0, %v18802_v5  ;;  %v586_v40 = vmul.f32 %v18650_v22, %v547_v52 }
 0x1a6   :  { %v17526_v41 = vpop.eup %17525  ;;  %17539 = vrsqrt.f32 %v492_v58  ;;  %16351 = vmatprep.mubr.msk.f32.mxu0 %vm156_vm0, %v18807_v62  ;;  %16407 = vmatprep.mubr.msk.f32.mxu1 %vm156_vm0, %v18807_v62  ;;  %v587_v6 = vmul.f32 %v18650_v22, %v548_v63 }
 0x1a7   :  { %v17528_v44 = vpop.eup %17527  ;;  %v493_v17 = vadd.f32 1e-06, %v461_v4  ;;  %v18821_v56 = vadd.f32 %v18656_v31, %v586_v40  ;;  %v549_v19 = vmul.f32 %v17526_v41, %v18583_v12  ;;  %16452 = vmatpush3.msra.mxu0 %v1254_v13 }
 0x1a8   :  { %v18825_v23 = vadd.f32 %v18656_v31, %v587_v6  ;;  %v550_v0 = vmul.f32 %v17528_v44, %v18592_v45  ;;  %16453 = vmatprep.subr.mxu0 %v1253_v54 }
 0x1a9   :  { %17541 = vrsqrt.f32 %v493_v17  ;;  %16352 = vmatmul.mubr.msk.f32.gmra.mxu0 %vm156_vm0, %v18821_v56  ;;  %16408 = vmatmul.mubr.msk.f32.gmra.mxu1 %vm156_vm0, %v18821_v56  ;;  %v588_v9 = vmul.f32 %v18650_v22, %v549_v19 }
 0x1aa   :  { %v17530_v30 = vpop.eup %17529  ;;  %16354 = vmatprep.mubr.msk.f32.mxu0 %vm156_vm0, %v18825_v23  ;;  %16410 = vmatprep.mubr.msk.f32.mxu1 %vm156_vm0, %v18825_v23  ;;  %v589_v12 = vmul.f32 %v18650_v22, %v550_v0 }
 0x1ab   :  { %v17532_v45 = vpop.eup %17531  ;;  %v18839_v33 = vadd.f32 %v18656_v31, %v588_v9  ;;  %v551_v32 = vmul.f32 %v17530_v30, %v18595_v16  ;;  %16454 = vmatpush3.msra.mxu0 %v1253_v54 }
 0x1ac   :  { %v18843_v35 = vadd.f32 %v18656_v31, %v589_v12  ;;  %v552_v2 = vmul.f32 %v17532_v45, %v18604_v20  ;;  %16455 = vmatprep.subr.mxu0 %v1252_v29 }
 0x1ad   :  { %16355 = vmatmul.mubr.msk.f32.gmra.mxu0 %vm156_vm0, %v18839_v33  ;;  %16411 = vmatmul.mubr.msk.f32.gmra.mxu1 %vm156_vm0, %v18839_v33  ;;  %v590_v21 = vmul.f32 %v18650_v22, %v551_v32 }
 0x1ae   :  { %v17534_v48 = vpop.eup %17533  ;;  %16357 = vmatprep.mubr.msk.f32.mxu0 %vm156_vm0, %v18843_v35  ;;  %16413 = vmatprep.mubr.msk.f32.mxu1 %vm156_vm0, %v18843_v35  ;;  %v591_v16 = vmul.f32 %v18650_v22, %v552_v2 }
 0x1af   :  { %v17536_v46 = vpop.eup %17535  ;;  %v629_v20 = vadd.f32 %v18656_v31, %v590_v21  ;;  %v553_v47 = vmul.f32 %v17534_v48, %v18607_v49  ;;  %16456 = vmatpush3.msra.mxu0 %v1252_v29 }
 0x1b0   :  { %v630_v37 = vadd.f32 %v18656_v31, %v591_v16  ;;  %v554_v13 = vmul.f32 %v17536_v46, %v18616_v24 }
 0x1b1   :  { %16358 = vmatmul.mubr.msk.f32.gmra.mxu0 %vm156_vm0, %v629_v20  ;;  %16414 = vmatmul.mubr.msk.f32.gmra.mxu1 %vm156_vm0, %v629_v20  ;;  %v592_v34 = vmul.f32 %v18650_v22, %v553_v47 }
 0x1b2   :  { %v17538_v51 = vpop.eup %17537  ;;  %16360 = vmatprep.mubr.msk.f32.mxu0 %vm156_vm0, %v630_v37  ;;  %16416 = vmatprep.mubr.msk.f32.mxu1 %vm156_vm0, %v630_v37  ;;  %v593_v61 = vmul.f32 %v18650_v22, %v554_v13 }
 0x1b3   :  { %v17540_v8 = vpop.eup %17539  ;;  %v631_v49 = vadd.f32 %v18656_v31, %v592_v34  ;;  %v555_v58 = vmul.f32 %v17538_v51, %v18619_v53 }
 0x1b4   :  { %v632_v24 = vadd.f32 %v18656_v31, %v593_v61  ;;  %v556_v52 = vmul.f32 %v17540_v8, %v18628_v28 }
 0x1b5   :  { %16361 = vmatmul.mubr.msk.f32.gmra.mxu0 %vm156_vm0, %v631_v49  ;;  %16417 = vmatmul.mubr.msk.f32.gmra.mxu1 %vm156_vm0, %v631_v49  ;;  %v594_v25 = vmul.f32 %v18650_v22, %v555_v58 }
 0x1b6   :  { %v17542_v63 = vpop.eup %17541  ;;  %16363 = vmatprep.mubr.msk.f32.mxu0 %vm156_vm0, %v632_v24  ;;  %16419 = vmatprep.mubr.msk.f32.mxu1 %vm156_vm0, %v632_v24  ;;  %v595_v4 = vmul.f32 %v18650_v22, %v556_v52 }
 0x1b7   :  { %v633_v40 = vadd.f32 %v18656_v31, %v594_v25  ;;  %v557_v53 = vmul.f32 %v17542_v63, %v18631_v57  ;;  %v18979_v57 = vld [vmem:[%s23646_s6] ss:$0 sm:$0xff] }
 0x1b8   :  { %v634_v54 = vadd.f32 %v18656_v31, %v595_v4 }
 0x1b9   :  { %16364 = vmatmul.mubr.msk.f32.gmra.mxu0 %vm156_vm0, %v633_v40  ;;  %16420 = vmatmul.mubr.msk.f32.gmra.mxu1 %vm156_vm0, %v633_v40  ;;  %v596_v28 = vmul.f32 %v18650_v22, %v557_v53 }
 0x1ba   :  { %16366 = vmatprep.mubr.msk.f32.mxu0 %vm156_vm0, %v634_v54  ;;  %16422 = vmatprep.mubr.msk.f32.mxu1 %vm156_vm0, %v634_v54 }
 0x1bb   :  { %v635_v41 = vadd.f32 %v18656_v31, %v596_v28 }
 0x1bd   :  { %16367 = vmatmul.mubr.msk.f32.gmra.mxu0 %vm156_vm0, %v635_v41  ;;  %16423 = vmatmul.mubr.msk.f32.gmra.mxu1 %vm156_vm0, %v635_v41 }
 0x1be   :  { %16425 = vmatprep.mubr.msk.f32.mxu1 %vm156_vm0, %v18660_v36  ;;  %16457 = vmatprep.mubr.msk.f32.mxu0 %vm156_vm0, %v18772_v14 }
 0x1c1   :  { %16426 = vmatmul.mubr.msk.f32.gmra.mxu1 %vm156_vm0, %v18669_v26  ;;  %16458 = vmatmul.mubr.msk.f32.vlgmr.msra.gmra.mxu0 %vm156_vm0, %v18784_v27 }
 0x1c2   :  { %16428 = vmatprep.mubr.msk.f32.mxu1 %vm156_vm0, %v18673_v18  ;;  %16460 = vmatprep.mubr.msk.f32.mxu0 %vm156_vm0, %v18788_v39 }
 0x1c5   :  { %16429 = vmatmul.mubr.msk.f32.gmra.mxu1 %vm156_vm0, %v18684_v42  ;;  %16461 = vmatmul.mubr.msk.f32.gmra.mxu0 %vm156_vm0, %v18802_v5 }
 0x1c6   :  { %16431 = vmatprep.mubr.msk.f32.mxu1 %vm156_vm0, %v18688_v10  ;;  %16463 = vmatprep.mubr.msk.f32.mxu0 %vm156_vm0, %v18807_v62 }
 0x1c9   :  { %16432 = vmatmul.mubr.msk.f32.gmra.mxu1 %vm156_vm0, %v18698_v3  ;;  %16464 = vmatmul.mubr.msk.f32.gmra.mxu0 %vm156_vm0, %v18821_v56  ;;  %v19027_v56 = vld [vmem:[%s23647_s7] ss:$0 sm:$0xff]  ;;  %s18214_s7 = smov 120  }
 0x1ca   :  { %16434 = vmatprep.mubr.msk.f32.mxu1 %vm156_vm0, %v18702_v11  ;;  %16466 = vmatprep.mubr.msk.f32.mxu0 %vm156_vm0, %v18825_v23 }
 0x1cd   :  { %16435 = vmatmul.mubr.msk.f32.gmra.mxu1 %vm156_vm0, %v18712_v7  ;;  %16467 = vmatmul.mubr.msk.f32.gmra.mxu0 %vm156_vm0, %v18839_v33 }
 0x1ce   :  { %16437 = vmatprep.mubr.msk.f32.mxu1 %vm156_vm0, %v18716_v38  ;;  %16469 = vmatprep.mubr.msk.f32.mxu0 %vm156_vm0, %v18843_v35 }
 0x1d1   :  { %16438 = vmatmul.mubr.msk.f32.gmra.mxu1 %vm156_vm0, %v18726_v1  ;;  %16470 = vmatmul.mubr.msk.f32.gmra.mxu0 %vm156_vm0, %v629_v20 }
 0x1d2   :  { %16440 = vmatprep.mubr.msk.f32.mxu1 %vm156_vm0, %v18730_v55  ;;  %16472 = vmatprep.mubr.msk.f32.mxu0 %vm156_vm0, %v630_v37 }
 0x1d5   :  { %16441 = vmatmul.mubr.msk.f32.gmra.mxu1 %vm156_vm0, %v18740_v43  ;;  %16473 = vmatmul.mubr.msk.f32.gmra.mxu0 %vm156_vm0, %v631_v49 }
 0x1d6   :  { %16443 = vmatprep.mubr.msk.f32.mxu1 %vm156_vm0, %v18744_v60  ;;  %16475 = vmatprep.mubr.msk.f32.mxu0 %vm156_vm0, %v632_v24 }
 0x1d9   :  { %16444 = vmatmul.mubr.msk.f32.gmra.mxu1 %vm156_vm0, %v18754_v59  ;;  %16476 = vmatmul.mubr.msk.f32.gmra.mxu0 %vm156_vm0, %v633_v40 }
 0x1da   :  { %16446 = vmatprep.mubr.msk.f32.mxu1 %vm156_vm0, %v18758_v50  ;;  %16478 = vmatprep.mubr.msk.f32.mxu0 %vm156_vm0, %v634_v54 }
 0x1dd   :  { %16447 = vmatmul.mubr.msk.f32.gmra.mxu1 %vm156_vm0, %v18768_v15  ;;  %16479 = vmatmul.mubr.msk.f32.gmra.mxu0 %vm156_vm0, %v635_v41 }
 0x1de   :  { %16481 = vmatprep.mubr.msk.f32.mxu0 %vm156_vm0, %v18660_v36 }
 0x1e1   :  { %16482 = vmatmul.mubr.msk.f32.gmra.mxu0 %vm156_vm0, %v18669_v26 }
 0x1e2   :  { %16484 = vmatprep.mubr.msk.f32.mxu0 %vm156_vm0, %v18673_v18 }
 0x1e5   :  { %16485 = vmatmul.mubr.msk.f32.gmra.mxu0 %vm156_vm0, %v18684_v42 }
 0x1e6   :  { %16487 = vmatprep.mubr.msk.f32.mxu0 %vm156_vm0, %v18688_v10 }
 0x1e9   :  { %16488 = vmatmul.mubr.msk.f32.gmra.mxu0 %vm156_vm0, %v18698_v3 }
 0x1ea   :  { %16490 = vmatprep.mubr.msk.f32.mxu0 %vm156_vm0, %v18702_v11 }
 0x1ed   :  { %16491 = vmatmul.mubr.msk.f32.gmra.mxu0 %vm156_vm0, %v18712_v7 }
 0x1ee   :  { %16493 = vmatprep.mubr.msk.f32.mxu0 %vm156_vm0, %v18716_v38 }
 0x1f1   :  { %16494 = vmatmul.mubr.msk.f32.gmra.mxu0 %vm156_vm0, %v18726_v1 }
 0x1f2   :  { %16496 = vmatprep.mubr.msk.f32.mxu0 %vm156_vm0, %v18730_v55 }
 0x1f5   :  { %16497 = vmatmul.mubr.msk.f32.gmra.mxu0 %vm156_vm0, %v18740_v43 }
 0x1f6   :  { %16499 = vmatprep.mubr.msk.f32.mxu0 %vm156_vm0, %v18744_v60 }
 0x1f9   :  { %16500 = vmatmul.mubr.msk.f32.gmra.mxu0 %vm156_vm0, %v18754_v59 }
 0x1fa   :  { %16502 = vmatprep.mubr.msk.f32.mxu0 %vm156_vm0, %v18758_v50 }
 0x1fd   :  { %16503 = vmatmul.mubr.msk.f32.gmra.mxu0 %vm156_vm0, %v18768_v15 }
 0x241   :  { %v16371_v22 = vpop.f32.mrf.mxu1 }
 0x242   :  { %v18982_v31 = vadd.f32 %v16371_v22, %v18979_v57 }
 0x243   :  { %v905_v36 = vpop.f32.mrf.mxu1 }
 0x244   :  { %v906_v26 = vadd.f32 %v18979_v57, %v905_v36 }
 0x245   :  { %v16374_v18 = vpop.f32.mrf.mxu1 }
 0x246   :  { %v18985_v42 = vmul.f32 0.35355338, %v906_v26  ;;  %v18988_v10 = vadd.f32 %v16374_v18, %v18979_v57 }
 0x247   :  { %v18990_v3 = vpop.f32.mrf.mxu1 }
 0x248   :  { %16565 = vmatprep.mubr.msk.f32.mxu0 %vm1496_vm1, %v18985_v42 }
 0x249   :  { %v16377_v11 = vpop.f32.mrf.mxu1 }
 0x24a   :  { %v18995_v7 = vadd.f32 %v16377_v11, %v18979_v57 }
 0x24b   :  { %v18997_v38 = vpop.f32.mrf.mxu1 }
 0x24d   :  { %v16380_v1 = vpop.f32.mrf.mxu1 }
 0x24e   :  { %v19000_v55 = vadd.f32 %v16380_v1, %v18979_v57 }
 0x24f   :  { %v19002_v43 = vpop.f32.mrf.mxu1 }
 0x251   :  { %v16383_v60 = vpop.f32.mrf.mxu1 }
 0x252   :  { %v19005_v59 = vadd.f32 %v16383_v60, %v18979_v57 }
 0x253   :  { %v19007_v50 = vpop.f32.mrf.mxu1 }
 0x255   :  { %v16386_v15 = vpop.f32.mrf.mxu1 }
 0x256   :  { %v19010_v14 = vadd.f32 %v16386_v15, %v18979_v57 }
 0x257   :  { %v19012_v27 = vpop.f32.mrf.mxu1 }
 0x259   :  { %v16389_v39 = vpop.f32.mrf.mxu1 }
 0x25a   :  { %v19015_v5 = vadd.f32 %v16389_v39, %v18979_v57 }
 0x25b   :  { %v19017_v62 = vpop.f32.mrf.mxu1 }
 0x25d   :  { %v16392_v6 = vpop.f32.mrf.mxu1 }
 0x25e   :  { %v19020_v44 = vadd.f32 %v16392_v6, %v18979_v57 }
 0x25f   :  { %v19022_v17 = vpop.f32.mrf.mxu1 }
 0x261   :  { %v16347_v19 = vpop.f32.mrf.mxu0  ;;  %v16403_v23 = vpop.f32.mrf.mxu1 }
 0x262   :  { %v831_v0 = vadd.f32 %v16347_v19, %v18979_v57  ;;  %v19031_v9 = vadd.f32 %v16403_v23, %v19027_v56 }
 0x263   :  { %v825_v29 = vpop.f32.mrf.mxu0  ;;  %v1093_v30 = vpop.f32.mrf.mxu1 }
 0x264   :  { %23929 = vst [vmem:[#allocation19_spill] sm:$0xff] %v19031_v9  ;;  %v19033_v12 = vmul.f32 0.35355338, %v831_v0  ;;  %v826_v45 = vadd.f32 %v18979_v57, %v825_v29  ;;  %v19037_v33 = vadd.f32 %v19027_v56, %v1093_v30  ;;  %16505 = vmatprep.subr.msk.mxu1 %vm1496_vm1, %v19031_v9 }
 0x265   :  { %v16350_v32 = vpop.f32.mrf.mxu0  ;;  %v16406_v35 = vpop.f32.mrf.mxu1  ;;  %16506 = vmatpush3.xpose.msk.msra.mxu1 %vm1496_vm1, %v19031_v9 }
 0x266   :  { %23930 = vst [vmem:[#allocation20_spill] sm:$0xff] %v19033_v12  ;;  %23931 = vst [vmem:[#allocation21_spill] sm:$0xff] %v19037_v33  ;;  %v19043_v2 = vmul.f32 0.35355338, %v826_v45  ;;  %v841_v21 = vadd.f32 %v16350_v32, %v18979_v57  ;;  %16507 = vmatprep.subr.msk.mxu1 %vm1496_vm1, %v19037_v33  ;;  %4572 = vrot.lane.b32.xlu0 %v19033_v12, %s18214_s7  ;;  %v19053_v20 = vadd.f32 %v16406_v35, %v19027_v56 }
 0x267   :  { %v835_v48 = vpop.f32.mrf.mxu0  ;;  %v1103_v16 = vpop.f32.mrf.mxu1 }
 0x268   :  { %23932 = vst [vmem:[#allocation22_spill] sm:$0xff] %v19043_v2  ;;  %v19050_v46 = vmul.f32 0.35355338, %v841_v21  ;;  %23934 = vst [vmem:[#allocation24_spill] sm:$0xff] %v19053_v20  ;;  %v836_v47 = vadd.f32 %v18979_v57, %v835_v48  ;;  %4570 = vrot.lane.b32.xlu1 %v19043_v2, %s18214_s7  ;;  %16509 = vmatprep.mubr.msk.f32.mxu1 %vm1496_vm1, %v19043_v2  ;;  %v19070_v49 = vadd.f32 %v19027_v56, %v1103_v16 }
 0x269   :  { %v16353_v37 = vpop.f32.mrf.mxu0  ;;  %v16409_v13 = vpop.f32.mrf.mxu1  ;;  %16508 = vmatpush3.xpose.msk.msra.mxu1 %vm1496_vm1, %v19037_v33 }
 0x26a   :  { %23933 = vst [vmem:[#allocation23_spill] sm:$0xff] %v19050_v46  ;;  %v19062_v34 = vmul.f32 0.35355338, %v836_v47  ;;  %v851_v51 = vadd.f32 %v16353_v37, %v18979_v57  ;;  %16512 = vmatprep.subr.msk.mxu1 %vm1496_vm1, %v19053_v20  ;;  %4663 = vrot.lane.b32.xlu0 %v19050_v46, %s18214_s7  ;;  %23936 = vst [vmem:[#allocation26_spill] sm:$0xff] %v19070_v49  ;;  %v19091_v54 = vadd.f32 %v16409_v13, %v19027_v56 }
 0x26b   :  { %v845_v61 = vpop.f32.mrf.mxu0  ;;  %v1113_v8 = vpop.f32.mrf.mxu1 }
 0x26c   :  { %23935 = vst [vmem:[#allocation25_spill] sm:$0xff] %v19062_v34  ;;  %v19072_v58 = vmul.f32 0.35355338, %v851_v51  ;;  %v846_v24 = vadd.f32 %v18979_v57, %v845_v61  ;;  %4661 = vrot.lane.b32.xlu1 %v19062_v34, %s18214_s7  ;;  %16510 = vmatmul.mubr.msk.f32.vlgmr.msra.gmra.mxu1 %vm1496_vm1, %v19033_v12  ;;  %23939 = vst [vmem:[#allocation29_spill] sm:$0xff] %v19091_v54  ;;  %v19108_v60 = vadd.f32 %v19027_v56, %v1113_v8 }
 0x26d   :  { %v16356_v52 = vpop.f32.mrf.mxu0  ;;  %v16412_v25 = vpop.f32.mrf.mxu1  ;;  %16513 = vmatpush3.xpose.msk.msra.mxu1 %vm1496_vm1, %v19053_v20  ;;  %16516 = vmatprep.mubr.msk.f32.mxu1 %vm1496_vm1, %v19062_v34  ;;  %v966_v12 = vadd.f32 %v18979_v57, %v19017_v62 }
 0x26e   :  { %23937 = vst [vmem:[#allocation27_spill] sm:$0xff] %v19072_v58  ;;  %v19083_v63 = vmul.f32 0.35355338, %v846_v24  ;;  %v861_v4 = vadd.f32 %v16356_v52, %v18979_v57  ;;  %4754 = vrot.lane.b32.xlu0 %v19072_v58, %s18214_s7  ;;  %16514 = vmatprep.subr.msk.mxu1 %vm1496_vm1, %v19070_v49  ;;  %23942 = vst [vmem:[#allocation32_spill] sm:$0xff] %v19108_v60  ;;  %v19131_v45 = vadd.f32 %v16412_v25, %v19027_v56 }
 0x26f   :  { %v855_v40 = vpop.f32.mrf.mxu0  ;;  %v1123_v53 = vpop.f32.mrf.mxu1 }
 0x270   :  { %23938 = vst [vmem:[#allocation28_spill] sm:$0xff] %v19083_v63  ;;  %v19093_v28 = vmul.f32 0.35355338, %v861_v4  ;;  %v856_v41 = vadd.f32 %v18979_v57, %v855_v40  ;;  %4752 = vrot.lane.b32.xlu1 %v19083_v63, %s18214_s7  ;;  %23945 = vst [vmem:[#allocation35_spill] sm:$0xff] %v19131_v45  ;;  %v19153_v13 = vadd.f32 %v19027_v56, %v1123_v53 }
 0x271   :  { %v16359_v22 = vpop.f32.mrf.mxu0  ;;  %v16415_v36 = vpop.f32.mrf.mxu1  ;;  %16515 = vmatpush3.xpose.msk.msra.mxu1 %vm1496_vm1, %v19070_v49 }
 0x272   :  { %23940 = vst [vmem:[#allocation30_spill] sm:$0xff] %v19093_v28  ;;  %v19100_v26 = vmul.f32 0.35355338, %v856_v41  ;;  %v871_v18 = vadd.f32 %v16359_v22, %v18979_v57  ;;  %4845 = vrot.lane.b32.xlu0 %v19093_v28, %s18214_s7  ;;  %16519 = vmatprep.subr.msk.mxu1 %vm1496_vm1, %v19091_v54  ;;  %23948 = vst [vmem:[#allocation38_spill] sm:$0xff] %v19153_v13  ;;  %v19179_v4 = vadd.f32 %v16415_v36, %v19027_v56 }
 0x273   :  { %v865_v11 = vpop.f32.mrf.mxu0  ;;  %v1133_v1 = vpop.f32.mrf.mxu1 }
 0x274   :  { %23941 = vst [vmem:[#allocation31_spill] sm:$0xff] %v19100_v26  ;;  %v19110_v15 = vmul.f32 0.35355338, %v871_v18  ;;  %v866_v39 = vadd.f32 %v18979_v57, %v865_v11  ;;  %4843 = vrot.lane.b32.xlu1 %v19100_v26, %s18214_s7  ;;  %16517 = vmatmul.mubr.msk.f32.vlgmr.msra.gmra.mxu1 %vm1496_vm1, %v19050_v46  ;;  %23950 = vst [vmem:[#allocation40_spill] sm:$0xff] %v19179_v4  ;;  %v19204_v11 = vadd.f32 %v19027_v56, %v1133_v1 }
 0x275   :  { %v16362_v6 = vpop.f32.mrf.mxu0  ;;  %v16418_v19 = vpop.f32.mrf.mxu1  ;;  %16520 = vmatpush3.xpose.msk.msra.mxu1 %vm1496_vm1, %v19091_v54  ;;  %16523 = vmatprep.mubr.msk.f32.mxu1 %vm1496_vm1, %v19083_v63 }
 0x276   :  { %23943 = vst [vmem:[#allocation33_spill] sm:$0xff] %v19110_v15  ;;  %v19121_v23 = vmul.f32 0.35355338, %v866_v39  ;;  %v881_v0 = vadd.f32 %v16362_v6, %v18979_v57  ;;  %4936 = vrot.lane.b32.xlu0 %v19110_v15, %s18214_s7  ;;  %16521 = vmatprep.subr.msk.mxu1 %vm1496_vm1, %v19108_v60  ;;  %23952 = vst [vmem:[#allocation42_spill] sm:$0xff] %v19204_v11 }
 0x277   :  { %v875_v29 = vpop.f32.mrf.mxu0  ;;  %v19128_v30 = vpop.f32.mrf.mxu1 }
 0x278   :  { %23944 = vst [vmem:[#allocation34_spill] sm:$0xff] %v19121_v23  ;;  %v19133_v32 = vmul.f32 0.35355338, %v881_v0  ;;  %v876_v35 = vadd.f32 %v18979_v57, %v875_v29  ;;  %4934 = vrot.lane.b32.xlu1 %v19121_v23, %s18214_s7  ;;  %v19227_v29 = vadd.f32 %v16418_v19, %v19027_v56  ;;  %v19247_v19 = vmul.f32 0.35355338, %v18982_v31 }
 0x279   :  { %v19138_v21 = vpop.f32.mrf.mxu0  ;;  %v19140_v48 = vpop.f32.mrf.mxu1  ;;  %16522 = vmatpush3.xpose.msk.msra.mxu1 %vm1496_vm1, %v19108_v60 }
 0x27a   :  { %23946 = vst [vmem:[#allocation36_spill] sm:$0xff] %v19133_v32  ;;  %v19144_v16 = vmul.f32 0.35355338, %v876_v35  ;;  %5027 = vrot.lane.b32.xlu0 %v19133_v32, %s18214_s7  ;;  %16526 = vmatprep.subr.msk.mxu1 %vm1496_vm1, %v19131_v45  ;;  %23953 = vst [vmem:[#allocation43_spill] sm:$0xff] %v19227_v29  ;;  %v926_v35 = vadd.f32 %v18979_v57, %v18997_v38 }
 0x27b   :  { %v885_v47 = vpop.f32.mrf.mxu0  ;;  %v19150_v37 = vpop.f32.mrf.mxu1 }
 0x27c   :  { %23947 = vst [vmem:[#allocation37_spill] sm:$0xff] %v19144_v16  ;;  %v886_v51 = vadd.f32 %v18979_v57, %v885_v47  ;;  %5025 = vrot.lane.b32.xlu1 %v19144_v16, %s18214_s7  ;;  %16524 = vmatmul.mubr.msk.f32.vlgmr.msra.gmra.mxu1 %vm1496_vm1, %v19072_v58  ;;  %v19272_v58 = vadd.f32 %v19027_v56, %v19128_v30 }
 0x27d   :  { %v19160_v61 = vpop.f32.mrf.mxu0  ;;  %v19162_v8 = vpop.f32.mrf.mxu1  ;;  %16527 = vmatpush3.xpose.msk.msra.mxu1 %vm1496_vm1, %v19131_v45  ;;  %16530 = vmatprep.mubr.msk.f32.mxu1 %vm1496_vm1, %v19100_v26  ;;  %v19292_v30 = vadd.f32 %v19140_v48, %v19027_v56 }
 0x27e   :  { %v19168_v24 = vmul.f32 0.35355338, %v886_v51  ;;  %4576 = vrot.lane.b32.xlu0 %v19031_v9, %s18214_s7  ;;  %16528 = vmatprep.subr.msk.mxu1 %vm1496_vm1, %v19153_v13  ;;  %23955 = vst [vmem:[#allocation45_spill] sm:$0xff] %v19272_v58 }
 0x27f   :  { %v19174_v52 = vpop.f32.mrf.mxu0  ;;  %v19176_v25 = vpop.f32.mrf.mxu1  ;;  %23957 = vst [vmem:[#allocation47_spill] sm:$0xff] %v19292_v30 }
 0x280   :  { %23949 = vst [vmem:[#allocation39_spill] sm:$0xff] %v19168_v24  ;;  %5116 = vrot.lane.b32.xlu1 %v19168_v24, %s18214_s7 }
 0x281   :  { %v16427_v40 = vpop.f32.mrf.mxu1  ;;  %v19183_v53 = vpop.f32.mrf.mxu0  ;;  %16529 = vmatpush3.xpose.msk.msra.mxu1 %vm1496_vm1, %v19153_v13 }
 0x282   :  { %v19188_v41 = vadd.f32 %v16427_v40, %v19027_v56  ;;  %4665 = vrot.lane.b32.xlu0 %v19070_v49, %s18214_s7  ;;  %16533 = vmatprep.subr.msk.mxu1 %vm1496_vm1, %v19179_v4 }
 0x283   :  { %v1173_v22 = vpop.f32.mrf.mxu1  ;;  %v19194_v36 = vpop.f32.mrf.mxu0 }
 0x284   :  { %23951 = vst [vmem:[#allocation41_spill] sm:$0xff] %v19188_v41  ;;  %v19197_v18 = vadd.f32 %v19027_v56, %v1173_v22  ;;  %4574 = vrot.lane.b32.xlu1 %v19037_v33, %s18214_s7  ;;  %16531 = vmatmul.mubr.msk.f32.vlgmr.msra.gmra.mxu1 %vm1496_vm1, %v19093_v28 }
 0x285   :  { %16561 = vmatprep.subr.msk.mxu0 %vm1496_vm1, %v19188_v41  ;;  %v19208_v39 = vpop.f32.mrf.mxu1  ;;  %v19210_v6 = vpop.f32.mrf.mxu0  ;;  %16534 = vmatpush3.xpose.msk.msra.mxu1 %vm1496_vm1, %v19179_v4 }
 0x286   :  { %16537 = vmatprep.mubr.msk.f32.mxu1 %vm1496_vm1, %v19121_v23  ;;  %16562 = vmatpush3.xpose.msk.msra.mxu0 %vm1496_vm1, %v19188_v41 }
 0x287   :  { %4756 = vrot.lane.b32.xlu0 %v19108_v60, %s18214_s7  ;;  %16535 = vmatprep.subr.msk.mxu1 %vm1496_vm1, %v19204_v11  ;;  %v19222_v1 = vpop.f32.mrf.mxu1  ;;  %v19224_v0 = vpop.f32.mrf.mxu0 }
 0x288   :  { %16563 = vmatprep.subr.msk.mxu0 %vm1496_vm1, %v19197_v18  ;;  %4667 = vrot.lane.b32.xlu1 %v19053_v20, %s18214_s7 }
 0x289   :  { %v16433_v47 = vpop.f32.mrf.mxu1  ;;  %v19235_v51 = vpop.f32.mrf.mxu0  ;;  %16536 = vmatpush3.xpose.msk.msra.mxu1 %vm1496_vm1, %v19204_v11 }
 0x28a   :  { %v19240_v40 = vadd.f32 %v16433_v47, %v19027_v56  ;;  %16564 = vmatpush3.xpose.msk.msra.mxu0 %vm1496_vm1, %v19197_v18  ;;  %16540 = vmatprep.subr.msk.mxu1 %vm1496_vm1, %v19227_v29  ;;  %v19257_v47 = vmul.f32 0.35355338, %v926_v35 }
 0x28b   :  { %4847 = vrot.lane.b32.xlu0 %v19153_v13, %s18214_s7  ;;  %v1193_v38 = vpop.f32.mrf.mxu1  ;;  %v19251_v22 = vpop.f32.mrf.mxu0  ;;  %v946_v13 = vadd.f32 %v18979_v57, %v19007_v50  ;;  %v19320_v50 = vmul.f32 0.35355338, %v18995_v7 }
 0x28c   :  { %23954 = vst [vmem:[#allocation44_spill] sm:$0xff] %v19251_v22  ;;  %4758 = vrot.lane.b32.xlu1 %v19091_v54, %s18214_s7  ;;  %16538 = vmatmul.mubr.msk.f32.vlgmr.msra.gmra.mxu1 %vm1496_vm1, %v19110_v15  ;;  %v19260_v28 = vadd.f32 %v19027_v56, %v1193_v38  ;;  %v19297_v15 = vld [vmem:[%s23648_s8] ss:$0 sm:$0xff]  ;;  %v19475_v54 = vadd.f32 %v19027_v56, %v19222_v1 }
 0x28d   :  { %16566 = vmatmul.mubr.msk.f32.vlgmr.msra.gmra.mxu0 %vm1496_vm1, %v19247_v19  ;;  %16575 = vmatprep.subr.msk.mxu0 %vm1496_vm1, %v19240_v40  ;;  %v19266_v31 = vpop.f32.mrf.mxu1  ;;  %v19268_v23 = vpop.f32.mrf.mxu0  ;;  %23961 = vst [vmem:[#allocation51_spill] sm:$0xff] %v19320_v50  ;;  %v19335_v7 = vmul.f32 0.35355338, %v946_v13  ;;  %v19446_v34 = vadd.f32 %v19183_v53, %v19297_v15  ;;  %v19490_v1 = vadd.f32 %v19235_v51, %v19297_v15  ;;  %v19509_v51 = vmul.f32 0.35355338, %v18988_v10 }
 0x28e   :  { %16541 = vmatpush3.xpose.msk.msra.mxu1 %vm1496_vm1, %v19227_v29  ;;  %16544 = vmatprep.mubr.msk.f32.mxu1 %vm1496_vm1, %v19144_v16 }
 0x28f   :  { %16576 = vmatpush3.xpose.msk.msra.mxu0 %vm1496_vm1, %v19240_v40  ;;  %16579 = vmatprep.mubr.msk.f32.mxu0 %vm1496_vm1, %v19257_v47  ;;  %v19282_v35 = vpop.f32.mrf.mxu1  ;;  %v19284_v38 = vpop.f32.mrf.mxu0  ;;  %23963 = vst [vmem:[#allocation53_spill] sm:$0xff] %v19335_v7  ;;  %23978 = vst [vmem:[#allocation68_spill] sm:$0xff] %v19446_v34 }
 0x290   :  { %23956 = vst [vmem:[#allocation46_spill] sm:$0xff] %v19284_v38  ;;  %4938 = vrot.lane.b32.xlu0 %v19204_v11, %s18214_s7  ;;  %16542 = vmatprep.subr.msk.mxu1 %vm1496_vm1, %v19272_v58  ;;  %23984 = vst [vmem:[#allocation74_spill] sm:$0xff] %v19490_v1 }
 0x291   :  { %16577 = vmatprep.subr.msk.mxu0 %vm1496_vm1, %v19260_v28  ;;  %4849 = vrot.lane.b32.xlu1 %v19131_v45, %s18214_s7  ;;  %v16439_v16 = vpop.f32.mrf.mxu1  ;;  %v16471_v11 = vpop.f32.mrf.mxu0 }
 0x292   :  { %v19306_v26 = vadd.f32 %v16439_v16, %v19027_v56  ;;  %v19309_v48 = vadd.f32 %v16471_v11, %v19297_v15  ;;  %16543 = vmatpush3.xpose.msk.msra.mxu1 %vm1496_vm1, %v19272_v58 }
 0x293   :  { %16578 = vmatpush3.xpose.msk.msra.mxu0 %vm1496_vm1, %v19260_v28  ;;  %16547 = vmatprep.subr.msk.mxu1 %vm1496_vm1, %v19292_v30  ;;  %v1213_v46 = vpop.f32.mrf.mxu1  ;;  %v19317_v60 = vpop.f32.mrf.mxu0 }
 0x294   :  { %23958 = vst [vmem:[#allocation48_spill] sm:$0xff] %v19306_v26  ;;  %23959 = vst [vmem:[#allocation49_spill] sm:$0xff] %v19309_v48  ;;  %5029 = vrot.lane.b32.xlu0 %v19272_v58, %s18214_s7  ;;  %16589 = vmatprep.subr.msk.mxu0 %vm1496_vm1, %v19306_v26  ;;  %v19327_v16 = vadd.f32 %v19027_v56, %v1213_v46  ;;  %v19339_v58 = vadd.f32 %v19027_v56, %v19150_v37 }
 0x295   :  { %23960 = vst [vmem:[#allocation50_spill] sm:$0xff] %v19317_v60  ;;  %4940 = vrot.lane.b32.xlu1 %v19179_v4, %s18214_s7  ;;  %16545 = vmatmul.mubr.msk.f32.vlgmr.msra.gmra.mxu1 %vm1496_vm1, %v19133_v32  ;;  %v19333_v11 = vpop.f32.mrf.mxu1  ;;  %v16474_v63 = vpop.f32.mrf.mxu0  ;;  %v891_v32 = vadd.f32 %v19138_v21, %v18979_v57  ;;  %v896_v21 = vadd.f32 %v18979_v57, %v19174_v52 }
 0x296   :  { %23962 = vst [vmem:[#allocation52_spill] sm:$0xff] %v19327_v16  ;;  %23964 = vst [vmem:[#allocation54_spill] sm:$0xff] %v19339_v58  ;;  %16580 = vmatmul.mubr.msk.f32.vlgmr.msra.gmra.mxu0 %vm1496_vm1, %v19320_v50  ;;  %v19344_v46 = vadd.f32 %v16474_v63, %v19297_v15  ;;  %16548 = vmatpush3.xpose.msk.msra.mxu1 %vm1496_vm1, %v19292_v30  ;;  %v19364_v63 = vadd.f32 %v19162_v8, %v19027_v56 }
 0x297   :  { %16551 = vmatprep.mubr.msk.f32.mxu1 %vm1496_vm1, %v19168_v24  ;;  %16590 = vmatpush3.xpose.msk.msra.mxu0 %vm1496_vm1, %v19306_v26  ;;  %v19354_v37 = vpop.f32.mrf.mxu1  ;;  %v19356_v13 = vpop.f32.mrf.mxu0  ;;  %v19384_v52 = vmul.f32 0.35355338, %v891_v32 }
 0x298   :  { %23965 = vst [vmem:[#allocation55_spill] sm:$0xff] %v19344_v46  ;;  %23966 = vst [vmem:[#allocation56_spill] sm:$0xff] %v19356_v13  ;;  %16593 = vmatprep.mubr.msk.f32.mxu0 %vm1496_vm1, %v19335_v7  ;;  %5120 = vrot.lane.b32.xlu0 %v19339_v58, %s18214_s7 }
 0x299   :  { %23967 = vst [vmem:[#allocation57_spill] sm:$0xff] %v19364_v63  ;;  %16549 = vmatprep.subr.msk.mxu1 %vm1496_vm1, %v19339_v58  ;;  %16591 = vmatprep.subr.msk.mxu0 %vm1496_vm1, %v19327_v16  ;;  %v16445_v24 = vpop.f32.mrf.mxu1  ;;  %v16477_v4 = vpop.f32.mrf.mxu0 }
 0x29a   :  { %5031 = vrot.lane.b32.xlu1 %v19227_v29, %s18214_s7  ;;  %v19377_v8 = vadd.f32 %v16445_v24, %v19027_v56  ;;  %v19380_v45 = vadd.f32 %v16477_v4, %v19297_v15  ;;  %16550 = vmatpush3.xpose.msk.msra.mxu1 %vm1496_vm1, %v19339_v58  ;;  %v19393_v24 = vmul.f32 0.35355338, %v19005_v59  ;;  %v19397_v4 = vmul.f32 0.35355338, %v896_v21 }
 0x29b   :  { %16592 = vmatpush3.xpose.msk.msra.mxu0 %vm1496_vm1, %v19327_v16  ;;  %16554 = vmatprep.subr.msk.mxu1 %vm1496_vm1, %v19364_v63  ;;  %v1233_v62 = vpop.f32.mrf.mxu1  ;;  %v19390_v49 = vpop.f32.mrf.mxu0  ;;  %v19404_v29 = vmul.f32 0.35355338, %v966_v12  ;;  %v19415_v21 = vadd.f32 %v19027_v56, %v19176_v25  ;;  %v916_v25 = vadd.f32 %v18979_v57, %v18990_v3 }
 0x29c   :  { %23968 = vst [vmem:[#allocation58_spill] sm:$0xff] %v19377_v8  ;;  %23969 = vst [vmem:[#allocation59_spill] sm:$0xff] %v19380_v45  ;;  %16603 = vmatprep.subr.msk.mxu0 %vm1496_vm1, %v19377_v8  ;;  %v19400_v32 = vadd.f32 %v19027_v56, %v1233_v62  ;;  %v901_v62 = vadd.f32 %v19160_v61, %v18979_v57 }
 0x29d   :  { %23970 = vst [vmem:[#allocation60_spill] sm:$0xff] %v19390_v49  ;;  %23971 = vst [vmem:[#allocation61_spill] sm:$0xff] %v19393_v24  ;;  %16552 = vmatmul.mubr.msk.f32.vlgmr.msra.gmra.mxu1 %vm1496_vm1, %v19384_v52  ;;  %v16480_v58 = vpop.f32.mrf.mxu0 }
 0x29e   :  { %23972 = vst [vmem:[#allocation62_spill] sm:$0xff] %v19400_v32  ;;  %23973 = vst [vmem:[#allocation63_spill] sm:$0xff] %v19404_v29  ;;  %5122 = vrot.lane.b32.xlu1 %v19292_v30, %s18214_s7  ;;  %16594 = vmatmul.mubr.msk.f32.vlgmr.msra.gmra.mxu0 %vm1496_vm1, %v19393_v24  ;;  %v19411_v59 = vadd.f32 %v16480_v58, %v19297_v15  ;;  %v19437_v30 = vadd.f32 %v19208_v39, %v19027_v56  ;;  %v19452_v3 = vmul.f32 0.35355338, %v901_v62 }
 0x29f   :  { %23975 = vst [vmem:[#allocation65_spill] sm:$0xff] %v19415_v21  ;;  %16555 = vmatpush3.xpose.msk.msra.mxu1 %vm1496_vm1, %v19364_v63  ;;  %16558 = vmatprep.mubr.msk.f32.mxu1 %vm1496_vm1, %v19397_v4  ;;  %v19421_v12 = vpop.f32.mrf.mxu0  ;;  %v19459_v39 = vmul.f32 0.35355338, %v19015_v5 }
 0x2a0   :  { %23974 = vst [vmem:[#allocation64_spill] sm:$0xff] %v19411_v59  ;;  %23976 = vst [vmem:[#allocation66_spill] sm:$0xff] %v19421_v12  ;;  %16604 = vmatpush3.xpose.msk.msra.mxu0 %vm1496_vm1, %v19377_v8  ;;  %16607 = vmatprep.mubr.msk.f32.mxu0 %vm1496_vm1, %v19404_v29 }
 0x2a1   :  { %16556 = vmatprep.subr.msk.mxu1 %vm1496_vm1, %v19415_v21  ;;  %16605 = vmatprep.subr.msk.mxu0 %vm1496_vm1, %v19400_v32  ;;  %v16483_v58 = vpop.f32.mrf.mxu0  ;;  %23980 = vst [vmem:[#allocation70_spill] sm:$0xff] %v19459_v39 }
 0x2a2   :  { %5213 = vrot.lane.b32.xlu1 %v19364_v63, %s18214_s7  ;;  %v19442_v61 = vadd.f32 %v16483_v58, %v19297_v15  ;;  %v19462_v58 = vmul.f32 0.35355338, %v916_v25  ;;  %v19471_v63 = vadd.f32 %v19297_v15, %v19194_v36  ;;  %v936_v36 = vadd.f32 %v18979_v57, %v19002_v43 }
 0x2a3   :  { %16557 = vmatpush3.xpose.msk.msra.mxu1 %vm1496_vm1, %v19415_v21  ;;  %v19450_v20 = vpop.f32.mrf.mxu0 }
 0x2a4   :  { %23977 = vst [vmem:[#allocation67_spill] sm:$0xff] %v19442_v61  ;;  %23979 = vst [vmem:[#allocation69_spill] sm:$0xff] %v19450_v20  ;;  %16606 = vmatpush3.xpose.msk.msra.mxu0 %vm1496_vm1, %v19400_v32  ;;  %16568 = vmatprep.subr.msk.mxu1 %vm1496_vm1, %v19437_v30 }
 0x2a5   :  { %16617 = vmatprep.subr.mxu0 %v19446_v34  ;;  %v16486_v53 = vpop.f32.mrf.mxu0  ;;  %23982 = vst [vmem:[#allocation72_spill] sm:$0xff] %v19471_v63 }
 0x2a6   :  { %16559 = vmatmul.mubr.msk.f32.vlgmr.msra.gmra.mxu1 %vm1496_vm1, %v19452_v3  ;;  %v19467_v62 = vadd.f32 %v16486_v53, %v19297_v15  ;;  %v19497_v53 = vadd.f32 %v19266_v31, %v19027_v56  ;;  %v19513_v31 = vmul.f32 0.35355338, %v936_v36 }
 0x2a7   :  { %16608 = vmatmul.mubr.msk.f32.vlgmr.msra.gmra.mxu0 %vm1496_vm1, %v19459_v39  ;;  %16569 = vmatpush3.xpose.msk.msra.mxu1 %vm1496_vm1, %v19437_v30  ;;  %v19481_v5 = vpop.f32.mrf.mxu0 }
 0x2a8   :  { %23981 = vst [vmem:[#allocation71_spill] sm:$0xff] %v19467_v62  ;;  %23983 = vst [vmem:[#allocation73_spill] sm:$0xff] %v19481_v5  ;;  %16572 = vmatprep.mubr.msk.f32.mxu1 %vm1496_vm1, %v19462_v58  ;;  %16618 = vmatpush3.msra.mxu0 %v19446_v34  ;;  %v19536_v5 = vadd.f32 %v19333_v11, %v19027_v56  ;;  %v19554_v11 = vadd.f32 %v19027_v56, %v19354_v37 }
 0x2a9   :  { %16570 = vmatprep.subr.msk.mxu1 %vm1496_vm1, %v19475_v54  ;;  %16619 = vmatprep.subr.mxu0 %v19471_v63  ;;  %v16489_v25 = vpop.f32.mrf.mxu0  ;;  %23985 = vst [vmem:[#allocation75_spill] sm:$0xff] %v19497_v53  ;;  %23988 = vst [vmem:[#allocation78_spill] sm:$0xff] %v19513_v31  ;;  %v976_v37 = vadd.f32 %v18979_v57, %v19022_v17 }
 0x2aa   :  { %16620 = vmatpush3.msra.mxu0 %v19471_v63  ;;  %v19501_v2 = vadd.f32 %v16489_v25, %v19297_v15  ;;  %v19517_v25 = vadd.f32 %v19027_v56, %v19282_v35  ;;  %v956_v35 = vadd.f32 %v18979_v57, %v19012_v27  ;;  %23992 = vst [vmem:[#allocation82_spill] sm:$0xff] %v19536_v5  ;;  %23997 = vst [vmem:[#allocation87_spill] sm:$0xff] %v19554_v11 }
 0x2ab   :  { %16631 = vmatprep.subr.mxu0 %v19490_v1  ;;  %16571 = vmatpush3.xpose.msk.msra.mxu1 %vm1496_vm1, %v19475_v54  ;;  %v19506_v43 = vpop.f32.mrf.mxu0  ;;  %v19586_v57 = vmul.f32 0.35355338, %v976_v37 }
 0x2ac   :  { %23986 = vst [vmem:[#allocation76_spill] sm:$0xff] %v19501_v2  ;;  %23987 = vst [vmem:[#allocation77_spill] sm:$0xff] %v19506_v43  ;;  %16582 = vmatprep.subr.msk.mxu1 %vm1496_vm1, %v19497_v53  ;;  %v19550_v27 = vmul.f32 0.35355338, %v956_v35 }
 0x2ad   :  { %v16492_v33 = vpop.f32.mrf.mxu0  ;;  %23989 = vst [vmem:[#allocation79_spill] sm:$0xff] %v19517_v25  ;;  %24004 = vst [vmem:[#allocation94_spill] sm:$0xff] %v19586_v57 }
 0x2ae   :  { %16573 = vmatmul.mubr.msk.f32.vlgmr.msra.gmra.mxu1 %vm1496_vm1, %v19509_v51  ;;  %v19522_v9 = vadd.f32 %v16492_v33, %v19297_v15  ;;  %23996 = vst [vmem:[#allocation86_spill] sm:$0xff] %v19550_v27 }
 0x2af   :  { %16583 = vmatpush3.xpose.msk.msra.mxu1 %vm1496_vm1, %v19497_v53  ;;  %16586 = vmatprep.mubr.msk.f32.mxu1 %vm1496_vm1, %v19513_v31  ;;  %v19528_v10 = vpop.f32.mrf.mxu0 }
 0x2b0   :  { %23990 = vst [vmem:[#allocation80_spill] sm:$0xff] %v19522_v9  ;;  %23991 = vst [vmem:[#allocation81_spill] sm:$0xff] %v19528_v10  ;;  %16584 = vmatprep.subr.msk.mxu1 %vm1496_vm1, %v19517_v25  ;;  %v19546_v10 = vmul.f32 0.35355338, %v19000_v55 }
 0x2b1   :  { %v16495_v36 = vpop.f32.mrf.mxu0 }
 0x2b2   :  { %v19539_v33 = vadd.f32 %v16495_v36, %v19297_v15  ;;  %23995 = vst [vmem:[#allocation85_spill] sm:$0xff] %v19546_v10 }
 0x2b3   :  { %16585 = vmatpush3.xpose.msk.msra.mxu1 %vm1496_vm1, %v19517_v25  ;;  %v19543_v9 = vpop.f32.mrf.mxu0 }
 0x2b4   :  { %23993 = vst [vmem:[#allocation83_spill] sm:$0xff] %v19539_v33  ;;  %23994 = vst [vmem:[#allocation84_spill] sm:$0xff] %v19543_v9  ;;  %16596 = vmatprep.subr.msk.mxu1 %vm1496_vm1, %v19536_v5  ;;  %v16448_v9 = vpop.f32.mrf.mxu1 }
 0x2b5   :  { %v16498_v43 = vpop.f32.mrf.mxu0  ;;  %v19572_v33 = vadd.f32 %v16448_v9, %v19027_v56 }
 0x2b6   :  { %16587 = vmatmul.mubr.msk.f32.vlgmr.msra.gmra.mxu1 %vm1496_vm1, %v19546_v10  ;;  %v19559_v36 = vadd.f32 %v16498_v43, %v19297_v15 }
 0x2b7   :  { %16597 = vmatpush3.xpose.msk.msra.mxu1 %vm1496_vm1, %v19536_v5  ;;  %16600 = vmatprep.mubr.msk.f32.mxu1 %vm1496_vm1, %v19550_v27  ;;  %v19565_v55 = vpop.f32.mrf.mxu0  ;;  %24000 = vst [vmem:[#allocation90_spill] sm:$0xff] %v19572_v33 }
 0x2b8   :  { %23998 = vst [vmem:[#allocation88_spill] sm:$0xff] %v19559_v36  ;;  %23999 = vst [vmem:[#allocation89_spill] sm:$0xff] %v19565_v55  ;;  %16598 = vmatprep.subr.msk.mxu1 %vm1496_vm1, %v19554_v11  ;;  %v1243_v36 = vpop.f32.mrf.mxu1  ;;  %v19582_v55 = vmul.f32 0.35355338, %v19010_v14  ;;  %v19604_v14 = vadd.f32 %v19210_v6, %v19297_v15  ;;  %v19621_v6 = vadd.f32 %v19268_v23, %v19297_v15 }
 0x2b9   :  { %v16501_v35 = vpop.f32.mrf.mxu0  ;;  %v19589_v9 = vadd.f32 %v19027_v56, %v1243_v36  ;;  %v19609_v56 = vmul.f32 0.35355338, %v19020_v44  ;;  %v19614_v36 = vadd.f32 %v19297_v15, %v19224_v0  ;;  %v19626_v44 = vld [vmem:[#allocation11 + $0x8] sm:$0xff]  ;;  %v19628_v0 = vld [vmem:[#allocation11] sm:$0xff] }
 0x2ba   :  { %v19575_v43 = vadd.f32 %v16501_v35, %v19297_v15  ;;  %24003 = vst [vmem:[#allocation93_spill] sm:$0xff] %v19582_v55  ;;  %24007 = vst [vmem:[#allocation97_spill] sm:$0xff] %v19604_v14 }
 0x2bb   :  { %16599 = vmatpush3.xpose.msk.msra.mxu1 %vm1496_vm1, %v19554_v11  ;;  %v19579_v2 = vpop.f32.mrf.mxu0  ;;  %24005 = vst [vmem:[#allocation95_spill] sm:$0xff] %v19589_v9  ;;  %24008 = vst [vmem:[#allocation98_spill] sm:$0xff] %v19609_v56 }
 0x2bc   :  { %24001 = vst [vmem:[#allocation91_spill] sm:$0xff] %v19575_v43  ;;  %24002 = vst [vmem:[#allocation92_spill] sm:$0xff] %v19579_v2  ;;  %16610 = vmatprep.subr.msk.mxu1 %vm1496_vm1, %v19572_v33 }
 0x2bd   :  { %v16504_v17 = vpop.f32.mrf.mxu0  ;;  %24009 = vst [vmem:[#allocation99_spill] sm:$0xff] %v19614_v36  ;;  %24010 = vst [vmem:[#allocation100_spill] sm:$0xff] %v19621_v6 }
 0x2be   :  { %16601 = vmatmul.mubr.msk.f32.vlgmr.msra.gmra.mxu1 %vm1496_vm1, %v19582_v55  ;;  %v19594_v35 = vadd.f32 %v16504_v17, %v19297_v15 }
 0x2bf   :  { %16611 = vmatpush3.xpose.msk.msra.mxu1 %vm1496_vm1, %v19572_v33  ;;  %16614 = vmatprep.mubr.msk.f32.mxu1 %vm1496_vm1, %v19586_v57 }
 0x2c0   :  { %24006 = vst [vmem:[#allocation96_spill] sm:$0xff] %v19594_v35  ;;  %16612 = vmatprep.subr.msk.mxu1 %vm1496_vm1, %v19589_v9 }
 0x2c3   :  { %16613 = vmatpush3.xpose.msk.msra.mxu1 %vm1496_vm1, %v19589_v9 }
 0x2c4   :  { %16624 = vmatprep.subr.mxu1 %v19604_v14 }
 0x2c6   :  { %16615 = vmatmul.mubr.msk.f32.vlgmr.msra.gmra.mxu1 %vm1496_vm1, %v19609_v56 }
 0x2c7   :  { %16625 = vmatpush3.msra.mxu1 %v19604_v14  ;;  %v19668_v14 = vpop.f32.mrf.mxu0 }
 0x2c8   :  { %16626 = vmatprep.subr.mxu1 %v19614_v36  ;;  %24011 = vst [vmem:[#allocation101_spill] sm:$0xff] %v19668_v14 }
 0x2c9   :  { %16627 = vmatpush3.msra.mxu1 %v19614_v36 }
 0x2ca   :  { %16638 = vmatprep.subr.mxu1 %v19621_v6 }
 0x32c   :  { %v16511_v37 = vpop.f32.mrf.mxu1 }
 0x32d   :  { %v19631_v17 = vadd.f32 %v16511_v37, %v19626_v44 }
 0x32e   :  { %v1575_v35 = vpop.f32.mrf.mxu1 }
 0x32f   :  { %v19634_v2 = vadd.f32 %v1575_v35, %v19628_v0  ;;  %v2893_v15 = vsel %vm2889_vm2, %v19631_v17, -inf }
 0x330   :  { %2894 = vmax.xlane.f32.xlu1 %v2893_v15 }
 0x331   :  { %v2890_v23 = vsel %vm2889_vm2, %v19634_v2, -inf }
 0x332   :  { %2891 = vmax.xlane.f32.xlu0 %v2890_v23 }
 0x334   :  { %v16518_v43 = vpop.f32.mrf.mxu1 }
 0x335   :  { %v19641_v62 = vadd.f32 %v16518_v43, %v19626_v44 }
 0x336   :  { %v1662_v20 = vpop.f32.mrf.mxu1 }
 0x337   :  { %v19644_v37 = vadd.f32 %v1662_v20, %v19628_v0  ;;  %v2899_v35 = vsel %vm2889_vm2, %v19641_v62, -inf }
 0x338   :  { %2900 = vmax.xlane.f32.xlu0 %v2899_v35 }
 0x339   :  { %v2896_v12 = vsel %vm2889_vm2, %v19644_v37, -inf }
 0x33c   :  { %v16525_v15 = vpop.f32.mrf.mxu1  ;;  %2897 = vmax.xlane.f32.xlu0 %v2896_v12 }
 0x33d   :  { %v19651_v61 = vadd.f32 %v16525_v15, %v19626_v44 }
 0x33e   :  { %v1749_v23 = vpop.f32.mrf.mxu1 }
 0x33f   :  { %v19654_v43 = vadd.f32 %v1749_v23, %v19628_v0  ;;  %v2905_v20 = vsel %vm2889_vm2, %v19651_v61, -inf }
 0x340   :  { %2906 = vmax.xlane.f32.xlu1 %v2905_v20 }
 0x341   :  { %v2902_v49 = vsel %vm2889_vm2, %v19654_v43, -inf }
 0x344   :  { %v16532_v35 = vpop.f32.mrf.mxu1  ;;  %2903 = vmax.xlane.f32.xlu1 %v2902_v49 }
 0x345   :  { %v19661_v59 = vadd.f32 %v16532_v35, %v19626_v44 }
 0x346   :  { %v1836_v12 = vpop.f32.mrf.mxu1 }
 0x347   :  { %v19664_v15 = vadd.f32 %v1836_v12, %v19628_v0  ;;  %v2911_v23 = vsel %vm2889_vm2, %v19661_v59, -inf }
 0x348   :  { %2912 = vmax.xlane.f32.xlu0 %v2911_v23 }
 0x349   :  { %v2908_v20 = vsel %vm2889_vm2, %v19664_v15, -inf }
 0x34c   :  { %v16539_v13 = vpop.f32.mrf.mxu1  ;;  %2909 = vmax.xlane.f32.xlu0 %v2908_v20 }
 0x34d   :  { %v19673_v49 = vadd.f32 %v16539_v13, %v19626_v44  ;;  %v16567_v35 = vpop.f32.mrf.mxu0 }
 0x34e   :  { %v19676_v36 = vadd.f32 %v16567_v35, %v19626_v44  ;;  %v1923_v34 = vpop.f32.mrf.mxu1 }
 0x34f   :  { %v2917_v12 = vsel %vm2889_vm2, %v19673_v49, -inf  ;;  %v19681_v23 = vadd.f32 %v1923_v34, %v19628_v0  ;;  %v2271_v45 = vpop.f32.mrf.mxu0 }
 0x350   :  { %2918 = vmax.xlane.f32.xlu1 %v2917_v12  ;;  %v2941_v14 = vsel %vm2889_vm2, %v19676_v36, -inf  ;;  %v19689_v35 = vadd.f32 %v2271_v45, %v19628_v0 }
 0x351   :  { %v2914_v60 = vsel %vm2889_vm2, %v19681_v23, -inf }
 0x352   :  { %v2938_v45 = vsel %vm2889_vm2, %v19689_v35, -inf }
 0x354   :  { %2942 = vmax.xlane.f32.xlu1 %v2941_v14 }
 0x355   :  { %v16546_v20 = vpop.f32.mrf.mxu1 }
 0x356   :  { %v19686_v13 = vadd.f32 %v16546_v20, %v19626_v44  ;;  %v16581_v12 = vpop.f32.mrf.mxu0 }
 0x357   :  { %v2010_v57 = vpop.f32.mrf.mxu1  ;;  %v19699_v14 = vadd.f32 %v16581_v12, %v19626_v44 }
 0x358   :  { %v19694_v34 = vadd.f32 %v2010_v57, %v19628_v0  ;;  %v2923_v63 = vsel %vm2889_vm2, %v19686_v13, -inf  ;;  %2915 = vmax.xlane.f32.xlu1 %v2914_v60  ;;  %v2445_v20 = vpop.f32.mrf.mxu0 }
 0x359   :  { %2924 = vmax.xlane.f32.xlu0 %v2923_v63  ;;  %v19706_v57 = vadd.f32 %v2445_v20, %v19628_v0  ;;  %v2953_v46 = vsel %vm2889_vm2, %v19699_v14, -inf  ;;  %v19710_v63 = vpop.permute.xlu1 %4570 }
 0x35a   :  { %v2920_v39 = vsel %vm2889_vm2, %v19694_v34, -inf  ;;  %24012 = vst [vmem:[#allocation102_spill] sm:$0xff] %v19710_v63 }
 0x35b   :  { %v2950_v56 = vsel %vm2889_vm2, %v19706_v57, -inf }
 0x35c   :  { %2939 = vmax.xlane.f32.xlu1 %v2938_v45 }
 0x35d   :  { %2921 = vmax.xlane.f32.xlu0 %v2920_v39  ;;  %v16553_v60 = vpop.f32.mrf.mxu1  ;;  %v19717_v45 = vpop.permute.xlu1 %4661 }
 0x35e   :  { %v19713_v12 = vadd.f32 %v16553_v60, %v19626_v44  ;;  %v16595_v6 = vpop.f32.mrf.mxu0  ;;  %24013 = vst [vmem:[#allocation103_spill] sm:$0xff] %v19717_v45 }
 0x35f   :  { %v2097_v55 = vpop.f32.mrf.mxu1  ;;  %v19720_v20 = vadd.f32 %v16595_v6, %v19626_v44 }
 0x360   :  { %2954 = vmax.xlane.f32.xlu1 %v2953_v46  ;;  %v2929_v46 = vsel %vm2889_vm2, %v19713_v12, -inf  ;;  %v19733_v45 = vadd.f32 %v2097_v55, %v19628_v0 }
 0x361   :  { %v2965_v6 = vsel %vm2889_vm2, %v19720_v20, -inf  ;;  %v19737_v9 = vpop.permute.xlu1 %4752 }
 0x362   :  { %24014 = vst [vmem:[#allocation104_spill] sm:$0xff] %v19737_v9 }
 0x364   :  { %2951 = vmax.xlane.f32.xlu1 %v2950_v56 }
 0x366   :  { %v16560_v39 = vpop.f32.mrf.mxu1 }
 0x367   :  { %v19723_v38 = vadd.f32 %v16560_v39, %v19626_v44  ;;  %v2619_v39 = vpop.f32.mrf.mxu0 }
 0x368   :  { %v2184_v60 = vpop.f32.mrf.mxu1  ;;  %2930 = vmax.xlane.f32.xlu1 %v2929_v46  ;;  %v19744_v48 = vadd.f32 %v2619_v39, %v19628_v0 }
 0x369   :  { %v19728_v63 = vadd.f32 %v2184_v60, %v19628_v0  ;;  %v2935_v56 = vsel %vm2889_vm2, %v19723_v38, -inf  ;;  %v19741_v60 = vpop.permute.xlu0 %4572  ;;  %v16609_v29 = vpop.f32.mrf.mxu0 }
 0x36a   :  { %2936 = vmax.xlane.f32.xlu0 %v2935_v56  ;;  %24015 = vst [vmem:[#allocation105_spill] sm:$0xff] %v19741_v60  ;;  %v2926_v56 = vsel %vm2889_vm2, %v19733_v45, -inf  ;;  %v19756_v60 = vpop.permute.xlu1 %4843  ;;  %v19759_v39 = vadd.f32 %v16609_v29, %v19626_v44 }
 0x36b   :  { %v2932_v46 = vsel %vm2889_vm2, %v19728_v63, -inf  ;;  %24016 = vst [vmem:[#allocation106_spill] sm:$0xff] %v19756_v60  ;;  %v2793_v24 = vpop.f32.mrf.mxu0 }
 0x36c   :  { %2966 = vmax.xlane.f32.xlu1 %v2965_v6  ;;  %v19768_v33 = vadd.f32 %v2793_v24, %v19628_v0  ;;  %v2977_v29 = vsel %vm2889_vm2, %v19759_v39, -inf }
 0x36d   :  { %v19763_v1 = vpop.permute.xlu0 %4663 }
 0x36e   :  { %v16574_v32 = vpop.f32.mrf.mxu1  ;;  %2933 = vmax.xlane.f32.xlu0 %v2932_v46  ;;  %24017 = vst [vmem:[#allocation107_spill] sm:$0xff] %v19763_v1  ;;  %v19775_v22 = vpop.permute.xlu1 %4934  ;;  %v2974_v24 = vsel %vm2889_vm2, %v19768_v33, -inf }
 0x36f   :  { %v19747_v55 = vadd.f32 %v16574_v32, %v19626_v44  ;;  %v2962_v32 = vsel %vm2889_vm2, %v19744_v48, -inf  ;;  %24018 = vst [vmem:[#allocation108_spill] sm:$0xff] %v19775_v22 }
 0x370   :  { %v2358_v6 = vpop.f32.mrf.mxu1  ;;  %2927 = vmax.xlane.f32.xlu1 %v2926_v56 }
 0x371   :  { %v19752_v9 = vadd.f32 %v2358_v6, %v19628_v0  ;;  %v2947_v46 = vsel %vm2889_vm2, %v19747_v55, -inf }
 0x372   :  { %2948 = vmax.xlane.f32.xlu0 %v2947_v46 }
 0x373   :  { %v2944_v56 = vsel %vm2889_vm2, %v19752_v9, -inf }
 0x374   :  { %2963 = vmax.xlane.f32.xlu1 %v2962_v32 }
 0x376   :  { %v16588_v6 = vpop.f32.mrf.mxu1  ;;  %2945 = vmax.xlane.f32.xlu0 %v2944_v56  ;;  %v19782_v56 = vpop.permute.xlu0 %4754 }
 0x377   :  { %v19771_v46 = vadd.f32 %v16588_v6, %v19626_v44  ;;  %24019 = vst [vmem:[#allocation109_spill] sm:$0xff] %v19782_v56 }
 0x378   :  { %v2532_v60 = vpop.f32.mrf.mxu1  ;;  %2978 = vmax.xlane.f32.xlu1 %v2977_v29  ;;  %v19788_v29 = vpop.permute.xlu1 %5025 }
 0x379   :  { %v19778_v32 = vadd.f32 %v2532_v60, %v19628_v0  ;;  %v2959_v1 = vsel %vm2889_vm2, %v19771_v46, -inf  ;;  %24020 = vst [vmem:[#allocation110_spill] sm:$0xff] %v19788_v29 }
 0x37a   :  { %2960 = vmax.xlane.f32.xlu0 %v2959_v1  ;;  %v19793_v27 = vpop.permute.xlu0 %4845 }
 0x37b   :  { %v2956_v6 = vsel %vm2889_vm2, %v19778_v32, -inf  ;;  %24021 = vst [vmem:[#allocation111_spill] sm:$0xff] %v19793_v27 }
 0x37c   :  { %2975 = vmax.xlane.f32.xlu1 %v2974_v24  ;;  %v19800_v24 = vpop.permute.xlu1 %5116 }
 0x37d   :  { %24022 = vst [vmem:[#allocation112_spill] sm:$0xff] %v19800_v24 }
 0x37e   :  { %v16602_v11 = vpop.f32.mrf.mxu1  ;;  %2957 = vmax.xlane.f32.xlu0 %v2956_v6  ;;  %v19804_v29 = vpop.permute.xlu0 %4936 }
 0x37f   :  { %v19791_v60 = vadd.f32 %v16602_v11, %v19626_v44  ;;  %24023 = vst [vmem:[#allocation113_spill] sm:$0xff] %v19804_v29 }
 0x380   :  { %v2706_v22 = vpop.f32.mrf.mxu1 }
 0x381   :  { %v19796_v1 = vadd.f32 %v2706_v22, %v19628_v0  ;;  %v2971_v56 = vsel %vm2889_vm2, %v19791_v60, -inf }
 0x382   :  { %2972 = vmax.xlane.f32.xlu0 %v2971_v56  ;;  %v19814_v56 = vpop.permute.xlu1 %4574 }
 0x383   :  { %v2968_v6 = vsel %vm2889_vm2, %v19796_v1, -inf  ;;  %24024 = vst [vmem:[#allocation114_spill] sm:$0xff] %v19814_v56 }
 0x386   :  { %v16616_v10 = vpop.f32.mrf.mxu1  ;;  %2969 = vmax.xlane.f32.xlu0 %v2968_v6  ;;  %v19818_v6 = vpop.permute.xlu0 %5027 }
 0x387   :  { %v19807_v11 = vadd.f32 %v16616_v10, %v19626_v44  ;;  %24025 = vst [vmem:[#allocation115_spill] sm:$0xff] %v19818_v6  ;;  %v19820_v29 = vpop.permute.xlu1 %4667 }
 0x388   :  { %v2880_v27 = vpop.f32.mrf.mxu1  ;;  %24026 = vst [vmem:[#allocation116_spill] sm:$0xff] %v19820_v29 }
 0x389   :  { %v19810_v22 = vadd.f32 %v2880_v27, %v19628_v0  ;;  %v2983_v8 = vsel %vm2889_vm2, %v19807_v11, -inf }
 0x38a   :  { %2984 = vmax.xlane.f32.xlu1 %v2983_v8  ;;  %v19822_v10 = vpop.permute.xlu0 %4576 }
 0x38b   :  { %v2980_v24 = vsel %vm2889_vm2, %v19810_v22, -inf  ;;  %24027 = vst [vmem:[#allocation117_spill] sm:$0xff] %v19822_v10  ;;  %v19824_v44 = vpop.permute.xlu1 %4758 }
 0x38c   :  { %2981 = vmax.xlane.f32.xlu0 %v2980_v24  ;;  %24028 = vst [vmem:[#allocation118_spill] sm:$0xff] %v19824_v44 }
 0x38e   :  { %v19826_v27 = vpop.permute.xlu0 %4665 }
 0x38f   :  { %24029 = vst [vmem:[#allocation119_spill] sm:$0xff] %v19826_v27  ;;  %v19830_v8 = vpop.permute.xlu1 %4849 }
 0x390   :  { %24030 = vst [vmem:[#allocation120_spill] sm:$0xff] %v19830_v8 }
 0x392   :  { %v19832_v0 = vpop.permute.xlu0 %4756 }
 0x393   :  { %24031 = vst [vmem:[#allocation121_spill] sm:$0xff] %v19832_v0  ;;  %v19836_v24 = vpop.permute.xlu1 %4940 }
 0x394   :  { %24032 = vst [vmem:[#allocation122_spill] sm:$0xff] %v19836_v24 }
 0x396   :  { %v19838_v6 = vpop.permute.xlu0 %4847 }
 0x397   :  { %24033 = vst [vmem:[#allocation123_spill] sm:$0xff] %v19838_v6  ;;  %v19840_v29 = vpop.permute.xlu1 %5031 }
 0x398   :  { %24034 = vst [vmem:[#allocation124_spill] sm:$0xff] %v19840_v29 }
 0x39a   :  { %v19842_v56 = vpop.permute.xlu0 %4938 }
 0x39b   :  { %5304 = vrot.lane.b32.xlu1 %v19188_v41, %s18214_s7  ;;  %24035 = vst [vmem:[#allocation125_spill] sm:$0xff] %v19842_v56  ;;  %v19844_v44 = vpop.permute.xlu1 %5122 }
 0x39c   :  { %24036 = vst [vmem:[#allocation126_spill] sm:$0xff] %v19844_v44 }
 0x39e   :  { %v19846_v27 = vpop.permute.xlu0 %5029 }
 0x39f   :  { %24037 = vst [vmem:[#allocation127_spill] sm:$0xff] %v19846_v27  ;;  %v19848_v41 = vpop.permute.xlu1 %5213 }
 0x3a0   :  { %24038 = vst [vmem:[#allocation128_spill] sm:$0xff] %v19848_v41 }
 0x3a2   :  { %5211 = vrot.lane.b32.xlu0 %v19415_v21, %s18214_s7  ;;  %v19850_v8 = vpop.permute.xlu0 %5120 }
 0x3a3   :  { %24039 = vst [vmem:[#allocation129_spill] sm:$0xff] %v19850_v8 }
 0x3b9   :  { %v2895_v0 = vpop.xlane.xlu1 %2894 }
 0x3ba   :  { %v2987_v10 = vsub.f32 %v19631_v17, %v2895_v0 }
 0x3bb   :  { %v2892_v21 = vpop.xlane.xlu0 %2891 }
 0x3bc   :  { %v3020_v16 = vmul.f32 1.442695, %v2987_v10  ;;  %v2986_v24 = vsub.f32 %v19634_v2, %v2892_v21 }
 0x3be   :  { %17543 = vpow2.f32 %v3020_v16  ;;  %v3018_v6 = vmul.f32 1.442695, %v2986_v24 }
 0x3c0   :  { %17545 = vpow2.f32 %v3018_v6 }
 0x3c1   :  { %v2901_v29 = vpop.xlane.xlu0 %2900 }
 0x3c2   :  { %v2989_v56 = vsub.f32 %v19641_v62, %v2901_v29 }
 0x3c4   :  { %v3024_v44 = vmul.f32 1.442695, %v2989_v56 }
 0x3c5   :  { %v2898_v7 = vpop.xlane.xlu0 %2897 }
 0x3c6   :  { %17547 = vpow2.f32 %v3024_v44  ;;  %v2988_v41 = vsub.f32 %v19644_v37, %v2898_v7 }
 0x3c8   :  { %v3022_v27 = vmul.f32 1.442695, %v2988_v41 }
 0x3c9   :  { %v2907_v8 = vpop.xlane.xlu1 %2906 }
 0x3ca   :  { %17549 = vpow2.f32 %v3022_v27  ;;  %v2991_v17 = vsub.f32 %v19651_v61, %v2907_v8 }
 0x3cb   :  { %v19857_v0 = vpop.eup %17543 }
 0x3cc   :  { %v3028_v10 = vmul.f32 1.442695, %v2991_v17  ;;  %v3085_v2 = vsel %vm2889_vm2, %v19857_v0, 0.0 }
 0x3cd   :  { %v19861_v16 = vpop.eup %17545  ;;  %v2904_v21 = vpop.xlane.xlu1 %2903  ;;  %3086 = vadd.xlane.f32.xlu1 %v3085_v2 }
 0x3ce   :  { %17551 = vpow2.f32 %v3028_v10  ;;  %v2990_v62 = vsub.f32 %v19654_v43, %v2904_v21  ;;  %v3082_v41 = vsel %vm2889_vm2, %v19861_v16, 0.0 }
 0x3cf   :  { %3083 = vadd.xlane.f32.xlu0 %v3082_v41 }
 0x3d0   :  { %v3026_v7 = vmul.f32 1.442695, %v2990_v62 }
 0x3d1   :  { %v2913_v37 = vpop.xlane.xlu0 %2912 }
 0x3d2   :  { %17553 = vpow2.f32 %v3026_v7  ;;  %v2993_v61 = vsub.f32 %v19661_v59, %v2913_v37 }
 0x3d3   :  { %v19867_v29 = vpop.eup %17547 }
 0x3d4   :  { %v3032_v56 = vmul.f32 1.442695, %v2993_v61  ;;  %v3091_v6 = vsel %vm2889_vm2, %v19867_v29, 0.0 }
 0x3d5   :  { %3092 = vadd.xlane.f32.xlu0 %v3091_v6  ;;  %v2910_v44 = vpop.xlane.xlu0 %2909 }
 0x3d6   :  { %17555 = vpow2.f32 %v3032_v56  ;;  %v2992_v43 = vsub.f32 %v19664_v15, %v2910_v44 }
 0x3d7   :  { %v19872_v27 = vpop.eup %17549 }
 0x3d8   :  { %v3030_v8 = vmul.f32 1.442695, %v2992_v43  ;;  %v3088_v24 = vsel %vm2889_vm2, %v19872_v27, 0.0 }
 0x3d9   :  { %v2919_v17 = vpop.xlane.xlu1 %2918  ;;  %3089 = vadd.xlane.f32.xlu0 %v3088_v24 }
 0x3da   :  { %17557 = vpow2.f32 %v3030_v8  ;;  %v2995_v59 = vsub.f32 %v19673_v49, %v2919_v17 }
 0x3db   :  { %v19877_v10 = vpop.eup %17551 }
 0x3dc   :  { %v3036_v2 = vmul.f32 1.442695, %v2995_v59  ;;  %v3097_v21 = vsel %vm2889_vm2, %v19877_v10, 0.0 }
 0x3dd   :  { %v2943_v62 = vpop.xlane.xlu1 %2942  ;;  %3098 = vadd.xlane.f32.xlu1 %v3097_v21 }
 0x3de   :  { %17559 = vpow2.f32 %v3036_v2  ;;  %v3003_v15 = vsub.f32 %v19676_v36, %v2943_v62 }
 0x3df   :  { %v19882_v41 = vpop.eup %17553 }
 0x3e0   :  { %v3052_v7 = vmul.f32 1.442695, %v3003_v15  ;;  %v3094_v37 = vsel %vm2889_vm2, %v19882_v41, 0.0 }
 0x3e1   :  { %v2916_v61 = vpop.xlane.xlu1 %2915  ;;  %3095 = vadd.xlane.f32.xlu1 %v3094_v37 }
 0x3e2   :  { %17561 = vpow2.f32 %v3052_v7  ;;  %v2994_v49 = vsub.f32 %v19681_v23, %v2916_v61  ;;  %v2925_v56 = vpop.xlane.xlu0 %2924 }
 0x3e3   :  { %v19887_v6 = vpop.eup %17555  ;;  %v2997_v44 = vsub.f32 %v19686_v13, %v2925_v56 }
 0x3e4   :  { %v3034_v43 = vmul.f32 1.442695, %v2994_v49  ;;  %v3103_v36 = vsel %vm2889_vm2, %v19887_v6, 0.0 }
 0x3e5   :  { %v3040_v8 = vmul.f32 1.442695, %v2997_v44  ;;  %v2940_v24 = vpop.xlane.xlu1 %2939  ;;  %3104 = vadd.xlane.f32.xlu0 %v3103_v36 }
 0x3e6   :  { %17563 = vpow2.f32 %v3034_v43  ;;  %v3002_v17 = vsub.f32 %v19689_v35, %v2940_v24  ;;  %v2922_v59 = vpop.xlane.xlu0 %2921 }
 0x3e7   :  { %v19893_v2 = vpop.eup %17557  ;;  %17565 = vpow2.f32 %v3040_v8  ;;  %v2996_v23 = vsub.f32 %v19694_v34, %v2922_v59 }
 0x3e8   :  { %v3050_v21 = vmul.f32 1.442695, %v3002_v17  ;;  %v3100_v13 = vsel %vm2889_vm2, %v19893_v2, 0.0 }
 0x3e9   :  { %v3038_v62 = vmul.f32 1.442695, %v2996_v23  ;;  %v2955_v15 = vpop.xlane.xlu1 %2954  ;;  %3101 = vadd.xlane.f32.xlu0 %v3100_v13 }
 0x3ea   :  { %17567 = vpow2.f32 %v3050_v21  ;;  %v3007_v7 = vsub.f32 %v19699_v14, %v2955_v15 }
 0x3eb   :  { %v19899_v37 = vpop.eup %17559  ;;  %17569 = vpow2.f32 %v3038_v62 }
 0x3ec   :  { %v3060_v35 = vmul.f32 1.442695, %v3007_v7  ;;  %v3109_v61 = vsel %vm2889_vm2, %v19899_v37, 0.0 }
 0x3ed   :  { %v2952_v49 = vpop.xlane.xlu1 %2951  ;;  %3110 = vadd.xlane.f32.xlu1 %v3109_v61 }
 0x3ee   :  { %17571 = vpow2.f32 %v3060_v35  ;;  %v3006_v34 = vsub.f32 %v19706_v57, %v2952_v49 }
 0x3ef   :  { %v19904_v56 = vpop.eup %17561 }
 0x3f0   :  { %v3058_v44 = vmul.f32 1.442695, %v3006_v34  ;;  %v3133_v43 = vsel %vm2889_vm2, %v19904_v56, 0.0 }
 0x3f1   :  { %v2931_v36 = vpop.xlane.xlu1 %2930  ;;  %3134 = vadd.xlane.f32.xlu1 %v3133_v43 }
 0x3f2   :  { %17573 = vpow2.f32 %v3058_v44  ;;  %v2999_v14 = vsub.f32 %v19713_v12, %v2931_v36 }
 0x3f3   :  { %v19909_v8 = vpop.eup %17563  ;;  %v2937_v24 = vpop.xlane.xlu0 %2936 }
 0x3f4   :  { %v19911_v17 = vpop.eup %17565  ;;  %v3044_v59 = vmul.f32 1.442695, %v2999_v14  ;;  %v3001_v23 = vsub.f32 %v19723_v38, %v2937_v24  ;;  %v3106_v57 = vsel %vm2889_vm2, %v19909_v8, 0.0 }
 0x3f5   :  { %v2967_v21 = vpop.xlane.xlu1 %2966  ;;  %3107 = vadd.xlane.f32.xlu1 %v3106_v57  ;;  %v3115_v13 = vsel %vm2889_vm2, %v19911_v17, 0.0 }
 0x3f6   :  { %17575 = vpow2.f32 %v3044_v59  ;;  %v3048_v62 = vmul.f32 1.442695, %v3001_v23  ;;  %v3011_v12 = vsub.f32 %v19720_v20, %v2967_v21  ;;  %3116 = vadd.xlane.f32.xlu0 %v3115_v13 }
 0x3f7   :  { %v19919_v15 = vpop.eup %17567  ;;  %v2934_v7 = vpop.xlane.xlu0 %2933 }
 0x3f8   :  { %v19921_v35 = vpop.eup %17569  ;;  %17577 = vpow2.f32 %v3048_v62  ;;  %v3068_v38 = vmul.f32 1.442695, %v3011_v12  ;;  %v3000_v61 = vsub.f32 %v19728_v63, %v2934_v7  ;;  %v3130_v49 = vsel %vm2889_vm2, %v19919_v15, 0.0 }
 0x3f9   :  { %v2928_v34 = vpop.xlane.xlu1 %2927  ;;  %3131 = vadd.xlane.f32.xlu1 %v3130_v49  ;;  %v3112_v44 = vsel %vm2889_vm2, %v19921_v35, 0.0 }
 0x3fa   :  { %17579 = vpow2.f32 %v3068_v38  ;;  %v3046_v20 = vmul.f32 1.442695, %v3000_v61  ;;  %v2998_v43 = vsub.f32 %v19733_v45, %v2928_v34  ;;  %3113 = vadd.xlane.f32.xlu0 %v3112_v44 }
 0x3fb   :  { %v19929_v36 = vpop.eup %17571  ;;  %v2949_v14 = vpop.xlane.xlu0 %2948 }
 0x3fc   :  { %17581 = vpow2.f32 %v3046_v20  ;;  %v3042_v24 = vmul.f32 1.442695, %v2998_v43  ;;  %v3005_v63 = vsub.f32 %v19747_v55, %v2949_v14  ;;  %v3145_v59 = vsel %vm2889_vm2, %v19929_v36, 0.0 }
 0x3fd   :  { %v2964_v23 = vpop.xlane.xlu1 %2963  ;;  %3146 = vadd.xlane.f32.xlu1 %v3145_v59 }
 0x3fe   :  { %17583 = vpow2.f32 %v3042_v24  ;;  %v3056_v57 = vmul.f32 1.442695, %v3005_v63  ;;  %v3010_v21 = vsub.f32 %v19744_v48, %v2964_v23 }
 0x3ff   :  { %v19935_v13 = vpop.eup %17573  ;;  %v2946_v45 = vpop.xlane.xlu0 %2945 }
 0x400   :  { %17585 = vpow2.f32 %v3056_v57  ;;  %v3066_v62 = vmul.f32 1.442695, %v3010_v21  ;;  %v3004_v12 = vsub.f32 %v19752_v9, %v2946_v45  ;;  %v3142_v7 = vsel %vm2889_vm2, %v19935_v13, 0.0 }
 0x401   :  { %v2979_v55 = vpop.xlane.xlu1 %2978  ;;  %3143 = vadd.xlane.f32.xlu1 %v3142_v7 }
 0x402   :  { %17587 = vpow2.f32 %v3066_v62  ;;  %v3054_v38 = vmul.f32 1.442695, %v3004_v12  ;;  %v3015_v61 = vsub.f32 %v19759_v39, %v2979_v55 }
 0x403   :  { %v19941_v49 = vpop.eup %17575  ;;  %v2961_v34 = vpop.xlane.xlu0 %2960 }
 0x404   :  { %17589 = vpow2.f32 %v3054_v38  ;;  %v3076_v48 = vmul.f32 1.442695, %v3015_v61  ;;  %v3009_v44 = vsub.f32 %v19771_v46, %v2961_v34  ;;  %v3121_v20 = vsel %vm2889_vm2, %v19941_v49, 0.0 }
 0x405   :  { %v19946_v9 = vpop.eup %17577  ;;  %v2976_v43 = vpop.xlane.xlu1 %2975  ;;  %3122 = vadd.xlane.f32.xlu1 %v3121_v20 }
 0x406   :  { %17591 = vpow2.f32 %v3076_v48  ;;  %v3064_v14 = vmul.f32 1.442695, %v3009_v44  ;;  %v3014_v24 = vsub.f32 %v19768_v33, %v2976_v43  ;;  %v3127_v39 = vsel %vm2889_vm2, %v19946_v9, 0.0 }
 0x407   :  { %v19951_v63 = vpop.eup %17579  ;;  %3128 = vadd.xlane.f32.xlu0 %v3127_v39  ;;  %v2958_v59 = vpop.xlane.xlu0 %2957 }
 0x408   :  { %17593 = vpow2.f32 %v3064_v14  ;;  %v3074_v46 = vmul.f32 1.442695, %v3014_v24  ;;  %v3008_v23 = vsub.f32 %v19778_v32, %v2958_v59  ;;  %v3157_v57 = vsel %vm2889_vm2, %v19951_v63, 0.0 }
 0x409   :  { %v19956_v21 = vpop.eup %17581  ;;  %3158 = vadd.xlane.f32.xlu1 %v3157_v57 }
 0x40a   :  { %17595 = vpow2.f32 %v3074_v46  ;;  %v3062_v45 = vmul.f32 1.442695, %v3008_v23  ;;  %v3124_v33 = vsel %vm2889_vm2, %v19956_v21, 0.0 }
 0x40b   :  { %v19960_v62 = vpop.eup %17583  ;;  %3125 = vadd.xlane.f32.xlu0 %v3124_v33  ;;  %v2973_v12 = vpop.xlane.xlu0 %2972 }
 0x40c   :  { %17597 = vpow2.f32 %v3062_v45  ;;  %v3013_v7 = vsub.f32 %v19791_v60, %v2973_v12  ;;  %v3118_v32 = vsel %vm2889_vm2, %v19960_v62, 0.0 }
 0x40d   :  { %v19965_v55 = vpop.eup %17585  ;;  %3119 = vadd.xlane.f32.xlu1 %v3118_v32 }
 0x40e   :  { %v3072_v38 = vmul.f32 1.442695, %v3013_v7  ;;  %v3139_v61 = vsel %vm2889_vm2, %v19965_v55, 0.0 }
 0x40f   :  { %v19969_v34 = vpop.eup %17587  ;;  %3140 = vadd.xlane.f32.xlu0 %v3139_v61  ;;  %v2970_v48 = vpop.xlane.xlu0 %2969 }
 0x410   :  { %17599 = vpow2.f32 %v3072_v38  ;;  %v3012_v44 = vsub.f32 %v19796_v1, %v2970_v48  ;;  %v3154_v60 = vsel %vm2889_vm2, %v19969_v34, 0.0 }
 0x411   :  { %v19974_v20 = vpop.eup %17589  ;;  %3155 = vadd.xlane.f32.xlu1 %v3154_v60 }
 0x412   :  { %v3070_v43 = vmul.f32 1.442695, %v3012_v44  ;;  %v3136_v14 = vsel %vm2889_vm2, %v19974_v20, 0.0 }
 0x413   :  { %v19978_v24 = vpop.eup %17591  ;;  %v2985_v39 = vpop.xlane.xlu1 %2984  ;;  %3137 = vadd.xlane.f32.xlu0 %v3136_v14 }
 0x414   :  { %17601 = vpow2.f32 %v3070_v43  ;;  %v3017_v59 = vsub.f32 %v19807_v11, %v2985_v39  ;;  %v3169_v1 = vsel %vm2889_vm2, %v19978_v24, 0.0 }
 0x415   :  { %v19983_v46 = vpop.eup %17593  ;;  %v2982_v23 = vpop.xlane.xlu0 %2981  ;;  %3170 = vadd.xlane.f32.xlu1 %v3169_v1 }
 0x416   :  { %v3080_v57 = vmul.f32 1.442695, %v3017_v59  ;;  %v3016_v45 = vsub.f32 %v19810_v22, %v2982_v23  ;;  %v3151_v33 = vsel %vm2889_vm2, %v19983_v46, 0.0 }
 0x417   :  { %v19988_v12 = vpop.eup %17595  ;;  %3152 = vadd.xlane.f32.xlu0 %v3151_v33  ;;  %v20036_v59 = vpop.permute.xlu1 %5304  ;;  %v24040_v33 = vld [vmem:[#allocation53_spill] sm:$0xff] }
 0x418   :  { %17603 = vpow2.f32 %v3080_v57  ;;  %v3078_v7 = vmul.f32 1.442695, %v3016_v45  ;;  %v3166_v11 = vsel %vm2889_vm2, %v19988_v12, 0.0 }
 0x419   :  { %v19992_v32 = vpop.eup %17597  ;;  %3167 = vadd.xlane.f32.xlu1 %v3166_v11  ;;  %v20040_v1 = vpop.permute.xlu0 %5211  ;;  %v24041_v11 = vld [vmem:[#allocation52_spill] sm:$0xff] }
 0x41a   :  { %17605 = vpow2.f32 %v3078_v7  ;;  %v3148_v38 = vsel %vm2889_vm2, %v19992_v32, 0.0 }
 0x41b   :  { %3149 = vadd.xlane.f32.xlu0 %v3148_v38 }
 0x41d   :  { %v19996_v22 = vpop.eup %17599 }
 0x41e   :  { %v3163_v61 = vsel %vm2889_vm2, %v19996_v22, 0.0 }
 0x41f   :  { %3164 = vadd.xlane.f32.xlu0 %v3163_v61  ;;  %v24042_v61 = vld [vmem:[#allocation58_spill] sm:$0xff] }
 0x421   :  { %v20000_v48 = vpop.eup %17601 }
 0x422   :  { %v3160_v44 = vsel %vm2889_vm2, %v20000_v48, 0.0 }
 0x423   :  { %3161 = vadd.xlane.f32.xlu0 %v3160_v44 }
 0x425   :  { %v20004_v60 = vpop.eup %17603 }
 0x426   :  { %v3175_v43 = vsel %vm2889_vm2, %v20004_v60, 0.0 }
 0x427   :  { %v20008_v14 = vpop.eup %17605  ;;  %3176 = vadd.xlane.f32.xlu1 %v3175_v43 }
 0x428   :  { %v3172_v39 = vsel %vm2889_vm2, %v20008_v14, 0.0 }
 0x429   :  { %3173 = vadd.xlane.f32.xlu0 %v3172_v39 }
 0x438   :  { %5207 = vrot.lane.b32.xlu1 %v19397_v4, %s18214_s7 }
 0x43c   :  { %5395 = vrot.lane.b32.xlu1 %v19437_v30, %s18214_s7 }
 0x43f   :  { %5118 = vrot.lane.b32.xlu0 %v19384_v52, %s18214_s7 }
 0x440   :  { %5298 = vrot.lane.b32.xlu1 %v18985_v42, %s18214_s7 }
 0x443   :  { %5302 = vrot.lane.b32.xlu0 %v19197_v18, %s18214_s7 }
 0x444   :  { %5486 = vrot.lane.b32.xlu1 %v19240_v40, %s18214_s7 }
 0x447   :  { %5209 = vrot.lane.b32.xlu0 %v19452_v3, %s18214_s7 }
 0x448   :  { %5389 = vrot.lane.b32.xlu1 %v19462_v58, %s18214_s7 }
 0x44b   :  { %5393 = vrot.lane.b32.xlu0 %v19475_v54, %s18214_s7 }
 0x44c   :  { %5577 = vrot.lane.b32.xlu1 %v19497_v53, %s18214_s7 }
 0x44f   :  { %5300 = vrot.lane.b32.xlu0 %v19247_v19, %s18214_s7 }
 0x450   :  { %5480 = vrot.lane.b32.xlu1 %v19257_v47, %s18214_s7 }
 0x453   :  { %5484 = vrot.lane.b32.xlu0 %v19260_v28, %s18214_s7 }
 0x454   :  { %5668 = vrot.lane.b32.xlu1 %v19306_v26, %s18214_s7 }
 0x456   :  { %v3087_v23 = vpop.xlane.xlu1 %3086 }
 0x457   :  { %5391 = vrot.lane.b32.xlu0 %v19509_v51, %s18214_s7  ;;  %17607 = vrcp.f32 %v3087_v23  ;;  %v24043_v23 = vld [vmem:[#allocation85_spill] sm:$0xff] }
 0x458   :  { %5571 = vrot.lane.b32.xlu1 %v19513_v31, %s18214_s7  ;;  %v3084_v57 = vpop.xlane.xlu0 %3083  ;;  %v24073_v31 = vld [vmem:[#allocation60_spill] sm:$0xff] }
 0x459   :  { %17609 = vrcp.f32 %v3084_v57 }
 0x45b   :  { %5575 = vrot.lane.b32.xlu0 %v19517_v25, %s18214_s7 }
 0x45c   :  { %5759 = vrot.lane.b32.xlu1 %v19536_v5, %s18214_s7 }
 0x45e   :  { %v3093_v45 = vpop.xlane.xlu0 %3092 }
 0x45f   :  { %5482 = vrot.lane.b32.xlu0 %v19320_v50, %s18214_s7  ;;  %17611 = vrcp.f32 %v3093_v45  ;;  %v24044_v45 = vld [vmem:[#allocation86_spill] sm:$0xff]  ;;  %v24045_v50 = vld [vmem:[#allocation87_spill] sm:$0xff] }
 0x460   :  { %5662 = vrot.lane.b32.xlu1 %v24040_v33, %s18214_s7 }
 0x462   :  { %v3090_v7 = vpop.xlane.xlu0 %3089 }
 0x463   :  { %5666 = vrot.lane.b32.xlu0 %v24041_v11, %s18214_s7  ;;  %17613 = vrcp.f32 %v3090_v7 }
 0x464   :  { %v17608_v38 = vpop.eup %17607  ;;  %5850 = vrot.lane.b32.xlu1 %v24042_v61, %s18214_s7 }
 0x465   :  { %v3211_v39 = vmul.f32 %v17608_v38, %v19857_v0  ;;  %v20072_v0 = vld [vmem:[%s23648_s8] ss:$0 sm:$0xff]  ;;  %v24046_v38 = vld [vmem:[#allocation44_spill] sm:$0xff]  ;;  %s18215_s8 = smov 112  }
 0x466   :  { %v17610_v44 = vpop.eup %17609  ;;  %v3099_v43 = vpop.xlane.xlu1 %3098 }
 0x467   :  { %5573 = vrot.lane.b32.xlu0 %v24043_v23, %s18214_s7  ;;  %v3210_v57 = vmul.f32 %v17610_v44, %v19861_v16  ;;  %17615 = vrcp.f32 %v3099_v43  ;;  %v3243_v7 = vmax.f32 %v3211_v39, 1e-08  ;;  %v20076_v16 = vadd.f32 %v20072_v0, %v24046_v38  ;;  %v24048_v44 = vld [vmem:[#allocation90_spill] sm:$0xff]  ;;  %v24051_v38 = vld [vmem:[#allocation63_spill] sm:$0xff] }
 0x468   :  { %5753 = vrot.lane.b32.xlu1 %v24044_v45, %s18214_s7  ;;  %v24049_v39 = vld [vmem:[#allocation74_spill] sm:$0xff] }
 0x469   :  { %v3242_v33 = vmax.f32 %v3210_v57, 1e-08  ;;  %24047 = vst [vmem:[#allocation44_spill] sm:$0xff] %v20076_v16  ;;  %v24053_v23 = vld [vmem:[#allocation62_spill] sm:$0xff] }
 0x46a   :  { %v3096_v11 = vpop.xlane.xlu1 %3095 }
 0x46b   :  { %5757 = vrot.lane.b32.xlu0 %v24045_v50, %s18214_s7  ;;  %17617 = vrcp.f32 %v3096_v11  ;;  %16621 = vmatprep.mubr.msk.f32.mxu0 %vm2889_vm2, %v3242_v33  ;;  %v24050_v11 = vld [vmem:[#allocation61_spill] sm:$0xff] }
 0x46c   :  { %5941 = vrot.lane.b32.xlu1 %v24048_v44, %s18214_s7  ;;  %16622 = vmatmul.mubr.msk.f32.vlgmr.msra.gmra.mxu0 %vm2889_vm2, %v3243_v7  ;;  %v17612_v43 = vpop.eup %17611  ;;  %v24052_v50 = vld [vmem:[#allocation49_spill] sm:$0xff] }
 0x46d   :  { %16632 = vmatpush3.msra.mxu0 %v24049_v39  ;;  %v3213_v7 = vmul.f32 %v17612_v43, %v19867_v29  ;;  %v24058_v43 = vld [vmem:[#allocation100_spill] sm:$0xff] }
 0x46e   :  { %16633 = vmatprep.subr.mxu0 %v20076_v16  ;;  %v3105_v33 = vpop.xlane.xlu0 %3104 }
 0x46f   :  { %5664 = vrot.lane.b32.xlu0 %v24050_v11, %s18214_s7  ;;  %16634 = vmatpush3.msra.mxu0 %v20076_v16  ;;  %17619 = vrcp.f32 %v3105_v33  ;;  %v24054_v11 = vld [vmem:[#allocation95_spill] sm:$0xff]  ;;  %v3245_v5 = vmax.f32 %v3213_v7, 1e-08  ;;  %v24055_v33 = vld [vmem:[#allocation46_spill] sm:$0xff] }
 0x470   :  { %v17614_v57 = vpop.eup %17613  ;;  %5844 = vrot.lane.b32.xlu1 %v24051_v38, %s18214_s7  ;;  %16645 = vmatprep.subr.mxu0 %v24052_v50  ;;  %v20098_v38 = vadd.f32 %v20072_v0, %v24055_v33  ;;  %v24060_v7 = vld [vmem:[#allocation55_spill] sm:$0xff]  ;;  %v24061_v33 = vld [vmem:[#allocation70_spill] sm:$0xff] }
 0x471   :  { %v3212_v44 = vmul.f32 %v17614_v57, %v19872_v27  ;;  %v24057_v27 = vld [vmem:[#allocation93_spill] sm:$0xff] }
 0x472   :  { %v3102_v45 = vpop.xlane.xlu0 %3101  ;;  %24056 = vst [vmem:[#allocation46_spill] sm:$0xff] %v20098_v38 }
 0x473   :  { %5848 = vrot.lane.b32.xlu0 %v24053_v23, %s18214_s7  ;;  %17621 = vrcp.f32 %v3102_v45  ;;  %v3244_v61 = vmax.f32 %v3212_v44, 1e-08  ;;  %v24059_v44 = vld [vmem:[#allocation98_spill] sm:$0xff] }
 0x474   :  { %5939 = vrot.lane.b32.xlu1 %v24054_v11, %s18214_s7  ;;  %v17616_v25 = vpop.eup %17615  ;;  %v24062_v11 = vld [vmem:[#allocation72_spill] sm:$0xff] }
 0x475   :  { %16628 = vmatprep.mubr.msk.f32.mxu1 %vm2889_vm2, %v3244_v61  ;;  %v3215_v61 = vmul.f32 %v17616_v25, %v19877_v10  ;;  %v24063_v25 = vld [vmem:[#allocation50_spill] sm:$0xff] }
 0x476   :  { %v3111_v29 = vpop.xlane.xlu1 %3110  ;;  %16629 = vmatmul.mubr.msk.f32.vlgmr.msra.gmra.mxu1 %vm2889_vm2, %v3245_v5  ;;  %v20120_v10 = vadd.f32 %v20072_v0, %v24063_v25 }
 0x477   :  { %5755 = vrot.lane.b32.xlu0 %v24057_v27, %s18214_s7  ;;  %16639 = vmatpush3.msra.mxu1 %v24058_v43  ;;  %17623 = vrcp.f32 %v3111_v29 }
 0x478   :  { %v17618_v45 = vpop.eup %17617  ;;  %5937 = vrot.lane.b32.xlu1 %v24059_v44, %s18214_s7  ;;  %16640 = vmatprep.subr.mxu1 %v20098_v38  ;;  %v3247_v44 = vmax.f32 %v3215_v61, 1e-08  ;;  %24064 = vst [vmem:[#allocation50_spill] sm:$0xff] %v20120_v10  ;;  %v24066_v61 = vld [vmem:[#allocation59_spill] sm:$0xff] }
 0x479   :  { %16641 = vmatpush3.msra.mxu1 %v20098_v38  ;;  %v3214_v57 = vmul.f32 %v17618_v45, %v19882_v41  ;;  %v24065_v45 = vld [vmem:[#allocation94_spill] sm:$0xff] }
 0x47a   :  { %16652 = vmatprep.subr.mxu1 %v24060_v7  ;;  %v20111_v5 = vpop.xlane.xlu1 %3134 }
 0x47b   :  { %5846 = vrot.lane.b32.xlu0 %v24061_v33, %s18214_s7  ;;  %v3246_v27 = vmax.f32 %v3214_v57, 1e-08  ;;  %v24068_v33 = vld [vmem:[#allocation99_spill] sm:$0xff] }
 0x47c   :  { %6412 = vrot.lane.b32.xlu1 %v24062_v11, %s18214_s7  ;;  %v17620_v23 = vpop.eup %17619 }
 0x47d   :  { %16635 = vmatprep.mubr.msk.f32.mxu0 %vm2889_vm2, %v3246_v27  ;;  %v3217_v27 = vmul.f32 %v17620_v23, %v19887_v6  ;;  %v24069_v6 = vld [vmem:[#allocation56_spill] sm:$0xff] }
 0x47e   :  { %v3108_v41 = vpop.xlane.xlu1 %3107  ;;  %16636 = vmatmul.mubr.msk.f32.vlgmr.msra.gmra.mxu0 %vm2889_vm2, %v3247_v44  ;;  %v20140_v23 = vadd.f32 %v20072_v0, %v24069_v6 }
 0x47f   :  { %5935 = vrot.lane.b32.xlu0 %v24065_v45, %s18214_s7  ;;  %17625 = vrcp.f32 %v3108_v41  ;;  %16646 = vmatpush3.msra.mxu0 %v24052_v50  ;;  %v3117_v29 = vpop.xlane.xlu0 %3116  ;;  %v24067_v41 = vld [vmem:[#allocation68_spill] sm:$0xff] }
 0x480   :  { %v17622_v57 = vpop.eup %17621  ;;  %6592 = vrot.lane.b32.xlu1 %v24049_v39, %s18214_s7  ;;  %16647 = vmatprep.subr.mxu0 %v20120_v10  ;;  %17627 = vrcp.f32 %v3117_v29  ;;  %v3249_v39 = vmax.f32 %v3217_v27, 1e-08  ;;  %24070 = vst [vmem:[#allocation56_spill] sm:$0xff] %v20140_v23  ;;  %v24071_v29 = vld [vmem:[#allocation97_spill] sm:$0xff] }
 0x481   :  { %16648 = vmatpush3.msra.mxu0 %v20120_v10  ;;  %v3216_v44 = vmul.f32 %v17622_v57, %v19893_v2 }
 0x482   :  { %16659 = vmatprep.subr.mxu0 %v24066_v61  ;;  %v3132_v25 = vpop.xlane.xlu1 %3131 }
 0x483   :  { %6414 = vrot.lane.b32.xlu0 %v24067_v41, %s18214_s7  ;;  %v3114_v45 = vpop.xlane.xlu0 %3113  ;;  %v3248_v11 = vmax.f32 %v3216_v44, 1e-08 }
 0x484   :  { %6501 = vrot.lane.b32.xlu1 %v24068_v33, %s18214_s7  ;;  %17629 = vrcp.f32 %v3114_v45  ;;  %v17624_v45 = vpop.eup %17623 }
 0x485   :  { %16642 = vmatprep.mubr.msk.f32.mxu1 %vm2889_vm2, %v3248_v11  ;;  %v24072_v11 = vld [vmem:[#allocation64_spill] sm:$0xff]  ;;  %v3219_v27 = vmul.f32 %v17624_v45, %v19899_v37  ;;  %v20167_v37 = vadd.f32 %v20072_v0, %v24073_v31 }
 0x486   :  { %v20142_v2 = vpop.xlane.xlu1 %3146  ;;  %16643 = vmatmul.mubr.msk.f32.vlgmr.msra.gmra.mxu1 %vm2889_vm2, %v3249_v39 }
 0x487   :  { %6503 = vrot.lane.b32.xlu0 %v24071_v29, %s18214_s7  ;;  %16653 = vmatpush3.msra.mxu1 %v24060_v7  ;;  %v3251_v41 = vmax.f32 %v3219_v27, 1e-08  ;;  %24074 = vst [vmem:[#allocation60_spill] sm:$0xff] %v20167_v37  ;;  %v24080_v27 = vld [vmem:[#allocation71_spill] sm:$0xff] }
 0x488   :  { %6590 = vrot.lane.b32.xlu1 %v20076_v16, %s18214_s7  ;;  %16654 = vmatprep.subr.mxu1 %v20140_v23 }
 0x489   :  { %16655 = vmatpush3.msra.mxu1 %v20140_v23 }
 0x48a   :  { %16666 = vmatprep.subr.mxu1 %v24072_v11  ;;  %v3144_v57 = vpop.xlane.xlu1 %3143 }
 0x48b   :  { %6681 = vrot.lane.b32.xlu0 %v24058_v43, %s18214_s7 }
 0x48c   :  { %v17626_v39 = vpop.eup %17625  ;;  %6770 = vrot.lane.b32.xlu1 %v24052_v50, %s18214_s7 }
 0x48d   :  { %v3218_v44 = vmul.f32 %v17626_v39, %v19909_v8  ;;  %v17628_v6 = vpop.eup %17627 }
 0x48e   :  { %v3123_v16 = vpop.xlane.xlu1 %3122  ;;  %v3221_v50 = vmul.f32 %v17628_v6, %v19911_v17 }
 0x48f   :  { %6679 = vrot.lane.b32.xlu0 %v20098_v38, %s18214_s7  ;;  %v3250_v29 = vmax.f32 %v3218_v44, 1e-08 }
 0x490   :  { %6948 = vrot.lane.b32.xlu1 %v24066_v61, %s18214_s7  ;;  %v3129_v33 = vpop.xlane.xlu0 %3128 }
 0x491   :  { %v17630_v43 = vpop.eup %17629  ;;  %16649 = vmatprep.mubr.msk.f32.mxu0 %vm2889_vm2, %v3250_v29  ;;  %17631 = vrcp.f32 %v3129_v33  ;;  %v3253_v33 = vmax.f32 %v3221_v50, 1e-08 }
 0x492   :  { %v3159_v8 = vpop.xlane.xlu1 %3158  ;;  %16650 = vmatmul.mubr.msk.f32.vlgmr.msra.gmra.mxu0 %vm2889_vm2, %v3251_v41  ;;  %v3220_v45 = vmul.f32 %v17630_v43, %v19921_v35  ;;  %17633 = vrcp.f32 %v3123_v16  ;;  %v24075_v35 = vld [vmem:[#allocation67_spill] sm:$0xff]  ;;  %v24076_v41 = vld [vmem:[#allocation66_spill] sm:$0xff] }
 0x493   :  { %6768 = vrot.lane.b32.xlu0 %v20120_v10, %s18214_s7  ;;  %16660 = vmatpush3.msra.mxu0 %v24066_v61  ;;  %v20182_v16 = vadd.f32 %v20072_v0, %v24076_v41 }
 0x494   :  { %6946 = vrot.lane.b32.xlu1 %v20167_v37, %s18214_s7  ;;  %v3126_v17 = vpop.xlane.xlu0 %3125  ;;  %16661 = vmatprep.subr.mxu0 %v20167_v37  ;;  %v3252_v31 = vmax.f32 %v3220_v45, 1e-08  ;;  %v24081_v45 = vld [vmem:[#allocation76_spill] sm:$0xff] }
 0x495   :  { %17635 = vrcp.f32 %v3126_v17  ;;  %16662 = vmatpush3.msra.mxu0 %v20167_v37  ;;  %24077 = vst [vmem:[#allocation66_spill] sm:$0xff] %v20182_v16 }
 0x496   :  { %17637 = vrcp.f32 %v3132_v25  ;;  %16656 = vmatprep.mubr.msk.f32.mxu1 %vm2889_vm2, %v3252_v31  ;;  %16673 = vmatprep.subr.mxu0 %v24075_v35  ;;  %v3120_v43 = vpop.xlane.xlu1 %3119  ;;  %v24078_v25 = vld [vmem:[#allocation69_spill] sm:$0xff] }
 0x497   :  { %6859 = vrot.lane.b32.xlu0 %v24060_v7, %s18214_s7  ;;  %17639 = vrcp.f32 %v3120_v43  ;;  %16657 = vmatmul.mubr.msk.f32.vlgmr.msra.gmra.mxu1 %vm2889_vm2, %v3253_v33  ;;  %v20193_v29 = vadd.f32 %v20072_v0, %v24078_v25  ;;  %v24082_v43 = vld [vmem:[#allocation77_spill] sm:$0xff] }
 0x498   :  { %7126 = vrot.lane.b32.xlu1 %v24075_v35, %s18214_s7  ;;  %16667 = vmatpush3.msra.mxu1 %v24072_v11  ;;  %v3141_v50 = vpop.xlane.xlu0 %3140  ;;  %17641 = vrcp.f32 %v20111_v5  ;;  %v20208_v41 = vadd.f32 %v20072_v0, %v24082_v43 }
 0x499   :  { %16668 = vmatprep.subr.mxu1 %v20182_v16  ;;  %24079 = vst [vmem:[#allocation69_spill] sm:$0xff] %v20193_v29  ;;  %17643 = vrcp.f32 %v3141_v50 }
 0x49a   :  { %16669 = vmatpush3.msra.mxu1 %v20182_v16  ;;  %v3156_v39 = vpop.xlane.xlu1 %3155  ;;  %24083 = vst [vmem:[#allocation77_spill] sm:$0xff] %v20208_v41 }
 0x49b   :  { %6857 = vrot.lane.b32.xlu0 %v20140_v23, %s18214_s7  ;;  %16680 = vmatprep.subr.mxu1 %v24080_v27 }
 0x49c   :  { %7124 = vrot.lane.b32.xlu1 %v20193_v29, %s18214_s7  ;;  %v3138_v44 = vpop.xlane.xlu0 %3137 }
 0x49d   :  { %17645 = vrcp.f32 %v3138_v44 }
 0x49e   :  { %17647 = vrcp.f32 %v3144_v57  ;;  %v17632_v6 = vpop.eup %17631  ;;  %v3171_v5 = vpop.xlane.xlu1 %3170 }
 0x49f   :  { %7037 = vrot.lane.b32.xlu0 %v24072_v11, %s18214_s7  ;;  %v17634_v31 = vpop.eup %17633  ;;  %17649 = vrcp.f32 %v20142_v2  ;;  %v3225_v50 = vmul.f32 %v17632_v6, %v19946_v9 }
 0x4a0   :  { %7304 = vrot.lane.b32.xlu1 %v24081_v45, %s18214_s7  ;;  %v3153_v17 = vpop.xlane.xlu0 %3152  ;;  %17651 = vrcp.f32 %v3156_v39  ;;  %v3223_v23 = vmul.f32 %v17634_v31, %v19941_v49 }
 0x4a1   :  { %v3257_v6 = vmax.f32 %v3225_v50, 1e-08 }
 0x4a2   :  { %v17636_v33 = vpop.eup %17635  ;;  %v3168_v9 = vpop.xlane.xlu1 %3167 }
 0x4a3   :  { %v17638_v57 = vpop.eup %17637  ;;  %7035 = vrot.lane.b32.xlu0 %v20182_v16, %s18214_s7  ;;  %v3224_v25 = vmul.f32 %v17636_v33, %v19956_v21  ;;  %v24084_v16 = vld [vmem:[#allocation73_spill] sm:$0xff] }
 0x4a4   :  { %v17640_v44 = vpop.eup %17639  ;;  %7302 = vrot.lane.b32.xlu1 %v20208_v41, %s18214_s7  ;;  %v3150_v11 = vpop.xlane.xlu0 %3149  ;;  %v3226_v39 = vmul.f32 %v17638_v57, %v19919_v15  ;;  %v20225_v49 = vadd.f32 %v20072_v0, %v24084_v16  ;;  %v24087_v15 = vld [vmem:[#allocation84_spill] sm:$0xff] }
 0x4a5   :  { %17653 = vrcp.f32 %v3150_v11  ;;  %v3256_v43 = vmax.f32 %v3224_v25, 1e-08  ;;  %v3222_v2 = vmul.f32 %v17640_v44, %v19960_v62  ;;  %v17642_v33 = vpop.eup %17641  ;;  %v24086_v11 = vld [vmem:[#allocation83_spill] sm:$0xff]  ;;  %v20234_v50 = vadd.f32 %v20072_v0, %v24087_v15  ;;  %v24089_v44 = vld [vmem:[#allocation80_spill] sm:$0xff] }
 0x4a6   :  { %17655 = vrcp.f32 %v3153_v17  ;;  %24085 = vst [vmem:[#allocation73_spill] sm:$0xff] %v20225_v49  ;;  %v17644_v17 = vpop.eup %17643  ;;  %v3227_v25 = vmul.f32 %v17642_v33, %v19904_v56  ;;  %v24091_v33 = vld [vmem:[#allocation81_spill] sm:$0xff] }
 0x4a7   :  { %17657 = vrcp.f32 %v3159_v8  ;;  %7215 = vrot.lane.b32.xlu0 %v24080_v27, %s18214_s7  ;;  %16670 = vmatprep.mubr.msk.f32.mxu1 %vm2889_vm2, %v3256_v43  ;;  %v3254_v21 = vmax.f32 %v3222_v2, 1e-08  ;;  %v3255_v8 = vmax.f32 %v3223_v23, 1e-08  ;;  %24088 = vst [vmem:[#allocation84_spill] sm:$0xff] %v20234_v50  ;;  %v3229_v2 = vmul.f32 %v17644_v17, %v19965_v55 }
 0x4a8   :  { %7482 = vrot.lane.b32.xlu1 %v24086_v11, %s18214_s7  ;;  %16671 = vmatmul.mubr.msk.f32.vlgmr.msra.gmra.mxu1 %vm2889_vm2, %v3257_v6  ;;  %v3165_v62 = vpop.xlane.xlu0 %3164  ;;  %17659 = vrcp.f32 %v3168_v9  ;;  %v3258_v23 = vmax.f32 %v3226_v39, 1e-08  ;;  %v24090_v39 = vld [vmem:[#allocation91_spill] sm:$0xff] }
 0x4a9   :  { %16681 = vmatpush3.msra.mxu1 %v24080_v27  ;;  %16663 = vmatprep.mubr.msk.f32.mxu0 %vm2889_vm2, %v3254_v21  ;;  %17661 = vrcp.f32 %v3171_v5  ;;  %v3259_v5 = vmax.f32 %v3227_v25, 1e-08  ;;  %v3261_v21 = vmax.f32 %v3229_v2, 1e-08 }
 0x4aa   :  { %v17646_v31 = vpop.eup %17645  ;;  %16682 = vmatprep.subr.mxu1 %v20225_v49  ;;  %16664 = vmatmul.mubr.msk.f32.vlgmr.msra.gmra.mxu0 %vm2889_vm2, %v3255_v8  ;;  %v20261_v8 = vadd.f32 %v20072_v0, %v24091_v33 }
 0x4ab   :  { %v17648_v16 = vpop.eup %17647  ;;  %16683 = vmatpush3.msra.mxu1 %v20225_v49  ;;  %7213 = vrot.lane.b32.xlu0 %v20225_v49, %s18214_s7  ;;  %v3228_v57 = vmul.f32 %v17646_v31, %v19974_v20 }
 0x4ac   :  { %16694 = vmatprep.subr.mxu1 %v24089_v44  ;;  %7480 = vrot.lane.b32.xlu1 %v20234_v50, %s18214_s7  ;;  %v3162_v43 = vpop.xlane.xlu0 %3161  ;;  %v3230_v20 = vmul.f32 %v17648_v16, %v19935_v13  ;;  %v17650_v56 = vpop.eup %17649  ;;  %24092 = vst [vmem:[#allocation81_spill] sm:$0xff] %v20261_v8 }
 0x4ad   :  { %16674 = vmatpush3.msra.mxu0 %v24075_v35  ;;  %17663 = vrcp.f32 %v3162_v43  ;;  %16677 = vmatprep.mubr.msk.f32.mxu0 %vm2889_vm2, %v3258_v23  ;;  %v3260_v9 = vmax.f32 %v3228_v57, 1e-08  ;;  %v17652_v6 = vpop.eup %17651  ;;  %v3231_v31 = vmul.f32 %v17650_v56, %v19929_v36  ;;  %v24093_v43 = vld [vmem:[#allocation92_spill] sm:$0xff] }
 0x4ae   :  { %16675 = vmatprep.subr.mxu0 %v20193_v29  ;;  %17665 = vrcp.f32 %v3165_v62  ;;  %v3262_v62 = vmax.f32 %v3230_v20, 1e-08  ;;  %v3234_v16 = vmul.f32 %v17652_v6, %v19969_v34  ;;  %v20276_v36 = vadd.f32 %v20072_v0, %v24093_v43  ;;  %v24095_v56 = vld [vmem:[#allocation88_spill] sm:$0xff] }
 0x4af   :  { %16676 = vmatpush3.msra.mxu0 %v20193_v29  ;;  %7393 = vrot.lane.b32.xlu0 %v24089_v44, %s18214_s7  ;;  %v3263_v34 = vmax.f32 %v3231_v31, 1e-08 }
 0x4b0   :  { %16684 = vmatprep.mubr.msk.f32.mxu1 %vm2889_vm2, %v3260_v9  ;;  %16687 = vmatprep.subr.mxu0 %v24081_v45  ;;  %v3177_v55 = vpop.xlane.xlu1 %3176  ;;  %24094 = vst [vmem:[#allocation92_spill] sm:$0xff] %v20276_v36 }
 0x4b1   :  { %7660 = vrot.lane.b32.xlu1 %v24090_v39, %s18214_s7  ;;  %16678 = vmatmul.mubr.msk.f32.vlgmr.msra.gmra.mxu0 %vm2889_vm2, %v3259_v5  ;;  %v3266_v5 = vmax.f32 %v3234_v16, 1e-08 }
 0x4b2   :  { %v17654_v13 = vpop.eup %17653  ;;  %16685 = vmatmul.mubr.msk.f32.vlgmr.msra.gmra.mxu1 %vm2889_vm2, %v3261_v21  ;;  %16688 = vmatpush3.msra.mxu0 %v24081_v45  ;;  %v3174_v17 = vpop.xlane.xlu0 %3173 }
 0x4b3   :  { %v17656_v15 = vpop.eup %17655  ;;  %16695 = vmatpush3.msra.mxu1 %v24089_v44  ;;  %16689 = vmatprep.subr.mxu0 %v20208_v41  ;;  %17667 = vrcp.f32 %v3174_v17  ;;  %v3232_v23 = vmul.f32 %v17654_v13, %v19992_v32 }
 0x4b4   :  { %v17658_v57 = vpop.eup %17657  ;;  %16691 = vmatprep.mubr.msk.f32.mxu0 %vm2889_vm2, %v3262_v62  ;;  %16696 = vmatprep.subr.mxu1 %v20261_v8  ;;  %v20272_v25 = vpop.permute.xlu1 %5207  ;;  %v3233_v20 = vmul.f32 %v17656_v15, %v19983_v46  ;;  %17669 = vrcp.f32 %v3177_v55  ;;  %v24096_v62 = vld [vmem:[#allocation19_spill] sm:$0xff]  ;;  %v24097_v15 = vld [vmem:[#allocation89_spill] sm:$0xff] }
 0x4b5   :  { %16690 = vmatpush3.msra.mxu0 %v20208_v41  ;;  %16697 = vmatpush3.msra.mxu1 %v20261_v8  ;;  %v3264_v2 = vmax.f32 %v3232_v23, 1e-08  ;;  %v17660_v9 = vpop.eup %17659  ;;  %v3235_v6 = vmul.f32 %v17658_v57, %v19951_v63 }
 0x4b6   :  { %7391 = vrot.lane.b32.xlu0 %v20261_v8, %s18214_s7  ;;  %16701 = vmatprep.subr.mxu0 %v24086_v11  ;;  %v20283_v32 = vpop.permute.xlu0 %5118  ;;  %v17662_v13 = vpop.eup %17661  ;;  %v3238_v46 = vmul.f32 %v17660_v9, %v19988_v12  ;;  %v3265_v63 = vmax.f32 %v3233_v20, 1e-08  ;;  %v20308_v12 = vadd.f32 %v20072_v0, %v24097_v15  ;;  %v24099_v20 = vld [vmem:[#allocation96_spill] sm:$0xff]  ;;  %v24103_v15 = vld [vmem:[#allocation114_spill] sm:$0xff] }
 0x4b7   :  { %16708 = vmatprep.subr.mxu1 %v24095_v56  ;;  %7658 = vrot.lane.b32.xlu1 %v20276_v36, %s18214_s7  ;;  %v3267_v17 = vmax.f32 %v3235_v6, 1e-08  ;;  %v3239_v43 = vmul.f32 %v17662_v13, %v19978_v24  ;;  %v24100_v13 = vld [vmem:[#allocation117_spill] sm:$0xff] }
 0x4b8   :  { %16692 = vmatmul.mubr.msk.f32.vlgmr.msra.gmra.mxu0 %vm2889_vm2, %v3263_v34  ;;  %16698 = vmatprep.mubr.msk.f32.mxu1 %vm2889_vm2, %v3264_v2  ;;  %v20292_v21 = vpop.permute.xlu1 %5395  ;;  %24098 = vst [vmem:[#allocation89_spill] sm:$0xff] %v20308_v12  ;;  %v3270_v57 = vmax.f32 %v3238_v46, 1e-08  ;;  %v24101_v46 = vld [vmem:[#allocation21_spill] sm:$0xff] }
 0x4b9   :  { %16702 = vmatpush3.msra.mxu0 %v24086_v11  ;;  %16705 = vmatprep.mubr.msk.f32.mxu0 %vm2889_vm2, %v3266_v5  ;;  %v3271_v5 = vmax.f32 %v3239_v43, 1e-08  ;;  %v24106_v43 = vld [vmem:[#allocation22_spill] sm:$0xff] }
 0x4ba   :  { %v17664_v55 = vpop.eup %17663  ;;  %16703 = vmatprep.subr.mxu0 %v20234_v50  ;;  %7571 = vrot.lane.b32.xlu0 %v24095_v56, %s18214_s7  ;;  %v20300_v33 = vpop.permute.xlu0 %5302 }
 0x4bb   :  { %16704 = vmatpush3.msra.mxu0 %v20234_v50  ;;  %7840 = vrot.lane.b32.xlu1 %v24096_v62, %s18215_s8  ;;  %v3236_v31 = vmul.f32 %v17664_v55, %v20000_v48  ;;  %v17666_v23 = vpop.eup %17665 }
 0x4bc   :  { %16715 = vmatprep.subr.mxu0 %v24090_v39  ;;  %16699 = vmatmul.mubr.msk.f32.vlgmr.msra.gmra.mxu1 %vm2889_vm2, %v3265_v63  ;;  %v20312_v16 = vpop.permute.xlu1 %5298  ;;  %v3237_v24 = vmul.f32 %v17666_v23, %v19996_v22  ;;  %v24104_v23 = vld [vmem:[#allocation101_spill] sm:$0xff] }
 0x4bd   :  { %16706 = vmatmul.mubr.msk.f32.vlgmr.msra.gmra.mxu0 %vm2889_vm2, %v3267_v17  ;;  %16709 = vmatpush3.msra.mxu1 %v24095_v56  ;;  %v3268_v2 = vmax.f32 %v3236_v31, 1e-08  ;;  %v24102_v17 = vld [vmem:[#allocation102_spill] sm:$0xff] }
 0x4be   :  { %16716 = vmatpush3.msra.mxu0 %v24090_v39  ;;  %16710 = vmatprep.subr.mxu1 %v20308_v12  ;;  %v20319_v48 = vpop.permute.xlu0 %5209 }
 0x4bf   :  { %16717 = vmatprep.subr.mxu0 %v20276_v36  ;;  %16719 = vmatprep.mubr.msk.f32.mxu0 %vm2889_vm2, %v3270_v57  ;;  %v20352_v57 = vadd.f32 %v20072_v0, %v24104_v23 }
 0x4c0   :  { %v17668_v9 = vpop.eup %17667  ;;  %16711 = vmatpush3.msra.mxu1 %v20308_v12  ;;  %16718 = vmatpush3.msra.mxu0 %v20276_v36  ;;  %v20325_v34 = vpop.permute.xlu1 %5486 }
 0x4c1   :  { %7569 = vrot.lane.b32.xlu0 %v20308_v12, %s18214_s7  ;;  %16722 = vmatprep.subr.mxu1 %v24099_v20  ;;  %v3240_v6 = vmul.f32 %v17668_v9, %v20008_v14  ;;  %v17670_v63 = vpop.eup %17669  ;;  %v3269_v14 = vmax.f32 %v3237_v24, 1e-08  ;;  %24105 = vst [vmem:[#allocation117_spill] sm:$0xff] %v20352_v57  ;;  %v24107_v24 = vld [vmem:[#allocation118_spill] sm:$0xff]  ;;  %v24134_v12 = vld [vmem:[#allocation112_spill] sm:$0xff] }
 0x4c2   :  { %16729 = vmatprep.subr.msk.mxu0 %vm1496_vm1, %v24100_v13  ;;  %7838 = vrot.lane.b32.xlu1 %v24101_v46, %s18215_s8  ;;  %v20336_v55 = vpop.permute.xlu0 %5393  ;;  %v3241_v9 = vmul.f32 %v17670_v63, %v20004_v60  ;;  %v24109_v60 = vld [vmem:[#allocation105_spill] sm:$0xff]  ;;  %v24111_v63 = vld [vmem:[#allocation104_spill] sm:$0xff] }
 0x4c3   :  { %16720 = vmatmul.mubr.msk.f32.vlgmr.msra.gmra.mxu0 %vm2889_vm2, %v3271_v5  ;;  %16712 = vmatprep.mubr.msk.f32.mxu1 %vm2889_vm2, %v3268_v2  ;;  %v3272_v22 = vmax.f32 %v3240_v6, 1e-08  ;;  %v24108_v5 = vld [vmem:[#allocation116_spill] sm:$0xff] }
 0x4c4   :  { %16730 = vmatpush3.xpose.msk.msra.mxu0 %vm1496_vm1, %v24100_v13  ;;  %16733 = vmatprep.mubr.msk.f32.mxu0 %vm1496_vm1, %v24102_v17  ;;  %v20344_v31 = vpop.permute.xlu1 %5389  ;;  %v24110_v13 = vld [vmem:[#allocation29_spill] sm:$0xff]  ;;  %v24133_v46 = vld [vmem:[#allocation40_spill] sm:$0xff] }
 0x4c5   :  { %16731 = vmatprep.subr.msk.mxu0 %vm1496_vm1, %v24103_v15  ;;  %7749 = vrot.lane.b32.xlu0 %v24099_v20, %s18214_s7 }
 0x4c6   :  { %7834 = vrot.lane.b32.xlu1 %v24106_v43, %s18215_s8  ;;  %16713 = vmatmul.mubr.msk.f32.vlgmr.msra.gmra.mxu1 %vm2889_vm2, %v3269_v14  ;;  %v20357_v2 = vpop.permute.xlu0 %5300  ;;  %v24112_v14 = vld [vmem:[#allocation121_spill] sm:$0xff]  ;;  %v24127_v43 = vld [vmem:[#allocation123_spill] sm:$0xff] }
 0x4c7   :  { %16723 = vmatpush3.msra.mxu1 %v24099_v20  ;;  %16726 = vmatprep.mubr.msk.f32.mxu1 %vm2889_vm2, %v3272_v22  ;;  %v3273_v22 = vmax.f32 %v3241_v9, 1e-08  ;;  %v24114_v9 = vld [vmem:[#allocation119_spill] sm:$0xff]  ;;  %v24131_v20 = vld [vmem:[#allocation124_spill] sm:$0xff] }
 0x4c8   :  { %16732 = vmatpush3.xpose.msk.msra.mxu0 %vm1496_vm1, %v24103_v15  ;;  %16724 = vmatprep.subr.mxu1 %v20352_v57  ;;  %v20365_v0 = vpop.permute.xlu1 %5577  ;;  %v24113_v15 = vld [vmem:[#allocation24_spill] sm:$0xff] }
 0x4c9   :  { %16743 = vmatprep.subr.msk.mxu0 %vm1496_vm1, %v24107_v24  ;;  %16725 = vmatpush3.msra.mxu1 %v20352_v57 }
 0x4ca   :  { %7747 = vrot.lane.b32.xlu0 %v20352_v57, %s18214_s7  ;;  %16736 = vmatprep.subr.msk.mxu1 %vm1496_vm1, %v24108_v5  ;;  %v20374_v6 = vpop.permute.xlu0 %5484  ;;  %v24124_v57 = vld [vmem:[#allocation125_spill] sm:$0xff] }
 0x4cb   :  { %16734 = vmatmul.mubr.msk.f32.vlgmr.msra.gmra.mxu0 %vm1496_vm1, %v24109_v60  ;;  %8022 = vrot.lane.b32.xlu1 %v24110_v13, %s18215_s8  ;;  %v24116_v60 = vld [vmem:[#allocation25_spill] sm:$0xff] }
 0x4cc   :  { %16744 = vmatpush3.xpose.msk.msra.mxu0 %vm1496_vm1, %v24107_v24  ;;  %16747 = vmatprep.mubr.msk.f32.mxu0 %vm1496_vm1, %v24111_v63  ;;  %v20384_v17 = vpop.permute.xlu1 %5480  ;;  %v24115_v24 = vld [vmem:[#allocation103_spill] sm:$0xff]  ;;  %v24118_v63 = vld [vmem:[#allocation26_spill] sm:$0xff] }
 0x4cd   :  { %16745 = vmatprep.subr.msk.mxu0 %vm1496_vm1, %v24112_v14  ;;  %16727 = vmatmul.mubr.msk.f32.vlgmr.msra.gmra.mxu1 %vm2889_vm2, %v3273_v22 }
 0x4ce   :  { %16737 = vmatpush3.xpose.msk.msra.mxu1 %vm1496_vm1, %v24108_v5  ;;  %7931 = vrot.lane.b32.xlu0 %v24113_v15, %s18215_s8  ;;  %v20393_v23 = vpop.permute.xlu0 %5391  ;;  %v24117_v5 = vld [vmem:[#allocation122_spill] sm:$0xff] }
 0x4cf   :  { %16738 = vmatprep.subr.msk.mxu1 %vm1496_vm1, %v24114_v9  ;;  %16740 = vmatprep.mubr.msk.f32.mxu1 %vm1496_vm1, %v24115_v24  ;;  %v24119_v24 = vld [vmem:[#allocation109_spill] sm:$0xff] }
 0x4d0   :  { %7925 = vrot.lane.b32.xlu1 %v24116_v60, %s18215_s8  ;;  %16746 = vmatpush3.xpose.msk.msra.mxu0 %vm1496_vm1, %v24112_v14  ;;  %v20403_v22 = vpop.permute.xlu1 %5668  ;;  %v24120_v60 = vld [vmem:[#allocation120_spill] sm:$0xff]  ;;  %v24121_v14 = vld [vmem:[#allocation35_spill] sm:$0xff] }
 0x4d1   :  { %16757 = vmatprep.subr.msk.mxu0 %vm1496_vm1, %v24117_v5 }
 0x4d2   :  { %16739 = vmatpush3.xpose.msk.msra.mxu1 %vm1496_vm1, %v24114_v9  ;;  %7929 = vrot.lane.b32.xlu0 %v24118_v63, %s18215_s8  ;;  %v20411_v13 = vpop.permute.xlu0 %5575  ;;  %v24122_v9 = vld [vmem:[#allocation108_spill] sm:$0xff]  ;;  %v24123_v63 = vld [vmem:[#allocation107_spill] sm:$0xff] }
 0x4d3   :  { %16748 = vmatmul.mubr.msk.f32.vlgmr.msra.gmra.mxu0 %vm1496_vm1, %v24119_v24  ;;  %16750 = vmatprep.subr.msk.mxu1 %vm1496_vm1, %v24120_v60 }
 0x4d4   :  { %8113 = vrot.lane.b32.xlu1 %v24121_v14, %s18215_s8  ;;  %16758 = vmatpush3.xpose.msk.msra.mxu0 %vm1496_vm1, %v24117_v5  ;;  %v20421_v15 = vpop.permute.xlu1 %5571  ;;  %v24125_v14 = vld [vmem:[#allocation106_spill] sm:$0xff]  ;;  %v24126_v5 = vld [vmem:[#allocation20_spill] sm:$0xff] }
 0x4d5   :  { %16761 = vmatprep.mubr.msk.f32.mxu0 %vm1496_vm1, %v24122_v9  ;;  %16741 = vmatmul.mubr.msk.f32.vlgmr.msra.gmra.mxu1 %vm1496_vm1, %v24123_v63  ;;  %v24128_v9 = vld [vmem:[#allocation28_spill] sm:$0xff] }
 0x4d6   :  { %16759 = vmatprep.subr.msk.mxu0 %vm1496_vm1, %v24124_v57  ;;  %16751 = vmatpush3.xpose.msk.msra.mxu1 %vm1496_vm1, %v24120_v60  ;;  %v20431_v24 = vpop.permute.xlu0 %5482  ;;  %v24129_v60 = vld [vmem:[#allocation126_spill] sm:$0xff] }
 0x4d7   :  { %16754 = vmatprep.mubr.msk.f32.mxu1 %vm1496_vm1, %v24125_v14  ;;  %7836 = vrot.lane.b32.xlu0 %v24126_v5, %s18215_s8  ;;  %v24130_v5 = vld [vmem:[#allocation32_spill] sm:$0xff] }
 0x4d8   :  { %16752 = vmatprep.subr.msk.mxu1 %vm1496_vm1, %v24127_v43  ;;  %8016 = vrot.lane.b32.xlu1 %v24128_v9, %s18215_s8  ;;  %v20441_v63 = vpop.permute.xlu1 %5759  ;;  %v24132_v9 = vld [vmem:[#allocation113_spill] sm:$0xff] }
 0x4d9   :  { %16760 = vmatpush3.xpose.msk.msra.mxu0 %vm1496_vm1, %v24124_v57 }
 0x4da   :  { %16771 = vmatprep.subr.msk.mxu0 %vm1496_vm1, %v24129_v60  ;;  %16753 = vmatpush3.xpose.msk.msra.mxu1 %vm1496_vm1, %v24127_v43  ;;  %v20449_v14 = vpop.permute.xlu0 %5666  ;;  %v24135_v43 = vld [vmem:[#allocation111_spill] sm:$0xff] }
 0x4db   :  { %8020 = vrot.lane.b32.xlu0 %v24130_v5, %s18215_s8  ;;  %16764 = vmatprep.subr.msk.mxu1 %vm1496_vm1, %v24131_v20  ;;  %v24136_v5 = vld [vmem:[#allocation129_spill] sm:$0xff] }
 0x4dc   :  { %16762 = vmatmul.mubr.msk.f32.vlgmr.msra.gmra.mxu0 %vm1496_vm1, %v24132_v9  ;;  %8204 = vrot.lane.b32.xlu1 %v24133_v46, %s18215_s8  ;;  %v5663_v57 = vpop.permute.xlu1 %5662  ;;  %v24137_v9 = vld [vmem:[#allocation110_spill] sm:$0xff]  ;;  %v24138_v46 = vld [vmem:[#allocation23_spill] sm:$0xff] }
 0x4dd   :  { %16772 = vmatpush3.xpose.msk.msra.mxu0 %vm1496_vm1, %v24129_v60  ;;  %16775 = vmatprep.mubr.msk.f32.mxu0 %vm1496_vm1, %v24134_v12  ;;  %v24139_v60 = vld [vmem:[#allocation127_spill] sm:$0xff] }
 0x4de   :  { %16755 = vmatmul.mubr.msk.f32.vlgmr.msra.gmra.mxu1 %vm1496_vm1, %v24135_v43  ;;  %16773 = vmatprep.subr.msk.mxu0 %vm1496_vm1, %v24136_v5  ;;  %v20467_v62 = vpop.permute.xlu0 %5573  ;;  %v24140_v12 = vld [vmem:[#allocation31_spill] sm:$0xff] }
 0x4df   :  { %16765 = vmatpush3.xpose.msk.msra.mxu1 %vm1496_vm1, %v24131_v20  ;;  %16768 = vmatprep.mubr.msk.f32.mxu1 %vm1496_vm1, %v24137_v9  ;;  %v24141_v9 = vld [vmem:[#allocation38_spill] sm:$0xff] }
 0x4e0   :  { %7927 = vrot.lane.b32.xlu0 %v24138_v46, %s18215_s8  ;;  %16766 = vmatprep.subr.msk.mxu1 %vm1496_vm1, %v24139_v60  ;;  %v20481_v43 = vpop.permute.xlu1 %5850 }
 0x4e1   :  { %8107 = vrot.lane.b32.xlu1 %v24140_v12, %s18215_s8  ;;  %16774 = vmatpush3.xpose.msk.msra.mxu0 %vm1496_vm1, %v24136_v5  ;;  %v24142_v12 = vld [vmem:[#allocation128_spill] sm:$0xff]  ;;  %v24143_v5 = vld [vmem:[#allocation43_spill] sm:$0xff] }
 0x4e2   :  { %16785 = vmatprep.subr.msk.mxu0 %vm1496_vm1, %v20036_v59  ;;  %v20485_v20 = vpop.permute.xlu0 %5757 }
 0x4e3   :  { %16767 = vmatpush3.xpose.msk.msra.mxu1 %vm1496_vm1, %v24139_v60  ;;  %v24144_v60 = vld [vmem:[#allocation115_spill] sm:$0xff] }
 0x4e4   :  { %8111 = vrot.lane.b32.xlu0 %v24141_v9, %s18215_s8  ;;  %16776 = vmatmul.mubr.msk.f32.vlgmr.msra.gmra.mxu0 %vm1496_vm1, %v20283_v32  ;;  %v5754_v32 = vpop.permute.xlu1 %5753 }
 0x4e5   :  { %16778 = vmatprep.subr.msk.mxu1 %vm1496_vm1, %v24142_v12  ;;  %8295 = vrot.lane.b32.xlu1 %v24143_v5, %s18215_s8  ;;  %v24145_v5 = vld [vmem:[#allocation27_spill] sm:$0xff] }
 0x4e6   :  { %16786 = vmatpush3.xpose.msk.msra.mxu0 %vm1496_vm1, %v20036_v59  ;;  %16789 = vmatprep.mubr.msk.f32.mxu0 %vm1496_vm1, %v20312_v16  ;;  %v5665_v46 = vpop.permute.xlu0 %5664  ;;  %v24146_v59 = vld [vmem:[#allocation34_spill] sm:$0xff] }
 0x4e7   :  { %16769 = vmatmul.mubr.msk.f32.vlgmr.msra.gmra.mxu1 %vm1496_vm1, %v24144_v60  ;;  %16787 = vmatprep.subr.msk.mxu0 %vm1496_vm1, %v20300_v33  ;;  %v24148_v60 = vld [vmem:[#allocation47_spill] sm:$0xff] }
 0x4e8   :  { %16779 = vmatpush3.xpose.msk.msra.mxu1 %vm1496_vm1, %v24142_v12  ;;  %16782 = vmatprep.mubr.msk.f32.mxu1 %vm1496_vm1, %v20272_v25  ;;  %v24147_v25 = vld [vmem:[#allocation42_spill] sm:$0xff]  ;;  %v5942_v12 = vpop.permute.xlu1 %5941 }
 0x4e9   :  { %8018 = vrot.lane.b32.xlu0 %v24145_v5, %s18215_s8  ;;  %16780 = vmatprep.subr.msk.mxu1 %vm1496_vm1, %v20040_v1 }
 0x4ea   :  { %8198 = vrot.lane.b32.xlu1 %v24146_v59, %s18215_s8  ;;  %16788 = vmatpush3.xpose.msk.msra.mxu0 %vm1496_vm1, %v20300_v33  ;;  %v5849_v16 = vpop.permute.xlu0 %5848  ;;  %v24149_v33 = vld [vmem:[#allocation30_spill] sm:$0xff] }
 0x4eb   :  { %16799 = vmatprep.subr.msk.mxu0 %vm1496_vm1, %v20325_v34 }
 0x4ec   :  { %16781 = vmatpush3.xpose.msk.msra.mxu1 %vm1496_vm1, %v20040_v1 }
 0x4ed   :  { %8202 = vrot.lane.b32.xlu0 %v24147_v25, %s18215_s8  ;;  %16790 = vmatmul.mubr.msk.f32.vlgmr.msra.gmra.mxu0 %vm1496_vm1, %v20357_v2  ;;  %v24152_v2 = vld [vmem:[#allocation57_spill] sm:$0xff] }
 0x4ee   :  { %16792 = vmatprep.subr.msk.mxu1 %vm1496_vm1, %v20292_v21  ;;  %8386 = vrot.lane.b32.xlu1 %v24148_v60, %s18215_s8  ;;  %v5756_v1 = vpop.permute.xlu0 %5755 }
 0x4ef   :  { %16800 = vmatpush3.xpose.msk.msra.mxu0 %vm1496_vm1, %v20325_v34  ;;  %16803 = vmatprep.mubr.msk.f32.mxu0 %vm1496_vm1, %v20384_v17  ;;  %v24150_v34 = vld [vmem:[#allocation37_spill] sm:$0xff]  ;;  %v24154_v17 = vld [vmem:[#allocation39_spill] sm:$0xff] }
 0x4f0   :  { %16783 = vmatmul.mubr.msk.f32.vlgmr.msra.gmra.mxu1 %vm1496_vm1, %v20319_v48  ;;  %16801 = vmatprep.subr.msk.mxu0 %vm1496_vm1, %v20374_v6  ;;  %v5845_v48 = vpop.permute.xlu1 %5844 }
 0x4f1   :  { %16793 = vmatpush3.xpose.msk.msra.mxu1 %vm1496_vm1, %v20292_v21  ;;  %16796 = vmatprep.mubr.msk.f32.mxu1 %vm1496_vm1, %v20344_v31  ;;  %v24151_v21 = vld [vmem:[#allocation45_spill] sm:$0xff] }
 0x4f2   :  { %8109 = vrot.lane.b32.xlu0 %v24149_v33, %s18215_s8  ;;  %16794 = vmatprep.subr.msk.mxu1 %vm1496_vm1, %v20336_v55  ;;  %v5847_v31 = vpop.permute.xlu0 %5846 }
 0x4f3   :  { %8289 = vrot.lane.b32.xlu1 %v24150_v34, %s18215_s8  ;;  %16802 = vmatpush3.xpose.msk.msra.mxu0 %vm1496_vm1, %v20374_v6  ;;  %v24153_v6 = vld [vmem:[#allocation33_spill] sm:$0xff] }
 0x4f4   :  { %16813 = vmatprep.subr.msk.mxu0 %vm1496_vm1, %v20403_v22 }
 0x4f5   :  { %16795 = vmatpush3.xpose.msk.msra.mxu1 %vm1496_vm1, %v20336_v55  ;;  %v5940_v55 = vpop.permute.xlu1 %5939 }
 0x4f6   :  { %8293 = vrot.lane.b32.xlu0 %v24151_v21, %s18215_s8  ;;  %16804 = vmatmul.mubr.msk.f32.vlgmr.msra.gmra.mxu0 %vm1496_vm1, %v20431_v24 }
 0x4f7   :  { %16806 = vmatprep.subr.msk.mxu1 %vm1496_vm1, %v20365_v0  ;;  %8477 = vrot.lane.b32.xlu1 %v24152_v2, %s18215_s8 }
 0x4f8   :  { %16814 = vmatpush3.xpose.msk.msra.mxu0 %vm1496_vm1, %v20403_v22  ;;  %16817 = vmatprep.mubr.msk.f32.mxu0 %vm1496_vm1, %v5663_v57 }
 0x4f9   :  { %16797 = vmatmul.mubr.msk.f32.vlgmr.msra.gmra.mxu1 %vm1496_vm1, %v20393_v23  ;;  %16815 = vmatprep.subr.msk.mxu0 %vm1496_vm1, %v20449_v14  ;;  %v5936_v23 = vpop.permute.xlu0 %5935 }
 0x4fa   :  { %16807 = vmatpush3.xpose.msk.msra.mxu1 %vm1496_vm1, %v20365_v0  ;;  %16810 = vmatprep.mubr.msk.f32.mxu1 %vm1496_vm1, %v20421_v15  ;;  %v24155_v0 = vld [vmem:[#allocation54_spill] sm:$0xff]  ;;  %v5938_v15 = vpop.permute.xlu1 %5937 }
 0x4fb   :  { %8200 = vrot.lane.b32.xlu0 %v24153_v6, %s18215_s8  ;;  %16808 = vmatprep.subr.msk.mxu1 %vm1496_vm1, %v20411_v13 }
 0x4fc   :  { %8380 = vrot.lane.b32.xlu1 %v24154_v17, %s18215_s8  ;;  %16816 = vmatpush3.xpose.msk.msra.mxu0 %vm1496_vm1, %v20449_v14 }
 0x4fd   :  { %16827 = vmatprep.subr.msk.mxu0 %vm1496_vm1, %v20481_v43 }
 0x4fe   :  { %16809 = vmatpush3.xpose.msk.msra.mxu1 %vm1496_vm1, %v20411_v13  ;;  %v6415_v13 = vpop.permute.xlu0 %6414  ;;  %v6413_v22 = vpop.permute.xlu1 %6412 }
 0x4ff   :  { %8384 = vrot.lane.b32.xlu0 %v24155_v0, %s18215_s8  ;;  %16818 = vmatmul.mubr.msk.f32.vlgmr.msra.gmra.mxu0 %vm1496_vm1, %v5665_v46  ;;  %v24156_v46 = vld [vmem:[#allocation36_spill] sm:$0xff] }
 0x500   :  { %16820 = vmatprep.subr.msk.mxu1 %vm1496_vm1, %v20441_v63  ;;  %16828 = vmatpush3.xpose.msk.msra.mxu0 %vm1496_vm1, %v20481_v43 }
 0x501   :  { %16831 = vmatprep.mubr.msk.f32.mxu0 %vm1496_vm1, %v5845_v48  ;;  %16811 = vmatmul.mubr.msk.f32.vlgmr.msra.gmra.mxu1 %vm1496_vm1, %v20467_v62 }
 0x502   :  { %16829 = vmatprep.subr.msk.mxu0 %vm1496_vm1, %v5849_v16  ;;  %16821 = vmatpush3.xpose.msk.msra.mxu1 %vm1496_vm1, %v20441_v63  ;;  %v20610_v62 = vpop.permute.xlu1 %6592  ;;  %v6504_v24 = vpop.permute.xlu0 %6503 }
 0x503   :  { %16824 = vmatprep.mubr.msk.f32.mxu1 %vm1496_vm1, %v5754_v32  ;;  %8291 = vrot.lane.b32.xlu0 %v24156_v46, %s18215_s8 }
 0x504   :  { %16822 = vmatprep.subr.msk.mxu1 %vm1496_vm1, %v20485_v20  ;;  %16830 = vmatpush3.xpose.msk.msra.mxu0 %vm1496_vm1, %v5849_v16 }
 0x505   :  { %16841 = vmatprep.subr.mxu0 %v6415_v13 }
 0x506   :  { %16823 = vmatpush3.xpose.msk.msra.mxu1 %vm1496_vm1, %v20485_v20  ;;  %v6502_v63 = vpop.permute.xlu1 %6501  ;;  %v20616_v14 = vpop.permute.xlu0 %6681 }
 0x507   :  { %16832 = vmatmul.mubr.msk.f32.vlgmr.msra.gmra.mxu0 %vm1496_vm1, %v5847_v31  ;;  %16834 = vmatprep.subr.msk.mxu1 %vm1496_vm1, %v5942_v12  ;;  %24157 = vst [vmem:[#allocation102_spill] sm:$0xff] %v20616_v14 }
 0x508   :  { %16842 = vmatpush3.msra.mxu0 %v6415_v13 }
 0x509   :  { %16825 = vmatmul.mubr.msk.f32.vlgmr.msra.gmra.mxu1 %vm1496_vm1, %v5756_v1  ;;  %16843 = vmatprep.subr.mxu0 %v6413_v22 }
 0x50a   :  { %16835 = vmatpush3.xpose.msk.msra.mxu1 %vm1496_vm1, %v5942_v12  ;;  %16838 = vmatprep.mubr.msk.f32.mxu1 %vm1496_vm1, %v5936_v23 }
 0x50b   :  { %16844 = vmatpush3.msra.mxu0 %v6413_v22  ;;  %16836 = vmatprep.subr.msk.mxu1 %vm1496_vm1, %v5940_v55 }
 0x50c   :  { %16855 = vmatprep.subr.mxu0 %v20610_v62 }
 0x50e   :  { %16837 = vmatpush3.xpose.msk.msra.mxu1 %vm1496_vm1, %v5940_v55 }
 0x50f   :  { %16848 = vmatprep.subr.mxu1 %v6504_v24 }
 0x511   :  { %16839 = vmatmul.mubr.msk.f32.vlgmr.msra.gmra.mxu1 %vm1496_vm1, %v5938_v15 }
 0x512   :  { %16849 = vmatpush3.msra.mxu1 %v6504_v24 }
 0x513   :  { %16850 = vmatprep.subr.mxu1 %v6502_v63 }
 0x514   :  { %16851 = vmatpush3.msra.mxu1 %v6502_v63 }
 0x515   :  { %16862 = vmatprep.subr.mxu1 %v20616_v14 }
 0x52c   :  { %v20619_v57 = vpop.f32.mrf.mxu0 }
 0x52d   :  { %24158 = vst [vmem:[#allocation114_spill] sm:$0xff] %v20619_v57 }
 0x52e   :  { %v20621_v43 = vpop.f32.mrf.mxu0 }
 0x52f   :  { %24159 = vst [vmem:[#allocation101_spill] sm:$0xff] %v20621_v43 }
 0x536   :  { %v20629_v12 = vpop.f32.mrf.mxu1 }
 0x537   :  { %24163 = vst [vmem:[#allocation104_spill] sm:$0xff] %v20629_v12 }
 0x538   :  { %v20633_v48 = vpop.f32.mrf.mxu1 }
 0x539   :  { %24165 = vst [vmem:[#allocation119_spill] sm:$0xff] %v20633_v48  ;;  %v20689_v48 = vld [vmem:[#allocation11 + $0x18] sm:$0xff] }
 0x53e   :  { %v20623_v20 = vpop.f32.mrf.mxu0 }
 0x53f   :  { %24160 = vst [vmem:[#allocation118_spill] sm:$0xff] %v20623_v20 }
 0x540   :  { %v20625_v32 = vpop.f32.mrf.mxu0 }
 0x541   :  { %24161 = vst [vmem:[#allocation116_spill] sm:$0xff] %v20625_v32 }
 0x546   :  { %v20637_v55 = vpop.f32.mrf.mxu1 }
 0x547   :  { %24167 = vst [vmem:[#allocation122_spill] sm:$0xff] %v20637_v55 }
 0x548   :  { %v20641_v15 = vpop.f32.mrf.mxu1 }
 0x549   :  { %24169 = vst [vmem:[#allocation120_spill] sm:$0xff] %v20641_v15 }
 0x552   :  { %v20627_v16 = vpop.f32.mrf.mxu0 }
 0x553   :  { %24162 = vst [vmem:[#allocation105_spill] sm:$0xff] %v20627_v16 }
 0x554   :  { %v20631_v1 = vpop.f32.mrf.mxu0 }
 0x555   :  { %24164 = vst [vmem:[#allocation121_spill] sm:$0xff] %v20631_v1  ;;  %v20653_v1 = vpop.permute.xlu1 %6590 }
 0x557   :  { %v20643_v13 = vpop.f32.mrf.mxu1 }
 0x558   :  { %24170 = vst [vmem:[#allocation108_spill] sm:$0xff] %v20643_v13 }
 0x559   :  { %v20649_v63 = vpop.f32.mrf.mxu1 }
 0x55a   :  { %24173 = vst [vmem:[#allocation106_spill] sm:$0xff] %v20649_v63 }
 0x568   :  { %v20651_v16 = vpop.f32.mrf.mxu1 }
 0x569   :  { %24174 = vst [vmem:[#allocation123_spill] sm:$0xff] %v20651_v16 }
 0x56a   :  { %v20635_v31 = vpop.f32.mrf.mxu0 }
 0x56b   :  { %24166 = vst [vmem:[#allocation103_spill] sm:$0xff] %v20635_v31  ;;  %v20657_v31 = vpop.permute.xlu0 %6679 }
 0x56c   :  { %v20639_v23 = vpop.f32.mrf.mxu0  ;;  %24176 = vst [vmem:[#allocation124_spill] sm:$0xff] %v20657_v31 }
 0x56d   :  { %24168 = vst [vmem:[#allocation109_spill] sm:$0xff] %v20639_v23  ;;  %v20661_v23 = vpop.f32.mrf.mxu1 }
 0x56e   :  { %24178 = vst [vmem:[#allocation112_spill] sm:$0xff] %v20661_v23 }
 0x571   :  { %v20645_v22 = vpop.f32.mrf.mxu0 }
 0x572   :  { %24171 = vst [vmem:[#allocation107_spill] sm:$0xff] %v20645_v22  ;;  %v20663_v15 = vpop.f32.mrf.mxu1  ;;  %v20667_v22 = vpop.permute.xlu1 %6770 }
 0x573   :  { %v20647_v24 = vpop.f32.mrf.mxu0  ;;  %24179 = vst [vmem:[#allocation111_spill] sm:$0xff] %v20663_v15 }
 0x574   :  { %24172 = vst [vmem:[#allocation125_spill] sm:$0xff] %v20647_v24  ;;  %v20669_v24 = vpop.permute.xlu0 %6768  ;;  %v20671_v63 = vpop.f32.mrf.mxu1 }
 0x575   :  { %24181 = vst [vmem:[#allocation110_spill] sm:$0xff] %v20669_v24  ;;  %24182 = vst [vmem:[#allocation127_spill] sm:$0xff] %v20671_v63 }
 0x578   :  { %v20655_v20 = vpop.f32.mrf.mxu0  ;;  %v20679_v12 = vpop.permute.xlu0 %6859 }
 0x579   :  { %24175 = vst [vmem:[#allocation126_spill] sm:$0xff] %v20655_v20  ;;  %v20677_v20 = vpop.permute.xlu1 %6948  ;;  %24186 = vst [vmem:[#allocation131_spill] sm:$0xff] %v20679_v12 }
 0x57a   :  { %v20659_v55 = vpop.f32.mrf.mxu0  ;;  %24185 = vst [vmem:[#allocation130_spill] sm:$0xff] %v20677_v20 }
 0x57b   :  { %24177 = vst [vmem:[#allocation113_spill] sm:$0xff] %v20659_v55 }
 0x57c   :  { %v20675_v32 = vpop.f32.mrf.mxu1  ;;  %v20693_v63 = vpop.permute.xlu0 %6857 }
 0x57d   :  { %v20665_v13 = vpop.f32.mrf.mxu0  ;;  %24184 = vst [vmem:[#allocation115_spill] sm:$0xff] %v20675_v32  ;;  %v20691_v57 = vpop.permute.xlu1 %6946  ;;  %24192 = vst [vmem:[#allocation137_spill] sm:$0xff] %v20693_v63  ;;  %v20695_v32 = vld [vmem:[#allocation11 + $0x10] sm:$0xff] }
 0x57e   :  { %24180 = vst [vmem:[#allocation129_spill] sm:$0xff] %v20665_v13  ;;  %v20683_v23 = vpop.f32.mrf.mxu1  ;;  %24191 = vst [vmem:[#allocation136_spill] sm:$0xff] %v20691_v57 }
 0x57f   :  { %v20673_v16 = vpop.f32.mrf.mxu0  ;;  %24188 = vst [vmem:[#allocation133_spill] sm:$0xff] %v20683_v23 }
 0x580   :  { %24183 = vst [vmem:[#allocation128_spill] sm:$0xff] %v20673_v16  ;;  %v20713_v60 = vpop.permute.xlu0 %7037 }
 0x581   :  { %v20709_v46 = vpop.permute.xlu1 %7126  ;;  %24196 = vst [vmem:[#allocation141_spill] sm:$0xff] %v20713_v60 }
 0x582   :  { %24195 = vst [vmem:[#allocation140_spill] sm:$0xff] %v20709_v46 }
 0x583   :  { %v20681_v55 = vpop.f32.mrf.mxu0 }
 0x584   :  { %24187 = vst [vmem:[#allocation132_spill] sm:$0xff] %v20681_v55  ;;  %v20727_v21 = vpop.permute.xlu0 %7035 }
 0x585   :  { %v20685_v15 = vpop.f32.mrf.mxu0  ;;  %v20720_v34 = vpop.permute.xlu1 %7124  ;;  %24199 = vst [vmem:[#allocation144_spill] sm:$0xff] %v20727_v21 }
 0x586   :  { %24189 = vst [vmem:[#allocation134_spill] sm:$0xff] %v20685_v15  ;;  %v20687_v13 = vpop.f32.mrf.mxu1  ;;  %24198 = vst [vmem:[#allocation143_spill] sm:$0xff] %v20720_v34 }
 0x587   :  { %24190 = vst [vmem:[#allocation135_spill] sm:$0xff] %v20687_v13 }
 0x588   :  { %v20700_v2 = vpop.f32.mrf.mxu1  ;;  %v20741_v5 = vpop.permute.xlu0 %7215 }
 0x589   :  { %24193 = vst [vmem:[#allocation138_spill] sm:$0xff] %v20700_v2  ;;  %v20734_v33 = vpop.permute.xlu1 %7304  ;;  %24201 = vst [vmem:[#allocation146_spill] sm:$0xff] %v20741_v5 }
 0x58a   :  { %24200 = vst [vmem:[#allocation145_spill] sm:$0xff] %v20734_v33 }
 0x58b   :  { %v16735_v16 = vpop.f32.mrf.mxu0 }
 0x58c   :  { %v20698_v43 = vadd.f32 %v16735_v16, %v20689_v48  ;;  %v20760_v39 = vpop.permute.xlu0 %7213 }
 0x58d   :  { %v4652_v55 = vpop.f32.mrf.mxu0  ;;  %v20707_v13 = vpop.f32.mrf.mxu1  ;;  %24203 = vst [vmem:[#allocation148_spill] sm:$0xff] %v20760_v39 }
 0x58e   :  { %v20703_v23 = vadd.f32 %v4652_v55, %v20695_v32  ;;  %v6029_v15 = vsel %vm2889_vm2, %v20698_v43, -inf  ;;  %24194 = vst [vmem:[#allocation139_spill] sm:$0xff] %v20707_v13 }
 0x58f   :  { %6030 = vmax.xlane.f32.xlu1 %v6029_v15  ;;  %v20715_v16 = vpop.f32.mrf.mxu1 }
 0x590   :  { %v6026_v17 = vsel %vm2889_vm2, %v20703_v23, -inf  ;;  %24197 = vst [vmem:[#allocation142_spill] sm:$0xff] %v20715_v16 }
 0x591   :  { %6027 = vmax.xlane.f32.xlu0 %v6026_v17 }
 0x593   :  { %v16749_v2 = vpop.f32.mrf.mxu0 }
 0x594   :  { %v20718_v55 = vadd.f32 %v16749_v2, %v20689_v48 }
 0x595   :  { %v16742_v0 = vpop.f32.mrf.mxu1  ;;  %v4834_v6 = vpop.f32.mrf.mxu0 }
 0x596   :  { %v20723_v15 = vadd.f32 %v4834_v6, %v20695_v32  ;;  %v6041_v13 = vsel %vm2889_vm2, %v20718_v55, -inf  ;;  %v20730_v17 = vadd.f32 %v16742_v0, %v20689_v48 }
 0x597   :  { %6042 = vmax.xlane.f32.xlu1 %v6041_v13  ;;  %v4743_v16 = vpop.f32.mrf.mxu1 }
 0x598   :  { %v6038_v2 = vsel %vm2889_vm2, %v20723_v15, -inf  ;;  %v20737_v59 = vadd.f32 %v4743_v16, %v20695_v32  ;;  %v6035_v25 = vsel %vm2889_vm2, %v20730_v17, -inf }
 0x599   :  { %6039 = vmax.xlane.f32.xlu0 %v6038_v2 }
 0x59a   :  { %v6032_v36 = vsel %vm2889_vm2, %v20737_v59, -inf }
 0x59c   :  { %v16763_v6 = vpop.f32.mrf.mxu0 }
 0x59d   :  { %v20744_v13 = vadd.f32 %v16763_v6, %v20689_v48  ;;  %6036 = vmax.xlane.f32.xlu0 %v6035_v25  ;;  %v20756_v6 = vpop.permute.xlu1 %7302 }
 0x59e   :  { %v16756_v0 = vpop.f32.mrf.mxu1  ;;  %v5016_v9 = vpop.f32.mrf.mxu0  ;;  %24202 = vst [vmem:[#allocation147_spill] sm:$0xff] %v20756_v6 }
 0x59f   :  { %v20747_v56 = vadd.f32 %v5016_v9, %v20695_v32  ;;  %v6053_v2 = vsel %vm2889_vm2, %v20744_v13, -inf  ;;  %v20752_v16 = vadd.f32 %v16756_v0, %v20689_v48 }
 0x5a0   :  { %6054 = vmax.xlane.f32.xlu1 %v6053_v2  ;;  %v4925_v8 = vpop.f32.mrf.mxu1 }
 0x5a1   :  { %6033 = vmax.xlane.f32.xlu0 %v6032_v36  ;;  %v6050_v25 = vsel %vm2889_vm2, %v20747_v56, -inf  ;;  %v20763_v9 = vadd.f32 %v4925_v8, %v20695_v32  ;;  %v6047_v0 = vsel %vm2889_vm2, %v20752_v16, -inf  ;;  %v20775_v11 = vpop.permute.xlu1 %7482 }
 0x5a2   :  { %24204 = vst [vmem:[#allocation149_spill] sm:$0xff] %v20775_v11 }
 0x5a4   :  { %6051 = vmax.xlane.f32.xlu1 %v6050_v25  ;;  %v16777_v44 = vpop.f32.mrf.mxu0  ;;  %v6044_v25 = vsel %vm2889_vm2, %v20763_v9, -inf }
 0x5a5   :  { %v20768_v2 = vadd.f32 %v16777_v44, %v20689_v48  ;;  %6048 = vmax.xlane.f32.xlu0 %v6047_v0  ;;  %v20782_v0 = vpop.permute.xlu0 %7393 }
 0x5a6   :  { %v5198_v36 = vpop.f32.mrf.mxu0  ;;  %24205 = vst [vmem:[#allocation150_spill] sm:$0xff] %v20782_v0 }
 0x5a7   :  { %v16770_v50 = vpop.f32.mrf.mxu1  ;;  %v20771_v49 = vadd.f32 %v5198_v36, %v20695_v32  ;;  %v6065_v39 = vsel %vm2889_vm2, %v20768_v2, -inf }
 0x5a8   :  { %v20778_v8 = vadd.f32 %v16770_v50, %v20689_v48  ;;  %6066 = vmax.xlane.f32.xlu1 %v6065_v39  ;;  %v20791_v39 = vpop.permute.xlu1 %7480 }
 0x5a9   :  { %v5107_v44 = vpop.f32.mrf.mxu1  ;;  %6045 = vmax.xlane.f32.xlu0 %v6044_v25  ;;  %v6062_v36 = vsel %vm2889_vm2, %v20771_v49, -inf  ;;  %24206 = vst [vmem:[#allocation151_spill] sm:$0xff] %v20791_v39  ;;  %v20796_v41 = vpop.permute.xlu0 %7391 }
 0x5aa   :  { %v20787_v27 = vadd.f32 %v5107_v44, %v20695_v32  ;;  %v6059_v11 = vsel %vm2889_vm2, %v20778_v8, -inf  ;;  %24207 = vst [vmem:[#allocation152_spill] sm:$0xff] %v20796_v41 }
 0x5ac   :  { %6063 = vmax.xlane.f32.xlu1 %v6062_v36  ;;  %v6056_v36 = vsel %vm2889_vm2, %v20787_v27, -inf  ;;  %v20808_v39 = vpop.permute.xlu1 %7660 }
 0x5ad   :  { %v16791_v50 = vpop.f32.mrf.mxu0  ;;  %6060 = vmax.xlane.f32.xlu0 %v6059_v11  ;;  %24208 = vst [vmem:[#allocation153_spill] sm:$0xff] %v20808_v39  ;;  %v20817_v45 = vpop.permute.xlu0 %7571 }
 0x5ae   :  { %v20794_v6 = vadd.f32 %v16791_v50, %v20689_v48  ;;  %24209 = vst [vmem:[#allocation154_spill] sm:$0xff] %v20817_v45 }
 0x5af   :  { %v5380_v25 = vpop.f32.mrf.mxu0 }
 0x5b0   :  { %v16784_v0 = vpop.f32.mrf.mxu1  ;;  %v20799_v5 = vadd.f32 %v5380_v25, %v20695_v32  ;;  %v6077_v44 = vsel %vm2889_vm2, %v20794_v6, -inf }
 0x5b1   :  { %v20806_v11 = vadd.f32 %v16784_v0, %v20689_v48  ;;  %6078 = vmax.xlane.f32.xlu1 %v6077_v44  ;;  %6057 = vmax.xlane.f32.xlu0 %v6056_v36  ;;  %v20834_v45 = vpop.permute.xlu0 %7569 }
 0x5b2   :  { %v5289_v50 = vpop.f32.mrf.mxu1  ;;  %v6074_v25 = vsel %vm2889_vm2, %v20799_v5, -inf  ;;  %24211 = vst [vmem:[#allocation156_spill] sm:$0xff] %v20834_v45 }
 0x5b3   :  { %v20811_v41 = vadd.f32 %v5289_v50, %v20695_v32  ;;  %v6071_v21 = vsel %vm2889_vm2, %v20806_v11, -inf }
 0x5b5   :  { %6075 = vmax.xlane.f32.xlu1 %v6074_v25  ;;  %6072 = vmax.xlane.f32.xlu0 %v6071_v21  ;;  %v6068_v39 = vsel %vm2889_vm2, %v20811_v41, -inf  ;;  %v20829_v25 = vpop.permute.xlu1 %7658  ;;  %v20850_v63 = vpop.permute.xlu0 %7749 }
 0x5b6   :  { %v16805_v0 = vpop.f32.mrf.mxu0  ;;  %24210 = vst [vmem:[#allocation155_spill] sm:$0xff] %v20829_v25  ;;  %24213 = vst [vmem:[#allocation158_spill] sm:$0xff] %v20850_v63 }
 0x5b7   :  { %v20820_v44 = vadd.f32 %v16805_v0, %v20689_v48 }
 0x5b8   :  { %v5562_v36 = vpop.f32.mrf.mxu0 }
 0x5b9   :  { %v16798_v50 = vpop.f32.mrf.mxu1  ;;  %v20825_v33 = vadd.f32 %v5562_v36, %v20695_v32  ;;  %v6089_v34 = vsel %vm2889_vm2, %v20820_v44, -inf  ;;  %6069 = vmax.xlane.f32.xlu0 %v6068_v39  ;;  %v20843_v25 = vpop.permute.xlu1 %7840 }
 0x5ba   :  { %v20832_v21 = vadd.f32 %v16798_v50, %v20689_v48  ;;  %6090 = vmax.xlane.f32.xlu1 %v6089_v34  ;;  %24212 = vst [vmem:[#allocation157_spill] sm:$0xff] %v20843_v25  ;;  %v20869_v63 = vpop.permute.xlu0 %7747 }
 0x5bb   :  { %v5471_v0 = vpop.f32.mrf.mxu1  ;;  %v6086_v60 = vsel %vm2889_vm2, %v20825_v33, -inf  ;;  %24215 = vst [vmem:[#allocation160_spill] sm:$0xff] %v20869_v63 }
 0x5bc   :  { %v20837_v29 = vadd.f32 %v5471_v0, %v20695_v32  ;;  %v6083_v36 = vsel %vm2889_vm2, %v20832_v21, -inf }
 0x5bd   :  { %6084 = vmax.xlane.f32.xlu0 %v6083_v36 }
 0x5be   :  { %6087 = vmax.xlane.f32.xlu1 %v6086_v60  ;;  %v6080_v34 = vsel %vm2889_vm2, %v20837_v29, -inf }
 0x5bf   :  { %v16819_v39 = vpop.f32.mrf.mxu0 }
 0x5c0   :  { %v20846_v50 = vadd.f32 %v16819_v39, %v20689_v48 }
 0x5c1   :  { %v16812_v45 = vpop.f32.mrf.mxu1  ;;  %v5744_v0 = vpop.f32.mrf.mxu0  ;;  %6081 = vmax.xlane.f32.xlu0 %v6080_v34 }
 0x5c2   :  { %v20853_v35 = vadd.f32 %v16812_v45, %v20689_v48  ;;  %v20856_v36 = vadd.f32 %v5744_v0, %v20695_v32  ;;  %v6101_v60 = vsel %vm2889_vm2, %v20846_v50, -inf  ;;  %v20865_v34 = vpop.permute.xlu1 %7838 }
 0x5c3   :  { %v5653_v25 = vpop.f32.mrf.mxu1  ;;  %6102 = vmax.xlane.f32.xlu1 %v6101_v60  ;;  %24214 = vst [vmem:[#allocation159_spill] sm:$0xff] %v20865_v34 }
 0x5c4   :  { %v20861_v39 = vadd.f32 %v5653_v25, %v20695_v32  ;;  %v6095_v46 = vsel %vm2889_vm2, %v20853_v35, -inf  ;;  %v6098_v45 = vsel %vm2889_vm2, %v20856_v36, -inf }
 0x5c5   :  { %6096 = vmax.xlane.f32.xlu0 %v6095_v46 }
 0x5c6   :  { %v6092_v25 = vsel %vm2889_vm2, %v20861_v39, -inf  ;;  %v20884_v63 = vpop.permute.xlu1 %7834 }
 0x5c7   :  { %6099 = vmax.xlane.f32.xlu1 %v6098_v45  ;;  %v16833_v0 = vpop.f32.mrf.mxu0  ;;  %24216 = vst [vmem:[#allocation161_spill] sm:$0xff] %v20884_v63 }
 0x5c8   :  { %v20872_v7 = vadd.f32 %v16833_v0, %v20689_v48 }
 0x5c9   :  { %v16826_v60 = vpop.f32.mrf.mxu1  ;;  %v5926_v37 = vpop.f32.mrf.mxu0  ;;  %6093 = vmax.xlane.f32.xlu0 %v6092_v25 }
 0x5ca   :  { %v20877_v46 = vadd.f32 %v16826_v60, %v20689_v48  ;;  %v20880_v34 = vadd.f32 %v5926_v37, %v20695_v32  ;;  %v6113_v45 = vsel %vm2889_vm2, %v20872_v7, -inf  ;;  %v20891_v25 = vpop.permute.xlu0 %7931 }
 0x5cb   :  { %v5835_v57 = vpop.f32.mrf.mxu1  ;;  %6114 = vmax.xlane.f32.xlu1 %v6113_v45  ;;  %24217 = vst [vmem:[#allocation162_spill] sm:$0xff] %v20891_v25  ;;  %v20897_v45 = vpop.permute.xlu1 %8022 }
 0x5cc   :  { %v20887_v0 = vadd.f32 %v5835_v57, %v20695_v32  ;;  %v6107_v12 = vsel %vm2889_vm2, %v20877_v46, -inf  ;;  %v6110_v37 = vsel %vm2889_vm2, %v20880_v34, -inf  ;;  %24218 = vst [vmem:[#allocation163_spill] sm:$0xff] %v20897_v45 }
 0x5cd   :  { %6108 = vmax.xlane.f32.xlu0 %v6107_v12 }
 0x5ce   :  { %v6104_v60 = vsel %vm2889_vm2, %v20887_v0, -inf  ;;  %v20902_v31 = vpop.permute.xlu0 %7929 }
 0x5cf   :  { %6111 = vmax.xlane.f32.xlu1 %v6110_v37  ;;  %24219 = vst [vmem:[#allocation164_spill] sm:$0xff] %v20902_v31 }
 0x5d1   :  { %v16840_v10 = vpop.f32.mrf.mxu1  ;;  %6105 = vmax.xlane.f32.xlu0 %v6104_v60  ;;  %v20911_v60 = vpop.permute.xlu1 %7925 }
 0x5d2   :  { %v20900_v57 = vadd.f32 %v16840_v10, %v20689_v48  ;;  %24220 = vst [vmem:[#allocation165_spill] sm:$0xff] %v20911_v60  ;;  %v20913_v45 = vpop.permute.xlu0 %7836 }
 0x5d3   :  { %v6017_v63 = vpop.f32.mrf.mxu1  ;;  %24221 = vst [vmem:[#allocation166_spill] sm:$0xff] %v20913_v45 }
 0x5d4   :  { %v20905_v12 = vadd.f32 %v6017_v63, %v20695_v32  ;;  %v6119_v25 = vsel %vm2889_vm2, %v20900_v57, -inf  ;;  %v24226_v63 = vld [vmem:[#allocation41_spill] sm:$0xff] }
 0x5d5   :  { %6120 = vmax.xlane.f32.xlu1 %v6119_v25  ;;  %v20915_v10 = vpop.permute.xlu1 %8113 }
 0x5d6   :  { %v6116_v37 = vsel %vm2889_vm2, %v20905_v12, -inf  ;;  %24222 = vst [vmem:[#allocation167_spill] sm:$0xff] %v20915_v10  ;;  %v20917_v48 = vpop.permute.xlu0 %8020 }
 0x5d7   :  { %6117 = vmax.xlane.f32.xlu0 %v6116_v37  ;;  %24223 = vst [vmem:[#allocation168_spill] sm:$0xff] %v20917_v48  ;;  %v24229_v37 = vld [vmem:[#allocation65_spill] sm:$0xff] }
 0x5d9   :  { %v20919_v31 = vpop.permute.xlu1 %8016 }
 0x5da   :  { %24224 = vst [vmem:[#allocation169_spill] sm:$0xff] %v20919_v31  ;;  %v20921_v32 = vpop.permute.xlu0 %7927 }
 0x5db   :  { %24225 = vst [vmem:[#allocation170_spill] sm:$0xff] %v20921_v32 }
 0x5dd   :  { %v20925_v25 = vpop.permute.xlu1 %8204 }
 0x5de   :  { %24227 = vst [vmem:[#allocation171_spill] sm:$0xff] %v20925_v25  ;;  %v20927_v61 = vpop.permute.xlu0 %8111 }
 0x5df   :  { %24228 = vst [vmem:[#allocation172_spill] sm:$0xff] %v20927_v61 }
 0x5e1   :  { %v20931_v60 = vpop.permute.xlu1 %8107 }
 0x5e2   :  { %24230 = vst [vmem:[#allocation173_spill] sm:$0xff] %v20931_v60  ;;  %v20933_v45 = vpop.permute.xlu0 %8018 }
 0x5e3   :  { %24231 = vst [vmem:[#allocation174_spill] sm:$0xff] %v20933_v45 }
 0x5e5   :  { %v20935_v10 = vpop.permute.xlu1 %8295 }
 0x5e6   :  { %8568 = vrot.lane.b32.xlu1 %v24226_v63, %s18215_s8  ;;  %24232 = vst [vmem:[#allocation175_spill] sm:$0xff] %v20935_v10  ;;  %v20937_v48 = vpop.permute.xlu0 %8202 }
 0x5e7   :  { %24233 = vst [vmem:[#allocation176_spill] sm:$0xff] %v20937_v48 }
 0x5e9   :  { %v20939_v31 = vpop.permute.xlu1 %8198 }
 0x5ea   :  { %24234 = vst [vmem:[#allocation177_spill] sm:$0xff] %v20939_v31  ;;  %v20941_v32 = vpop.permute.xlu0 %8109 }
 0x5eb   :  { %24235 = vst [vmem:[#allocation178_spill] sm:$0xff] %v20941_v32 }
 0x5ed   :  { %8475 = vrot.lane.b32.xlu0 %v24229_v37, %s18215_s8  ;;  %v20943_v63 = vpop.permute.xlu1 %8386 }
 0x5ee   :  { %24236 = vst [vmem:[#allocation179_spill] sm:$0xff] %v20943_v63  ;;  %v20945_v25 = vpop.permute.xlu0 %8293 }
 0x5ef   :  { %24237 = vst [vmem:[#allocation180_spill] sm:$0xff] %v20945_v25 }
 0x5f1   :  { %v20947_v61 = vpop.permute.xlu1 %8289 }
 0x5f2   :  { %24238 = vst [vmem:[#allocation181_spill] sm:$0xff] %v20947_v61  ;;  %v20949_v14 = vpop.permute.xlu0 %8200 }
 0x5f3   :  { %24239 = vst [vmem:[#allocation182_spill] sm:$0xff] %v20949_v14 }
 0x5f5   :  { %v20951_v37 = vpop.permute.xlu1 %8477 }
 0x5f6   :  { %24240 = vst [vmem:[#allocation183_spill] sm:$0xff] %v20951_v37  ;;  %v20953_v60 = vpop.permute.xlu0 %8384 }
 0x5f7   :  { %24241 = vst [vmem:[#allocation184_spill] sm:$0xff] %v20953_v60 }
 0x5f9   :  { %v20955_v45 = vpop.permute.xlu1 %8380 }
 0x5fa   :  { %24242 = vst [vmem:[#allocation185_spill] sm:$0xff] %v20955_v45  ;;  %v20957_v10 = vpop.permute.xlu0 %8291 }
 0x5fb   :  { %24243 = vst [vmem:[#allocation186_spill] sm:$0xff] %v20957_v10 }
 0x618   :  { %v6031_v48 = vpop.xlane.xlu1 %6030 }
 0x619   :  { %v6123_v31 = vsub.f32 %v20698_v43, %v6031_v48 }
 0x61a   :  { %v6028_v32 = vpop.xlane.xlu0 %6027 }
 0x61b   :  { %v6156_v38 = vmul.f32 1.442695, %v6123_v31  ;;  %v6122_v63 = vsub.f32 %v20703_v23, %v6028_v32 }
 0x61d   :  { %17671 = vpow2.f32 %v6156_v38  ;;  %v6154_v25 = vmul.f32 1.442695, %v6122_v63 }
 0x61f   :  { %17673 = vpow2.f32 %v6154_v25 }
 0x620   :  { %v6043_v61 = vpop.xlane.xlu1 %6042 }
 0x621   :  { %v6127_v14 = vsub.f32 %v20718_v55, %v6043_v61 }
 0x622   :  { %v6040_v37 = vpop.xlane.xlu0 %6039 }
 0x623   :  { %v6164_v20 = vmul.f32 1.442695, %v6127_v14  ;;  %v6126_v60 = vsub.f32 %v20723_v15, %v6040_v37 }
 0x625   :  { %17675 = vpow2.f32 %v6164_v20  ;;  %v6162_v45 = vmul.f32 1.442695, %v6126_v60 }
 0x626   :  { %v6037_v10 = vpop.xlane.xlu0 %6036 }
 0x627   :  { %17677 = vpow2.f32 %v6162_v45  ;;  %v6125_v43 = vsub.f32 %v20730_v17, %v6037_v10 }
 0x629   :  { %v6160_v48 = vmul.f32 1.442695, %v6125_v43  ;;  %v6055_v31 = vpop.xlane.xlu1 %6054 }
 0x62a   :  { %v20964_v24 = vpop.eup %17671  ;;  %v6131_v38 = vsub.f32 %v20744_v13, %v6055_v31  ;;  %v6034_v23 = vpop.xlane.xlu0 %6033 }
 0x62b   :  { %17679 = vpow2.f32 %v6160_v48  ;;  %v6124_v61 = vsub.f32 %v20737_v59, %v6034_v23  ;;  %v6221_v14 = vsel %vm2889_vm2, %v20964_v24, 0.0 }
 0x62c   :  { %v20970_v55 = vpop.eup %17673  ;;  %v6172_v20 = vmul.f32 1.442695, %v6131_v38  ;;  %6222 = vadd.xlane.f32.xlu1 %v6221_v14 }
 0x62d   :  { %v6158_v15 = vmul.f32 1.442695, %v6124_v61  ;;  %v6052_v45 = vpop.xlane.xlu1 %6051  ;;  %v6218_v17 = vsel %vm2889_vm2, %v20970_v55, 0.0 }
 0x62e   :  { %17681 = vpow2.f32 %v6172_v20  ;;  %v6130_v60 = vsub.f32 %v20747_v56, %v6052_v45  ;;  %6219 = vadd.xlane.f32.xlu0 %v6218_v17  ;;  %v6049_v13 = vpop.xlane.xlu0 %6048 }
 0x62f   :  { %17683 = vpow2.f32 %v6158_v15  ;;  %v6129_v59 = vsub.f32 %v20752_v16, %v6049_v13 }
 0x630   :  { %v6170_v10 = vmul.f32 1.442695, %v6130_v60 }
 0x631   :  { %v6168_v32 = vmul.f32 1.442695, %v6129_v59  ;;  %v6067_v63 = vpop.xlane.xlu1 %6066 }
 0x632   :  { %v20976_v25 = vpop.eup %17675  ;;  %17685 = vpow2.f32 %v6170_v10  ;;  %v6135_v37 = vsub.f32 %v20768_v2, %v6067_v63  ;;  %v6046_v43 = vpop.xlane.xlu0 %6045 }
 0x633   :  { %17687 = vpow2.f32 %v6168_v32  ;;  %v6128_v48 = vsub.f32 %v20763_v9, %v6046_v43  ;;  %v6233_v56 = vsel %vm2889_vm2, %v20976_v25, 0.0 }
 0x634   :  { %v20982_v31 = vpop.eup %17677  ;;  %v6180_v38 = vmul.f32 1.442695, %v6135_v37  ;;  %6234 = vadd.xlane.f32.xlu1 %v6233_v56 }
 0x635   :  { %v6166_v16 = vmul.f32 1.442695, %v6128_v48  ;;  %v6064_v23 = vpop.xlane.xlu1 %6063  ;;  %v6230_v20 = vsel %vm2889_vm2, %v20982_v31, 0.0 }
 0x636   :  { %17689 = vpow2.f32 %v6180_v38  ;;  %v6134_v61 = vsub.f32 %v20771_v49, %v6064_v23  ;;  %v6061_v14 = vpop.xlane.xlu0 %6060 }
 0x637   :  { %17691 = vpow2.f32 %v6166_v16  ;;  %v6133_v2 = vsub.f32 %v20778_v8, %v6061_v14 }
 0x638   :  { %v20988_v9 = vpop.eup %17679  ;;  %v6178_v15 = vmul.f32 1.442695, %v6134_v61  ;;  %6231 = vadd.xlane.f32.xlu1 %v6230_v20 }
 0x639   :  { %v6176_v45 = vmul.f32 1.442695, %v6133_v2  ;;  %v6227_v17 = vsel %vm2889_vm2, %v20988_v9, 0.0 }
 0x63a   :  { %17693 = vpow2.f32 %v6178_v15  ;;  %v6079_v60 = vpop.xlane.xlu1 %6078  ;;  %6228 = vadd.xlane.f32.xlu0 %v6227_v17  ;;  %v6058_v13 = vpop.xlane.xlu0 %6057 }
 0x63b   :  { %v20992_v49 = vpop.eup %17681  ;;  %17695 = vpow2.f32 %v6176_v45  ;;  %v6139_v8 = vsub.f32 %v20794_v6, %v6079_v60  ;;  %v6132_v59 = vsub.f32 %v20787_v27, %v6058_v13 }
 0x63c   :  { %v20996_v10 = vpop.eup %17683  ;;  %v6245_v32 = vsel %vm2889_vm2, %v20992_v49, 0.0 }
 0x63d   :  { %v6188_v63 = vmul.f32 1.442695, %v6139_v8  ;;  %v6174_v37 = vmul.f32 1.442695, %v6132_v59  ;;  %6246 = vadd.xlane.f32.xlu1 %v6245_v32  ;;  %v6224_v43 = vsel %vm2889_vm2, %v20996_v10, 0.0 }
 0x63e   :  { %v6076_v48 = vpop.xlane.xlu1 %6075  ;;  %6225 = vadd.xlane.f32.xlu0 %v6224_v43  ;;  %v6073_v56 = vpop.xlane.xlu0 %6072 }
 0x63f   :  { %v21002_v38 = vpop.eup %17685  ;;  %17697 = vpow2.f32 %v6188_v63  ;;  %v6138_v6 = vsub.f32 %v20799_v5, %v6076_v48  ;;  %v6137_v27 = vsub.f32 %v20806_v11, %v6073_v56 }
 0x640   :  { %v21006_v16 = vpop.eup %17687  ;;  %17699 = vpow2.f32 %v6174_v37  ;;  %v6242_v23 = vsel %vm2889_vm2, %v21002_v38, 0.0 }
 0x641   :  { %v6186_v61 = vmul.f32 1.442695, %v6138_v6  ;;  %v6184_v14 = vmul.f32 1.442695, %v6137_v27  ;;  %6243 = vadd.xlane.f32.xlu1 %v6242_v23  ;;  %v6239_v2 = vsel %vm2889_vm2, %v21006_v16, 0.0 }
 0x642   :  { %6240 = vadd.xlane.f32.xlu0 %v6239_v2  ;;  %v6070_v20 = vpop.xlane.xlu0 %6069 }
 0x643   :  { %v21012_v15 = vpop.eup %17689  ;;  %17701 = vpow2.f32 %v6186_v61  ;;  %v6091_v5 = vpop.xlane.xlu1 %6090  ;;  %v6136_v11 = vsub.f32 %v20811_v41, %v6070_v20 }
 0x644   :  { %v21015_v45 = vpop.eup %17691  ;;  %17703 = vpow2.f32 %v6184_v14  ;;  %v6143_v17 = vsub.f32 %v20820_v44, %v6091_v5  ;;  %v6257_v60 = vsel %vm2889_vm2, %v21012_v15, 0.0 }
 0x645   :  { %v6182_v13 = vmul.f32 1.442695, %v6136_v11  ;;  %6258 = vadd.xlane.f32.xlu1 %v6257_v60  ;;  %v6236_v8 = vsel %vm2889_vm2, %v21015_v45, 0.0 }
 0x646   :  { %v6196_v59 = vmul.f32 1.442695, %v6143_v17  ;;  %6237 = vadd.xlane.f32.xlu0 %v6236_v8  ;;  %v6085_v32 = vpop.xlane.xlu0 %6084 }
 0x647   :  { %v21022_v63 = vpop.eup %17693  ;;  %17705 = vpow2.f32 %v6182_v13  ;;  %v6088_v41 = vpop.xlane.xlu1 %6087  ;;  %v6141_v37 = vsub.f32 %v20832_v21, %v6085_v32 }
 0x648   :  { %v21025_v43 = vpop.eup %17695  ;;  %17707 = vpow2.f32 %v6196_v59  ;;  %v6142_v44 = vsub.f32 %v20825_v33, %v6088_v41  ;;  %v6254_v48 = vsel %vm2889_vm2, %v21022_v63, 0.0 }
 0x649   :  { %v6192_v56 = vmul.f32 1.442695, %v6141_v37  ;;  %6255 = vadd.xlane.f32.xlu1 %v6254_v48  ;;  %v6251_v6 = vsel %vm2889_vm2, %v21025_v43, 0.0 }
 0x64a   :  { %v6194_v27 = vmul.f32 1.442695, %v6142_v44  ;;  %6252 = vadd.xlane.f32.xlu0 %v6251_v6  ;;  %v6082_v23 = vpop.xlane.xlu0 %6081 }
 0x64b   :  { %17709 = vpow2.f32 %v6192_v56  ;;  %v6140_v61 = vsub.f32 %v20837_v29, %v6082_v23 }
 0x64c   :  { %v21033_v21 = vpop.eup %17697  ;;  %17711 = vpow2.f32 %v6194_v27  ;;  %v6103_v14 = vpop.xlane.xlu1 %6102 }
 0x64d   :  { %v21035_v2 = vpop.eup %17699  ;;  %v6147_v33 = vsub.f32 %v20846_v50, %v6103_v14  ;;  %v6190_v20 = vmul.f32 1.442695, %v6140_v61  ;;  %v6269_v5 = vsel %vm2889_vm2, %v21033_v21, 0.0 }
 0x64e   :  { %6270 = vadd.xlane.f32.xlu1 %v6269_v5  ;;  %v6248_v11 = vsel %vm2889_vm2, %v21035_v2, 0.0  ;;  %v6097_v17 = vpop.xlane.xlu0 %6096 }
 0x64f   :  { %v6204_v60 = vmul.f32 1.442695, %v6147_v33  ;;  %17713 = vpow2.f32 %v6190_v20  ;;  %6249 = vadd.xlane.f32.xlu0 %v6248_v11  ;;  %v6145_v29 = vsub.f32 %v20853_v35, %v6097_v17 }
 0x650   :  { %v21043_v13 = vpop.eup %17701  ;;  %v6100_v8 = vpop.xlane.xlu1 %6099 }
 0x651   :  { %v21045_v59 = vpop.eup %17703  ;;  %17715 = vpow2.f32 %v6204_v60  ;;  %v6146_v50 = vsub.f32 %v20856_v36, %v6100_v8  ;;  %v6200_v32 = vmul.f32 1.442695, %v6145_v29  ;;  %v6266_v41 = vsel %vm2889_vm2, %v21043_v13, 0.0 }
 0x652   :  { %6267 = vadd.xlane.f32.xlu1 %v6266_v41  ;;  %v6263_v37 = vsel %vm2889_vm2, %v21045_v59, 0.0  ;;  %v6094_v44 = vpop.xlane.xlu0 %6093 }
 0x653   :  { %v6202_v48 = vmul.f32 1.442695, %v6146_v50  ;;  %17717 = vpow2.f32 %v6200_v32  ;;  %6264 = vadd.xlane.f32.xlu0 %v6263_v37  ;;  %v6144_v35 = vsub.f32 %v20861_v39, %v6094_v44 }
 0x654   :  { %v21053_v56 = vpop.eup %17705  ;;  %v6115_v6 = vpop.xlane.xlu1 %6114 }
 0x655   :  { %v21055_v27 = vpop.eup %17707  ;;  %17719 = vpow2.f32 %v6202_v48  ;;  %v6151_v36 = vsub.f32 %v20872_v7, %v6115_v6  ;;  %v6198_v23 = vmul.f32 1.442695, %v6144_v35  ;;  %v6260_v61 = vsel %vm2889_vm2, %v21053_v56, 0.0 }
 0x656   :  { %v6281_v14 = vsel %vm2889_vm2, %v21055_v27, 0.0  ;;  %v6109_v33 = vpop.xlane.xlu0 %6108 }
 0x657   :  { %v6212_v20 = vmul.f32 1.442695, %v6151_v36  ;;  %17721 = vpow2.f32 %v6198_v23  ;;  %6282 = vadd.xlane.f32.xlu1 %v6281_v14  ;;  %6261 = vadd.xlane.f32.xlu0 %v6260_v61  ;;  %v6149_v39 = vsub.f32 %v20877_v46, %v6109_v33 }
 0x658   :  { %v21063_v5 = vpop.eup %17709  ;;  %v6112_v11 = vpop.xlane.xlu1 %6111 }
 0x659   :  { %v21065_v17 = vpop.eup %17711  ;;  %17723 = vpow2.f32 %v6212_v20  ;;  %v6150_v7 = vsub.f32 %v20880_v34, %v6112_v11  ;;  %v6208_v60 = vmul.f32 1.442695, %v6149_v39  ;;  %v6275_v29 = vsel %vm2889_vm2, %v21063_v5, 0.0 }
 0x65a   :  { %v6278_v8 = vsel %vm2889_vm2, %v21065_v17, 0.0  ;;  %v6106_v50 = vpop.xlane.xlu0 %6105 }
 0x65b   :  { %v6210_v32 = vmul.f32 1.442695, %v6150_v7  ;;  %17725 = vpow2.f32 %v6208_v60  ;;  %6279 = vadd.xlane.f32.xlu1 %v6278_v8  ;;  %6276 = vadd.xlane.f32.xlu0 %v6275_v29  ;;  %v6148_v46 = vsub.f32 %v20887_v0, %v6106_v50 }
 0x65c   :  { %v21073_v41 = vpop.eup %17713 }
 0x65d   :  { %17727 = vpow2.f32 %v6210_v32  ;;  %v6206_v37 = vmul.f32 1.442695, %v6148_v46  ;;  %v6272_v34 = vsel %vm2889_vm2, %v21073_v41, 0.0 }
 0x65e   :  { %v21077_v44 = vpop.eup %17715  ;;  %v6121_v48 = vpop.xlane.xlu1 %6120 }
 0x65f   :  { %v6153_v35 = vsub.f32 %v20900_v57, %v6121_v48  ;;  %17729 = vpow2.f32 %v6206_v37  ;;  %v6293_v6 = vsel %vm2889_vm2, %v21077_v44, 0.0  ;;  %6273 = vadd.xlane.f32.xlu0 %v6272_v34 }
 0x660   :  { %v21082_v36 = vpop.eup %17717  ;;  %6294 = vadd.xlane.f32.xlu1 %v6293_v6  ;;  %v6118_v0 = vpop.xlane.xlu0 %6117  ;;  %v24244_v6 = vld [vmem:[#allocation78_spill] sm:$0xff] }
 0x661   :  { %v6216_v23 = vmul.f32 1.442695, %v6153_v35  ;;  %v6152_v61 = vsub.f32 %v20905_v12, %v6118_v0  ;;  %v6287_v14 = vsel %vm2889_vm2, %v21082_v36, 0.0  ;;  %v24245_v0 = vld [vmem:[#allocation79_spill] sm:$0xff] }
 0x662   :  { %v21087_v33 = vpop.eup %17719 }
 0x663   :  { %17731 = vpow2.f32 %v6216_v23  ;;  %v6214_v20 = vmul.f32 1.442695, %v6152_v61  ;;  %v6290_v57 = vsel %vm2889_vm2, %v21087_v33, 0.0  ;;  %6288 = vadd.xlane.f32.xlu0 %v6287_v14  ;;  %v24246_v23 = vld [vmem:[#allocation82_spill] sm:$0xff]  ;;  %v24247_v61 = vld [vmem:[#allocation51_spill] sm:$0xff]  ;;  %v24248_v14 = vld [vmem:[#allocation53_spill] sm:$0xff] }
 0x664   :  { %v21091_v39 = vpop.eup %17721  ;;  %6291 = vadd.xlane.f32.xlu1 %v6290_v57  ;;  %v21161_v57 = vpop.permute.xlu1 %8568 }
 0x665   :  { %17733 = vpow2.f32 %v6214_v20  ;;  %v6284_v11 = vsel %vm2889_vm2, %v21091_v39, 0.0  ;;  %v24249_v20 = vld [vmem:[#allocation52_spill] sm:$0xff] }
 0x666   :  { %v21095_v7 = vpop.eup %17723 }
 0x667   :  { %v6305_v12 = vsel %vm2889_vm2, %v21095_v7, 0.0  ;;  %6285 = vadd.xlane.f32.xlu0 %v6284_v11  ;;  %v24250_v11 = vld [vmem:[#allocation58_spill] sm:$0xff] }
 0x668   :  { %v21099_v60 = vpop.eup %17725  ;;  %6306 = vadd.xlane.f32.xlu1 %v6305_v12  ;;  %v24251_v12 = vld [vmem:[#allocation85_spill] sm:$0xff] }
 0x669   :  { %v6299_v29 = vsel %vm2889_vm2, %v21099_v60, 0.0 }
 0x66a   :  { %v21103_v8 = vpop.eup %17727 }
 0x66b   :  { %v6302_v50 = vsel %vm2889_vm2, %v21103_v8, 0.0  ;;  %6300 = vadd.xlane.f32.xlu0 %v6299_v29  ;;  %v21167_v29 = vpop.permute.xlu0 %8475 }
 0x66c   :  { %v21107_v32 = vpop.eup %17729  ;;  %6303 = vadd.xlane.f32.xlu1 %v6302_v50  ;;  %v24252_v50 = vld [vmem:[#allocation86_spill] sm:$0xff] }
 0x66d   :  { %v6296_v46 = vsel %vm2889_vm2, %v21107_v32, 0.0 }
 0x670   :  { %v21111_v37 = vpop.eup %17731  ;;  %6297 = vadd.xlane.f32.xlu1 %v6296_v46 }
 0x671   :  { %v6311_v48 = vsel %vm2889_vm2, %v21111_v37, 0.0 }
 0x672   :  { %v21113_v34 = vpop.eup %17733 }
 0x673   :  { %v6308_v35 = vsel %vm2889_vm2, %v21113_v34, 0.0 }
 0x674   :  { %6312 = vadd.xlane.f32.xlu1 %v6311_v48  ;;  %6309 = vadd.xlane.f32.xlu0 %v6308_v35  ;;  %v24253_v48 = vld [vmem:[#allocation87_spill] sm:$0xff] }
 0x685   :  { %8471 = vrot.lane.b32.xlu1 %v19397_v4, %s18215_s8 }
 0x689   :  { %8659 = vrot.lane.b32.xlu1 %v19437_v30, %s18215_s8 }
 0x68a   :  { %8382 = vrot.lane.b32.xlu0 %v19384_v52, %s18215_s8 }
 0x68d   :  { %8562 = vrot.lane.b32.xlu1 %v18985_v42, %s18215_s8 }
 0x68e   :  { %8566 = vrot.lane.b32.xlu0 %v19197_v18, %s18215_s8 }
 0x691   :  { %8750 = vrot.lane.b32.xlu1 %v19240_v40, %s18215_s8 }
 0x692   :  { %8473 = vrot.lane.b32.xlu0 %v19452_v3, %s18215_s8 }
 0x695   :  { %8653 = vrot.lane.b32.xlu1 %v19462_v58, %s18215_s8 }
 0x696   :  { %8657 = vrot.lane.b32.xlu0 %v19475_v54, %s18215_s8 }
 0x699   :  { %8841 = vrot.lane.b32.xlu1 %v19497_v53, %s18215_s8  ;;  %v24263_v53 = vld [vmem:[#allocation94_spill] sm:$0xff] }
 0x69a   :  { %8564 = vrot.lane.b32.xlu0 %v19247_v19, %s18215_s8 }
 0x69d   :  { %8744 = vrot.lane.b32.xlu1 %v19257_v47, %s18215_s8 }
 0x69e   :  { %8748 = vrot.lane.b32.xlu0 %v19260_v28, %s18215_s8 }
 0x6a1   :  { %8932 = vrot.lane.b32.xlu1 %v19306_v26, %s18215_s8  ;;  %v24257_v26 = vld [vmem:[#allocation62_spill] sm:$0xff] }
 0x6a2   :  { %8655 = vrot.lane.b32.xlu0 %v19509_v51, %s18215_s8 }
 0x6a5   :  { %8835 = vrot.lane.b32.xlu1 %v24244_v6, %s18215_s8 }
 0x6a6   :  { %8839 = vrot.lane.b32.xlu0 %v24245_v0, %s18215_s8 }
 0x6a9   :  { %9023 = vrot.lane.b32.xlu1 %v24246_v23, %s18215_s8  ;;  %v24254_v23 = vld [vmem:[#allocation90_spill] sm:$0xff] }
 0x6aa   :  { %8746 = vrot.lane.b32.xlu0 %v24247_v61, %s18215_s8 }
 0x6ad   :  { %8926 = vrot.lane.b32.xlu1 %v24248_v14, %s18215_s8 }
 0x6ae   :  { %8930 = vrot.lane.b32.xlu0 %v24249_v20, %s18215_s8 }
 0x6b1   :  { %9114 = vrot.lane.b32.xlu1 %v24250_v11, %s18215_s8  ;;  %v24255_v11 = vld [vmem:[#allocation61_spill] sm:$0xff] }
 0x6b2   :  { %8837 = vrot.lane.b32.xlu0 %v24251_v12, %s18215_s8  ;;  %v24256_v12 = vld [vmem:[#allocation63_spill] sm:$0xff] }
 0x6b5   :  { %9017 = vrot.lane.b32.xlu1 %v24252_v50, %s18215_s8  ;;  %v6223_v46 = vpop.xlane.xlu1 %6222  ;;  %v24258_v50 = vld [vmem:[#allocation95_spill] sm:$0xff] }
 0x6b6   :  { %9021 = vrot.lane.b32.xlu0 %v24253_v48, %s18215_s8  ;;  %17735 = vrcp.f32 %v6223_v46 }
 0x6b7   :  { %v6220_v35 = vpop.xlane.xlu0 %6219 }
 0x6b8   :  { %17737 = vrcp.f32 %v6220_v35  ;;  %v24259_v35 = vld [vmem:[#allocation93_spill] sm:$0xff] }
 0x6b9   :  { %9205 = vrot.lane.b32.xlu1 %v24254_v23, %s18215_s8 }
 0x6ba   :  { %8928 = vrot.lane.b32.xlu0 %v24255_v11, %s18215_s8  ;;  %v24260_v11 = vld [vmem:[#allocation98_spill] sm:$0xff] }
 0x6bd   :  { %9108 = vrot.lane.b32.xlu1 %v24256_v12, %s18215_s8  ;;  %v6235_v14 = vpop.xlane.xlu1 %6234 }
 0x6be   :  { %9112 = vrot.lane.b32.xlu0 %v24257_v26, %s18215_s8  ;;  %17739 = vrcp.f32 %v6235_v14  ;;  %v24261_v26 = vld [vmem:[#allocation70_spill] sm:$0xff] }
 0x6c1   :  { %9203 = vrot.lane.b32.xlu1 %v24258_v50, %s18215_s8  ;;  %v6232_v46 = vpop.xlane.xlu1 %6231 }
 0x6c2   :  { %9019 = vrot.lane.b32.xlu0 %v24259_v35, %s18215_s8  ;;  %17741 = vrcp.f32 %v6232_v46  ;;  %v24262_v46 = vld [vmem:[#allocation72_spill] sm:$0xff] }
 0x6c3   :  { %v17736_v23 = vpop.eup %17735  ;;  %v6229_v48 = vpop.xlane.xlu0 %6228 }
 0x6c4   :  { %17743 = vrcp.f32 %v6229_v48  ;;  %v6347_v12 = vmul.f32 %v17736_v23, %v20964_v24 }
 0x6c5   :  { %v17738_v20 = vpop.eup %17737  ;;  %9201 = vrot.lane.b32.xlu1 %v24260_v11, %s18215_s8 }
 0x6c6   :  { %9110 = vrot.lane.b32.xlu0 %v24261_v26, %s18215_s8  ;;  %v6247_v14 = vpop.xlane.xlu1 %6246  ;;  %v6346_v50 = vmul.f32 %v17738_v20, %v20970_v55  ;;  %v6379_v35 = vmax.f32 %v6347_v12, 1e-08  ;;  %v24264_v55 = vld [vmem:[#allocation74_spill] sm:$0xff] }
 0x6c7   :  { %v6226_v61 = vpop.xlane.xlu0 %6225 }
 0x6c8   :  { %17745 = vrcp.f32 %v6226_v61  ;;  %v6378_v6 = vmax.f32 %v6346_v50, 1e-08  ;;  %v24265_v61 = vld [vmem:[#allocation68_spill] sm:$0xff] }
 0x6c9   :  { %17747 = vrcp.f32 %v6247_v14  ;;  %9674 = vrot.lane.b32.xlu1 %v24262_v46, %s18215_s8 }
 0x6ca   :  { %9199 = vrot.lane.b32.xlu0 %v24263_v53, %s18215_s8  ;;  %v6244_v48 = vpop.xlane.xlu1 %6243  ;;  %16845 = vmatprep.mubr.msk.f32.mxu0 %vm2889_vm2, %v6378_v6 }
 0x6cb   :  { %17749 = vrcp.f32 %v6244_v48  ;;  %16846 = vmatmul.mubr.msk.f32.vlgmr.msra.gmra.mxu0 %vm2889_vm2, %v6379_v35  ;;  %v6241_v24 = vpop.xlane.xlu0 %6240  ;;  %v17740_v23 = vpop.eup %17739  ;;  %v24266_v35 = vld [vmem:[#allocation99_spill] sm:$0xff]  ;;  %v24267_v48 = vld [vmem:[#allocation97_spill] sm:$0xff] }
 0x6cc   :  { %16856 = vmatpush3.msra.mxu0 %v20610_v62  ;;  %17751 = vrcp.f32 %v6241_v24  ;;  %v6351_v50 = vmul.f32 %v17740_v23, %v20976_v25  ;;  %v24268_v25 = vld [vmem:[#allocation44_spill] sm:$0xff] }
 0x6cd   :  { %9850 = vrot.lane.b32.xlu1 %v24264_v55, %s18215_s8  ;;  %16857 = vmatprep.subr.mxu0 %v20653_v1 }
 0x6ce   :  { %9676 = vrot.lane.b32.xlu0 %v24265_v61, %s18215_s8  ;;  %v6259_v20 = vpop.xlane.xlu1 %6258  ;;  %16858 = vmatpush3.msra.mxu0 %v20653_v1  ;;  %v6383_v55 = vmax.f32 %v6351_v50, 1e-08  ;;  %v24270_v50 = vld [vmem:[#allocation110_spill] sm:$0xff] }
 0x6cf   :  { %v17742_v6 = vpop.eup %17741  ;;  %16869 = vmatprep.subr.mxu0 %v20667_v22  ;;  %v6238_v12 = vpop.xlane.xlu0 %6237 }
 0x6d0   :  { %17753 = vrcp.f32 %v6238_v12  ;;  %v6350_v62 = vmul.f32 %v17742_v6, %v20982_v31 }
 0x6d1   :  { %9761 = vrot.lane.b32.xlu1 %v24266_v35, %s18215_s8  ;;  %v17744_v14 = vpop.eup %17743  ;;  %17755 = vrcp.f32 %v6259_v20  ;;  %v24269_v20 = vld [vmem:[#allocation100_spill] sm:$0xff] }
 0x6d2   :  { %9763 = vrot.lane.b32.xlu0 %v24267_v48, %s18215_s8  ;;  %v6256_v24 = vpop.xlane.xlu1 %6255  ;;  %v6382_v61 = vmax.f32 %v6350_v62, 1e-08  ;;  %v6349_v31 = vmul.f32 %v17744_v14, %v20988_v9  ;;  %v24272_v9 = vld [vmem:[#allocation130_spill] sm:$0xff] }
 0x6d3   :  { %17757 = vrcp.f32 %v6256_v24  ;;  %v6253_v1 = vpop.xlane.xlu0 %6252 }
 0x6d4   :  { %16859 = vmatprep.mubr.msk.f32.mxu0 %vm2889_vm2, %v6382_v61  ;;  %17759 = vrcp.f32 %v6253_v1  ;;  %v6381_v14 = vmax.f32 %v6349_v31, 1e-08 }
 0x6d5   :  { %v17746_v53 = vpop.eup %17745  ;;  %9848 = vrot.lane.b32.xlu1 %v24268_v25, %s18215_s8  ;;  %16860 = vmatmul.mubr.msk.f32.vlgmr.msra.gmra.mxu0 %vm2889_vm2, %v6383_v55  ;;  %v24271_v55 = vld [vmem:[#allocation49_spill] sm:$0xff] }
 0x6d6   :  { %v17748_v23 = vpop.eup %17747  ;;  %9937 = vrot.lane.b32.xlu0 %v24269_v20, %s18215_s8  ;;  %16870 = vmatpush3.msra.mxu0 %v20667_v22  ;;  %v6348_v6 = vmul.f32 %v17746_v53, %v20996_v10  ;;  %v24273_v53 = vld [vmem:[#allocation46_spill] sm:$0xff] }
 0x6d7   :  { %v6271_v12 = vpop.xlane.xlu1 %6270  ;;  %16871 = vmatprep.subr.mxu0 %v24270_v50  ;;  %v6355_v22 = vmul.f32 %v17748_v23, %v20992_v49  ;;  %v24276_v49 = vld [vmem:[#allocation124_spill] sm:$0xff] }
 0x6d8   :  { %v17750_v61 = vpop.eup %17749  ;;  %16872 = vmatpush3.msra.mxu0 %v24270_v50  ;;  %v6250_v62 = vpop.xlane.xlu0 %6249  ;;  %v6380_v24 = vmax.f32 %v6348_v6, 1e-08 }
 0x6d9   :  { %10024 = vrot.lane.b32.xlu1 %v24271_v55, %s18215_s8  ;;  %17761 = vrcp.f32 %v6250_v62  ;;  %16883 = vmatprep.subr.mxu0 %v24272_v9  ;;  %v6354_v1 = vmul.f32 %v17750_v61, %v21002_v38  ;;  %v17752_v10 = vpop.eup %17751  ;;  %v24274_v62 = vld [vmem:[#allocation102_spill] sm:$0xff]  ;;  %v24275_v38 = vld [vmem:[#allocation59_spill] sm:$0xff]  ;;  %v6387_v23 = vmax.f32 %v6355_v22, 1e-08 }
 0x6da   :  { %17763 = vrcp.f32 %v6271_v12  ;;  %9935 = vrot.lane.b32.xlu0 %v24273_v53, %s18215_s8  ;;  %16852 = vmatprep.mubr.msk.f32.mxu1 %vm2889_vm2, %v6380_v24  ;;  %v24277_v12 = vld [vmem:[#allocation50_spill] sm:$0xff]  ;;  %v6353_v24 = vmul.f32 %v17752_v10, %v21006_v16  ;;  %v24278_v22 = vld [vmem:[#allocation131_spill] sm:$0xff] }
 0x6db   :  { %v6268_v50 = vpop.xlane.xlu1 %6267  ;;  %16853 = vmatmul.mubr.msk.f32.vlgmr.msra.gmra.mxu1 %vm2889_vm2, %v6381_v14  ;;  %v6386_v6 = vmax.f32 %v6354_v1, 1e-08 }
 0x6dc   :  { %17765 = vrcp.f32 %v6268_v50  ;;  %16863 = vmatpush3.msra.mxu1 %v24274_v62  ;;  %v6265_v25 = vpop.xlane.xlu0 %6264  ;;  %v6385_v10 = vmax.f32 %v6353_v24, 1e-08  ;;  %v24284_v24 = vld [vmem:[#allocation56_spill] sm:$0xff] }
 0x6dd   :  { %v17754_v31 = vpop.eup %17753  ;;  %10198 = vrot.lane.b32.xlu1 %v24275_v38, %s18215_s8  ;;  %16864 = vmatprep.subr.mxu1 %v24276_v49  ;;  %17767 = vrcp.f32 %v6265_v25  ;;  %v24281_v25 = vld [vmem:[#allocation55_spill] sm:$0xff] }
 0x6de   :  { %10022 = vrot.lane.b32.xlu0 %v24277_v12, %s18215_s8  ;;  %16873 = vmatprep.mubr.msk.f32.mxu0 %vm2889_vm2, %v6386_v6  ;;  %v6352_v61 = vmul.f32 %v17754_v31, %v21015_v45  ;;  %v17756_v14 = vpop.eup %17755  ;;  %v24279_v6 = vld [vmem:[#allocation136_spill] sm:$0xff] }
 0x6df   :  { %16865 = vmatpush3.msra.mxu1 %v24276_v49  ;;  %16874 = vmatmul.mubr.msk.f32.vlgmr.msra.gmra.mxu0 %vm2889_vm2, %v6387_v23  ;;  %v24280_v45 = vld [vmem:[#allocation60_spill] sm:$0xff] }
 0x6e0   :  { %v17758_v1 = vpop.eup %17757  ;;  %v6283_v50 = vpop.xlane.xlu1 %6282  ;;  %16884 = vmatpush3.msra.mxu0 %v24272_v9  ;;  %16876 = vmatprep.subr.mxu1 %v24278_v22  ;;  %v6384_v12 = vmax.f32 %v6352_v61, 1e-08  ;;  %v6359_v9 = vmul.f32 %v17756_v14, %v21012_v15  ;;  %v24282_v49 = vld [vmem:[#allocation140_spill] sm:$0xff]  ;;  %v24285_v15 = vld [vmem:[#allocation137_spill] sm:$0xff] }
 0x6e1   :  { %v6262_v62 = vpop.xlane.xlu0 %6261  ;;  %17769 = vrcp.f32 %v6283_v50  ;;  %16885 = vmatprep.subr.mxu0 %v24279_v6  ;;  %10196 = vrot.lane.b32.xlu1 %v24280_v45, %s18215_s8  ;;  %v6358_v16 = vmul.f32 %v17758_v1, %v21022_v63  ;;  %v17760_v31 = vpop.eup %17759  ;;  %v24283_v63 = vld [vmem:[#allocation67_spill] sm:$0xff] }
 0x6e2   :  { %16886 = vmatpush3.msra.mxu0 %v24279_v6  ;;  %17771 = vrcp.f32 %v6262_v62  ;;  %10111 = vrot.lane.b32.xlu0 %v24281_v25, %s18215_s8  ;;  %v6391_v14 = vmax.f32 %v6359_v9, 1e-08  ;;  %v24287_v9 = vld [vmem:[#allocation69_spill] sm:$0xff] }
 0x6e3   :  { %16897 = vmatprep.subr.mxu0 %v24282_v49  ;;  %16866 = vmatprep.mubr.msk.f32.mxu1 %vm2889_vm2, %v6384_v12  ;;  %v6390_v23 = vmax.f32 %v6358_v16, 1e-08  ;;  %v6357_v12 = vmul.f32 %v17760_v31, %v21025_v43  ;;  %v24288_v31 = vld [vmem:[#allocation143_spill] sm:$0xff] }
 0x6e4   :  { %v6280_v61 = vpop.xlane.xlu1 %6279  ;;  %16867 = vmatmul.mubr.msk.f32.vlgmr.msra.gmra.mxu1 %vm2889_vm2, %v6385_v10 }
 0x6e5   :  { %v6277_v50 = vpop.xlane.xlu0 %6276  ;;  %17773 = vrcp.f32 %v6280_v61  ;;  %10372 = vrot.lane.b32.xlu1 %v24283_v63, %s18215_s8  ;;  %16877 = vmatpush3.msra.mxu1 %v24278_v22  ;;  %v24286_v22 = vld [vmem:[#allocation141_spill] sm:$0xff] }
 0x6e6   :  { %v17762_v1 = vpop.eup %17761  ;;  %10109 = vrot.lane.b32.xlu0 %v24284_v24, %s18215_s8  ;;  %16878 = vmatprep.subr.mxu1 %v24285_v15  ;;  %17775 = vrcp.f32 %v6277_v50 }
 0x6e7   :  { %v17764_v62 = vpop.eup %17763  ;;  %16887 = vmatprep.mubr.msk.f32.mxu0 %vm2889_vm2, %v6390_v23  ;;  %16879 = vmatpush3.msra.mxu1 %v24285_v15  ;;  %v6356_v6 = vmul.f32 %v17762_v1, %v21035_v2  ;;  %v24289_v23 = vld [vmem:[#allocation64_spill] sm:$0xff]  ;;  %v6389_v2 = vmax.f32 %v6357_v12, 1e-08  ;;  %v24290_v15 = vld [vmem:[#allocation145_spill] sm:$0xff] }
 0x6e8   :  { %16888 = vmatmul.mubr.msk.f32.vlgmr.msra.gmra.mxu0 %vm2889_vm2, %v6391_v14  ;;  %16890 = vmatprep.subr.mxu1 %v24286_v22  ;;  %v6363_v1 = vmul.f32 %v17764_v62, %v21033_v21  ;;  %v24292_v21 = vld [vmem:[#allocation66_spill] sm:$0xff]  ;;  %v24293_v12 = vld [vmem:[#allocation144_spill] sm:$0xff] }
 0x6e9   :  { %v6274_v16 = vpop.xlane.xlu0 %6273  ;;  %v17766_v10 = vpop.eup %17765  ;;  %16898 = vmatpush3.msra.mxu0 %v24282_v49  ;;  %10370 = vrot.lane.b32.xlu1 %v24287_v9, %s18215_s8  ;;  %v6388_v43 = vmax.f32 %v6356_v6, 1e-08  ;;  %v24291_v9 = vld [vmem:[#allocation76_spill] sm:$0xff] }
 0x6ea   :  { %v6295_v61 = vpop.xlane.xlu1 %6294  ;;  %17777 = vrcp.f32 %v6274_v16  ;;  %16899 = vmatprep.subr.mxu0 %v24288_v31  ;;  %10285 = vrot.lane.b32.xlu0 %v24289_v23, %s18215_s8  ;;  %v6362_v50 = vmul.f32 %v17766_v10, %v21043_v13  ;;  %v17768_v49 = vpop.eup %17767  ;;  %v6395_v62 = vmax.f32 %v6363_v1, 1e-08 }
 0x6eb   :  { %17779 = vrcp.f32 %v6295_v61  ;;  %16900 = vmatpush3.msra.mxu0 %v24288_v31  ;;  %16880 = vmatprep.mubr.msk.f32.mxu1 %vm2889_vm2, %v6388_v43  ;;  %v6361_v61 = vmul.f32 %v17768_v49, %v21045_v59  ;;  %v24294_v43 = vld [vmem:[#allocation146_spill] sm:$0xff] }
 0x6ec   :  { %16911 = vmatprep.subr.mxu0 %v24290_v15  ;;  %16881 = vmatmul.mubr.msk.f32.vlgmr.msra.gmra.mxu1 %vm2889_vm2, %v6389_v2  ;;  %v6394_v6 = vmax.f32 %v6362_v50, 1e-08  ;;  %v24295_v50 = vld [vmem:[#allocation77_spill] sm:$0xff] }
 0x6ed   :  { %v6289_v14 = vpop.xlane.xlu0 %6288  ;;  %10546 = vrot.lane.b32.xlu1 %v24291_v9, %s18215_s8  ;;  %16891 = vmatpush3.msra.mxu1 %v24286_v22 }
 0x6ee   :  { %v6292_v16 = vpop.xlane.xlu1 %6291  ;;  %v17770_v13 = vpop.eup %17769  ;;  %10283 = vrot.lane.b32.xlu0 %v24292_v21, %s18215_s8  ;;  %16892 = vmatprep.subr.mxu1 %v24293_v12 }
 0x6ef   :  { %17781 = vrcp.f32 %v6292_v16  ;;  %v17772_v10 = vpop.eup %17771  ;;  %16901 = vmatprep.mubr.msk.f32.mxu0 %vm2889_vm2, %v6394_v6  ;;  %16893 = vmatpush3.msra.mxu1 %v24293_v12  ;;  %v24297_v6 = vld [vmem:[#allocation71_spill] sm:$0xff]  ;;  %v6367_v49 = vmul.f32 %v17770_v13, %v21055_v27  ;;  %v24298_v12 = vld [vmem:[#allocation149_spill] sm:$0xff] }
 0x6f0   :  { %17783 = vrcp.f32 %v6289_v14  ;;  %16902 = vmatmul.mubr.msk.f32.vlgmr.msra.gmra.mxu0 %vm2889_vm2, %v6395_v62  ;;  %16904 = vmatprep.subr.mxu1 %v24294_v43  ;;  %v6360_v31 = vmul.f32 %v17772_v10, %v21053_v56  ;;  %v24296_v14 = vld [vmem:[#allocation147_spill] sm:$0xff]  ;;  %v6393_v56 = vmax.f32 %v6361_v61, 1e-08  ;;  %v24300_v13 = vld [vmem:[#allocation73_spill] sm:$0xff] }
 0x6f1   :  { %v6286_v22 = vpop.xlane.xlu0 %6285  ;;  %16912 = vmatpush3.msra.mxu0 %v24290_v15  ;;  %10544 = vrot.lane.b32.xlu1 %v24295_v50, %s18215_s8 }
 0x6f2   :  { %v6307_v2 = vpop.xlane.xlu1 %6306  ;;  %17785 = vrcp.f32 %v6286_v22  ;;  %v17774_v1 = vpop.eup %17773  ;;  %16913 = vmatprep.subr.mxu0 %v24296_v14  ;;  %10459 = vrot.lane.b32.xlu0 %v24297_v6, %s18215_s8  ;;  %v6392_v59 = vmax.f32 %v6360_v31, 1e-08  ;;  %v24299_v22 = vld [vmem:[#allocation83_spill] sm:$0xff] }
 0x6f3   :  { %17787 = vrcp.f32 %v6307_v2  ;;  %16914 = vmatpush3.msra.mxu0 %v24296_v14  ;;  %v6366_v16 = vmul.f32 %v17774_v1, %v21065_v17  ;;  %v17776_v15 = vpop.eup %17775  ;;  %v6399_v17 = vmax.f32 %v6367_v49, 1e-08  ;;  %v24301_v2 = vld [vmem:[#allocation148_spill] sm:$0xff] }
 0x6f4   :  { %16925 = vmatprep.subr.mxu0 %v24298_v12  ;;  %16894 = vmatprep.mubr.msk.f32.mxu1 %vm2889_vm2, %v6392_v59  ;;  %v6365_v61 = vmul.f32 %v17776_v15, %v21063_v5  ;;  %v24304_v5 = vld [vmem:[#allocation84_spill] sm:$0xff] }
 0x6f5   :  { %v6301_v62 = vpop.xlane.xlu0 %6300  ;;  %10720 = vrot.lane.b32.xlu1 %v24299_v22, %s18215_s8  ;;  %16895 = vmatmul.mubr.msk.f32.vlgmr.msra.gmra.mxu1 %vm2889_vm2, %v6393_v56  ;;  %v6398_v31 = vmax.f32 %v6366_v16, 1e-08  ;;  %v24303_v56 = vld [vmem:[#allocation151_spill] sm:$0xff]  ;;  %v24353_v22 = vld [vmem:[#allocation178_spill] sm:$0xff] }
 0x6f6   :  { %v6304_v10 = vpop.xlane.xlu1 %6303  ;;  %16905 = vmatpush3.msra.mxu1 %v24294_v43  ;;  %10457 = vrot.lane.b32.xlu0 %v24300_v13, %s18215_s8  ;;  %v24302_v43 = vld [vmem:[#allocation150_spill] sm:$0xff]  ;;  %v6397_v15 = vmax.f32 %v6365_v61, 1e-08  ;;  %v24307_v61 = vld [vmem:[#allocation91_spill] sm:$0xff] }
 0x6f7   :  { %v17778_v27 = vpop.eup %17777  ;;  %17789 = vrcp.f32 %v6304_v10  ;;  %16906 = vmatprep.subr.mxu1 %v24301_v2  ;;  %16915 = vmatprep.mubr.msk.f32.mxu0 %vm2889_vm2, %v6398_v31  ;;  %v24306_v10 = vld [vmem:[#allocation153_spill] sm:$0xff] }
 0x6f8   :  { %17791 = vrcp.f32 %v6301_v62  ;;  %v6364_v1 = vmul.f32 %v17778_v27, %v21073_v41  ;;  %v17780_v14 = vpop.eup %17779  ;;  %16907 = vmatpush3.msra.mxu1 %v24301_v2  ;;  %16916 = vmatmul.mubr.msk.f32.vlgmr.msra.gmra.mxu0 %vm2889_vm2, %v6399_v17  ;;  %v24305_v41 = vld [vmem:[#allocation80_spill] sm:$0xff] }
 0x6f9   :  { %16926 = vmatpush3.msra.mxu0 %v24298_v12  ;;  %16918 = vmatprep.subr.mxu1 %v24302_v43  ;;  %v6371_v62 = vmul.f32 %v17780_v14, %v21077_v44  ;;  %v24308_v14 = vld [vmem:[#allocation81_spill] sm:$0xff] }
 0x6fa   :  { %v6298_v59 = vpop.xlane.xlu1 %6297  ;;  %v6396_v49 = vmax.f32 %v6364_v1, 1e-08  ;;  %16927 = vmatprep.subr.mxu0 %v24303_v56  ;;  %10718 = vrot.lane.b32.xlu1 %v24304_v5, %s18215_s8 }
 0x6fb   :  { %17793 = vrcp.f32 %v6298_v59  ;;  %16928 = vmatpush3.msra.mxu0 %v24303_v56  ;;  %10633 = vrot.lane.b32.xlu0 %v24305_v41, %s18215_s8  ;;  %v24309_v59 = vld [vmem:[#allocation152_spill] sm:$0xff] }
 0x6fc   :  { %v17782_v16 = vpop.eup %17781  ;;  %16939 = vmatprep.subr.mxu0 %v24306_v10  ;;  %16908 = vmatprep.mubr.msk.f32.mxu1 %vm2889_vm2, %v6396_v49 }
 0x6fd   :  { %v17784_v12 = vpop.eup %17783  ;;  %v6370_v31 = vmul.f32 %v17782_v16, %v21087_v33  ;;  %16909 = vmatmul.mubr.msk.f32.vlgmr.msra.gmra.mxu1 %vm2889_vm2, %v6397_v15  ;;  %v6310_v17 = vpop.xlane.xlu0 %6309  ;;  %v6403_v33 = vmax.f32 %v6371_v62, 1e-08  ;;  %v24311_v62 = vld [vmem:[#allocation92_spill] sm:$0xff] }
 0x6fe   :  { %v6313_v27 = vpop.xlane.xlu1 %6312  ;;  %10894 = vrot.lane.b32.xlu1 %v24307_v61, %s18215_s8  ;;  %16919 = vmatpush3.msra.mxu1 %v24302_v43  ;;  %v6369_v44 = vmul.f32 %v17784_v12, %v21082_v36  ;;  %v24310_v43 = vld [vmem:[#allocation154_spill] sm:$0xff]  ;;  %v24346_v61 = vld [vmem:[#allocation172_spill] sm:$0xff] }
 0x6ff   :  { %v17786_v2 = vpop.eup %17785  ;;  %17795 = vrcp.f32 %v6313_v27  ;;  %v6402_v1 = vmax.f32 %v6370_v31, 1e-08  ;;  %10631 = vrot.lane.b32.xlu0 %v24308_v14, %s18215_s8  ;;  %16920 = vmatprep.subr.mxu1 %v24309_v59  ;;  %v24312_v31 = vld [vmem:[#allocation155_spill] sm:$0xff]  ;;  %v24313_v27 = vld [vmem:[#allocation88_spill] sm:$0xff] }
 0x700   :  { %17797 = vrcp.f32 %v6310_v17  ;;  %v6368_v49 = vmul.f32 %v17786_v2, %v21091_v39  ;;  %v17788_v56 = vpop.eup %17787  ;;  %16921 = vmatpush3.msra.mxu1 %v24309_v59  ;;  %v6401_v12 = vmax.f32 %v6369_v44, 1e-08 }
 0x701   :  { %16929 = vmatprep.mubr.msk.f32.mxu0 %vm2889_vm2, %v6402_v1  ;;  %16932 = vmatprep.subr.mxu1 %v24310_v43  ;;  %v21341_v36 = vpop.permute.xlu0 %8382  ;;  %v6375_v17 = vmul.f32 %v17788_v56, %v21095_v7 }
 0x702   :  { %16930 = vmatmul.mubr.msk.f32.vlgmr.msra.gmra.mxu0 %vm2889_vm2, %v6403_v33  ;;  %v21339_v16 = vpop.permute.xlu1 %8471  ;;  %v6400_v15 = vmax.f32 %v6368_v49, 1e-08  ;;  %10892 = vrot.lane.b32.xlu1 %v24311_v62, %s18215_s8  ;;  %v24315_v33 = vld [vmem:[#allocation19_spill] sm:$0xff] }
 0x703   :  { %16940 = vmatpush3.msra.mxu0 %v24306_v10  ;;  %10807 = vrot.lane.b32.xlu0 %v24313_v27, %s18215_s8  ;;  %v24314_v10 = vld [vmem:[#allocation157_spill] sm:$0xff] }
 0x704   :  { %v17790_v39 = vpop.eup %17789  ;;  %16941 = vmatprep.subr.mxu0 %v24312_v31  ;;  %16922 = vmatprep.mubr.msk.f32.mxu1 %vm2889_vm2, %v6400_v15  ;;  %v24317_v15 = vld [vmem:[#allocation156_spill] sm:$0xff] }
 0x705   :  { %v17792_v2 = vpop.eup %17791  ;;  %16942 = vmatpush3.msra.mxu0 %v24312_v31  ;;  %v6374_v1 = vmul.f32 %v17790_v39, %v21103_v8  ;;  %16923 = vmatmul.mubr.msk.f32.vlgmr.msra.gmra.mxu1 %vm2889_vm2, %v6401_v12  ;;  %v21358_v44 = vpop.permute.xlu0 %8566  ;;  %v24316_v8 = vld [vmem:[#allocation89_spill] sm:$0xff]  ;;  %v6407_v39 = vmax.f32 %v6375_v17, 1e-08  ;;  %v24318_v31 = vld [vmem:[#allocation158_spill] sm:$0xff] }
 0x706   :  { %16953 = vmatprep.subr.msk.mxu0 %vm1496_vm1, %v24314_v10  ;;  %v21355_v59 = vpop.permute.xlu1 %8659  ;;  %11072 = vrot.lane.b32.xlu1 %v24315_v33, %s18216_s5  ;;  %v6373_v56 = vmul.f32 %v17792_v2, %v21099_v60  ;;  %v24319_v60 = vld [vmem:[#allocation161_spill] sm:$0xff] }
 0x707   :  { %16933 = vmatpush3.msra.mxu1 %v24310_v43  ;;  %v6406_v7 = vmax.f32 %v6374_v1, 1e-08  ;;  %10805 = vrot.lane.b32.xlu0 %v24316_v8, %s18215_s8 }
 0x708   :  { %v17794_v49 = vpop.eup %17793  ;;  %16934 = vmatprep.subr.mxu1 %v24317_v15  ;;  %v6405_v33 = vmax.f32 %v6373_v56, 1e-08 }
 0x709   :  { %16943 = vmatprep.mubr.msk.f32.mxu0 %vm2889_vm2, %v6406_v7  ;;  %16935 = vmatpush3.msra.mxu1 %v24317_v15  ;;  %v6372_v12 = vmul.f32 %v17794_v49, %v21107_v32  ;;  %v21374_v1 = vpop.permute.xlu0 %8473  ;;  %v24320_v7 = vld [vmem:[#allocation159_spill] sm:$0xff]  ;;  %v24321_v32 = vld [vmem:[#allocation21_spill] sm:$0xff]  ;;  %v24322_v15 = vld [vmem:[#allocation96_spill] sm:$0xff] }
 0x70a   :  { %16944 = vmatmul.mubr.msk.f32.vlgmr.msra.gmra.mxu0 %vm2889_vm2, %v6407_v39  ;;  %16946 = vmatprep.subr.mxu1 %v24318_v31  ;;  %v21372_v43 = vpop.permute.xlu1 %8562 }
 0x70b   :  { %16954 = vmatpush3.xpose.msk.msra.mxu0 %vm1496_vm1, %v24314_v10  ;;  %16957 = vmatprep.mubr.msk.f32.mxu0 %vm1496_vm1, %v24319_v60  ;;  %v6404_v17 = vmax.f32 %v6372_v12, 1e-08  ;;  %v24323_v60 = vld [vmem:[#allocation163_spill] sm:$0xff] }
 0x70c   :  { %v17796_v2 = vpop.eup %17795  ;;  %16955 = vmatprep.subr.msk.mxu0 %vm1496_vm1, %v24320_v7  ;;  %11070 = vrot.lane.b32.xlu1 %v24321_v32, %s18216_s5 }
 0x70d   :  { %v17798_v49 = vpop.eup %17797  ;;  %10981 = vrot.lane.b32.xlu0 %v24322_v15, %s18215_s8  ;;  %16936 = vmatprep.mubr.msk.f32.mxu1 %vm2889_vm2, %v6404_v17  ;;  %v6377_v10 = vmul.f32 %v17796_v2, %v21111_v37  ;;  %v21391_v12 = vpop.permute.xlu0 %8657  ;;  %v24324_v17 = vld [vmem:[#allocation22_spill] sm:$0xff]  ;;  %v24325_v2 = vld [vmem:[#allocation117_spill] sm:$0xff] }
 0x70e   :  { %v21388_v39 = vpop.permute.xlu1 %8750  ;;  %16937 = vmatmul.mubr.msk.f32.vlgmr.msra.gmra.mxu1 %vm2889_vm2, %v6405_v33  ;;  %v6376_v56 = vmul.f32 %v17798_v49, %v21113_v34  ;;  %v24326_v33 = vld [vmem:[#allocation160_spill] sm:$0xff]  ;;  %v24327_v15 = vld [vmem:[#allocation166_spill] sm:$0xff] }
 0x70f   :  { %16956 = vmatpush3.xpose.msk.msra.mxu0 %vm1496_vm1, %v24320_v7  ;;  %16947 = vmatpush3.msra.mxu1 %v24318_v31  ;;  %v6409_v32 = vmax.f32 %v6377_v10, 1e-08  ;;  %v24328_v7 = vld [vmem:[#allocation169_spill] sm:$0xff]  ;;  %v24329_v49 = vld [vmem:[#allocation162_spill] sm:$0xff]  ;;  %v24330_v10 = vld [vmem:[#allocation168_spill] sm:$0xff] }
 0x710   :  { %16967 = vmatprep.subr.msk.mxu0 %vm1496_vm1, %v24323_v60  ;;  %11066 = vrot.lane.b32.xlu1 %v24324_v17, %s18216_s5  ;;  %v6408_v37 = vmax.f32 %v6376_v56, 1e-08  ;;  %v24332_v56 = vld [vmem:[#allocation24_spill] sm:$0xff] }
 0x711   :  { %10979 = vrot.lane.b32.xlu0 %v24325_v2, %s18215_s8  ;;  %16948 = vmatprep.subr.mxu1 %v24326_v33  ;;  %v21409_v31 = vpop.permute.xlu0 %8564  ;;  %v24342_v2 = vld [vmem:[#allocation170_spill] sm:$0xff] }
 0x712   :  { %16958 = vmatmul.mubr.msk.f32.vlgmr.msra.gmra.mxu0 %vm1496_vm1, %v24327_v15  ;;  %16949 = vmatpush3.msra.mxu1 %v24326_v33  ;;  %v21407_v34 = vpop.permute.xlu1 %8653  ;;  %v24331_v15 = vld [vmem:[#allocation26_spill] sm:$0xff]  ;;  %v24334_v33 = vld [vmem:[#allocation164_spill] sm:$0xff] }
 0x713   :  { %16968 = vmatpush3.xpose.msk.msra.mxu0 %vm1496_vm1, %v24323_v60  ;;  %16971 = vmatprep.mubr.msk.f32.mxu0 %vm1496_vm1, %v24328_v7  ;;  %v24336_v7 = vld [vmem:[#allocation25_spill] sm:$0xff] }
 0x714   :  { %16950 = vmatprep.mubr.msk.f32.mxu1 %vm2889_vm2, %v6408_v37  ;;  %16960 = vmatprep.subr.msk.mxu1 %vm1496_vm1, %v24329_v49  ;;  %v24333_v37 = vld [vmem:[#allocation165_spill] sm:$0xff] }
 0x715   :  { %16969 = vmatprep.subr.msk.mxu0 %vm1496_vm1, %v24330_v10  ;;  %11161 = vrot.lane.b32.xlu1 %v24331_v15, %s18216_s5  ;;  %v21427_v17 = vpop.permute.xlu0 %8748  ;;  %v24337_v15 = vld [vmem:[#allocation20_spill] sm:$0xff] }
 0x716   :  { %16951 = vmatmul.mubr.msk.f32.vlgmr.msra.gmra.mxu1 %vm2889_vm2, %v6409_v32  ;;  %11163 = vrot.lane.b32.xlu0 %v24332_v56, %s18216_s5  ;;  %v21425_v60 = vpop.permute.xlu1 %8841  ;;  %v24335_v32 = vld [vmem:[#allocation171_spill] sm:$0xff] }
 0x717   :  { %16961 = vmatpush3.xpose.msk.msra.mxu1 %vm1496_vm1, %v24329_v49  ;;  %16964 = vmatprep.mubr.msk.f32.mxu1 %vm1496_vm1, %v24333_v37  ;;  %v24338_v37 = vld [vmem:[#allocation174_spill] sm:$0xff] }
 0x718   :  { %16962 = vmatprep.subr.msk.mxu1 %vm1496_vm1, %v24334_v33  ;;  %16970 = vmatpush3.xpose.msk.msra.mxu0 %vm1496_vm1, %v24330_v10  ;;  %v24339_v10 = vld [vmem:[#allocation167_spill] sm:$0xff] }
 0x719   :  { %16981 = vmatprep.subr.msk.mxu0 %vm1496_vm1, %v24335_v32  ;;  %11157 = vrot.lane.b32.xlu1 %v24336_v7, %s18216_s5  ;;  %v21445_v49 = vpop.permute.xlu0 %8655  ;;  %v24340_v7 = vld [vmem:[#allocation177_spill] sm:$0xff] }
 0x71a   :  { %11068 = vrot.lane.b32.xlu0 %v24337_v15, %s18216_s5  ;;  %v21443_v56 = vpop.permute.xlu1 %8744  ;;  %v24341_v15 = vld [vmem:[#allocation176_spill] sm:$0xff] }
 0x71b   :  { %16963 = vmatpush3.xpose.msk.msra.mxu1 %vm1496_vm1, %v24334_v33  ;;  %16972 = vmatmul.mubr.msk.f32.vlgmr.msra.gmra.mxu0 %vm1496_vm1, %v24338_v37  ;;  %v24343_v33 = vld [vmem:[#allocation32_spill] sm:$0xff] }
 0x71c   :  { %16974 = vmatprep.subr.msk.mxu1 %vm1496_vm1, %v24339_v10  ;;  %16982 = vmatpush3.xpose.msk.msra.mxu0 %vm1496_vm1, %v24335_v32  ;;  %v24344_v32 = vld [vmem:[#allocation173_spill] sm:$0xff] }
 0x71d   :  { %16985 = vmatprep.mubr.msk.f32.mxu0 %vm1496_vm1, %v24340_v7  ;;  %16983 = vmatprep.subr.msk.mxu0 %vm1496_vm1, %v24341_v15  ;;  %v21465_v37 = vpop.permute.xlu0 %8839  ;;  %v24345_v7 = vld [vmem:[#allocation29_spill] sm:$0xff] }
 0x71e   :  { %16965 = vmatmul.mubr.msk.f32.vlgmr.msra.gmra.mxu1 %vm1496_vm1, %v24342_v2  ;;  %11252 = vrot.lane.b32.xlu1 %v24343_v33, %s18216_s5  ;;  %v21463_v62 = vpop.permute.xlu1 %8932  ;;  %v24347_v2 = vld [vmem:[#allocation179_spill] sm:$0xff]  ;;  %v24348_v33 = vld [vmem:[#allocation28_spill] sm:$0xff] }
 0x71f   :  { %16975 = vmatpush3.xpose.msk.msra.mxu1 %vm1496_vm1, %v24339_v10  ;;  %16978 = vmatprep.mubr.msk.f32.mxu1 %vm1496_vm1, %v24344_v32  ;;  %v24349_v32 = vld [vmem:[#allocation182_spill] sm:$0xff] }
 0x720   :  { %11254 = vrot.lane.b32.xlu0 %v24345_v7, %s18216_s5  ;;  %16976 = vmatprep.subr.msk.mxu1 %vm1496_vm1, %v24346_v61  ;;  %v24350_v7 = vld [vmem:[#allocation23_spill] sm:$0xff] }
 0x721   :  { %16984 = vmatpush3.xpose.msk.msra.mxu0 %vm1496_vm1, %v24341_v15  ;;  %v21483_v10 = vpop.permute.xlu0 %8746  ;;  %v24351_v15 = vld [vmem:[#allocation175_spill] sm:$0xff] }
 0x722   :  { %16995 = vmatprep.subr.msk.mxu0 %vm1496_vm1, %v24347_v2  ;;  %11248 = vrot.lane.b32.xlu1 %v24348_v33, %s18216_s5  ;;  %v21481_v27 = vpop.permute.xlu1 %8835  ;;  %v24352_v33 = vld [vmem:[#allocation185_spill] sm:$0xff] }
 0x723   :  { %16977 = vmatpush3.xpose.msk.msra.mxu1 %vm1496_vm1, %v24346_v61 }
 0x724   :  { %16986 = vmatmul.mubr.msk.f32.vlgmr.msra.gmra.mxu0 %vm1496_vm1, %v24349_v32  ;;  %11159 = vrot.lane.b32.xlu0 %v24350_v7, %s18216_s5  ;;  %v24354_v32 = vld [vmem:[#allocation184_spill] sm:$0xff]  ;;  %v24355_v7 = vld [vmem:[#allocation38_spill] sm:$0xff] }
 0x725   :  { %16988 = vmatprep.subr.msk.mxu1 %vm1496_vm1, %v24351_v15  ;;  %16996 = vmatpush3.xpose.msk.msra.mxu0 %vm1496_vm1, %v24347_v2  ;;  %v21501_v61 = vpop.permute.xlu0 %8930  ;;  %v24356_v2 = vld [vmem:[#allocation181_spill] sm:$0xff] }
 0x726   :  { %16999 = vmatprep.mubr.msk.f32.mxu0 %vm1496_vm1, %v24352_v33  ;;  %16979 = vmatmul.mubr.msk.f32.vlgmr.msra.gmra.mxu1 %vm1496_vm1, %v24353_v22  ;;  %v21499_v8 = vpop.permute.xlu1 %9023  ;;  %v24357_v33 = vld [vmem:[#allocation35_spill] sm:$0xff]  ;;  %v24358_v22 = vld [vmem:[#allocation180_spill] sm:$0xff] }
 0x727   :  { %16997 = vmatprep.subr.msk.mxu0 %vm1496_vm1, %v24354_v32  ;;  %11343 = vrot.lane.b32.xlu1 %v24355_v7, %s18216_s5  ;;  %v24360_v7 = vld [vmem:[#allocation27_spill] sm:$0xff] }
 0x728   :  { %16989 = vmatpush3.xpose.msk.msra.mxu1 %vm1496_vm1, %v24351_v15  ;;  %16992 = vmatprep.mubr.msk.f32.mxu1 %vm1496_vm1, %v24356_v2  ;;  %v24359_v15 = vld [vmem:[#allocation31_spill] sm:$0xff] }
 0x729   :  { %11345 = vrot.lane.b32.xlu0 %v24357_v33, %s18216_s5  ;;  %16990 = vmatprep.subr.msk.mxu1 %vm1496_vm1, %v24358_v22  ;;  %v21517_v5 = vpop.permute.xlu0 %8837  ;;  %v24361_v2 = vld [vmem:[#allocation183_spill] sm:$0xff] }
 0x72a   :  { %16998 = vmatpush3.xpose.msk.msra.mxu0 %vm1496_vm1, %v24354_v32  ;;  %v8927_v41 = vpop.permute.xlu1 %8926 }
 0x72b   :  { %17009 = vmatprep.subr.msk.mxu0 %vm1496_vm1, %v21161_v57  ;;  %11339 = vrot.lane.b32.xlu1 %v24359_v15, %s18216_s5  ;;  %v24362_v15 = vld [vmem:[#allocation186_spill] sm:$0xff] }
 0x72c   :  { %16991 = vmatpush3.xpose.msk.msra.mxu1 %vm1496_vm1, %v24358_v22 }
 0x72d   :  { %11250 = vrot.lane.b32.xlu0 %v24360_v7, %s18216_s5  ;;  %17000 = vmatmul.mubr.msk.f32.vlgmr.msra.gmra.mxu0 %vm1496_vm1, %v21341_v36  ;;  %v21533_v33 = vpop.permute.xlu0 %9021  ;;  %v24363_v36 = vld [vmem:[#allocation42_spill] sm:$0xff] }
 0x72e   :  { %17002 = vmatprep.subr.msk.mxu1 %vm1496_vm1, %v24361_v2  ;;  %17010 = vmatpush3.xpose.msk.msra.mxu0 %vm1496_vm1, %v21161_v57  ;;  %v9115_v32 = vpop.permute.xlu1 %9114  ;;  %v24364_v57 = vld [vmem:[#allocation40_spill] sm:$0xff]  ;;  %v24365_v7 = vld [vmem:[#allocation34_spill] sm:$0xff] }
 0x72f   :  { %17013 = vmatprep.mubr.msk.f32.mxu0 %vm1496_vm1, %v21372_v43  ;;  %16993 = vmatmul.mubr.msk.f32.vlgmr.msra.gmra.mxu1 %vm1496_vm1, %v24362_v15 }
 0x730   :  { %17011 = vmatprep.subr.msk.mxu0 %vm1496_vm1, %v21358_v44  ;;  %11434 = vrot.lane.b32.xlu1 %v24363_v36, %s18216_s5 }
 0x731   :  { %17003 = vmatpush3.xpose.msk.msra.mxu1 %vm1496_vm1, %v24361_v2  ;;  %17006 = vmatprep.mubr.msk.f32.mxu1 %vm1496_vm1, %v21339_v16  ;;  %v8929_v22 = vpop.permute.xlu0 %8928  ;;  %v24366_v16 = vld [vmem:[#allocation30_spill] sm:$0xff] }
 0x732   :  { %11436 = vrot.lane.b32.xlu0 %v24364_v57, %s18216_s5  ;;  %17004 = vmatprep.subr.msk.mxu1 %vm1496_vm1, %v21167_v29  ;;  %v9018_v43 = vpop.permute.xlu1 %9017 }
 0x733   :  { %17012 = vmatpush3.xpose.msk.msra.mxu0 %vm1496_vm1, %v21358_v44 }
 0x734   :  { %17023 = vmatprep.subr.msk.mxu0 %vm1496_vm1, %v21388_v39  ;;  %11430 = vrot.lane.b32.xlu1 %v24365_v7, %s18216_s5 }
 0x735   :  { %17005 = vmatpush3.xpose.msk.msra.mxu1 %vm1496_vm1, %v21167_v29  ;;  %v9113_v15 = vpop.permute.xlu0 %9112  ;;  %v24367_v29 = vld [vmem:[#allocation45_spill] sm:$0xff] }
 0x736   :  { %11341 = vrot.lane.b32.xlu0 %v24366_v16, %s18216_s5  ;;  %17014 = vmatmul.mubr.msk.f32.vlgmr.msra.gmra.mxu0 %vm1496_vm1, %v21409_v31  ;;  %v9206_v2 = vpop.permute.xlu1 %9205  ;;  %v24368_v31 = vld [vmem:[#allocation43_spill] sm:$0xff] }
 0x737   :  { %17016 = vmatprep.subr.msk.mxu1 %vm1496_vm1, %v21355_v59  ;;  %17024 = vmatpush3.xpose.msk.msra.mxu0 %vm1496_vm1, %v21388_v39 }
 0x738   :  { %17027 = vmatprep.mubr.msk.f32.mxu0 %vm1496_vm1, %v21443_v56  ;;  %17007 = vmatmul.mubr.msk.f32.vlgmr.msra.gmra.mxu1 %vm1496_vm1, %v21374_v1  ;;  %v24369_v1 = vld [vmem:[#allocation37_spill] sm:$0xff]  ;;  %v24373_v56 = vld [vmem:[#allocation39_spill] sm:$0xff] }
 0x739   :  { %17025 = vmatprep.subr.msk.mxu0 %vm1496_vm1, %v21427_v17  ;;  %11525 = vrot.lane.b32.xlu1 %v24367_v29, %s18216_s5  ;;  %v9020_v39 = vpop.permute.xlu0 %9019 }
 0x73a   :  { %17017 = vmatpush3.xpose.msk.msra.mxu1 %vm1496_vm1, %v21355_v59  ;;  %17020 = vmatprep.mubr.msk.f32.mxu1 %vm1496_vm1, %v21407_v34  ;;  %v9109_v44 = vpop.permute.xlu1 %9108  ;;  %v24370_v59 = vld [vmem:[#allocation33_spill] sm:$0xff] }
 0x73b   :  { %11527 = vrot.lane.b32.xlu0 %v24368_v31, %s18216_s5  ;;  %17018 = vmatprep.subr.msk.mxu1 %vm1496_vm1, %v21391_v12 }
 0x73c   :  { %17026 = vmatpush3.xpose.msk.msra.mxu0 %vm1496_vm1, %v21427_v17 }
 0x73d   :  { %17037 = vmatprep.subr.msk.mxu0 %vm1496_vm1, %v21463_v62  ;;  %11521 = vrot.lane.b32.xlu1 %v24369_v1, %s18216_s5  ;;  %v9111_v34 = vpop.permute.xlu0 %9110 }
 0x73e   :  { %17019 = vmatpush3.xpose.msk.msra.mxu1 %vm1496_vm1, %v21391_v12  ;;  %v9204_v17 = vpop.permute.xlu1 %9203  ;;  %v24371_v12 = vld [vmem:[#allocation54_spill] sm:$0xff] }
 0x73f   :  { %11432 = vrot.lane.b32.xlu0 %v24370_v59, %s18216_s5  ;;  %17028 = vmatmul.mubr.msk.f32.vlgmr.msra.gmra.mxu0 %vm1496_vm1, %v21483_v10 }
 0x740   :  { %17030 = vmatprep.subr.msk.mxu1 %vm1496_vm1, %v21425_v60  ;;  %17038 = vmatpush3.xpose.msk.msra.mxu0 %vm1496_vm1, %v21463_v62  ;;  %v24372_v62 = vld [vmem:[#allocation47_spill] sm:$0xff] }
 0x741   :  { %17041 = vmatprep.mubr.msk.f32.mxu0 %vm1496_vm1, %v8927_v41  ;;  %17021 = vmatmul.mubr.msk.f32.vlgmr.msra.gmra.mxu1 %vm1496_vm1, %v21445_v49  ;;  %v9200_v41 = vpop.permute.xlu0 %9199 }
 0x742   :  { %17039 = vmatprep.subr.msk.mxu0 %vm1496_vm1, %v21501_v61  ;;  %11616 = vrot.lane.b32.xlu1 %v24371_v12, %s18216_s5  ;;  %v9202_v49 = vpop.permute.xlu1 %9201 }
 0x743   :  { %17031 = vmatpush3.xpose.msk.msra.mxu1 %vm1496_vm1, %v21425_v60  ;;  %17034 = vmatprep.mubr.msk.f32.mxu1 %vm1496_vm1, %v21481_v27  ;;  %v24374_v27 = vld [vmem:[#allocation36_spill] sm:$0xff] }
 0x744   :  { %11618 = vrot.lane.b32.xlu0 %v24372_v62, %s18216_s5  ;;  %17032 = vmatprep.subr.msk.mxu1 %vm1496_vm1, %v21465_v37 }
 0x745   :  { %17040 = vmatpush3.xpose.msk.msra.mxu0 %vm1496_vm1, %v21501_v61  ;;  %v9677_v60 = vpop.permute.xlu0 %9676 }
 0x746   :  { %17051 = vmatprep.subr.msk.mxu0 %vm1496_vm1, %v9115_v32  ;;  %11612 = vrot.lane.b32.xlu1 %v24373_v56, %s18216_s5  ;;  %v9675_v10 = vpop.permute.xlu1 %9674 }
 0x747   :  { %17033 = vmatpush3.xpose.msk.msra.mxu1 %vm1496_vm1, %v21465_v37  ;;  %v24375_v37 = vld [vmem:[#allocation57_spill] sm:$0xff] }
 0x748   :  { %11523 = vrot.lane.b32.xlu0 %v24374_v27, %s18216_s5  ;;  %17042 = vmatmul.mubr.msk.f32.vlgmr.msra.gmra.mxu0 %vm1496_vm1, %v8929_v22 }
 0x749   :  { %17044 = vmatprep.subr.msk.mxu1 %vm1496_vm1, %v21499_v8  ;;  %17052 = vmatpush3.xpose.msk.msra.mxu0 %vm1496_vm1, %v9115_v32 }
 0x74a   :  { %17055 = vmatprep.mubr.msk.f32.mxu0 %vm1496_vm1, %v9109_v44  ;;  %17035 = vmatmul.mubr.msk.f32.vlgmr.msra.gmra.mxu1 %vm1496_vm1, %v21517_v5  ;;  %v21644_v5 = vpop.permute.xlu1 %9850 }
 0x74b   :  { %17053 = vmatprep.subr.msk.mxu0 %vm1496_vm1, %v9113_v15  ;;  %17045 = vmatpush3.xpose.msk.msra.mxu1 %vm1496_vm1, %v21499_v8  ;;  %v9764_v8 = vpop.permute.xlu0 %9763 }
 0x74c   :  { %17048 = vmatprep.mubr.msk.f32.mxu1 %vm1496_vm1, %v9018_v43  ;;  %11709 = vrot.lane.b32.xlu0 %v24375_v37, %s18216_s5 }
 0x74d   :  { %17046 = vmatprep.subr.msk.mxu1 %vm1496_vm1, %v21533_v33  ;;  %17054 = vmatpush3.xpose.msk.msra.mxu0 %vm1496_vm1, %v9113_v15 }
 0x74e   :  { %17065 = vmatprep.subr.mxu0 %v9677_v60  ;;  %v9762_v61 = vpop.permute.xlu1 %9761 }
 0x74f   :  { %17047 = vmatpush3.xpose.msk.msra.mxu1 %vm1496_vm1, %v21533_v33  ;;  %v21652_v32 = vpop.permute.xlu0 %9937 }
 0x750   :  { %17056 = vmatmul.mubr.msk.f32.vlgmr.msra.gmra.mxu0 %vm1496_vm1, %v9111_v34  ;;  %17058 = vmatprep.subr.msk.mxu1 %vm1496_vm1, %v9206_v2  ;;  %24376 = vst [vmem:[#allocation79_spill] sm:$0xff] %v21652_v32 }
 0x751   :  { %17066 = vmatpush3.msra.mxu0 %v9677_v60 }
 0x752   :  { %17049 = vmatmul.mubr.msk.f32.vlgmr.msra.gmra.mxu1 %vm1496_vm1, %v9020_v39  ;;  %17067 = vmatprep.subr.mxu0 %v9675_v10  ;;  %v21685_v34 = vpop.permute.xlu1 %9848 }
 0x753   :  { %17059 = vmatpush3.xpose.msk.msra.mxu1 %vm1496_vm1, %v9206_v2  ;;  %17062 = vmatprep.mubr.msk.f32.mxu1 %vm1496_vm1, %v9200_v41  ;;  %v21693_v41 = vpop.permute.xlu0 %9935 }
 0x754   :  { %17068 = vmatpush3.msra.mxu0 %v9675_v10  ;;  %17060 = vmatprep.subr.msk.mxu1 %vm1496_vm1, %v9204_v17  ;;  %24395 = vst [vmem:[#allocation148_spill] sm:$0xff] %v21693_v41 }
 0x755   :  { %17079 = vmatprep.subr.mxu0 %v21644_v5 }
 0x757   :  { %17061 = vmatpush3.xpose.msk.msra.mxu1 %vm1496_vm1, %v9204_v17  ;;  %v21705_v10 = vpop.permute.xlu0 %10022 }
 0x758   :  { %17072 = vmatprep.subr.mxu1 %v9764_v8  ;;  %24400 = vst [vmem:[#allocation154_spill] sm:$0xff] %v21705_v10 }
 0x75a   :  { %17063 = vmatmul.mubr.msk.f32.vlgmr.msra.gmra.mxu1 %vm1496_vm1, %v9202_v49  ;;  %v21697_v49 = vpop.permute.xlu1 %10024 }
 0x75b   :  { %17073 = vmatpush3.msra.mxu1 %v9764_v8 }
 0x75c   :  { %17074 = vmatprep.subr.mxu1 %v9762_v61 }
 0x75d   :  { %17075 = vmatpush3.msra.mxu1 %v9762_v61 }
 0x75e   :  { %17086 = vmatprep.subr.mxu1 %v21652_v32  ;;  %v21709_v61 = vpop.permute.xlu1 %10198 }
 0x75f   :  { %24402 = vst [vmem:[#allocation157_spill] sm:$0xff] %v21709_v61 }
 0x78b   :  { %v21655_v33 = vpop.f32.mrf.mxu0 }
 0x78c   :  { %24377 = vst [vmem:[#allocation98_spill] sm:$0xff] %v21655_v33 }
 0x78d   :  { %v21657_v36 = vpop.f32.mrf.mxu0 }
 0x78e   :  { %24378 = vst [vmem:[#allocation70_spill] sm:$0xff] %v21657_v36 }
 0x795   :  { %v21659_v57 = vpop.f32.mrf.mxu0 }
 0x796   :  { %24379 = vst [vmem:[#allocation72_spill] sm:$0xff] %v21659_v57 }
 0x797   :  { %v21661_v43 = vpop.f32.mrf.mxu0 }
 0x798   :  { %24380 = vst [vmem:[#allocation110_spill] sm:$0xff] %v21661_v43 }
 0x79b   :  { %v21663_v22 = vpop.f32.mrf.mxu1 }
 0x79c   :  { %24381 = vst [vmem:[#allocation130_spill] sm:$0xff] %v21663_v22 }
 0x79d   :  { %v21667_v16 = vpop.f32.mrf.mxu1 }
 0x79e   :  { %24383 = vst [vmem:[#allocation124_spill] sm:$0xff] %v21667_v16 }
 0x79f   :  { %v21665_v7 = vpop.f32.mrf.mxu0 }
 0x7a0   :  { %24382 = vst [vmem:[#allocation102_spill] sm:$0xff] %v21665_v7 }
 0x7a1   :  { %v21669_v2 = vpop.f32.mrf.mxu0 }
 0x7a2   :  { %24384 = vst [vmem:[#allocation131_spill] sm:$0xff] %v21669_v2 }
 0x7a4   :  { %v21671_v15 = vpop.f32.mrf.mxu1 }
 0x7a5   :  { %24385 = vst [vmem:[#allocation136_spill] sm:$0xff] %v21671_v15 }
 0x7a6   :  { %v21675_v44 = vpop.f32.mrf.mxu1 }
 0x7a7   :  { %24387 = vst [vmem:[#allocation137_spill] sm:$0xff] %v21675_v44 }
 0x7a8   :  { %v21673_v29 = vpop.f32.mrf.mxu0 }
 0x7a9   :  { %24386 = vst [vmem:[#allocation140_spill] sm:$0xff] %v21673_v29  ;;  %v21727_v29 = vld [vmem:[#allocation11 + $0x28] sm:$0xff] }
 0x7aa   :  { %v21677_v39 = vpop.f32.mrf.mxu0 }
 0x7ab   :  { %24388 = vst [vmem:[#allocation141_spill] sm:$0xff] %v21677_v39  ;;  %v21729_v39 = vld [vmem:[#allocation11 + $0x20] sm:$0xff] }
 0x7ac   :  { %v21679_v31 = vpop.f32.mrf.mxu1 }
 0x7ad   :  { %24389 = vst [vmem:[#allocation143_spill] sm:$0xff] %v21679_v31 }
 0x7ae   :  { %v21683_v59 = vpop.f32.mrf.mxu1 }
 0x7af   :  { %24391 = vst [vmem:[#allocation144_spill] sm:$0xff] %v21683_v59 }
 0x7b0   :  { %v21681_v1 = vpop.f32.mrf.mxu0 }
 0x7b1   :  { %24390 = vst [vmem:[#allocation145_spill] sm:$0xff] %v21681_v1 }
 0x7b2   :  { %v21687_v17 = vpop.f32.mrf.mxu0 }
 0x7b3   :  { %24392 = vst [vmem:[#allocation146_spill] sm:$0xff] %v21687_v17 }
 0x7b5   :  { %v21689_v12 = vpop.f32.mrf.mxu1 }
 0x7b6   :  { %24393 = vst [vmem:[#allocation147_spill] sm:$0xff] %v21689_v12  ;;  %v21717_v12 = vpop.permute.xlu0 %10111 }
 0x7b7   :  { %v21695_v56 = vpop.f32.mrf.mxu1  ;;  %24406 = vst [vmem:[#allocation161_spill] sm:$0xff] %v21717_v12 }
 0x7b8   :  { %v21691_v62 = vpop.f32.mrf.mxu0  ;;  %24396 = vst [vmem:[#allocation150_spill] sm:$0xff] %v21695_v56 }
 0x7b9   :  { %24394 = vst [vmem:[#allocation149_spill] sm:$0xff] %v21691_v62 }
 0x7ba   :  { %v21699_v27 = vpop.f32.mrf.mxu0 }
 0x7bb   :  { %24397 = vst [vmem:[#allocation151_spill] sm:$0xff] %v21699_v27  ;;  %v21721_v27 = vpop.permute.xlu1 %10196 }
 0x7bc   :  { %24408 = vst [vmem:[#allocation21_spill] sm:$0xff] %v21721_v27 }
 0x7bd   :  { %v21701_v60 = vpop.f32.mrf.mxu1 }
 0x7be   :  { %24398 = vst [vmem:[#allocation153_spill] sm:$0xff] %v21701_v60 }
 0x7bf   :  { %v21707_v8 = vpop.f32.mrf.mxu1 }
 0x7c0   :  { %24401 = vst [vmem:[#allocation155_spill] sm:$0xff] %v21707_v8 }
 0x7c2   :  { %v21703_v37 = vpop.f32.mrf.mxu0 }
 0x7c3   :  { %24399 = vst [vmem:[#allocation152_spill] sm:$0xff] %v21703_v37 }
 0x7c4   :  { %v21711_v1 = vpop.f32.mrf.mxu0 }
 0x7c5   :  { %24403 = vst [vmem:[#allocation19_spill] sm:$0xff] %v21711_v1  ;;  %v21713_v62 = vpop.f32.mrf.mxu1  ;;  %v21731_v1 = vpop.permute.xlu0 %10109 }
 0x7c6   :  { %24404 = vst [vmem:[#allocation156_spill] sm:$0xff] %v21713_v62  ;;  %24411 = vst [vmem:[#allocation160_spill] sm:$0xff] %v21731_v1 }
 0x7c7   :  { %v21719_v56 = vpop.f32.mrf.mxu1 }
 0x7c8   :  { %24407 = vst [vmem:[#allocation159_spill] sm:$0xff] %v21719_v56 }
 0x7ca   :  { %v21715_v17 = vpop.f32.mrf.mxu0 }
 0x7cb   :  { %24405 = vst [vmem:[#allocation158_spill] sm:$0xff] %v21715_v17 }
 0x7cc   :  { %v21723_v60 = vpop.f32.mrf.mxu0 }
 0x7cd   :  { %24409 = vst [vmem:[#allocation163_spill] sm:$0xff] %v21723_v60 }
 0x7ce   :  { %v21725_v37 = vpop.f32.mrf.mxu1 }
 0x7cf   :  { %24410 = vst [vmem:[#allocation22_spill] sm:$0xff] %v21725_v37  ;;  %v21743_v37 = vpop.permute.xlu1 %10372 }
 0x7d0   :  { %v21736_v17 = vpop.f32.mrf.mxu1  ;;  %24413 = vst [vmem:[#allocation169_spill] sm:$0xff] %v21743_v37 }
 0x7d1   :  { %24412 = vst [vmem:[#allocation166_spill] sm:$0xff] %v21736_v17 }
 0x7d2   :  { %v16959_v8 = vpop.f32.mrf.mxu0 }
 0x7d3   :  { %v21734_v62 = vadd.f32 %v16959_v8, %v21727_v29  ;;  %v21749_v8 = vpop.permute.xlu0 %10285  ;;  %v21751_v17 = vpop.permute.xlu1 %10370 }
 0x7d4   :  { %v7916_v31 = vpop.f32.mrf.mxu0  ;;  %24415 = vst [vmem:[#allocation168_spill] sm:$0xff] %v21749_v8  ;;  %24416 = vst [vmem:[#allocation26_spill] sm:$0xff] %v21751_v17 }
 0x7d5   :  { %v21739_v56 = vadd.f32 %v7916_v31, %v21729_v39  ;;  %v9293_v60 = vsel %vm2889_vm2, %v21734_v62, -inf }
 0x7d6   :  { %9294 = vmax.xlane.f32.xlu1 %v9293_v60  ;;  %v21747_v7 = vpop.f32.mrf.mxu1 }
 0x7d7   :  { %v9290_v59 = vsel %vm2889_vm2, %v21739_v56, -inf  ;;  %24414 = vst [vmem:[#allocation162_spill] sm:$0xff] %v21747_v7  ;;  %v21763_v7 = vpop.permute.xlu0 %10283 }
 0x7d8   :  { %9291 = vmax.xlane.f32.xlu0 %v9290_v59  ;;  %v21753_v15 = vpop.f32.mrf.mxu1  ;;  %24418 = vst [vmem:[#allocation165_spill] sm:$0xff] %v21763_v7 }
 0x7d9   :  { %24417 = vst [vmem:[#allocation24_spill] sm:$0xff] %v21753_v15 }
 0x7db   :  { %v16973_v2 = vpop.f32.mrf.mxu0  ;;  %v21777_v36 = vpop.permute.xlu0 %10459 }
 0x7dc   :  { %v21756_v31 = vadd.f32 %v16973_v2, %v21727_v29  ;;  %v21770_v2 = vpop.permute.xlu1 %10546  ;;  %24420 = vst [vmem:[#allocation171_spill] sm:$0xff] %v21777_v36 }
 0x7dd   :  { %v8098_v44 = vpop.f32.mrf.mxu0  ;;  %24419 = vst [vmem:[#allocation164_spill] sm:$0xff] %v21770_v2 }
 0x7de   :  { %v16966_v57 = vpop.f32.mrf.mxu1  ;;  %v21759_v60 = vadd.f32 %v8098_v44, %v21729_v39  ;;  %v9305_v43 = vsel %vm2889_vm2, %v21756_v31, -inf }
 0x7df   :  { %9306 = vmax.xlane.f32.xlu1 %v9305_v43  ;;  %v21766_v59 = vadd.f32 %v16966_v57, %v21727_v29 }
 0x7e0   :  { %v9302_v15 = vsel %vm2889_vm2, %v21759_v60, -inf  ;;  %v8007_v22 = vpop.f32.mrf.mxu1 }
 0x7e1   :  { %9303 = vmax.xlane.f32.xlu0 %v9302_v15  ;;  %v21773_v16 = vadd.f32 %v8007_v22, %v21729_v39  ;;  %v9299_v33 = vsel %vm2889_vm2, %v21766_v59, -inf  ;;  %v21787_v22 = vpop.permute.xlu1 %10544 }
 0x7e2   :  { %24421 = vst [vmem:[#allocation25_spill] sm:$0xff] %v21787_v22 }
 0x7e3   :  { %v9296_v36 = vsel %vm2889_vm2, %v21773_v16, -inf }
 0x7e4   :  { %v16987_v44 = vpop.f32.mrf.mxu0 }
 0x7e5   :  { %v21780_v43 = vadd.f32 %v16987_v44, %v21727_v29  ;;  %9300 = vmax.xlane.f32.xlu0 %v9299_v33  ;;  %v21794_v33 = vpop.permute.xlu0 %10457 }
 0x7e6   :  { %v16980_v57 = vpop.f32.mrf.mxu1  ;;  %v8280_v9 = vpop.f32.mrf.mxu0  ;;  %24422 = vst [vmem:[#allocation20_spill] sm:$0xff] %v21794_v33 }
 0x7e7   :  { %v21783_v14 = vadd.f32 %v8280_v9, %v21729_v39  ;;  %v9317_v15 = vsel %vm2889_vm2, %v21780_v43, -inf  ;;  %v21790_v50 = vadd.f32 %v16980_v57, %v21727_v29 }
 0x7e8   :  { %9318 = vmax.xlane.f32.xlu1 %v9317_v15  ;;  %v8189_v44 = vpop.f32.mrf.mxu1  ;;  %v21803_v15 = vpop.permute.xlu1 %10720 }
 0x7e9   :  { %9297 = vmax.xlane.f32.xlu0 %v9296_v36  ;;  %v9314_v9 = vsel %vm2889_vm2, %v21783_v14, -inf  ;;  %v21799_v7 = vadd.f32 %v8189_v44, %v21729_v39  ;;  %v9311_v22 = vsel %vm2889_vm2, %v21790_v50, -inf  ;;  %24423 = vst [vmem:[#allocation174_spill] sm:$0xff] %v21803_v15 }
 0x7ec   :  { %9315 = vmax.xlane.f32.xlu1 %v9314_v9  ;;  %v9308_v9 = vsel %vm2889_vm2, %v21799_v7, -inf }
 0x7ed   :  { %v17001_v57 = vpop.f32.mrf.mxu0  ;;  %9312 = vmax.xlane.f32.xlu0 %v9311_v22  ;;  %v21818_v22 = vpop.permute.xlu0 %10633 }
 0x7ee   :  { %v21806_v21 = vadd.f32 %v17001_v57, %v21727_v29  ;;  %24424 = vst [vmem:[#allocation167_spill] sm:$0xff] %v21818_v22  ;;  %v21820_v57 = vpop.permute.xlu1 %10718 }
 0x7ef   :  { %v16994_v36 = vpop.f32.mrf.mxu1  ;;  %v8462_v13 = vpop.f32.mrf.mxu0  ;;  %24425 = vst [vmem:[#allocation177_spill] sm:$0xff] %v21820_v57 }
 0x7f0   :  { %v21809_v33 = vadd.f32 %v16994_v36, %v21727_v29  ;;  %v21812_v2 = vadd.f32 %v8462_v13, %v21729_v39  ;;  %v9329_v44 = vsel %vm2889_vm2, %v21806_v21, -inf }
 0x7f1   :  { %v8371_v15 = vpop.f32.mrf.mxu1  ;;  %9330 = vmax.xlane.f32.xlu1 %v9329_v44  ;;  %9309 = vmax.xlane.f32.xlu0 %v9308_v9  ;;  %v21829_v6 = vpop.permute.xlu0 %10631 }
 0x7f2   :  { %v21823_v45 = vadd.f32 %v8371_v15, %v21729_v39  ;;  %v9326_v13 = vsel %vm2889_vm2, %v21812_v2, -inf  ;;  %v9323_v36 = vsel %vm2889_vm2, %v21809_v33, -inf  ;;  %24426 = vst [vmem:[#allocation176_spill] sm:$0xff] %v21829_v6 }
 0x7f4   :  { %v9320_v15 = vsel %vm2889_vm2, %v21823_v45, -inf }
 0x7f5   :  { %9327 = vmax.xlane.f32.xlu1 %v9326_v13  ;;  %9324 = vmax.xlane.f32.xlu0 %v9323_v36  ;;  %v21844_v36 = vpop.permute.xlu1 %10894  ;;  %v21851_v24 = vpop.permute.xlu0 %10807 }
 0x7f6   :  { %v17015_v17 = vpop.f32.mrf.mxu0  ;;  %24427 = vst [vmem:[#allocation170_spill] sm:$0xff] %v21844_v36  ;;  %24428 = vst [vmem:[#allocation32_spill] sm:$0xff] %v21851_v24 }
 0x7f7   :  { %v21832_v22 = vadd.f32 %v17015_v17, %v21727_v29 }
 0x7f8   :  { %v17008_v44 = vpop.f32.mrf.mxu1  ;;  %v8644_v9 = vpop.f32.mrf.mxu0 }
 0x7f9   :  { %v21837_v57 = vadd.f32 %v17008_v44, %v21727_v29  ;;  %v21840_v8 = vadd.f32 %v8644_v9, %v21729_v39  ;;  %v9341_v13 = vsel %vm2889_vm2, %v21832_v22, -inf  ;;  %9321 = vmax.xlane.f32.xlu0 %v9320_v15  ;;  %v21855_v63 = vpop.permute.xlu1 %10892 }
 0x7fa   :  { %v8553_v6 = vpop.f32.mrf.mxu1  ;;  %9342 = vmax.xlane.f32.xlu1 %v9341_v13  ;;  %24429 = vst [vmem:[#allocation173_spill] sm:$0xff] %v21855_v63 }
 0x7fb   :  { %v21847_v17 = vadd.f32 %v8553_v6, %v21729_v39  ;;  %v9335_v1 = vsel %vm2889_vm2, %v21837_v57, -inf  ;;  %v9338_v44 = vsel %vm2889_vm2, %v21840_v8, -inf }
 0x7fd   :  { %9336 = vmax.xlane.f32.xlu0 %v9335_v1  ;;  %v9332_v6 = vsel %vm2889_vm2, %v21847_v17, -inf }
 0x7fe   :  { %9339 = vmax.xlane.f32.xlu1 %v9338_v44  ;;  %v21870_v44 = vpop.permute.xlu0 %10805 }
 0x7ff   :  { %v17029_v9 = vpop.f32.mrf.mxu0  ;;  %24430 = vst [vmem:[#allocation29_spill] sm:$0xff] %v21870_v44 }
 0x800   :  { %v21858_v15 = vadd.f32 %v17029_v9, %v21727_v29 }
 0x801   :  { %v17022_v13 = vpop.f32.mrf.mxu1  ;;  %v8826_v36 = vpop.f32.mrf.mxu0  ;;  %9333 = vmax.xlane.f32.xlu0 %v9332_v6 }
 0x802   :  { %v21863_v37 = vadd.f32 %v17022_v13, %v21727_v29  ;;  %v21866_v24 = vadd.f32 %v8826_v36, %v21729_v39  ;;  %v9353_v1 = vsel %vm2889_vm2, %v21858_v15, -inf  ;;  %v21879_v13 = vpop.permute.xlu1 %11072  ;;  %v21883_v44 = vpop.permute.xlu0 %10981 }
 0x803   :  { %v8735_v63 = vpop.f32.mrf.mxu1  ;;  %9354 = vmax.xlane.f32.xlu1 %v9353_v1  ;;  %24431 = vst [vmem:[#allocation172_spill] sm:$0xff] %v21879_v13  ;;  %24432 = vst [vmem:[#allocation179_spill] sm:$0xff] %v21883_v44 }
 0x804   :  { %v21873_v9 = vadd.f32 %v8735_v63, %v21729_v39  ;;  %v9347_v23 = vsel %vm2889_vm2, %v21863_v37, -inf  ;;  %v9350_v6 = vsel %vm2889_vm2, %v21866_v24, -inf }
 0x805   :  { %9348 = vmax.xlane.f32.xlu0 %v9347_v23 }
 0x806   :  { %v9344_v27 = vsel %vm2889_vm2, %v21873_v9, -inf  ;;  %v21896_v38 = vpop.permute.xlu1 %11070 }
 0x807   :  { %9351 = vmax.xlane.f32.xlu1 %v9350_v6  ;;  %24433 = vst [vmem:[#allocation28_spill] sm:$0xff] %v21896_v38 }
 0x808   :  { %v17043_v36 = vpop.f32.mrf.mxu0 }
 0x809   :  { %v21886_v1 = vadd.f32 %v17043_v36, %v21727_v29  ;;  %9345 = vmax.xlane.f32.xlu0 %v9344_v27  ;;  %v21903_v36 = vpop.permute.xlu0 %10979 }
 0x80a   :  { %v17036_v63 = vpop.f32.mrf.mxu1  ;;  %v9008_v12 = vpop.f32.mrf.mxu0  ;;  %24434 = vst [vmem:[#allocation182_spill] sm:$0xff] %v21903_v36 }
 0x80b   :  { %v21889_v23 = vadd.f32 %v17036_v63, %v21727_v29  ;;  %v21892_v53 = vadd.f32 %v9008_v12, %v21729_v39  ;;  %v9365_v6 = vsel %vm2889_vm2, %v21886_v1, -inf  ;;  %v21912_v32 = vpop.permute.xlu1 %11066 }
 0x80c   :  { %v8917_v13 = vpop.f32.mrf.mxu1  ;;  %9366 = vmax.xlane.f32.xlu1 %v9365_v6  ;;  %24435 = vst [vmem:[#allocation23_spill] sm:$0xff] %v21912_v32 }
 0x80d   :  { %v21899_v44 = vadd.f32 %v8917_v13, %v21729_v39  ;;  %v9359_v27 = vsel %vm2889_vm2, %v21889_v23, -inf  ;;  %v9362_v12 = vsel %vm2889_vm2, %v21892_v53, -inf }
 0x80e   :  { %9360 = vmax.xlane.f32.xlu0 %v9359_v27 }
 0x80f   :  { %v9356_v6 = vsel %vm2889_vm2, %v21899_v44, -inf }
 0x810   :  { %9363 = vmax.xlane.f32.xlu1 %v9362_v12  ;;  %v17057_v63 = vpop.f32.mrf.mxu0 }
 0x811   :  { %v21908_v41 = vadd.f32 %v17057_v63, %v21727_v29  ;;  %v21922_v63 = vpop.permute.xlu0 %11163 }
 0x812   :  { %v17050_v38 = vpop.f32.mrf.mxu1  ;;  %v9190_v13 = vpop.f32.mrf.mxu0  ;;  %9357 = vmax.xlane.f32.xlu0 %v9356_v6  ;;  %24436 = vst [vmem:[#allocation175_spill] sm:$0xff] %v21922_v63 }
 0x813   :  { %v21915_v27 = vadd.f32 %v17050_v38, %v21727_v29  ;;  %v21918_v36 = vadd.f32 %v9190_v13, %v21729_v39  ;;  %v9377_v12 = vsel %vm2889_vm2, %v21908_v41, -inf  ;;  %v21931_v13 = vpop.permute.xlu1 %11161 }
 0x814   :  { %v9099_v25 = vpop.f32.mrf.mxu1  ;;  %9378 = vmax.xlane.f32.xlu1 %v9377_v12  ;;  %24437 = vst [vmem:[#allocation185_spill] sm:$0xff] %v21931_v13 }
 0x815   :  { %v21925_v61 = vadd.f32 %v9099_v25, %v21729_v39  ;;  %v9371_v6 = vsel %vm2889_vm2, %v21915_v27, -inf  ;;  %v9374_v38 = vsel %vm2889_vm2, %v21918_v36, -inf  ;;  %v21935_v12 = vpop.permute.xlu0 %11068 }
 0x816   :  { %9372 = vmax.xlane.f32.xlu0 %v9371_v6  ;;  %24438 = vst [vmem:[#allocation178_spill] sm:$0xff] %v21935_v12 }
 0x817   :  { %v9368_v32 = vsel %vm2889_vm2, %v21925_v61, -inf }
 0x818   :  { %9375 = vmax.xlane.f32.xlu1 %v9374_v38  ;;  %v21945_v38 = vpop.permute.xlu1 %11157 }
 0x819   :  { %24439 = vst [vmem:[#allocation184_spill] sm:$0xff] %v21945_v38 }
 0x81a   :  { %v17064_v10 = vpop.f32.mrf.mxu1  ;;  %9369 = vmax.xlane.f32.xlu0 %v9368_v32  ;;  %v21949_v32 = vpop.permute.xlu0 %11254 }
 0x81b   :  { %v21938_v25 = vadd.f32 %v17064_v10, %v21727_v29  ;;  %24440 = vst [vmem:[#allocation38_spill] sm:$0xff] %v21949_v32 }
 0x81c   :  { %v9281_v63 = vpop.f32.mrf.mxu1  ;;  %v21951_v12 = vpop.permute.xlu1 %11252 }
 0x81d   :  { %v21941_v35 = vadd.f32 %v9281_v63, %v21729_v39  ;;  %v9383_v6 = vsel %vm2889_vm2, %v21938_v25, -inf  ;;  %24441 = vst [vmem:[#allocation181_spill] sm:$0xff] %v21951_v12  ;;  %v24445_v63 = vld [vmem:[#allocation65_spill] sm:$0xff] }
 0x81e   :  { %9384 = vmax.xlane.f32.xlu1 %v9383_v6  ;;  %v21953_v29 = vpop.permute.xlu0 %11159 }
 0x81f   :  { %v9380_v13 = vsel %vm2889_vm2, %v21941_v35, -inf  ;;  %24442 = vst [vmem:[#allocation35_spill] sm:$0xff] %v21953_v29 }
 0x820   :  { %9381 = vmax.xlane.f32.xlu0 %v9380_v13  ;;  %v21955_v10 = vpop.permute.xlu1 %11248 }
 0x821   :  { %24443 = vst [vmem:[#allocation180_spill] sm:$0xff] %v21955_v10 }
 0x822   :  { %v21957_v39 = vpop.permute.xlu0 %11345 }
 0x823   :  { %24444 = vst [vmem:[#allocation31_spill] sm:$0xff] %v21957_v39 }
 0x824   :  { %v21961_v6 = vpop.permute.xlu1 %11343 }
 0x825   :  { %24446 = vst [vmem:[#allocation27_spill] sm:$0xff] %v21961_v6 }
 0x826   :  { %v21963_v38 = vpop.permute.xlu0 %11250 }
 0x827   :  { %24447 = vst [vmem:[#allocation183_spill] sm:$0xff] %v21963_v38 }
 0x828   :  { %v21967_v13 = vpop.permute.xlu1 %11339 }
 0x829   :  { %24448 = vst [vmem:[#allocation186_spill] sm:$0xff] %v21967_v13 }
 0x82a   :  { %v21969_v32 = vpop.permute.xlu0 %11436 }
 0x82b   :  { %24449 = vst [vmem:[#allocation42_spill] sm:$0xff] %v21969_v32 }
 0x82c   :  { %v21971_v12 = vpop.permute.xlu1 %11434 }
 0x82d   :  { %24450 = vst [vmem:[#allocation40_spill] sm:$0xff] %v21971_v12 }
 0x82e   :  { %v21973_v29 = vpop.permute.xlu0 %11341 }
 0x82f   :  { %11707 = vrot.lane.b32.xlu1 %v24445_v63, %s18216_s5  ;;  %24451 = vst [vmem:[#allocation34_spill] sm:$0xff] %v21973_v29 }
 0x830   :  { %v21975_v10 = vpop.permute.xlu1 %11430 }
 0x831   :  { %24452 = vst [vmem:[#allocation30_spill] sm:$0xff] %v21975_v10 }
 0x832   :  { %v21977_v39 = vpop.permute.xlu0 %11527 }
 0x833   :  { %24453 = vst [vmem:[#allocation45_spill] sm:$0xff] %v21977_v39 }
 0x834   :  { %v21979_v63 = vpop.permute.xlu1 %11525 }
 0x835   :  { %24454 = vst [vmem:[#allocation43_spill] sm:$0xff] %v21979_v63 }
 0x836   :  { %11614 = vrot.lane.b32.xlu0 %v19384_v52, %s18216_s5  ;;  %v21981_v6 = vpop.permute.xlu0 %11432 }
 0x837   :  { %24455 = vst [vmem:[#allocation37_spill] sm:$0xff] %v21981_v6 }
 0x838   :  { %v21983_v38 = vpop.permute.xlu1 %11521 }
 0x839   :  { %24456 = vst [vmem:[#allocation33_spill] sm:$0xff] %v21983_v38 }
 0x83a   :  { %v21985_v55 = vpop.permute.xlu0 %11618 }
 0x83b   :  { %24457 = vst [vmem:[#allocation54_spill] sm:$0xff] %v21985_v55 }
 0x83c   :  { %v21987_v52 = vpop.permute.xlu1 %11616 }
 0x83d   :  { %24458 = vst [vmem:[#allocation47_spill] sm:$0xff] %v21987_v52 }
 0x83e   :  { %v21989_v13 = vpop.permute.xlu0 %11523 }
 0x83f   :  { %24459 = vst [vmem:[#allocation39_spill] sm:$0xff] %v21989_v13 }
 0x840   :  { %v21991_v32 = vpop.permute.xlu1 %11612 }
 0x841   :  { %24460 = vst [vmem:[#allocation36_spill] sm:$0xff] %v21991_v32 }
 0x842   :  { %v21993_v12 = vpop.permute.xlu0 %11709 }
 0x843   :  { %24461 = vst [vmem:[#allocation57_spill] sm:$0xff] %v21993_v12 }
 0x85f   :  { %v9295_v29 = vpop.xlane.xlu1 %9294 }
 0x860   :  { %v9387_v10 = vsub.f32 %v21734_v62, %v9295_v29 }
 0x861   :  { %v9292_v39 = vpop.xlane.xlu0 %9291 }
 0x862   :  { %v9420_v48 = vmul.f32 1.442695, %v9387_v10  ;;  %v9386_v63 = vsub.f32 %v21739_v56, %v9292_v39 }
 0x864   :  { %17799 = vpow2.f32 %v9420_v48  ;;  %v9418_v6 = vmul.f32 1.442695, %v9386_v63 }
 0x866   :  { %17801 = vpow2.f32 %v9418_v6 }
 0x868   :  { %v9307_v38 = vpop.xlane.xlu1 %9306 }
 0x869   :  { %v9391_v55 = vsub.f32 %v21756_v31, %v9307_v38 }
 0x86a   :  { %v9304_v52 = vpop.xlane.xlu0 %9303 }
 0x86b   :  { %v9428_v20 = vmul.f32 1.442695, %v9391_v55  ;;  %v9390_v13 = vsub.f32 %v21759_v60, %v9304_v52 }
 0x86d   :  { %17803 = vpow2.f32 %v9428_v20  ;;  %v9426_v32 = vmul.f32 1.442695, %v9390_v13 }
 0x86e   :  { %v9301_v12 = vpop.xlane.xlu0 %9300 }
 0x86f   :  { %17805 = vpow2.f32 %v9426_v32  ;;  %v9389_v62 = vsub.f32 %v21766_v59, %v9301_v12 }
 0x871   :  { %v22000_v29 = vpop.eup %17799  ;;  %v9424_v10 = vmul.f32 1.442695, %v9389_v62  ;;  %v9319_v56 = vpop.xlane.xlu1 %9318 }
 0x872   :  { %v9395_v48 = vsub.f32 %v21780_v43, %v9319_v56  ;;  %v9298_v39 = vpop.xlane.xlu0 %9297  ;;  %v9485_v31 = vsel %vm2889_vm2, %v22000_v29, 0.0 }
 0x873   :  { %v22005_v38 = vpop.eup %17801  ;;  %17807 = vpow2.f32 %v9424_v10  ;;  %v9388_v20 = vsub.f32 %v21773_v16, %v9298_v39  ;;  %9486 = vadd.xlane.f32.xlu1 %v9485_v31 }
 0x874   :  { %v9436_v55 = vmul.f32 1.442695, %v9395_v48  ;;  %v9482_v60 = vsel %vm2889_vm2, %v22005_v38, 0.0 }
 0x875   :  { %v9422_v59 = vmul.f32 1.442695, %v9388_v20  ;;  %v9316_v12 = vpop.xlane.xlu1 %9315  ;;  %9483 = vadd.xlane.f32.xlu0 %v9482_v60 }
 0x876   :  { %17809 = vpow2.f32 %v9436_v55  ;;  %v9394_v43 = vsub.f32 %v21783_v14, %v9316_v12  ;;  %v9313_v32 = vpop.xlane.xlu0 %9312 }
 0x877   :  { %17811 = vpow2.f32 %v9422_v59  ;;  %v9393_v6 = vsub.f32 %v21790_v50, %v9313_v32 }
 0x878   :  { %v9434_v13 = vmul.f32 1.442695, %v9394_v43 }
 0x879   :  { %v9432_v63 = vmul.f32 1.442695, %v9393_v6 }
 0x87a   :  { %v22012_v52 = vpop.eup %17803  ;;  %17813 = vpow2.f32 %v9434_v13  ;;  %v9331_v16 = vpop.xlane.xlu1 %9330 }
 0x87b   :  { %v9310_v62 = vpop.xlane.xlu0 %9309  ;;  %17815 = vpow2.f32 %v9432_v63  ;;  %v9399_v10 = vsub.f32 %v21806_v21, %v9331_v16  ;;  %v9497_v48 = vsel %vm2889_vm2, %v22012_v52, 0.0 }
 0x87c   :  { %v9392_v56 = vsub.f32 %v21799_v7, %v9310_v62  ;;  %v22018_v14 = vpop.eup %17805  ;;  %9498 = vadd.xlane.f32.xlu1 %v9497_v48 }
 0x87d   :  { %v9444_v39 = vmul.f32 1.442695, %v9399_v10  ;;  %v9494_v21 = vsel %vm2889_vm2, %v22018_v14, 0.0 }
 0x87e   :  { %v9430_v50 = vmul.f32 1.442695, %v9392_v56  ;;  %v9328_v31 = vpop.xlane.xlu1 %9327 }
 0x87f   :  { %v9325_v20 = vpop.xlane.xlu0 %9324  ;;  %17817 = vpow2.f32 %v9444_v39  ;;  %v9398_v55 = vsub.f32 %v21812_v2, %v9328_v31 }
 0x880   :  { %v9397_v60 = vsub.f32 %v21809_v33, %v9325_v20  ;;  %v22024_v59 = vpop.eup %17807  ;;  %17819 = vpow2.f32 %v9430_v50  ;;  %9495 = vadd.xlane.f32.xlu1 %v9494_v21 }
 0x881   :  { %v9442_v7 = vmul.f32 1.442695, %v9398_v55  ;;  %v9491_v43 = vsel %vm2889_vm2, %v22024_v59, 0.0 }
 0x882   :  { %v9440_v12 = vmul.f32 1.442695, %v9397_v60  ;;  %9492 = vadd.xlane.f32.xlu0 %v9491_v43 }
 0x883   :  { %v9322_v32 = vpop.xlane.xlu0 %9321  ;;  %v22028_v6 = vpop.eup %17809  ;;  %17821 = vpow2.f32 %v9442_v7 }
 0x884   :  { %v9343_v2 = vpop.xlane.xlu1 %9342  ;;  %v9396_v33 = vsub.f32 %v21823_v45, %v9322_v32  ;;  %v22031_v13 = vpop.eup %17811  ;;  %17823 = vpow2.f32 %v9440_v12  ;;  %v9509_v16 = vsel %vm2889_vm2, %v22028_v6, 0.0 }
 0x885   :  { %v9403_v63 = vsub.f32 %v21832_v22, %v9343_v2  ;;  %9510 = vadd.xlane.f32.xlu1 %v9509_v16  ;;  %v9488_v10 = vsel %vm2889_vm2, %v22031_v13, 0.0 }
 0x886   :  { %v9438_v62 = vmul.f32 1.442695, %v9396_v33  ;;  %9489 = vadd.xlane.f32.xlu0 %v9488_v10 }
 0x887   :  { %v9452_v56 = vmul.f32 1.442695, %v9403_v63  ;;  %v9337_v48 = vpop.xlane.xlu0 %9336  ;;  %v22038_v39 = vpop.eup %17813 }
 0x888   :  { %17825 = vpow2.f32 %v9438_v62  ;;  %v9340_v45 = vpop.xlane.xlu1 %9339  ;;  %v9401_v50 = vsub.f32 %v21837_v57, %v9337_v48  ;;  %v22041_v31 = vpop.eup %17815  ;;  %v9506_v20 = vsel %vm2889_vm2, %v22038_v39, 0.0 }
 0x889   :  { %17827 = vpow2.f32 %v9452_v56  ;;  %v9402_v22 = vsub.f32 %v21840_v8, %v9340_v45  ;;  %9507 = vadd.xlane.f32.xlu1 %v9506_v20  ;;  %v9503_v60 = vsel %vm2889_vm2, %v22041_v31, 0.0 }
 0x88a   :  { %v9448_v55 = vmul.f32 1.442695, %v9401_v50  ;;  %9504 = vadd.xlane.f32.xlu0 %v9503_v60 }
 0x88b   :  { %v9450_v21 = vmul.f32 1.442695, %v9402_v22  ;;  %v9334_v7 = vpop.xlane.xlu0 %9333 }
 0x88c   :  { %17829 = vpow2.f32 %v9448_v55  ;;  %v9400_v12 = vsub.f32 %v21847_v17, %v9334_v7  ;;  %v22049_v57 = vpop.eup %17817  ;;  %v9355_v43 = vpop.xlane.xlu1 %9354 }
 0x88d   :  { %17831 = vpow2.f32 %v9450_v21  ;;  %v22051_v32 = vpop.eup %17819  ;;  %v9407_v8 = vsub.f32 %v21858_v15, %v9355_v43  ;;  %v9521_v33 = vsel %vm2889_vm2, %v22049_v57, 0.0 }
 0x88e   :  { %v9446_v2 = vmul.f32 1.442695, %v9400_v12  ;;  %9522 = vadd.xlane.f32.xlu1 %v9521_v33  ;;  %v9500_v63 = vsel %vm2889_vm2, %v22051_v32, 0.0 }
 0x88f   :  { %v9349_v16 = vpop.xlane.xlu0 %9348  ;;  %v9460_v62 = vmul.f32 1.442695, %v9407_v8  ;;  %9501 = vadd.xlane.f32.xlu0 %v9500_v63 }
 0x890   :  { %17833 = vpow2.f32 %v9446_v2  ;;  %v9405_v17 = vsub.f32 %v21863_v37, %v9349_v16  ;;  %v22059_v10 = vpop.eup %17821  ;;  %v9352_v56 = vpop.xlane.xlu1 %9351 }
 0x891   :  { %v22061_v48 = vpop.eup %17823  ;;  %17835 = vpow2.f32 %v9460_v62  ;;  %v9406_v15 = vsub.f32 %v21866_v24, %v9352_v56  ;;  %v9518_v50 = vsel %vm2889_vm2, %v22059_v10, 0.0 }
 0x892   :  { %v9456_v45 = vmul.f32 1.442695, %v9405_v17  ;;  %9519 = vadd.xlane.f32.xlu1 %v9518_v50  ;;  %v9515_v22 = vsel %vm2889_vm2, %v22061_v48, 0.0 }
 0x893   :  { %v9346_v20 = vpop.xlane.xlu0 %9345  ;;  %v9458_v55 = vmul.f32 1.442695, %v9406_v15  ;;  %9516 = vadd.xlane.f32.xlu0 %v9515_v22 }
 0x894   :  { %17837 = vpow2.f32 %v9456_v45  ;;  %v9404_v37 = vsub.f32 %v21873_v9, %v9346_v20 }
 0x895   :  { %v22069_v60 = vpop.eup %17825  ;;  %17839 = vpow2.f32 %v9458_v55  ;;  %v9367_v24 = vpop.xlane.xlu1 %9366 }
 0x896   :  { %v22071_v21 = vpop.eup %17827  ;;  %v9454_v7 = vmul.f32 1.442695, %v9404_v37  ;;  %v9512_v12 = vsel %vm2889_vm2, %v22069_v60, 0.0  ;;  %v9411_v43 = vsub.f32 %v21886_v1, %v9367_v24 }
 0x897   :  { %v9533_v8 = vsel %vm2889_vm2, %v22071_v21, 0.0  ;;  %9513 = vadd.xlane.f32.xlu0 %v9512_v12  ;;  %v9361_v2 = vpop.xlane.xlu0 %9360 }
 0x898   :  { %17841 = vpow2.f32 %v9454_v7  ;;  %9534 = vadd.xlane.f32.xlu1 %v9533_v8  ;;  %v9468_v33 = vmul.f32 1.442695, %v9411_v43  ;;  %v9409_v63 = vsub.f32 %v21889_v23, %v9361_v2 }
 0x899   :  { %v22078_v9 = vpop.eup %17829  ;;  %v9364_v62 = vpop.xlane.xlu1 %9363 }
 0x89a   :  { %v22081_v16 = vpop.eup %17831  ;;  %v9527_v17 = vsel %vm2889_vm2, %v22078_v9, 0.0  ;;  %17843 = vpow2.f32 %v9468_v33  ;;  %v9410_v1 = vsub.f32 %v21892_v53, %v9364_v62  ;;  %v9464_v56 = vmul.f32 1.442695, %v9409_v63 }
 0x89b   :  { %v9530_v15 = vsel %vm2889_vm2, %v22081_v16, 0.0  ;;  %9528 = vadd.xlane.f32.xlu0 %v9527_v17  ;;  %v9358_v45 = vpop.xlane.xlu0 %9357 }
 0x89c   :  { %9531 = vadd.xlane.f32.xlu1 %v9530_v15  ;;  %v9466_v22 = vmul.f32 1.442695, %v9410_v1  ;;  %17845 = vpow2.f32 %v9464_v56  ;;  %v9408_v23 = vsub.f32 %v21899_v44, %v9358_v45 }
 0x89d   :  { %v22088_v50 = vpop.eup %17833  ;;  %v9379_v20 = vpop.xlane.xlu1 %9378 }
 0x89e   :  { %v9524_v55 = vsel %vm2889_vm2, %v22088_v50, 0.0  ;;  %v22093_v37 = vpop.eup %17835  ;;  %17847 = vpow2.f32 %v9466_v22  ;;  %v9415_v53 = vsub.f32 %v21908_v41, %v9379_v20  ;;  %v9462_v24 = vmul.f32 1.442695, %v9408_v23 }
 0x89f   :  { %v9545_v7 = vsel %vm2889_vm2, %v22093_v37, 0.0  ;;  %9525 = vadd.xlane.f32.xlu0 %v9524_v55  ;;  %v9373_v12 = vpop.xlane.xlu0 %9372 }
 0x8a0   :  { %v9476_v8 = vmul.f32 1.442695, %v9415_v53  ;;  %17849 = vpow2.f32 %v9462_v24  ;;  %9546 = vadd.xlane.f32.xlu1 %v9545_v7  ;;  %v9413_v44 = vsub.f32 %v21915_v27, %v9373_v12 }
 0x8a1   :  { %v22098_v43 = vpop.eup %17837  ;;  %v9376_v2 = vpop.xlane.xlu1 %9375 }
 0x8a2   :  { %v9539_v33 = vsel %vm2889_vm2, %v22098_v43, 0.0  ;;  %v22103_v63 = vpop.eup %17839  ;;  %17851 = vpow2.f32 %v9476_v8  ;;  %v9414_v41 = vsub.f32 %v21918_v36, %v9376_v2  ;;  %v9472_v62 = vmul.f32 1.442695, %v9413_v44 }
 0x8a3   :  { %v9542_v17 = vsel %vm2889_vm2, %v22103_v63, 0.0  ;;  %9540 = vadd.xlane.f32.xlu0 %v9539_v33  ;;  %v9370_v1 = vpop.xlane.xlu0 %9369 }
 0x8a4   :  { %v9474_v15 = vmul.f32 1.442695, %v9414_v41  ;;  %17853 = vpow2.f32 %v9472_v62  ;;  %9543 = vadd.xlane.f32.xlu1 %v9542_v17  ;;  %v9412_v27 = vsub.f32 %v21925_v61, %v9370_v1 }
 0x8a5   :  { %v22108_v56 = vpop.eup %17841 }
 0x8a6   :  { %v9536_v45 = vsel %vm2889_vm2, %v22108_v56, 0.0  ;;  %17855 = vpow2.f32 %v9474_v15  ;;  %v9470_v22 = vmul.f32 1.442695, %v9412_v27 }
 0x8a7   :  { %v22113_v23 = vpop.eup %17843  ;;  %v9385_v36 = vpop.xlane.xlu1 %9384  ;;  %9537 = vadd.xlane.f32.xlu0 %v9536_v45 }
 0x8a8   :  { %v9417_v20 = vsub.f32 %v21938_v25, %v9385_v36  ;;  %17857 = vpow2.f32 %v9470_v22  ;;  %v9557_v55 = vsel %vm2889_vm2, %v22113_v23, 0.0 }
 0x8a9   :  { %v22118_v53 = vpop.eup %17845  ;;  %9558 = vadd.xlane.f32.xlu1 %v9557_v55  ;;  %v9382_v24 = vpop.xlane.xlu0 %9381 }
 0x8aa   :  { %v9480_v61 = vmul.f32 1.442695, %v9417_v20  ;;  %v9416_v7 = vsub.f32 %v21941_v35, %v9382_v24  ;;  %v9551_v12 = vsel %vm2889_vm2, %v22118_v53, 0.0  ;;  %v24462_v24 = vld [vmem:[#allocation41_spill] sm:$0xff] }
 0x8ab   :  { %v22123_v8 = vpop.eup %17847  ;;  %9552 = vadd.xlane.f32.xlu0 %v9551_v12  ;;  %v24474_v12 = vld [vmem:[#allocation62_spill] sm:$0xff] }
 0x8ac   :  { %17859 = vpow2.f32 %v9480_v61  ;;  %v9478_v44 = vmul.f32 1.442695, %v9416_v7  ;;  %v9554_v25 = vsel %vm2889_vm2, %v22123_v8, 0.0  ;;  %v24473_v7 = vld [vmem:[#allocation61_spill] sm:$0xff] }
 0x8ad   :  { %v22127_v2 = vpop.eup %17849  ;;  %9555 = vadd.xlane.f32.xlu1 %v9554_v25 }
 0x8ae   :  { %17861 = vpow2.f32 %v9478_v44  ;;  %v9548_v33 = vsel %vm2889_vm2, %v22127_v2, 0.0  ;;  %v24475_v44 = vld [vmem:[#allocation58_spill] sm:$0xff] }
 0x8af   :  { %v22131_v41 = vpop.eup %17851  ;;  %9549 = vadd.xlane.f32.xlu0 %v9548_v33  ;;  %v24476_v33 = vld [vmem:[#allocation63_spill] sm:$0xff] }
 0x8b0   :  { %v9569_v35 = vsel %vm2889_vm2, %v22131_v41, 0.0 }
 0x8b1   :  { %v22135_v62 = vpop.eup %17853  ;;  %9570 = vadd.xlane.f32.xlu1 %v9569_v35  ;;  %v24477_v35 = vld [vmem:[#allocation93_spill] sm:$0xff] }
 0x8b2   :  { %v9563_v17 = vsel %vm2889_vm2, %v22135_v62, 0.0 }
 0x8b3   :  { %v22139_v1 = vpop.eup %17855  ;;  %9564 = vadd.xlane.f32.xlu0 %v9563_v17 }
 0x8b4   :  { %v9566_v15 = vsel %vm2889_vm2, %v22139_v1, 0.0 }
 0x8b5   :  { %v22143_v27 = vpop.eup %17857  ;;  %9567 = vadd.xlane.f32.xlu1 %v9566_v15 }
 0x8b6   :  { %v9560_v45 = vsel %vm2889_vm2, %v22143_v27, 0.0 }
 0x8b9   :  { %v22147_v22 = vpop.eup %17859  ;;  %9561 = vadd.xlane.f32.xlu1 %v9560_v45  ;;  %v24478_v45 = vld [vmem:[#allocation95_spill] sm:$0xff] }
 0x8ba   :  { %v9575_v20 = vsel %vm2889_vm2, %v22147_v22, 0.0 }
 0x8bb   :  { %v22149_v36 = vpop.eup %17861 }
 0x8bc   :  { %v9572_v55 = vsel %vm2889_vm2, %v22149_v36, 0.0 }
 0x8bd   :  { %9576 = vadd.xlane.f32.xlu1 %v9575_v20  ;;  %9573 = vadd.xlane.f32.xlu0 %v9572_v55  ;;  %v24479_v20 = vld [vmem:[#allocation90_spill] sm:$0xff] }
 0x8ce   :  { %11703 = vrot.lane.b32.xlu1 %v19397_v4, %s18216_s5  ;;  %v22199_v4 = vpop.permute.xlu0 %11614 }
 0x8d2   :  { %11798 = vrot.lane.b32.xlu1 %v19197_v18, %s18216_s5  ;;  %v24466_v18 = vld [vmem:[#allocation52_spill] sm:$0xff] }
 0x8d3   :  { %11800 = vrot.lane.b32.xlu0 %v24462_v24, %s18216_s5 }
 0x8d6   :  { %11794 = vrot.lane.b32.xlu1 %v18985_v42, %s18216_s5  ;;  %v24463_v42 = vld [vmem:[#allocation75_spill] sm:$0xff] }
 0x8d7   :  { %11705 = vrot.lane.b32.xlu0 %v19452_v3, %s18216_s5  ;;  %v24470_v3 = vld [vmem:[#allocation87_spill] sm:$0xff] }
 0x8da   :  { %11889 = vrot.lane.b32.xlu1 %v19475_v54, %s18216_s5  ;;  %v24464_v54 = vld [vmem:[#allocation78_spill] sm:$0xff] }
 0x8db   :  { %11891 = vrot.lane.b32.xlu0 %v19437_v30, %s18216_s5  ;;  %v22197_v30 = vpop.permute.xlu1 %11707 }
 0x8de   :  { %11885 = vrot.lane.b32.xlu1 %v19462_v58, %s18216_s5  ;;  %v24471_v58 = vld [vmem:[#allocation82_spill] sm:$0xff] }
 0x8df   :  { %11796 = vrot.lane.b32.xlu0 %v19247_v19, %s18216_s5  ;;  %v24468_v19 = vld [vmem:[#allocation53_spill] sm:$0xff] }
 0x8e2   :  { %11980 = vrot.lane.b32.xlu1 %v19260_v28, %s18216_s5  ;;  %v24465_v28 = vld [vmem:[#allocation51_spill] sm:$0xff] }
 0x8e3   :  { %11982 = vrot.lane.b32.xlu0 %v19240_v40, %s18216_s5  ;;  %v24467_v40 = vld [vmem:[#allocation48_spill] sm:$0xff] }
 0x8e6   :  { %11976 = vrot.lane.b32.xlu1 %v19257_v47, %s18216_s5  ;;  %v24469_v47 = vld [vmem:[#allocation85_spill] sm:$0xff] }
 0x8e7   :  { %11887 = vrot.lane.b32.xlu0 %v19509_v51, %s18216_s5 }
 0x8ea   :  { %12071 = vrot.lane.b32.xlu1 %v24245_v0, %s18216_s5  ;;  %v24472_v0 = vld [vmem:[#allocation86_spill] sm:$0xff] }
 0x8eb   :  { %12073 = vrot.lane.b32.xlu0 %v24463_v42, %s18216_s5 }
 0x8ee   :  { %12067 = vrot.lane.b32.xlu1 %v24464_v54, %s18216_s5 }
 0x8ef   :  { %11978 = vrot.lane.b32.xlu0 %v24465_v28, %s18216_s5 }
 0x8f2   :  { %12162 = vrot.lane.b32.xlu1 %v24466_v18, %s18216_s5 }
 0x8f3   :  { %12164 = vrot.lane.b32.xlu0 %v24467_v40, %s18216_s5 }
 0x8f6   :  { %12158 = vrot.lane.b32.xlu1 %v24468_v19, %s18216_s5 }
 0x8f7   :  { %12069 = vrot.lane.b32.xlu0 %v24469_v47, %s18216_s5  ;;  %v24481_v47 = vld [vmem:[#allocation74_spill] sm:$0xff] }
 0x8fa   :  { %12253 = vrot.lane.b32.xlu1 %v24470_v3, %s18216_s5 }
 0x8fb   :  { %12255 = vrot.lane.b32.xlu0 %v24471_v58, %s18216_s5  ;;  %v24482_v58 = vld [vmem:[#allocation68_spill] sm:$0xff] }
 0x8fc   :  { %v9487_v51 = vpop.xlane.xlu1 %9486 }
 0x8fd   :  { %17863 = vrcp.f32 %v9487_v51 }
 0x8fe   :  { %12249 = vrot.lane.b32.xlu1 %v24472_v0, %s18216_s5  ;;  %v9484_v61 = vpop.xlane.xlu0 %9483 }
 0x8ff   :  { %12160 = vrot.lane.b32.xlu0 %v24473_v7, %s18216_s5  ;;  %17865 = vrcp.f32 %v9484_v61 }
 0x902   :  { %12344 = vrot.lane.b32.xlu1 %v24474_v12, %s18216_s5 }
 0x903   :  { %12346 = vrot.lane.b32.xlu0 %v24475_v44, %s18216_s5  ;;  %v24484_v44 = vld [vmem:[#allocation97_spill] sm:$0xff] }
 0x905   :  { %v9499_v25 = vpop.xlane.xlu1 %9498 }
 0x906   :  { %12340 = vrot.lane.b32.xlu1 %v24476_v33, %s18216_s5  ;;  %17867 = vrcp.f32 %v9499_v25 }
 0x907   :  { %12251 = vrot.lane.b32.xlu0 %v24477_v35, %s18216_s5 }
 0x909   :  { %v9496_v17 = vpop.xlane.xlu1 %9495 }
 0x90a   :  { %v17864_v15 = vpop.eup %17863  ;;  %12435 = vrot.lane.b32.xlu1 %v24478_v45, %s18216_s5  ;;  %17869 = vrcp.f32 %v9496_v17  ;;  %v24485_v17 = vld [vmem:[#allocation49_spill] sm:$0xff]  ;;  %v24486_v45 = vld [vmem:[#allocation99_spill] sm:$0xff] }
 0x90b   :  { %12437 = vrot.lane.b32.xlu0 %v24479_v20, %s18216_s5  ;;  %v9493_v55 = vpop.xlane.xlu0 %9492  ;;  %v9611_v42 = vmul.f32 %v17864_v15, %v22000_v29  ;;  %v24487_v20 = vld [vmem:[#allocation154_spill] sm:$0xff] }
 0x90c   :  { %v17866_v24 = vpop.eup %17865  ;;  %17871 = vrcp.f32 %v9493_v55 }
 0x90d   :  { %v9610_v54 = vmul.f32 %v17866_v24, %v22005_v38  ;;  %v9643_v19 = vmax.f32 %v9611_v42, 1e-08  ;;  %v24480_v38 = vld [vmem:[#allocation94_spill] sm:$0xff] }
 0x90e   :  { %12433 = vrot.lane.b32.xlu1 %v24260_v11, %s18216_s5  ;;  %v9511_v28 = vpop.xlane.xlu1 %9510 }
 0x90f   :  { %12342 = vrot.lane.b32.xlu0 %v24261_v26, %s18216_s5  ;;  %v9490_v18 = vpop.xlane.xlu0 %9489  ;;  %v9642_v40 = vmax.f32 %v9610_v54, 1e-08 }
 0x910   :  { %17873 = vrcp.f32 %v9490_v18  ;;  %v24488_v18 = vld [vmem:[#allocation157_spill] sm:$0xff] }
 0x911   :  { %17875 = vrcp.f32 %v9511_v28  ;;  %17069 = vmatprep.mubr.msk.f32.mxu0 %vm2889_vm2, %v9642_v40  ;;  %v24490_v40 = vld [vmem:[#allocation44_spill] sm:$0xff] }
 0x912   :  { %12906 = vrot.lane.b32.xlu1 %v24262_v46, %s18216_s5  ;;  %v9508_v29 = vpop.xlane.xlu1 %9507  ;;  %17070 = vmatmul.mubr.msk.f32.vlgmr.msra.gmra.mxu0 %vm2889_vm2, %v9643_v19 }
 0x913   :  { %12431 = vrot.lane.b32.xlu0 %v24480_v38, %s18216_s5  ;;  %17877 = vrcp.f32 %v9508_v29  ;;  %17080 = vmatpush3.msra.mxu0 %v21644_v5  ;;  %v9505_v26 = vpop.xlane.xlu0 %9504  ;;  %v17868_v11 = vpop.eup %17867 }
 0x914   :  { %17081 = vmatprep.subr.mxu0 %v21685_v34  ;;  %v9615_v3 = vmul.f32 %v17868_v11, %v22012_v52  ;;  %17879 = vrcp.f32 %v9505_v26 }
 0x915   :  { %17082 = vmatpush3.msra.mxu0 %v21685_v34  ;;  %v24483_v34 = vld [vmem:[#allocation100_spill] sm:$0xff] }
 0x916   :  { %13082 = vrot.lane.b32.xlu1 %v24481_v47, %s18216_s5  ;;  %17093 = vmatprep.subr.mxu0 %v21697_v49  ;;  %v9647_v12 = vmax.f32 %v9615_v3, 1e-08 }
 0x917   :  { %v17870_v46 = vpop.eup %17869  ;;  %12908 = vrot.lane.b32.xlu0 %v24482_v58, %s18216_s5  ;;  %v9523_v51 = vpop.xlane.xlu1 %9522  ;;  %v24494_v58 = vld [vmem:[#allocation46_spill] sm:$0xff] }
 0x918   :  { %v9502_v5 = vpop.xlane.xlu0 %9501  ;;  %v9614_v0 = vmul.f32 %v17870_v46, %v22018_v14  ;;  %v24493_v46 = vld [vmem:[#allocation59_spill] sm:$0xff] }
 0x919   :  { %17881 = vrcp.f32 %v9502_v5  ;;  %v17872_v61 = vpop.eup %17871 }
 0x91a   :  { %13169 = vrot.lane.b32.xlu1 %v24483_v34, %s18216_s5  ;;  %v9646_v7 = vmax.f32 %v9614_v0, 1e-08  ;;  %17883 = vrcp.f32 %v9523_v51  ;;  %v9613_v35 = vmul.f32 %v17872_v61, %v22024_v59  ;;  %v24495_v0 = vld [vmem:[#allocation161_spill] sm:$0xff] }
 0x91b   :  { %12995 = vrot.lane.b32.xlu0 %v24484_v44, %s18216_s5  ;;  %v9520_v52 = vpop.xlane.xlu1 %9519  ;;  %v24497_v44 = vld [vmem:[#allocation64_spill] sm:$0xff] }
 0x91c   :  { %17885 = vrcp.f32 %v9520_v52  ;;  %v9517_v25 = vpop.xlane.xlu0 %9516  ;;  %17083 = vmatprep.mubr.msk.f32.mxu0 %vm2889_vm2, %v9646_v7  ;;  %v9645_v54 = vmax.f32 %v9613_v35, 1e-08  ;;  %v24499_v35 = vld [vmem:[#allocation169_spill] sm:$0xff] }
 0x91d   :  { %v17874_v33 = vpop.eup %17873  ;;  %17084 = vmatmul.mubr.msk.f32.vlgmr.msra.gmra.mxu0 %vm2889_vm2, %v9647_v12  ;;  %17887 = vrcp.f32 %v9517_v25  ;;  %v24496_v12 = vld [vmem:[#allocation21_spill] sm:$0xff] }
 0x91e   :  { %v17876_v14 = vpop.eup %17875  ;;  %13256 = vrot.lane.b32.xlu1 %v24485_v17, %s18216_s5  ;;  %17094 = vmatpush3.msra.mxu0 %v21697_v49  ;;  %v9612_v15 = vmul.f32 %v17874_v33, %v22031_v13  ;;  %v24489_v13 = vld [vmem:[#allocation55_spill] sm:$0xff]  ;;  %v24498_v33 = vld [vmem:[#allocation50_spill] sm:$0xff] }
 0x91f   :  { %12993 = vrot.lane.b32.xlu0 %v24486_v45, %s18216_s5  ;;  %17095 = vmatprep.subr.mxu0 %v24487_v20  ;;  %v9619_v28 = vmul.f32 %v17876_v14, %v22028_v6  ;;  %v24491_v6 = vld [vmem:[#allocation79_spill] sm:$0xff] }
 0x920   :  { %v17878_v55 = vpop.eup %17877  ;;  %17096 = vmatpush3.msra.mxu0 %v24487_v20  ;;  %v9514_v59 = vpop.xlane.xlu0 %9513  ;;  %v9644_v42 = vmax.f32 %v9612_v15, 1e-08 }
 0x921   :  { %v9535_v24 = vpop.xlane.xlu1 %9534  ;;  %17107 = vmatprep.subr.mxu0 %v24488_v18  ;;  %v9618_v49 = vmul.f32 %v17878_v55, %v22038_v39  ;;  %17889 = vrcp.f32 %v9514_v59  ;;  %v17880_v29 = vpop.eup %17879  ;;  %v9651_v11 = vmax.f32 %v9619_v28, 1e-08  ;;  %v24492_v39 = vld [vmem:[#allocation148_spill] sm:$0xff] }
 0x922   :  { %13343 = vrot.lane.b32.xlu1 %v24489_v13, %s18216_s5  ;;  %17076 = vmatprep.mubr.msk.f32.mxu1 %vm2889_vm2, %v9644_v42  ;;  %17891 = vrcp.f32 %v9535_v24  ;;  %v9617_v3 = vmul.f32 %v17880_v29, %v22041_v31  ;;  %v24501_v24 = vld [vmem:[#allocation56_spill] sm:$0xff]  ;;  %v24504_v13 = vld [vmem:[#allocation71_spill] sm:$0xff] }
 0x923   :  { %13080 = vrot.lane.b32.xlu0 %v24490_v40, %s18216_s5  ;;  %17077 = vmatmul.mubr.msk.f32.vlgmr.msra.gmra.mxu1 %vm2889_vm2, %v9645_v54  ;;  %v9650_v19 = vmax.f32 %v9618_v49, 1e-08  ;;  %v24502_v59 = vld [vmem:[#allocation160_spill] sm:$0xff] }
 0x924   :  { %17087 = vmatpush3.msra.mxu1 %v24491_v6  ;;  %v9529_v26 = vpop.xlane.xlu0 %9528 }
 0x925   :  { %v9532_v38 = vpop.xlane.xlu1 %9531  ;;  %17088 = vmatprep.subr.mxu1 %v24492_v39  ;;  %17097 = vmatprep.mubr.msk.f32.mxu0 %vm2889_vm2, %v9650_v19 }
 0x926   :  { %17893 = vrcp.f32 %v9532_v38  ;;  %v17882_v47 = vpop.eup %17881  ;;  %13430 = vrot.lane.b32.xlu1 %v24493_v46, %s18216_s5  ;;  %17089 = vmatpush3.msra.mxu1 %v24492_v39  ;;  %v24505_v38 = vld [vmem:[#allocation26_spill] sm:$0xff]  ;;  %v24507_v39 = vld [vmem:[#allocation164_spill] sm:$0xff] }
 0x927   :  { %17895 = vrcp.f32 %v9529_v26  ;;  %13167 = vrot.lane.b32.xlu0 %v24494_v58, %s18216_s5  ;;  %17098 = vmatmul.mubr.msk.f32.vlgmr.msra.gmra.mxu0 %vm2889_vm2, %v9651_v11  ;;  %v9616_v51 = vmul.f32 %v17882_v47, %v22051_v32  ;;  %v17884_v5 = vpop.eup %17883  ;;  %v9649_v32 = vmax.f32 %v9617_v3, 1e-08  ;;  %v24508_v3 = vld [vmem:[#allocation73_spill] sm:$0xff] }
 0x928   :  { %17108 = vmatpush3.msra.mxu0 %v24488_v18  ;;  %17100 = vmatprep.subr.mxu1 %v24495_v0  ;;  %v9526_v61 = vpop.xlane.xlu0 %9525  ;;  %v9623_v25 = vmul.f32 %v17884_v5, %v22049_v57  ;;  %v24503_v18 = vld [vmem:[#allocation168_spill] sm:$0xff]  ;;  %v24510_v5 = vld [vmem:[#allocation165_spill] sm:$0xff] }
 0x929   :  { %v17886_v34 = vpop.eup %17885  ;;  %v9547_v7 = vpop.xlane.xlu1 %9546  ;;  %17109 = vmatprep.subr.mxu0 %v24496_v12  ;;  %17897 = vrcp.f32 %v9526_v61  ;;  %v9648_v31 = vmax.f32 %v9616_v51, 1e-08  ;;  %v24509_v51 = vld [vmem:[#allocation66_spill] sm:$0xff] }
 0x92a   :  { %13517 = vrot.lane.b32.xlu1 %v24497_v44, %s18216_s5  ;;  %17110 = vmatpush3.msra.mxu0 %v24496_v12  ;;  %v9622_v52 = vmul.f32 %v17886_v34, %v22059_v10  ;;  %17899 = vrcp.f32 %v9547_v7  ;;  %v17888_v14 = vpop.eup %17887  ;;  %v24500_v10 = vld [vmem:[#allocation67_spill] sm:$0xff]  ;;  %v9655_v20 = vmax.f32 %v9623_v25, 1e-08  ;;  %v24514_v25 = vld [vmem:[#allocation69_spill] sm:$0xff] }
 0x92b   :  { %13254 = vrot.lane.b32.xlu0 %v24498_v33, %s18216_s5  ;;  %17121 = vmatprep.subr.mxu0 %v24499_v35  ;;  %v9621_v55 = vmul.f32 %v17888_v14, %v22061_v48  ;;  %v24511_v7 = vld [vmem:[#allocation171_spill] sm:$0xff]  ;;  %v24515_v14 = vld [vmem:[#allocation174_spill] sm:$0xff] }
 0x92c   :  { %17090 = vmatprep.mubr.msk.f32.mxu1 %vm2889_vm2, %v9648_v31  ;;  %v9541_v17 = vpop.xlane.xlu0 %9540  ;;  %v9654_v15 = vmax.f32 %v9622_v52, 1e-08  ;;  %v24512_v31 = vld [vmem:[#allocation77_spill] sm:$0xff] }
 0x92d   :  { %v9544_v45 = vpop.xlane.xlu1 %9543  ;;  %17091 = vmatmul.mubr.msk.f32.vlgmr.msra.gmra.mxu1 %vm2889_vm2, %v9649_v32  ;;  %v9653_v19 = vmax.f32 %v9621_v55, 1e-08  ;;  %v24513_v32 = vld [vmem:[#allocation25_spill] sm:$0xff]  ;;  %v24517_v55 = vld [vmem:[#allocation76_spill] sm:$0xff] }
 0x92e   :  { %17901 = vrcp.f32 %v9544_v45  ;;  %13604 = vrot.lane.b32.xlu1 %v24500_v10, %s18216_s5  ;;  %17101 = vmatpush3.msra.mxu1 %v24495_v0  ;;  %v17890_v57 = vpop.eup %17889  ;;  %v24516_v45 = vld [vmem:[#allocation81_spill] sm:$0xff] }
 0x92f   :  { %17903 = vrcp.f32 %v9541_v17  ;;  %13341 = vrot.lane.b32.xlu0 %v24501_v24, %s18216_s5  ;;  %17102 = vmatprep.subr.mxu1 %v24502_v59  ;;  %v17892_v42 = vpop.eup %17891  ;;  %v9620_v28 = vmul.f32 %v17890_v57, %v22069_v60  ;;  %v24506_v60 = vld [vmem:[#allocation60_spill] sm:$0xff] }
 0x930   :  { %17111 = vmatprep.mubr.msk.f32.mxu0 %vm2889_vm2, %v9654_v15  ;;  %17103 = vmatpush3.msra.mxu1 %v24502_v59  ;;  %v9538_v54 = vpop.xlane.xlu0 %9537  ;;  %v9627_v29 = vmul.f32 %v17892_v42, %v22071_v21  ;;  %v24519_v42 = vld [vmem:[#allocation167_spill] sm:$0xff] }
 0x931   :  { %17112 = vmatmul.mubr.msk.f32.vlgmr.msra.gmra.mxu0 %vm2889_vm2, %v9655_v20  ;;  %17114 = vmatprep.subr.mxu1 %v24503_v18  ;;  %17905 = vrcp.f32 %v9538_v54  ;;  %v9652_v40 = vmax.f32 %v9620_v28, 1e-08 }
 0x932   :  { %v9559_v49 = vpop.xlane.xlu1 %9558  ;;  %17122 = vmatpush3.msra.mxu0 %v24499_v35  ;;  %13691 = vrot.lane.b32.xlu1 %v24504_v13, %s18216_s5 }
 0x933   :  { %v17894_v48 = vpop.eup %17893  ;;  %17123 = vmatprep.subr.mxu0 %v24505_v38  ;;  %13428 = vrot.lane.b32.xlu0 %v24506_v60, %s18216_s5  ;;  %17907 = vrcp.f32 %v9559_v49  ;;  %v24522_v49 = vld [vmem:[#allocation80_spill] sm:$0xff]  ;;  %v24524_v60 = vld [vmem:[#allocation89_spill] sm:$0xff] }
 0x934   :  { %v9626_v6 = vmul.f32 %v17894_v48, %v22081_v16  ;;  %v17896_v26 = vpop.eup %17895  ;;  %17124 = vmatpush3.msra.mxu0 %v24505_v38  ;;  %17104 = vmatprep.mubr.msk.f32.mxu1 %vm2889_vm2, %v9652_v40  ;;  %v9553_v11 = vpop.xlane.xlu0 %9552  ;;  %v9659_v16 = vmax.f32 %v9627_v29, 1e-08 }
 0x935   :  { %17135 = vmatprep.subr.mxu0 %v24507_v39  ;;  %17105 = vmatmul.mubr.msk.f32.vlgmr.msra.gmra.mxu1 %vm2889_vm2, %v9653_v19  ;;  %17909 = vrcp.f32 %v9553_v11  ;;  %v9625_v58 = vmul.f32 %v17896_v26, %v22078_v9  ;;  %v24523_v19 = vld [vmem:[#allocation170_spill] sm:$0xff]  ;;  %v24525_v11 = vld [vmem:[#allocation83_spill] sm:$0xff] }
 0x936   :  { %v9658_v47 = vmax.f32 %v9626_v6, 1e-08  ;;  %v17898_v21 = vpop.eup %17897  ;;  %v9556_v46 = vpop.xlane.xlu1 %9555  ;;  %13689 = vrot.lane.b32.xlu1 %v24508_v3, %s18216_s5  ;;  %17115 = vmatpush3.msra.mxu1 %v24503_v18  ;;  %v24527_v3 = vld [vmem:[#allocation32_spill] sm:$0xff] }
 0x937   :  { %17911 = vrcp.f32 %v9556_v46  ;;  %13515 = vrot.lane.b32.xlu0 %v24509_v51, %s18216_s5  ;;  %17116 = vmatprep.subr.mxu1 %v24510_v5  ;;  %v9624_v0 = vmul.f32 %v17898_v21, %v22088_v50  ;;  %v17900_v61 = vpop.eup %17899  ;;  %v9657_v50 = vmax.f32 %v9625_v58, 1e-08 }
 0x938   :  { %17125 = vmatprep.mubr.msk.f32.mxu0 %vm2889_vm2, %v9658_v47  ;;  %17117 = vmatpush3.msra.mxu1 %v24510_v5  ;;  %v9550_v34 = vpop.xlane.xlu0 %9549  ;;  %v9631_v52 = vmul.f32 %v17900_v61, %v22093_v37  ;;  %v24529_v61 = vld [vmem:[#allocation173_spill] sm:$0xff] }
 0x939   :  { %17126 = vmatmul.mubr.msk.f32.vlgmr.msra.gmra.mxu0 %vm2889_vm2, %v9659_v16  ;;  %17128 = vmatprep.subr.mxu1 %v24511_v7  ;;  %17913 = vrcp.f32 %v9550_v34  ;;  %v9656_v9 = vmax.f32 %v9624_v0, 1e-08 }
 0x93a   :  { %v9571_v12 = vpop.xlane.xlu1 %9570  ;;  %17136 = vmatpush3.msra.mxu0 %v24507_v39  ;;  %13776 = vrot.lane.b32.xlu1 %v24512_v31, %s18216_s5  ;;  %v9663_v57 = vmax.f32 %v9631_v52, 1e-08  ;;  %v24526_v39 = vld [vmem:[#allocation176_spill] sm:$0xff] }
 0x93b   :  { %v17902_v44 = vpop.eup %17901  ;;  %17137 = vmatprep.subr.mxu0 %v24513_v32  ;;  %13602 = vrot.lane.b32.xlu0 %v24514_v25, %s18216_s5  ;;  %17915 = vrcp.f32 %v9571_v12 }
 0x93c   :  { %v17904_v33 = vpop.eup %17903  ;;  %17138 = vmatpush3.msra.mxu0 %v24513_v32  ;;  %17118 = vmatprep.mubr.msk.f32.mxu1 %vm2889_vm2, %v9656_v9  ;;  %v9630_v35 = vmul.f32 %v17902_v44, %v22103_v63  ;;  %v9565_v17 = vpop.xlane.xlu0 %9564  ;;  %v24518_v63 = vld [vmem:[#allocation20_spill] sm:$0xff] }
 0x93d   :  { %17149 = vmatprep.subr.mxu0 %v24515_v14  ;;  %17119 = vmatmul.mubr.msk.f32.vlgmr.msra.gmra.mxu1 %vm2889_vm2, %v9657_v50  ;;  %v9629_v20 = vmul.f32 %v17904_v33, %v22098_v43  ;;  %v24520_v43 = vld [vmem:[#allocation84_spill] sm:$0xff] }
 0x93e   :  { %v17906_v15 = vpop.eup %17905  ;;  %v9568_v37 = vpop.xlane.xlu1 %9567  ;;  %13863 = vrot.lane.b32.xlu1 %v24516_v45, %s18216_s5  ;;  %17129 = vmatpush3.msra.mxu1 %v24511_v7  ;;  %v9662_v10 = vmax.f32 %v9630_v35, 1e-08  ;;  %v24530_v9 = vld [vmem:[#allocation172_spill] sm:$0xff] }
 0x93f   :  { %17917 = vrcp.f32 %v9568_v37  ;;  %13778 = vrot.lane.b32.xlu0 %v24517_v55, %s18216_s5  ;;  %17130 = vmatprep.subr.mxu1 %v24518_v63  ;;  %v9628_v24 = vmul.f32 %v17906_v15, %v22108_v56  ;;  %v9661_v48 = vmax.f32 %v9629_v20, 1e-08  ;;  %v24521_v56 = vld [vmem:[#allocation177_spill] sm:$0xff]  ;;  %v24534_v37 = vld [vmem:[#allocation28_spill] sm:$0xff]  ;;  %v24535_v55 = vld [vmem:[#allocation38_spill] sm:$0xff] }
 0x940   :  { %17919 = vrcp.f32 %v9565_v17  ;;  %17139 = vmatprep.mubr.msk.f32.mxu0 %vm2889_vm2, %v9662_v10  ;;  %17131 = vmatpush3.msra.mxu1 %v24518_v63  ;;  %v17908_v59 = vpop.eup %17907  ;;  %v24536_v63 = vld [vmem:[#allocation182_spill] sm:$0xff] }
 0x941   :  { %17140 = vmatmul.mubr.msk.f32.vlgmr.msra.gmra.mxu0 %vm2889_vm2, %v9663_v57  ;;  %17142 = vmatprep.subr.mxu1 %v24519_v42  ;;  %v9660_v54 = vmax.f32 %v9628_v24, 1e-08  ;;  %v9635_v40 = vmul.f32 %v17908_v59, %v22113_v23  ;;  %v24537_v59 = vld [vmem:[#allocation178_spill] sm:$0xff] }
 0x942   :  { %17150 = vmatpush3.msra.mxu0 %v24515_v14  ;;  %13950 = vrot.lane.b32.xlu1 %v24520_v43, %s18216_s5  ;;  %v9562_v28 = vpop.xlane.xlu1 %9561  ;;  %v17910_v18 = vpop.eup %17909  ;;  %v24533_v14 = vld [vmem:[#allocation23_spill] sm:$0xff] }
 0x943   :  { %17151 = vmatprep.subr.mxu0 %v24521_v56  ;;  %17921 = vrcp.f32 %v9562_v28  ;;  %13865 = vrot.lane.b32.xlu0 %v24522_v49, %s18216_s5  ;;  %v9633_v23 = vmul.f32 %v17910_v18, %v22118_v53  ;;  %v24539_v43 = vld [vmem:[#allocation175_spill] sm:$0xff]  ;;  %v24540_v28 = vld [vmem:[#allocation181_spill] sm:$0xff]  ;;  %v24541_v18 = vld [vmem:[#allocation184_spill] sm:$0xff] }
 0x944   :  { %v17912_v13 = vpop.eup %17911  ;;  %17152 = vmatpush3.msra.mxu0 %v24521_v56  ;;  %17132 = vmatprep.mubr.msk.f32.mxu1 %vm2889_vm2, %v9660_v54  ;;  %v24538_v54 = vld [vmem:[#allocation180_spill] sm:$0xff]  ;;  %v24542_v49 = vld [vmem:[#allocation185_spill] sm:$0xff] }
 0x945   :  { %17163 = vmatprep.subr.mxu0 %v24523_v19  ;;  %17133 = vmatmul.mubr.msk.f32.vlgmr.msra.gmra.mxu1 %vm2889_vm2, %v9661_v48  ;;  %v9634_v29 = vmul.f32 %v17912_v13, %v22123_v8  ;;  %v9667_v8 = vmax.f32 %v9635_v40, 1e-08  ;;  %v9665_v51 = vmax.f32 %v9633_v23, 1e-08  ;;  %v24543_v13 = vld [vmem:[#allocation42_spill] sm:$0xff]  ;;  %v24544_v40 = vld [vmem:[#allocation183_spill] sm:$0xff] }
 0x946   :  { %v17914_v38 = vpop.eup %17913  ;;  %14037 = vrot.lane.b32.xlu1 %v24524_v60, %s18216_s5  ;;  %v9577_v6 = vpop.xlane.xlu1 %9576  ;;  %17143 = vmatpush3.msra.mxu1 %v24519_v42  ;;  %v24546_v60 = vld [vmem:[#allocation30_spill] sm:$0xff] }
 0x947   :  { %v9574_v26 = vpop.xlane.xlu0 %9573  ;;  %17923 = vrcp.f32 %v9577_v6  ;;  %13952 = vrot.lane.b32.xlu0 %v24525_v11, %s18216_s5  ;;  %17144 = vmatprep.subr.mxu1 %v24526_v39  ;;  %v9666_v47 = vmax.f32 %v9634_v29, 1e-08  ;;  %v9632_v21 = vmul.f32 %v17914_v38, %v22127_v2  ;;  %v24528_v2 = vld [vmem:[#allocation88_spill] sm:$0xff]  ;;  %v24545_v38 = vld [vmem:[#allocation31_spill] sm:$0xff]  ;;  %v24549_v23 = vld [vmem:[#allocation186_spill] sm:$0xff] }
 0x948   :  { %17925 = vrcp.f32 %v9574_v26  ;;  %17145 = vmatpush3.msra.mxu1 %v24526_v39  ;;  %v17916_v46 = vpop.eup %17915  ;;  %v24547_v6 = vld [vmem:[#allocation40_spill] sm:$0xff]  ;;  %v24548_v26 = vld [vmem:[#allocation35_spill] sm:$0xff] }
 0x949   :  { %17153 = vmatprep.mubr.msk.f32.mxu0 %vm2889_vm2, %v9666_v47  ;;  %17156 = vmatprep.subr.mxu1 %v24527_v3  ;;  %v9664_v16 = vmax.f32 %v9632_v21, 1e-08  ;;  %v9639_v0 = vmul.f32 %v17916_v46, %v22131_v41  ;;  %v24531_v41 = vld [vmem:[#allocation29_spill] sm:$0xff]  ;;  %v24550_v47 = vld [vmem:[#allocation27_spill] sm:$0xff]  ;;  %v24551_v21 = vld [vmem:[#allocation54_spill] sm:$0xff] }
 0x94a   :  { %17154 = vmatmul.mubr.msk.f32.vlgmr.msra.gmra.mxu0 %vm2889_vm2, %v9667_v8  ;;  %v22375_v53 = vpop.permute.xlu1 %11703  ;;  %v24552_v8 = vld [vmem:[#allocation37_spill] sm:$0xff] }
 0x94b   :  { %v22377_v58 = vpop.permute.xlu0 %11800  ;;  %17164 = vmatpush3.msra.mxu0 %v24523_v19  ;;  %14039 = vrot.lane.b32.xlu0 %v24528_v2, %s18216_s5  ;;  %v9671_v52 = vmax.f32 %v9639_v0, 1e-08  ;;  %v24555_v2 = vld [vmem:[#allocation47_spill] sm:$0xff]  ;;  %v24557_v0 = vld [vmem:[#allocation33_spill] sm:$0xff] }
 0x94c   :  { %v17918_v5 = vpop.eup %17917  ;;  %17165 = vmatprep.subr.mxu0 %v24529_v61  ;;  %17146 = vmatprep.mubr.msk.f32.mxu1 %vm2889_vm2, %v9664_v16  ;;  %v24553_v16 = vld [vmem:[#allocation45_spill] sm:$0xff] }
 0x94d   :  { %v17920_v34 = vpop.eup %17919  ;;  %17166 = vmatpush3.msra.mxu0 %v24529_v61  ;;  %17147 = vmatmul.mubr.msk.f32.vlgmr.msra.gmra.mxu1 %vm2889_vm2, %v9665_v51  ;;  %v9638_v7 = vmul.f32 %v17918_v5, %v22139_v1  ;;  %v24532_v1 = vld [vmem:[#allocation179_spill] sm:$0xff]  ;;  %v24554_v51 = vld [vmem:[#allocation36_spill] sm:$0xff]  ;;  %v24556_v5 = vld [vmem:[#allocation34_spill] sm:$0xff] }
 0x94e   :  { %17177 = vmatprep.subr.msk.mxu0 %vm1496_vm1, %v24530_v9  ;;  %v22390_v12 = vpop.permute.xlu1 %11798  ;;  %17157 = vmatpush3.msra.mxu1 %v24527_v3  ;;  %v9637_v32 = vmul.f32 %v17920_v34, %v22135_v62 }
 0x94f   :  { %v22393_v31 = vpop.permute.xlu0 %11705  ;;  %17158 = vmatprep.subr.mxu1 %v24531_v41  ;;  %v9670_v44 = vmax.f32 %v9638_v7, 1e-08  ;;  %v24558_v7 = vld [vmem:[#allocation43_spill] sm:$0xff] }
 0x950   :  { %v17922_v50 = vpop.eup %17921  ;;  %17159 = vmatpush3.msra.mxu1 %v24531_v41  ;;  %v9669_v15 = vmax.f32 %v9637_v32, 1e-08 }
 0x951   :  { %17167 = vmatprep.mubr.msk.f32.mxu0 %vm2889_vm2, %v9670_v44  ;;  %17170 = vmatprep.subr.mxu1 %v24532_v1  ;;  %v9636_v25 = vmul.f32 %v17922_v50, %v22143_v27  ;;  %v24559_v44 = vld [vmem:[#allocation57_spill] sm:$0xff]  ;;  %v24560_v50 = vld [vmem:[#allocation39_spill] sm:$0xff] }
 0x952   :  { %17168 = vmatmul.mubr.msk.f32.vlgmr.msra.gmra.mxu0 %vm2889_vm2, %v9671_v52  ;;  %v22402_v33 = vpop.permute.xlu1 %11794 }
 0x953   :  { %v22404_v35 = vpop.permute.xlu0 %11891  ;;  %17178 = vmatpush3.xpose.msk.msra.mxu0 %vm1496_vm1, %v24530_v9  ;;  %17181 = vmatprep.mubr.msk.f32.mxu0 %vm1496_vm1, %v24533_v14  ;;  %v9668_v62 = vmax.f32 %v9636_v25, 1e-08 }
 0x954   :  { %v17924_v17 = vpop.eup %17923  ;;  %17179 = vmatprep.subr.msk.mxu0 %vm1496_vm1, %v24534_v37 }
 0x955   :  { %v17926_v45 = vpop.eup %17925  ;;  %v9641_v27 = vmul.f32 %v17924_v17, %v22147_v22  ;;  %17160 = vmatprep.mubr.msk.f32.mxu1 %vm2889_vm2, %v9668_v62 }
 0x956   :  { %v22414_v10 = vpop.permute.xlu1 %11889  ;;  %17161 = vmatmul.mubr.msk.f32.vlgmr.msra.gmra.mxu1 %vm2889_vm2, %v9669_v15  ;;  %v9640_v20 = vmul.f32 %v17926_v45, %v22149_v36 }
 0x957   :  { %v22417_v57 = vpop.permute.xlu0 %11796  ;;  %17180 = vmatpush3.xpose.msk.msra.mxu0 %vm1496_vm1, %v24534_v37  ;;  %17171 = vmatpush3.msra.mxu1 %v24532_v1  ;;  %v9673_v24 = vmax.f32 %v9641_v27, 1e-08 }
 0x958   :  { %17191 = vmatprep.subr.msk.mxu0 %vm1496_vm1, %v24535_v55  ;;  %17172 = vmatprep.subr.mxu1 %v24536_v63  ;;  %v9672_v22 = vmax.f32 %v9640_v20, 1e-08 }
 0x959   :  { %17173 = vmatpush3.msra.mxu1 %v24536_v63 }
 0x95a   :  { %17182 = vmatmul.mubr.msk.f32.vlgmr.msra.gmra.mxu0 %vm1496_vm1, %v24537_v59  ;;  %17174 = vmatprep.mubr.msk.f32.mxu1 %vm2889_vm2, %v9672_v22  ;;  %v22430_v36 = vpop.permute.xlu1 %11885 }
 0x95b   :  { %v22432_v42 = vpop.permute.xlu0 %11982  ;;  %17192 = vmatpush3.xpose.msk.msra.mxu0 %vm1496_vm1, %v24535_v55  ;;  %17195 = vmatprep.mubr.msk.f32.mxu0 %vm1496_vm1, %v24538_v54 }
 0x95c   :  { %17184 = vmatprep.subr.msk.mxu1 %vm1496_vm1, %v24539_v43  ;;  %17193 = vmatprep.subr.msk.mxu0 %vm1496_vm1, %v24540_v28 }
 0x95d   :  { %17175 = vmatmul.mubr.msk.f32.vlgmr.msra.gmra.mxu1 %vm2889_vm2, %v9673_v24 }
 0x95e   :  { %17185 = vmatpush3.xpose.msk.msra.mxu1 %vm1496_vm1, %v24539_v43  ;;  %17188 = vmatprep.mubr.msk.f32.mxu1 %vm1496_vm1, %v24541_v18  ;;  %v22447_v48 = vpop.permute.xlu1 %11980 }
 0x95f   :  { %v22449_v56 = vpop.permute.xlu0 %11887  ;;  %17186 = vmatprep.subr.msk.mxu1 %vm1496_vm1, %v24542_v49  ;;  %17194 = vmatpush3.xpose.msk.msra.mxu0 %vm1496_vm1, %v24540_v28 }
 0x960   :  { %17205 = vmatprep.subr.msk.mxu0 %vm1496_vm1, %v24543_v13 }
 0x962   :  { %17187 = vmatpush3.xpose.msk.msra.mxu1 %vm1496_vm1, %v24542_v49  ;;  %17196 = vmatmul.mubr.msk.f32.vlgmr.msra.gmra.mxu0 %vm1496_vm1, %v24544_v40  ;;  %v11977_v19 = vpop.permute.xlu1 %11976 }
 0x963   :  { %v22461_v29 = vpop.permute.xlu0 %12073  ;;  %17198 = vmatprep.subr.msk.mxu1 %vm1496_vm1, %v24545_v38  ;;  %17206 = vmatpush3.xpose.msk.msra.mxu0 %vm1496_vm1, %v24543_v13 }
 0x964   :  { %17209 = vmatprep.mubr.msk.f32.mxu0 %vm1496_vm1, %v24546_v60  ;;  %17207 = vmatprep.subr.msk.mxu0 %vm1496_vm1, %v24547_v6 }
 0x965   :  { %17189 = vmatmul.mubr.msk.f32.vlgmr.msra.gmra.mxu1 %vm1496_vm1, %v24548_v26 }
 0x966   :  { %17199 = vmatpush3.xpose.msk.msra.mxu1 %vm1496_vm1, %v24545_v38  ;;  %17202 = vmatprep.mubr.msk.f32.mxu1 %vm1496_vm1, %v24549_v23  ;;  %v22477_v11 = vpop.permute.xlu1 %12071 }
 0x967   :  { %v11979_v39 = vpop.permute.xlu0 %11978  ;;  %17200 = vmatprep.subr.msk.mxu1 %vm1496_vm1, %v24550_v47  ;;  %17208 = vmatpush3.xpose.msk.msra.mxu0 %vm1496_vm1, %v24547_v6 }
 0x968   :  { %17219 = vmatprep.subr.msk.mxu0 %vm1496_vm1, %v24551_v21 }
 0x96a   :  { %17201 = vmatpush3.xpose.msk.msra.mxu1 %vm1496_vm1, %v24550_v47  ;;  %17210 = vmatmul.mubr.msk.f32.vlgmr.msra.gmra.mxu0 %vm1496_vm1, %v24552_v8  ;;  %v12068_v46 = vpop.permute.xlu1 %12067  ;;  %v22655_v47 = vld [vmem:[#allocation11 + $0x30] sm:$0xff] }
 0x96b   :  { %v12165_v3 = vpop.permute.xlu0 %12164  ;;  %17212 = vmatprep.subr.msk.mxu1 %vm1496_vm1, %v24553_v16  ;;  %17220 = vmatpush3.xpose.msk.msra.mxu0 %vm1496_vm1, %v24551_v21 }
 0x96c   :  { %17223 = vmatprep.mubr.msk.f32.mxu0 %vm1496_vm1, %v24554_v51  ;;  %17221 = vmatprep.subr.msk.mxu0 %vm1496_vm1, %v24555_v2 }
 0x96d   :  { %17203 = vmatmul.mubr.msk.f32.vlgmr.msra.gmra.mxu1 %vm1496_vm1, %v24556_v5 }
 0x96e   :  { %17213 = vmatpush3.xpose.msk.msra.mxu1 %vm1496_vm1, %v24553_v16  ;;  %17216 = vmatprep.mubr.msk.f32.mxu1 %vm1496_vm1, %v24557_v0  ;;  %v12163_v61 = vpop.permute.xlu1 %12162 }
 0x96f   :  { %v12070_v34 = vpop.permute.xlu0 %12069  ;;  %17214 = vmatprep.subr.msk.mxu1 %vm1496_vm1, %v24558_v7  ;;  %17222 = vmatpush3.xpose.msk.msra.mxu0 %vm1496_vm1, %v24555_v2 }
 0x970   :  { %17233 = vmatprep.subr.msk.mxu0 %vm1496_vm1, %v22377_v58 }
 0x972   :  { %17215 = vmatpush3.xpose.msk.msra.mxu1 %vm1496_vm1, %v24558_v7  ;;  %17224 = vmatmul.mubr.msk.f32.vlgmr.msra.gmra.mxu0 %vm1496_vm1, %v22199_v4  ;;  %v12159_v9 = vpop.permute.xlu1 %12158 }
 0x973   :  { %v12256_v41 = vpop.permute.xlu0 %12255  ;;  %17226 = vmatprep.subr.msk.mxu1 %vm1496_vm1, %v24559_v44  ;;  %17234 = vmatpush3.xpose.msk.msra.mxu0 %vm1496_vm1, %v22377_v58 }
 0x974   :  { %17237 = vmatprep.mubr.msk.f32.mxu0 %vm1496_vm1, %v22402_v33  ;;  %17235 = vmatprep.subr.msk.mxu0 %vm1496_vm1, %v22390_v12 }
 0x975   :  { %17217 = vmatmul.mubr.msk.f32.vlgmr.msra.gmra.mxu1 %vm1496_vm1, %v24560_v50 }
 0x976   :  { %17227 = vmatpush3.xpose.msk.msra.mxu1 %vm1496_vm1, %v24559_v44  ;;  %17230 = vmatprep.mubr.msk.f32.mxu1 %vm1496_vm1, %v22375_v53  ;;  %v12254_v4 = vpop.permute.xlu1 %12253 }
 0x977   :  { %v12161_v52 = vpop.permute.xlu0 %12160  ;;  %17228 = vmatprep.subr.msk.mxu1 %vm1496_vm1, %v22197_v30  ;;  %17236 = vmatpush3.xpose.msk.msra.mxu0 %vm1496_vm1, %v22390_v12 }
 0x978   :  { %17247 = vmatprep.subr.msk.mxu0 %vm1496_vm1, %v22432_v42 }
 0x97a   :  { %17229 = vmatpush3.xpose.msk.msra.mxu1 %vm1496_vm1, %v22197_v30  ;;  %17238 = vmatmul.mubr.msk.f32.vlgmr.msra.gmra.mxu0 %vm1496_vm1, %v22417_v57  ;;  %v12250_v58 = vpop.permute.xlu1 %12249 }
 0x97b   :  { %v12347_v32 = vpop.permute.xlu0 %12346  ;;  %17240 = vmatprep.subr.msk.mxu1 %vm1496_vm1, %v22404_v35  ;;  %17248 = vmatpush3.xpose.msk.msra.mxu0 %vm1496_vm1, %v22432_v42 }
 0x97c   :  { %17251 = vmatprep.mubr.msk.f32.mxu0 %vm1496_vm1, %v11977_v19  ;;  %17249 = vmatprep.subr.msk.mxu0 %vm1496_vm1, %v22447_v48 }
 0x97d   :  { %17231 = vmatmul.mubr.msk.f32.vlgmr.msra.gmra.mxu1 %vm1496_vm1, %v22393_v31 }
 0x97e   :  { %17241 = vmatpush3.xpose.msk.msra.mxu1 %vm1496_vm1, %v22404_v35  ;;  %17244 = vmatprep.mubr.msk.f32.mxu1 %vm1496_vm1, %v22430_v36  ;;  %v12345_v30 = vpop.permute.xlu1 %12344 }
 0x97f   :  { %v12252_v53 = vpop.permute.xlu0 %12251  ;;  %17242 = vmatprep.subr.msk.mxu1 %vm1496_vm1, %v22414_v10  ;;  %17250 = vmatpush3.xpose.msk.msra.mxu0 %vm1496_vm1, %v22447_v48 }
 0x980   :  { %17261 = vmatprep.subr.msk.mxu0 %vm1496_vm1, %v12165_v3 }
 0x982   :  { %17243 = vmatpush3.xpose.msk.msra.mxu1 %vm1496_vm1, %v22414_v10  ;;  %17252 = vmatmul.mubr.msk.f32.vlgmr.msra.gmra.mxu0 %vm1496_vm1, %v11979_v39  ;;  %v12341_v12 = vpop.permute.xlu1 %12340 }
 0x983   :  { %v12438_v31 = vpop.permute.xlu0 %12437  ;;  %17254 = vmatprep.subr.msk.mxu1 %vm1496_vm1, %v22461_v29  ;;  %17262 = vmatpush3.xpose.msk.msra.mxu0 %vm1496_vm1, %v12165_v3 }
 0x984   :  { %17265 = vmatprep.mubr.msk.f32.mxu0 %vm1496_vm1, %v12159_v9  ;;  %17263 = vmatprep.subr.msk.mxu0 %vm1496_vm1, %v12163_v61 }
 0x985   :  { %17245 = vmatmul.mubr.msk.f32.vlgmr.msra.gmra.mxu1 %vm1496_vm1, %v22449_v56 }
 0x986   :  { %17255 = vmatpush3.xpose.msk.msra.mxu1 %vm1496_vm1, %v22461_v29  ;;  %17258 = vmatprep.mubr.msk.f32.mxu1 %vm1496_vm1, %v12068_v46  ;;  %v12436_v1 = vpop.permute.xlu1 %12435 }
 0x987   :  { %v12343_v25 = vpop.permute.xlu0 %12342  ;;  %17256 = vmatprep.subr.msk.mxu1 %vm1496_vm1, %v22477_v11  ;;  %17264 = vmatpush3.xpose.msk.msra.mxu0 %vm1496_vm1, %v12163_v61 }
 0x988   :  { %17275 = vmatprep.subr.msk.mxu0 %vm1496_vm1, %v12347_v32 }
 0x98a   :  { %17257 = vmatpush3.xpose.msk.msra.mxu1 %vm1496_vm1, %v22477_v11  ;;  %17266 = vmatmul.mubr.msk.f32.vlgmr.msra.gmra.mxu0 %vm1496_vm1, %v12161_v52  ;;  %v12434_v33 = vpop.permute.xlu1 %12433  ;;  %v22653_v11 = vld [vmem:[#allocation11 + $0x38] sm:$0xff] }
 0x98b   :  { %v12432_v35 = vpop.permute.xlu0 %12431  ;;  %17268 = vmatprep.subr.msk.mxu1 %vm1496_vm1, %v12256_v41  ;;  %17276 = vmatpush3.xpose.msk.msra.mxu0 %vm1496_vm1, %v12347_v32 }
 0x98c   :  { %17279 = vmatprep.mubr.msk.f32.mxu0 %vm1496_vm1, %v12341_v12  ;;  %17277 = vmatprep.subr.msk.mxu0 %vm1496_vm1, %v12345_v30 }
 0x98d   :  { %17259 = vmatmul.mubr.msk.f32.vlgmr.msra.gmra.mxu1 %vm1496_vm1, %v12070_v34 }
 0x98e   :  { %17269 = vmatpush3.xpose.msk.msra.mxu1 %vm1496_vm1, %v12256_v41  ;;  %17272 = vmatprep.mubr.msk.f32.mxu1 %vm1496_vm1, %v12250_v58  ;;  %v12907_v14 = vpop.permute.xlu1 %12906 }
 0x98f   :  { %v12909_v62 = vpop.permute.xlu0 %12908  ;;  %17270 = vmatprep.subr.msk.mxu1 %vm1496_vm1, %v12254_v4  ;;  %17278 = vmatpush3.xpose.msk.msra.mxu0 %vm1496_vm1, %v12345_v30 }
 0x990   :  { %17289 = vmatprep.subr.mxu0 %v12909_v62 }
 0x992   :  { %17271 = vmatpush3.xpose.msk.msra.mxu1 %vm1496_vm1, %v12254_v4  ;;  %17280 = vmatmul.mubr.msk.f32.vlgmr.msra.gmra.mxu0 %vm1496_vm1, %v12343_v25  ;;  %v22587_v17 = vpop.permute.xlu1 %13082 }
 0x993   :  { %17282 = vmatprep.subr.msk.mxu1 %vm1496_vm1, %v12438_v31  ;;  %17290 = vmatpush3.msra.mxu0 %v12909_v62  ;;  %v12996_v15 = vpop.permute.xlu0 %12995 }
 0x994   :  { %17291 = vmatprep.subr.mxu0 %v12907_v14 }
 0x995   :  { %17273 = vmatmul.mubr.msk.f32.vlgmr.msra.gmra.mxu1 %vm1496_vm1, %v12252_v53  ;;  %17292 = vmatpush3.msra.mxu0 %v12907_v14 }
 0x996   :  { %17283 = vmatpush3.xpose.msk.msra.mxu1 %vm1496_vm1, %v12438_v31  ;;  %17286 = vmatprep.mubr.msk.f32.mxu1 %vm1496_vm1, %v12432_v35  ;;  %v22596_v45 = vpop.permute.xlu1 %13169 }
 0x997   :  { %17284 = vmatprep.subr.msk.mxu1 %vm1496_vm1, %v12436_v1  ;;  %17303 = vmatprep.subr.mxu0 %v22587_v17  ;;  %v12994_v37 = vpop.permute.xlu0 %12993 }
 0x99a   :  { %17285 = vmatpush3.xpose.msk.msra.mxu1 %vm1496_vm1, %v12436_v1 }
 0x99b   :  { %17296 = vmatprep.subr.mxu1 %v12996_v15 }
 0x99d   :  { %17287 = vmatmul.mubr.msk.f32.vlgmr.msra.gmra.mxu1 %vm1496_vm1, %v12434_v33 }
 0x99e   :  { %17297 = vmatpush3.msra.mxu1 %v12996_v15 }
 0x99f   :  { %17298 = vmatprep.subr.mxu1 %v12994_v37 }
 0x9a0   :  { %17299 = vmatpush3.msra.mxu1 %v12994_v37 }
 0x9a1   :  { %17310 = vmatprep.subr.mxu1 %v22596_v45 }
 0x9d2   :  { %v22599_v27 = vpop.f32.mrf.mxu0 }
 0x9d4   :  { %v22601_v10 = vpop.f32.mrf.mxu0 }
 0x9dd   :  { %v22603_v57 = vpop.f32.mrf.mxu0 }
 0x9df   :  { %v22605_v20 = vpop.f32.mrf.mxu0 }
 0x9e3   :  { %v22609_v63 = vpop.f32.mrf.mxu1 }
 0x9e5   :  { %v22615_v59 = vpop.f32.mrf.mxu1 }
 0x9e7   :  { %v22607_v55 = vpop.f32.mrf.mxu0 }
 0x9e9   :  { %v22611_v22 = vpop.f32.mrf.mxu0 }
 0x9ed   :  { %v22617_v36 = vpop.f32.mrf.mxu1 }
 0x9ef   :  { %v22623_v43 = vpop.f32.mrf.mxu1 }
 0x9f1   :  { %v22613_v24 = vpop.f32.mrf.mxu0 }
 0x9f2   :  { %24561 = vst [vmem:[#allocation65_spill] sm:$0xff] %v22613_v24 }
 0x9f3   :  { %v22619_v42 = vpop.f32.mrf.mxu0 }
 0x9f4   :  { %24562 = vst [vmem:[#allocation41_spill] sm:$0xff] %v22619_v42 }
 0x9f5   :  { %v22625_v28 = vpop.f32.mrf.mxu1 }
 0x9f6   :  { %24564 = vst [vmem:[#allocation78_spill] sm:$0xff] %v22625_v28 }
 0x9f7   :  { %v22631_v56 = vpop.f32.mrf.mxu1 }
 0x9f8   :  { %24567 = vst [vmem:[#allocation48_spill] sm:$0xff] %v22631_v56 }
 0x9f9   :  { %v22621_v54 = vpop.f32.mrf.mxu0 }
 0x9fa   :  { %24563 = vst [vmem:[#allocation75_spill] sm:$0xff] %v22621_v54 }
 0x9fb   :  { %v22627_v18 = vpop.f32.mrf.mxu0 }
 0x9fc   :  { %24565 = vst [vmem:[#allocation51_spill] sm:$0xff] %v22627_v18 }
 0x9fd   :  { %v22633_v49 = vpop.f32.mrf.mxu1 }
 0x9fe   :  { %24568 = vst [vmem:[#allocation53_spill] sm:$0xff] %v22633_v49 }
 0x9ff   :  { %v22639_v19 = vpop.f32.mrf.mxu1 }
 0xa00   :  { %24571 = vst [vmem:[#allocation82_spill] sm:$0xff] %v22639_v19 }
 0xa01   :  { %v22629_v48 = vpop.f32.mrf.mxu0 }
 0xa02   :  { %24566 = vst [vmem:[#allocation52_spill] sm:$0xff] %v22629_v48 }
 0xa03   :  { %v22635_v13 = vpop.f32.mrf.mxu0 }
 0xa04   :  { %24569 = vst [vmem:[#allocation85_spill] sm:$0xff] %v22635_v13 }
 0xa05   :  { %v22641_v29 = vpop.f32.mrf.mxu1 }
 0xa06   :  { %24572 = vst [vmem:[#allocation86_spill] sm:$0xff] %v22641_v29 }
 0xa07   :  { %v22647_v6 = vpop.f32.mrf.mxu1 }
 0xa08   :  { %24575 = vst [vmem:[#allocation58_spill] sm:$0xff] %v22647_v6 }
 0xa0a   :  { %v22637_v40 = vpop.f32.mrf.mxu0 }
 0xa0b   :  { %24570 = vst [vmem:[#allocation87_spill] sm:$0xff] %v22637_v40 }
 0xa0c   :  { %v22643_v38 = vpop.f32.mrf.mxu0 }
 0xa0d   :  { %24573 = vst [vmem:[#allocation61_spill] sm:$0xff] %v22643_v38  ;;  %v22649_v26 = vpop.f32.mrf.mxu1 }
 0xa0e   :  { %24576 = vst [vmem:[#allocation63_spill] sm:$0xff] %v22649_v26 }
 0xa0f   :  { %v22660_v8 = vpop.f32.mrf.mxu1 }
 0xa10   :  { %24578 = vst [vmem:[#allocation95_spill] sm:$0xff] %v22660_v8 }
 0xa12   :  { %v22645_v60 = vpop.f32.mrf.mxu0 }
 0xa13   :  { %24574 = vst [vmem:[#allocation62_spill] sm:$0xff] %v22645_v60 }
 0xa14   :  { %v22651_v23 = vpop.f32.mrf.mxu0 }
 0xa15   :  { %24577 = vst [vmem:[#allocation93_spill] sm:$0xff] %v22651_v23 }
 0xa16   :  { %v22667_v51 = vpop.f32.mrf.mxu1 }
 0xa17   :  { %24579 = vst [vmem:[#allocation90_spill] sm:$0xff] %v22667_v51 }
 0xa18   :  { %v22671_v5 = vpop.f32.mrf.mxu1 }
 0xa19   :  { %24580 = vst [vmem:[#allocation94_spill] sm:$0xff] %v22671_v5 }
 0xa1a   :  { %v17183_v39 = vpop.f32.mrf.mxu0 }
 0xa1b   :  { %v22658_v21 = vadd.f32 %v17183_v39, %v22653_v11 }
 0xa1c   :  { %v11148_v46 = vpop.f32.mrf.mxu0 }
 0xa1d   :  { %v22663_v3 = vadd.f32 %v11148_v46, %v22655_v47  ;;  %v12525_v16 = vsel %vm2889_vm2, %v22658_v21, -inf  ;;  %v22681_v41 = vpop.f32.mrf.mxu1 }
 0xa1e   :  { %12526 = vmax.xlane.f32.xlu1 %v12525_v16  ;;  %24581 = vst [vmem:[#allocation74_spill] sm:$0xff] %v22681_v41 }
 0xa1f   :  { %v12522_v2 = vsel %vm2889_vm2, %v22663_v3, -inf  ;;  %v22685_v50 = vpop.f32.mrf.mxu1 }
 0xa20   :  { %12523 = vmax.xlane.f32.xlu0 %v12522_v2  ;;  %24582 = vst [vmem:[#allocation68_spill] sm:$0xff] %v22685_v50 }
 0xa22   :  { %v17197_v0 = vpop.f32.mrf.mxu0 }
 0xa23   :  { %v22674_v61 = vadd.f32 %v17197_v0, %v22653_v11 }
 0xa24   :  { %v11330_v34 = vpop.f32.mrf.mxu0 }
 0xa25   :  { %v22677_v7 = vadd.f32 %v11330_v34, %v22655_v47  ;;  %v12537_v9 = vsel %vm2889_vm2, %v22674_v61, -inf  ;;  %v17190_v58 = vpop.f32.mrf.mxu1 }
 0xa26   :  { %12538 = vmax.xlane.f32.xlu1 %v12537_v9  ;;  %v22696_v12 = vadd.f32 %v17190_v58, %v22653_v11 }
 0xa27   :  { %v12534_v44 = vsel %vm2889_vm2, %v22677_v7, -inf  ;;  %v11239_v1 = vpop.f32.mrf.mxu1 }
 0xa28   :  { %12535 = vmax.xlane.f32.xlu0 %v12534_v44  ;;  %v22701_v35 = vadd.f32 %v11239_v1, %v22655_v47  ;;  %v12531_v62 = vsel %vm2889_vm2, %v22696_v12, -inf }
 0xa2a   :  { %v17211_v4 = vpop.f32.mrf.mxu0  ;;  %v12528_v16 = vsel %vm2889_vm2, %v22701_v35, -inf }
 0xa2b   :  { %v22688_v52 = vadd.f32 %v17211_v4, %v22653_v11 }
 0xa2c   :  { %v11512_v32 = vpop.f32.mrf.mxu0 }
 0xa2d   :  { %v22691_v30 = vadd.f32 %v11512_v32, %v22655_v47  ;;  %v12549_v53 = vsel %vm2889_vm2, %v22688_v52, -inf  ;;  %v17204_v25 = vpop.f32.mrf.mxu1 }
 0xa2e   :  { %12550 = vmax.xlane.f32.xlu1 %v12549_v53  ;;  %v22709_v37 = vadd.f32 %v17204_v25, %v22653_v11 }
 0xa2f   :  { %v12546_v31 = vsel %vm2889_vm2, %v22691_v30, -inf  ;;  %v11421_v2 = vpop.f32.mrf.mxu1 }
 0xa30   :  { %12547 = vmax.xlane.f32.xlu0 %v12546_v31  ;;  %v12543_v0 = vsel %vm2889_vm2, %v22709_v37, -inf  ;;  %v22721_v44 = vadd.f32 %v11421_v2, %v22655_v47 }
 0xa32   :  { %v17225_v33 = vpop.f32.mrf.mxu0  ;;  %v12540_v25 = vsel %vm2889_vm2, %v22721_v44, -inf }
 0xa33   :  { %v22704_v14 = vadd.f32 %v17225_v33, %v22653_v11 }
 0xa34   :  { %v11694_v15 = vpop.f32.mrf.mxu0  ;;  %12532 = vmax.xlane.f32.xlu0 %v12531_v62 }
 0xa35   :  { %v12561_v39 = vsel %vm2889_vm2, %v22704_v14, -inf  ;;  %v22714_v46 = vadd.f32 %v11694_v15, %v22655_v47  ;;  %v17218_v34 = vpop.f32.mrf.mxu1 }
 0xa36   :  { %12562 = vmax.xlane.f32.xlu1 %v12561_v39  ;;  %v22729_v53 = vadd.f32 %v17218_v34, %v22653_v11 }
 0xa37   :  { %v12558_v58 = vsel %vm2889_vm2, %v22714_v46, -inf  ;;  %v11603_v33 = vpop.f32.mrf.mxu1 }
 0xa38   :  { %12529 = vmax.xlane.f32.xlu0 %v12528_v16  ;;  %v12555_v62 = vsel %vm2889_vm2, %v22729_v53, -inf  ;;  %v22741_v16 = vadd.f32 %v11603_v33, %v22655_v47 }
 0xa3a   :  { %12544 = vmax.xlane.f32.xlu1 %v12543_v0  ;;  %v17239_v9 = vpop.f32.mrf.mxu0 }
 0xa3b   :  { %v22724_v4 = vadd.f32 %v17239_v9, %v22653_v11 }
 0xa3c   :  { %12559 = vmax.xlane.f32.xlu0 %v12558_v58  ;;  %v11876_v32 = vpop.f32.mrf.mxu0 }
 0xa3d   :  { %v12573_v31 = vsel %vm2889_vm2, %v22724_v4, -inf  ;;  %v22734_v1 = vadd.f32 %v11876_v32, %v22655_v47  ;;  %v17232_v15 = vpop.f32.mrf.mxu1 }
 0xa3e   :  { %12574 = vmax.xlane.f32.xlu1 %v12573_v31  ;;  %v22749_v9 = vadd.f32 %v17232_v15, %v22653_v11  ;;  %v12552_v31 = vsel %vm2889_vm2, %v22741_v16, -inf }
 0xa3f   :  { %v12570_v0 = vsel %vm2889_vm2, %v22734_v1, -inf }
 0xa40   :  { %12541 = vmax.xlane.f32.xlu0 %v12540_v25  ;;  %v11785_v25 = vpop.f32.mrf.mxu1  ;;  %v12567_v33 = vsel %vm2889_vm2, %v22749_v9, -inf }
 0xa41   :  { %v22761_v15 = vadd.f32 %v11785_v25, %v22655_v47 }
 0xa42   :  { %12556 = vmax.xlane.f32.xlu1 %v12555_v62  ;;  %v17253_v39 = vpop.f32.mrf.mxu0 }
 0xa43   :  { %v22744_v2 = vadd.f32 %v17253_v39, %v22653_v11  ;;  %v12564_v25 = vsel %vm2889_vm2, %v22761_v15, -inf }
 0xa44   :  { %12571 = vmax.xlane.f32.xlu0 %v12570_v0  ;;  %v12058_v34 = vpop.f32.mrf.mxu0 }
 0xa45   :  { %v12585_v58 = vsel %vm2889_vm2, %v22744_v2, -inf  ;;  %v22754_v32 = vadd.f32 %v12058_v34, %v22655_v47  ;;  %v17246_v62 = vpop.f32.mrf.mxu1 }
 0xa46   :  { %12586 = vmax.xlane.f32.xlu1 %v12585_v58  ;;  %v22769_v50 = vadd.f32 %v17246_v62, %v22653_v11 }
 0xa47   :  { %v12582_v34 = vsel %vm2889_vm2, %v22754_v32, -inf  ;;  %v11967_v41 = vpop.f32.mrf.mxu1 }
 0xa48   :  { %12553 = vmax.xlane.f32.xlu0 %v12552_v31  ;;  %v22781_v62 = vadd.f32 %v11967_v41, %v22655_v47 }
 0xa4a   :  { %12568 = vmax.xlane.f32.xlu1 %v12567_v33  ;;  %v17267_v39 = vpop.f32.mrf.mxu0 }
 0xa4b   :  { %v22764_v0 = vadd.f32 %v17267_v39, %v22653_v11 }
 0xa4c   :  { %12583 = vmax.xlane.f32.xlu0 %v12582_v34  ;;  %v12240_v58 = vpop.f32.mrf.mxu0  ;;  %v12579_v34 = vsel %vm2889_vm2, %v22769_v50, -inf }
 0xa4d   :  { %v12597_v31 = vsel %vm2889_vm2, %v22764_v0, -inf  ;;  %v22774_v33 = vadd.f32 %v12240_v58, %v22655_v47  ;;  %v17260_v39 = vpop.f32.mrf.mxu1 }
 0xa4e   :  { %12598 = vmax.xlane.f32.xlu1 %v12597_v31  ;;  %v22789_v5 = vadd.f32 %v17260_v39, %v22653_v11 }
 0xa4f   :  { %v12594_v58 = vsel %vm2889_vm2, %v22774_v33, -inf  ;;  %v12149_v31 = vpop.f32.mrf.mxu1 }
 0xa50   :  { %12565 = vmax.xlane.f32.xlu0 %v12564_v25  ;;  %v22804_v39 = vadd.f32 %v12149_v31, %v22655_v47 }
 0xa52   :  { %12580 = vmax.xlane.f32.xlu1 %v12579_v34  ;;  %v17281_v60 = vpop.f32.mrf.mxu0  ;;  %v12588_v31 = vsel %vm2889_vm2, %v22804_v39, -inf }
 0xa53   :  { %v22784_v23 = vadd.f32 %v17281_v60, %v22653_v11  ;;  %v12576_v60 = vsel %vm2889_vm2, %v22781_v62, -inf }
 0xa54   :  { %12595 = vmax.xlane.f32.xlu0 %v12594_v58  ;;  %v12422_v51 = vpop.f32.mrf.mxu0  ;;  %v12591_v58 = vsel %vm2889_vm2, %v22789_v5, -inf }
 0xa55   :  { %v12609_v25 = vsel %vm2889_vm2, %v22784_v23, -inf  ;;  %v17274_v34 = vpop.f32.mrf.mxu1  ;;  %v22794_v41 = vadd.f32 %v12422_v51, %v22655_v47 }
 0xa56   :  { %12610 = vmax.xlane.f32.xlu1 %v12609_v25  ;;  %v22799_v40 = vadd.f32 %v17274_v34, %v22653_v11 }
 0xa57   :  { %v12331_v38 = vpop.f32.mrf.mxu1  ;;  %v12606_v25 = vsel %vm2889_vm2, %v22794_v41, -inf }
 0xa58   :  { %12577 = vmax.xlane.f32.xlu0 %v12576_v60  ;;  %v12603_v26 = vsel %vm2889_vm2, %v22799_v40, -inf  ;;  %v22814_v34 = vadd.f32 %v12331_v38, %v22655_v47 }
 0xa5a   :  { %12592 = vmax.xlane.f32.xlu1 %v12591_v58 }
 0xa5c   :  { %12607 = vmax.xlane.f32.xlu0 %v12606_v25 }
 0xa5d   :  { %v17288_v51 = vpop.f32.mrf.mxu1 }
 0xa5e   :  { %v22811_v60 = vadd.f32 %v17288_v51, %v22653_v11  ;;  %12604 = vmax.xlane.f32.xlu1 %v12603_v26  ;;  %v12600_v11 = vsel %vm2889_vm2, %v22814_v34, -inf  ;;  %v22825_v26 = vpop.permute.xlu1 %13256  ;;  %v22829_v51 = vpop.permute.xlu0 %13080 }
 0xa5f   :  { %v12513_v58 = vpop.f32.mrf.mxu1 }
 0xa60   :  { %12589 = vmax.xlane.f32.xlu0 %v12588_v31  ;;  %v12615_v8 = vsel %vm2889_vm2, %v22811_v60, -inf  ;;  %v22821_v25 = vadd.f32 %v12513_v58, %v22655_v47 }
 0xa62   :  { %12616 = vmax.xlane.f32.xlu1 %v12615_v8  ;;  %v12612_v38 = vsel %vm2889_vm2, %v22821_v25, -inf  ;;  %v22831_v31 = vpop.permute.xlu1 %13343  ;;  %v22833_v48 = vpop.permute.xlu0 %13167 }
 0xa63   :  { %24583 = vst [vmem:[#allocation100_spill] sm:$0xff] %v22831_v31 }
 0xa64   :  { %12601 = vmax.xlane.f32.xlu0 %v12600_v11 }
 0xa66   :  { %v22835_v8 = vpop.permute.xlu1 %13430  ;;  %v22837_v47 = vpop.permute.xlu0 %13254 }
 0xa68   :  { %12613 = vmax.xlane.f32.xlu0 %v12612_v38 }
 0xa6a   :  { %v22839_v58 = vpop.permute.xlu1 %13517  ;;  %v22841_v13 = vpop.permute.xlu0 %13341 }
 0xa6b   :  { %24584 = vst [vmem:[#allocation97_spill] sm:$0xff] %v22839_v58  ;;  %24585 = vst [vmem:[#allocation49_spill] sm:$0xff] %v22841_v13 }
 0xa6e   :  { %v22843_v11 = vpop.permute.xlu1 %13604  ;;  %v22845_v29 = vpop.permute.xlu0 %13428 }
 0xa72   :  { %v22847_v6 = vpop.permute.xlu1 %13691  ;;  %v22849_v38 = vpop.permute.xlu0 %13515 }
 0xa73   :  { %24586 = vst [vmem:[#allocation99_spill] sm:$0xff] %v22847_v6  ;;  %24587 = vst [vmem:[#allocation154_spill] sm:$0xff] %v22849_v38 }
 0xa76   :  { %v22851_v54 = vpop.permute.xlu1 %13689  ;;  %v22853_v18 = vpop.permute.xlu0 %13602 }
 0xa77   :  { %24588 = vst [vmem:[#allocation157_spill] sm:$0xff] %v22851_v54  ;;  %24589 = vst [vmem:[#allocation55_spill] sm:$0xff] %v22853_v18 }
 0xa7a   :  { %v22855_v49 = vpop.permute.xlu1 %13776  ;;  %v22857_v19 = vpop.permute.xlu0 %13778 }
 0xa7b   :  { %24590 = vst [vmem:[#allocation44_spill] sm:$0xff] %v22855_v49  ;;  %24591 = vst [vmem:[#allocation79_spill] sm:$0xff] %v22857_v19 }
 0xa7e   :  { %v22859_v24 = vpop.permute.xlu1 %13863  ;;  %v22861_v58 = vpop.permute.xlu0 %13865 }
 0xa7f   :  { %24592 = vst [vmem:[#allocation148_spill] sm:$0xff] %v22859_v24  ;;  %24593 = vst [vmem:[#allocation59_spill] sm:$0xff] %v22861_v58 }
 0xa82   :  { %v22863_v42 = vpop.permute.xlu1 %13950  ;;  %v22865_v13 = vpop.permute.xlu0 %13952 }
 0xa83   :  { %24594 = vst [vmem:[#allocation46_spill] sm:$0xff] %v22863_v42  ;;  %24595 = vst [vmem:[#allocation161_spill] sm:$0xff] %v22865_v13 }
 0xa86   :  { %v22867_v28 = vpop.permute.xlu1 %14037  ;;  %v22869_v6 = vpop.permute.xlu0 %14039 }
 0xa87   :  { %24596 = vst [vmem:[#allocation21_spill] sm:$0xff] %v22867_v28  ;;  %24597 = vst [vmem:[#allocation64_spill] sm:$0xff] %v22869_v6 }
 0xaa7   :  { %v12527_v38 = vpop.xlane.xlu1 %12526 }
 0xaa8   :  { %v12619_v54 = vsub.f32 %v22658_v21, %v12527_v38 }
 0xaa9   :  { %v12524_v56 = vpop.xlane.xlu0 %12523 }
 0xaaa   :  { %v12652_v18 = vmul.f32 1.442695, %v12619_v54  ;;  %v12618_v49 = vsub.f32 %v22663_v3, %v12524_v56 }
 0xaac   :  { %17927 = vpow2.f32 %v12652_v18  ;;  %v12650_v19 = vmul.f32 1.442695, %v12618_v49 }
 0xaae   :  { %17929 = vpow2.f32 %v12650_v19 }
 0xaaf   :  { %v12539_v24 = vpop.xlane.xlu1 %12538 }
 0xab0   :  { %v12623_v58 = vsub.f32 %v22674_v61, %v12539_v24 }
 0xab1   :  { %v12536_v42 = vpop.xlane.xlu0 %12535 }
 0xab2   :  { %v12660_v31 = vmul.f32 1.442695, %v12623_v58  ;;  %v12622_v13 = vsub.f32 %v22677_v7, %v12536_v42 }
 0xab4   :  { %17931 = vpow2.f32 %v12660_v31  ;;  %v12658_v28 = vmul.f32 1.442695, %v12622_v13 }
 0xab6   :  { %17933 = vpow2.f32 %v12658_v28 }
 0xab7   :  { %v12551_v6 = vpop.xlane.xlu1 %12550 }
 0xab8   :  { %v12627_v21 = vsub.f32 %v22688_v52, %v12551_v6 }
 0xab9   :  { %v22876_v38 = vpop.eup %17927  ;;  %v12548_v54 = vpop.xlane.xlu0 %12547 }
 0xaba   :  { %v12668_v56 = vmul.f32 1.442695, %v12627_v21  ;;  %v12626_v18 = vsub.f32 %v22691_v30, %v12548_v54  ;;  %v12717_v49 = vsel %vm2889_vm2, %v22876_v38, 0.0 }
 0xabb   :  { %v22881_v24 = vpop.eup %17929  ;;  %12718 = vadd.xlane.f32.xlu1 %v12717_v49 }
 0xabc   :  { %17935 = vpow2.f32 %v12668_v56  ;;  %v12666_v42 = vmul.f32 1.442695, %v12626_v18  ;;  %v12714_v28 = vsel %vm2889_vm2, %v22881_v24, 0.0 }
 0xabd   :  { %12715 = vadd.xlane.f32.xlu0 %v12714_v28  ;;  %v12533_v13 = vpop.xlane.xlu0 %12532 }
 0xabe   :  { %17937 = vpow2.f32 %v12666_v42  ;;  %v12621_v19 = vsub.f32 %v22696_v12, %v12533_v13 }
 0xabf   :  { %v12563_v6 = vpop.xlane.xlu1 %12562 }
 0xac0   :  { %v12656_v3 = vmul.f32 1.442695, %v12621_v19  ;;  %v12631_v61 = vsub.f32 %v22704_v14, %v12563_v6 }
 0xac1   :  { %v22887_v7 = vpop.eup %17931  ;;  %v12530_v52 = vpop.xlane.xlu0 %12529 }
 0xac2   :  { %17939 = vpow2.f32 %v12656_v3  ;;  %v12676_v30 = vmul.f32 1.442695, %v12631_v61  ;;  %v12620_v31 = vsub.f32 %v22701_v35, %v12530_v52  ;;  %v12729_v58 = vsel %vm2889_vm2, %v22887_v7, 0.0 }
 0xac3   :  { %v22892_v21 = vpop.eup %17933  ;;  %v12545_v54 = vpop.xlane.xlu1 %12544  ;;  %12730 = vadd.xlane.f32.xlu1 %v12729_v58 }
 0xac4   :  { %17941 = vpow2.f32 %v12676_v30  ;;  %v12654_v12 = vmul.f32 1.442695, %v12620_v31  ;;  %v12625_v56 = vsub.f32 %v22709_v37, %v12545_v54  ;;  %v12726_v14 = vsel %vm2889_vm2, %v22892_v21, 0.0 }
 0xac5   :  { %12727 = vadd.xlane.f32.xlu0 %v12726_v14  ;;  %v12560_v18 = vpop.xlane.xlu0 %12559 }
 0xac6   :  { %17943 = vpow2.f32 %v12654_v12  ;;  %v12664_v49 = vmul.f32 1.442695, %v12625_v56  ;;  %v12630_v35 = vsub.f32 %v22714_v46, %v12560_v18 }
 0xac7   :  { %v12575_v42 = vpop.xlane.xlu1 %12574 }
 0xac8   :  { %17945 = vpow2.f32 %v12664_v49  ;;  %v12674_v28 = vmul.f32 1.442695, %v12630_v35  ;;  %v12635_v13 = vsub.f32 %v22724_v4, %v12575_v42 }
 0xac9   :  { %v22899_v19 = vpop.eup %17935  ;;  %v12542_v6 = vpop.xlane.xlu0 %12541 }
 0xaca   :  { %17947 = vpow2.f32 %v12674_v28  ;;  %v12684_v3 = vmul.f32 1.442695, %v12635_v13  ;;  %v12624_v37 = vsub.f32 %v22721_v44, %v12542_v6  ;;  %v12741_v61 = vsel %vm2889_vm2, %v22899_v19, 0.0 }
 0xacb   :  { %v22904_v52 = vpop.eup %17937  ;;  %v12557_v30 = vpop.xlane.xlu1 %12556  ;;  %12742 = vadd.xlane.f32.xlu1 %v12741_v61 }
 0xacc   :  { %17949 = vpow2.f32 %v12684_v3  ;;  %v12662_v46 = vmul.f32 1.442695, %v12624_v37  ;;  %v12629_v31 = vsub.f32 %v22729_v53, %v12557_v30  ;;  %v12738_v4 = vsel %vm2889_vm2, %v22904_v52, 0.0 }
 0xacd   :  { %12739 = vadd.xlane.f32.xlu0 %v12738_v4  ;;  %v12572_v58 = vpop.xlane.xlu0 %12571 }
 0xace   :  { %v12634_v54 = vsub.f32 %v22734_v1, %v12572_v58  ;;  %17951 = vpow2.f32 %v12662_v46  ;;  %v12672_v44 = vmul.f32 1.442695, %v12629_v31 }
 0xacf   :  { %v22910_v12 = vpop.eup %17939  ;;  %v12587_v56 = vpop.xlane.xlu1 %12586 }
 0xad0   :  { %v12682_v14 = vmul.f32 1.442695, %v12634_v54  ;;  %v12639_v18 = vsub.f32 %v22744_v2, %v12587_v56  ;;  %v12723_v49 = vsel %vm2889_vm2, %v22910_v12, 0.0 }
 0xad1   :  { %v22915_v35 = vpop.eup %17941  ;;  %12724 = vadd.xlane.f32.xlu1 %v12723_v49  ;;  %v12554_v53 = vpop.xlane.xlu0 %12553 }
 0xad2   :  { %17953 = vpow2.f32 %v12682_v14  ;;  %v12692_v42 = vmul.f32 1.442695, %v12639_v18  ;;  %v12628_v28 = vsub.f32 %v22741_v16, %v12554_v53  ;;  %v12753_v6 = vsel %vm2889_vm2, %v22915_v35, 0.0 }
 0xad3   :  { %v22918_v1 = vpop.eup %17943  ;;  %17955 = vpow2.f32 %v12672_v44  ;;  %v12569_v13 = vpop.xlane.xlu1 %12568 }
 0xad4   :  { %17957 = vpow2.f32 %v12692_v42  ;;  %v12670_v2 = vmul.f32 1.442695, %v12628_v28  ;;  %v12633_v3 = vsub.f32 %v22749_v9, %v12569_v13  ;;  %v12720_v37 = vsel %vm2889_vm2, %v22918_v1, 0.0 }
 0xad5   :  { %v22925_v61 = vpop.eup %17945  ;;  %12754 = vadd.xlane.f32.xlu1 %v12753_v6  ;;  %12721 = vadd.xlane.f32.xlu0 %v12720_v37  ;;  %v12584_v30 = vpop.xlane.xlu0 %12583 }
 0xad6   :  { %v12638_v16 = vsub.f32 %v22754_v32, %v12584_v30  ;;  %17959 = vpow2.f32 %v12670_v2  ;;  %v12680_v31 = vmul.f32 1.442695, %v12633_v3  ;;  %v12735_v9 = vsel %vm2889_vm2, %v22925_v61, 0.0 }
 0xad7   :  { %v22928_v46 = vpop.eup %17947  ;;  %v12599_v4 = vpop.xlane.xlu1 %12598 }
 0xad8   :  { %v12690_v58 = vmul.f32 1.442695, %v12638_v16  ;;  %v12643_v54 = vsub.f32 %v22764_v0, %v12599_v4  ;;  %v12750_v44 = vsel %vm2889_vm2, %v22928_v46, 0.0 }
 0xad9   :  { %v22935_v56 = vpop.eup %17949  ;;  %12736 = vadd.xlane.f32.xlu1 %v12735_v9  ;;  %12751 = vadd.xlane.f32.xlu0 %v12750_v44  ;;  %v12566_v14 = vpop.xlane.xlu0 %12565 }
 0xada   :  { %17961 = vpow2.f32 %v12690_v58  ;;  %v12700_v32 = vmul.f32 1.442695, %v12643_v54  ;;  %v12632_v18 = vsub.f32 %v22761_v15, %v12566_v14  ;;  %v12765_v28 = vsel %vm2889_vm2, %v22935_v56, 0.0 }
 0xadb   :  { %17963 = vpow2.f32 %v12680_v31  ;;  %v12581_v49 = vpop.xlane.xlu1 %12580  ;;  %v22938_v53 = vpop.eup %17951 }
 0xadc   :  { %17965 = vpow2.f32 %v12700_v32  ;;  %v12678_v0 = vmul.f32 1.442695, %v12632_v18  ;;  %v12637_v42 = vsub.f32 %v22769_v50, %v12581_v49  ;;  %v12732_v37 = vsel %vm2889_vm2, %v22938_v53, 0.0 }
 0xadd   :  { %12766 = vadd.xlane.f32.xlu0 %v12765_v28  ;;  %v12596_v13 = vpop.xlane.xlu0 %12595 }
 0xade   :  { %v12688_v6 = vmul.f32 1.442695, %v12637_v42  ;;  %v12642_v2 = vsub.f32 %v22774_v33, %v12596_v13  ;;  %17967 = vpow2.f32 %v12678_v0 }
 0xadf   :  { %v22944_v3 = vpop.eup %17953  ;;  %v12611_v15 = vpop.xlane.xlu1 %12610 }
 0xae0   :  { %v22948_v30 = vpop.eup %17955  ;;  %17969 = vpow2.f32 %v12688_v6  ;;  %v12698_v16 = vmul.f32 1.442695, %v12642_v2  ;;  %v12647_v50 = vsub.f32 %v22784_v23, %v12611_v15  ;;  %v12762_v31 = vsel %vm2889_vm2, %v22944_v3, 0.0 }
 0xae1   :  { %v22953_v4 = vpop.eup %17957  ;;  %12733 = vadd.xlane.f32.xlu0 %v12732_v37  ;;  %12763 = vadd.xlane.f32.xlu1 %v12762_v31  ;;  %v12578_v33 = vpop.xlane.xlu0 %12577  ;;  %v12747_v44 = vsel %vm2889_vm2, %v22948_v30, 0.0 }
 0xae2   :  { %v12708_v58 = vmul.f32 1.442695, %v12647_v50  ;;  %v12636_v54 = vsub.f32 %v22781_v62, %v12578_v33  ;;  %17971 = vpow2.f32 %v12698_v16  ;;  %v12777_v18 = vsel %vm2889_vm2, %v22953_v4, 0.0 }
 0xae3   :  { %v12593_v9 = vpop.xlane.xlu1 %12592  ;;  %v22958_v14 = vpop.eup %17959 }
 0xae4   :  { %17973 = vpow2.f32 %v12708_v58  ;;  %v12686_v23 = vmul.f32 1.442695, %v12636_v54  ;;  %v12641_v32 = vsub.f32 %v22789_v5, %v12593_v9  ;;  %v12744_v6 = vsel %vm2889_vm2, %v22958_v14, 0.0 }
 0xae5   :  { %12778 = vadd.xlane.f32.xlu0 %v12777_v18  ;;  %12748 = vadd.xlane.f32.xlu1 %v12747_v44  ;;  %v12608_v49 = vpop.xlane.xlu0 %12607 }
 0xae6   :  { %v12696_v0 = vmul.f32 1.442695, %v12641_v32  ;;  %v12646_v62 = vsub.f32 %v22794_v41, %v12608_v49  ;;  %17975 = vpow2.f32 %v12686_v23 }
 0xae7   :  { %v22964_v42 = vpop.eup %17961 }
 0xae8   :  { %v22966_v28 = vpop.eup %17963  ;;  %17977 = vpow2.f32 %v12696_v0  ;;  %v12706_v13 = vmul.f32 1.442695, %v12646_v62  ;;  %v12774_v5 = vsel %vm2889_vm2, %v22964_v42, 0.0 }
 0xae9   :  { %v22972_v2 = vpop.eup %17965  ;;  %12745 = vadd.xlane.f32.xlu0 %v12744_v6  ;;  %12775 = vadd.xlane.f32.xlu1 %v12774_v5  ;;  %v12590_v15 = vpop.xlane.xlu0 %12589  ;;  %v12759_v31 = vsel %vm2889_vm2, %v22966_v28, 0.0 }
 0xaea   :  { %v12640_v41 = vsub.f32 %v22804_v39, %v12590_v15  ;;  %17979 = vpow2.f32 %v12706_v13  ;;  %v12789_v50 = vsel %vm2889_vm2, %v22972_v2, 0.0  ;;  %v24598_v15 = vld [vmem:[#allocation91_spill] sm:$0xff] }
 0xaeb   :  { %v22975_v37 = vpop.eup %17967 }
 0xaec   :  { %v12694_v16 = vmul.f32 1.442695, %v12640_v41  ;;  %v12756_v54 = vsel %vm2889_vm2, %v22975_v37, 0.0  ;;  %v12605_v41 = vpop.xlane.xlu1 %12604 }
 0xaed   :  { %v22981_v33 = vpop.eup %17969  ;;  %12790 = vadd.xlane.f32.xlu0 %v12789_v50  ;;  %12760 = vadd.xlane.f32.xlu1 %v12759_v31  ;;  %v12645_v50 = vsub.f32 %v22799_v40, %v12605_v41 }
 0xaee   :  { %17981 = vpow2.f32 %v12694_v16  ;;  %v12771_v39 = vsel %vm2889_vm2, %v22981_v33, 0.0  ;;  %v24599_v16 = vld [vmem:[#allocation92_spill] sm:$0xff] }
 0xaef   :  { %v22983_v58 = vpop.eup %17971 }
 0xaf0   :  { %v12786_v32 = vsel %vm2889_vm2, %v22983_v58, 0.0  ;;  %v12617_v31 = vpop.xlane.xlu1 %12616 }
 0xaf1   :  { %v22989_v9 = vpop.eup %17973  ;;  %12772 = vadd.xlane.f32.xlu0 %v12771_v39  ;;  %12757 = vadd.xlane.f32.xlu1 %v12756_v54  ;;  %v12602_v39 = vpop.xlane.xlu0 %12601  ;;  %v12704_v54 = vmul.f32 1.442695, %v12645_v50 }
 0xaf2   :  { %v12801_v23 = vsel %vm2889_vm2, %v22989_v9, 0.0 }
 0xaf3   :  { %v22991_v44 = vpop.eup %17975  ;;  %17983 = vpow2.f32 %v12704_v54 }
 0xaf4   :  { %v12768_v0 = vsel %vm2889_vm2, %v22991_v44, 0.0 }
 0xaf5   :  { %v22997_v18 = vpop.eup %17977  ;;  %12802 = vadd.xlane.f32.xlu0 %v12801_v23  ;;  %12787 = vadd.xlane.f32.xlu1 %v12786_v32  ;;  %v12649_v23 = vsub.f32 %v22811_v60, %v12617_v31 }
 0xaf6   :  { %v12783_v49 = vsel %vm2889_vm2, %v22997_v18, 0.0 }
 0xaf7   :  { %v23003_v62 = vpop.eup %17979  ;;  %v12712_v32 = vmul.f32 1.442695, %v12649_v23  ;;  %v24600_v23 = vld [vmem:[#allocation96_spill] sm:$0xff] }
 0xaf8   :  { %v12798_v13 = vsel %vm2889_vm2, %v23003_v62, 0.0 }
 0xaf9   :  { %12784 = vadd.xlane.f32.xlu0 %v12783_v49  ;;  %12769 = vadd.xlane.f32.xlu1 %v12768_v0  ;;  %v12644_v49 = vsub.f32 %v22814_v34, %v12602_v39  ;;  %v12614_v0 = vpop.xlane.xlu0 %12613  ;;  %17985 = vpow2.f32 %v12712_v32  ;;  %v24601_v32 = vld [vmem:[#allocation117_spill] sm:$0xff] }
 0xafb   :  { %v23007_v6 = vpop.eup %17981 }
 0xafc   :  { %v12780_v5 = vsel %vm2889_vm2, %v23007_v6, 0.0 }
 0xafd   :  { %12799 = vadd.xlane.f32.xlu1 %v12798_v13  ;;  %v12702_v13 = vmul.f32 1.442695, %v12644_v49 }
 0xaff   :  { %17987 = vpow2.f32 %v12702_v13 }
 0xb01   :  { %12781 = vadd.xlane.f32.xlu1 %v12780_v5  ;;  %v12648_v5 = vsub.f32 %v22821_v25, %v12614_v0  ;;  %v24602_v0 = vld [vmem:[#allocation70_spill] sm:$0xff] }
 0xb0f   :  { %14126 = vrot.lane.b32.xlu0 %v24598_v15, %s18216_s5  ;;  %v12710_v15 = vmul.f32 1.442695, %v12648_v5  ;;  %v24603_v5 = vld [vmem:[#allocation98_spill] sm:$0xff] }
 0xb11   :  { %17989 = vpow2.f32 %v12710_v15 }
 0xb12   :  { %14124 = vrot.lane.b32.xlu1 %v24599_v16, %s18216_s5  ;;  %v23019_v16 = vpop.eup %17983 }
 0xb13   :  { %v12795_v40 = vsel %vm2889_vm2, %v23019_v16, 0.0  ;;  %v23023_v41 = vpop.eup %17985 }
 0xb14   :  { %v12807_v60 = vsel %vm2889_vm2, %v23023_v41, 0.0  ;;  %v23027_v34 = vpop.eup %17987 }
 0xb15   :  { %v12792_v25 = vsel %vm2889_vm2, %v23027_v34, 0.0 }
 0xb1e   :  { %v23031_v50 = vpop.eup %17989 }
 0xb1f   :  { %v12804_v31 = vsel %vm2889_vm2, %v23031_v50, 0.0 }
 0xb2e   :  { %12796 = vadd.xlane.f32.xlu0 %v12795_v40 }
 0xb32   :  { %12808 = vadd.xlane.f32.xlu0 %v12807_v60 }
 0xb36   :  { %12793 = vadd.xlane.f32.xlu1 %v12792_v25 }
 0xb3a   :  { %12805 = vadd.xlane.f32.xlu1 %v12804_v31  ;;  %v24604_v31 = vld [vmem:[#allocation124_spill] sm:$0xff] }
 0xb44   :  { %v12719_v39 = vpop.xlane.xlu1 %12718 }
 0xb45   :  { %17991 = vrcp.f32 %v12719_v39 }
 0xb46   :  { %v12716_v54 = vpop.xlane.xlu0 %12715 }
 0xb47   :  { %17993 = vrcp.f32 %v12716_v54 }
 0xb48   :  { %14213 = vrot.lane.b32.xlu0 %v24600_v23, %s18216_s5  ;;  %v24605_v23 = vld [vmem:[#allocation130_spill] sm:$0xff] }
 0xb4b   :  { %14211 = vrot.lane.b32.xlu1 %v24601_v32, %s18216_s5 }
 0xb4c   :  { %v12731_v49 = vpop.xlane.xlu1 %12730  ;;  %14330 = vrot.lane.b32.xlu0 %v24602_v0, %s18209_s27  ;;  %v24606_v0 = vld [vmem:[#allocation110_spill] sm:$0xff] }
 0xb4d   :  { %17995 = vrcp.f32 %v12731_v49 }
 0xb4e   :  { %v12728_v13 = vpop.xlane.xlu0 %12727 }
 0xb4f   :  { %17997 = vrcp.f32 %v12728_v13  ;;  %14332 = vrot.lane.b32.xlu1 %v24603_v5, %s18209_s27  ;;  %v24607_v5 = vld [vmem:[#allocation72_spill] sm:$0xff] }
 0xb50   :  { %14458 = vrot.lane.b32.xlu0 %v22601_v10, %s18217_s21 }
 0xb52   :  { %v17992_v15 = vpop.eup %17991 }
 0xb53   :  { %14460 = vrot.lane.b32.xlu1 %v22599_v27, %s18217_s21  ;;  %v12843_v60 = vmul.f32 %v17992_v15, %v22876_v38 }
 0xb54   :  { %v17994_v40 = vpop.eup %17993  ;;  %v12743_v25 = vpop.xlane.xlu1 %12742  ;;  %14334 = vrot.lane.b32.xlu0 %v24604_v31, %s18209_s27  ;;  %v24609_v31 = vld [vmem:[#allocation136_spill] sm:$0xff] }
 0xb55   :  { %17999 = vrcp.f32 %v12743_v25  ;;  %v12842_v39 = vmul.f32 %v17994_v40, %v22881_v24  ;;  %v12875_v32 = vmax.f32 %v12843_v60, 1e-08 }
 0xb56   :  { %v12740_v54 = vpop.xlane.xlu0 %12739 }
 0xb57   :  { %18001 = vrcp.f32 %v12740_v54  ;;  %14336 = vrot.lane.b32.xlu1 %v24605_v23, %s18209_s27  ;;  %v12874_v10 = vmax.f32 %v12842_v39, 1e-08  ;;  %v24610_v54 = vld [vmem:[#allocation131_spill] sm:$0xff] }
 0xb58   :  { %14462 = vrot.lane.b32.xlu0 %v22615_v59, %s18217_s21 }
 0xb59   :  { %17293 = vmatprep.mubr.msk.f32.mxu0 %vm2889_vm2, %v12874_v10 }
 0xb5a   :  { %v17996_v27 = vpop.eup %17995  ;;  %v12725_v38 = vpop.xlane.xlu1 %12724  ;;  %17294 = vmatmul.mubr.msk.f32.vlgmr.msra.gmra.mxu0 %vm2889_vm2, %v12875_v32 }
 0xb5b   :  { %17304 = vmatpush3.msra.mxu0 %v22587_v17  ;;  %14464 = vrot.lane.b32.xlu1 %v22609_v63, %s18217_s21  ;;  %v12847_v49 = vmul.f32 %v17996_v27, %v22887_v7  ;;  %18003 = vrcp.f32 %v12725_v38 }
 0xb5c   :  { %v17998_v24 = vpop.eup %17997  ;;  %17305 = vmatprep.subr.mxu0 %v22829_v51  ;;  %14338 = vrot.lane.b32.xlu0 %v24606_v0, %s18209_s27 }
 0xb5d   :  { %17306 = vmatpush3.msra.mxu0 %v22829_v51  ;;  %v12846_v59 = vmul.f32 %v17998_v24, %v22892_v21  ;;  %v12879_v15 = vmax.f32 %v12847_v49, 1e-08 }
 0xb5e   :  { %17317 = vmatprep.subr.mxu0 %v22825_v26  ;;  %v12755_v13 = vpop.xlane.xlu1 %12754  ;;  %v12722_v17 = vpop.xlane.xlu0 %12721 }
 0xb5f   :  { %14340 = vrot.lane.b32.xlu1 %v24607_v5, %s18209_s27  ;;  %v12878_v63 = vmax.f32 %v12846_v59, 1e-08  ;;  %18005 = vrcp.f32 %v12722_v17 }
 0xb60   :  { %14466 = vrot.lane.b32.xlu0 %v22605_v20, %s18217_s21  ;;  %18007 = vrcp.f32 %v12755_v13  ;;  %v24608_v20 = vld [vmem:[#allocation137_spill] sm:$0xff] }
 0xb61   :  { %17307 = vmatprep.mubr.msk.f32.mxu0 %vm2889_vm2, %v12878_v63  ;;  %v24613_v63 = vld [vmem:[#allocation100_spill] sm:$0xff] }
 0xb62   :  { %v18000_v7 = vpop.eup %17999  ;;  %17308 = vmatmul.mubr.msk.f32.vlgmr.msra.gmra.mxu0 %vm2889_vm2, %v12879_v15  ;;  %v12752_v51 = vpop.xlane.xlu0 %12751  ;;  %v24614_v15 = vld [vmem:[#allocation143_spill] sm:$0xff] }
 0xb63   :  { %17318 = vmatpush3.msra.mxu0 %v22825_v26  ;;  %14468 = vrot.lane.b32.xlu1 %v22603_v57, %s18217_s21  ;;  %v12851_v40 = vmul.f32 %v18000_v7, %v22899_v19  ;;  %18009 = vrcp.f32 %v12752_v51  ;;  %v12737_v25 = vpop.xlane.xlu1 %12736  ;;  %v24615_v51 = vld [vmem:[#allocation55_spill] sm:$0xff] }
 0xb64   :  { %v18002_v21 = vpop.eup %18001  ;;  %17319 = vmatprep.subr.mxu0 %v22837_v47  ;;  %14342 = vrot.lane.b32.xlu0 %v24608_v20, %s18209_s27 }
 0xb65   :  { %17320 = vmatpush3.msra.mxu0 %v22837_v47  ;;  %v12850_v60 = vmul.f32 %v18002_v21, %v22904_v52  ;;  %v12883_v39 = vmax.f32 %v12851_v40, 1e-08  ;;  %v24616_v21 = vld [vmem:[#allocation48_spill] sm:$0xff] }
 0xb66   :  { %17331 = vmatprep.subr.mxu0 %v22835_v8  ;;  %v12767_v26 = vpop.xlane.xlu0 %12766 }
 0xb67   :  { %14344 = vrot.lane.b32.xlu1 %v24609_v31, %s18209_s27  ;;  %v12882_v57 = vmax.f32 %v12850_v60, 1e-08  ;;  %18011 = vrcp.f32 %v12767_v26 }
 0xb68   :  { %14470 = vrot.lane.b32.xlu0 %v22623_v43, %s18217_s21  ;;  %18013 = vrcp.f32 %v12737_v25  ;;  %v18004_v19 = vpop.eup %18003 }
 0xb69   :  { %17321 = vmatprep.mubr.msk.f32.mxu0 %vm2889_vm2, %v12882_v57  ;;  %v12845_v23 = vmul.f32 %v18004_v19, %v22910_v12  ;;  %v24619_v19 = vld [vmem:[#allocation141_spill] sm:$0xff] }
 0xb6a   :  { %v12764_v47 = vpop.xlane.xlu1 %12763  ;;  %17322 = vmatmul.mubr.msk.f32.vlgmr.msra.gmra.mxu0 %vm2889_vm2, %v12883_v39  ;;  %v12734_v52 = vpop.xlane.xlu0 %12733 }
 0xb6b   :  { %18015 = vrcp.f32 %v12764_v47  ;;  %17332 = vmatpush3.msra.mxu0 %v22835_v8  ;;  %14472 = vrot.lane.b32.xlu1 %v22617_v36, %s18217_s21  ;;  %v24611_v36 = vld [vmem:[#allocation102_spill] sm:$0xff]  ;;  %v12877_v49 = vmax.f32 %v12845_v23, 1e-08 }
 0xb6c   :  { %18017 = vrcp.f32 %v12734_v52  ;;  %17333 = vmatprep.subr.mxu0 %v22845_v29  ;;  %14346 = vrot.lane.b32.xlu0 %v24610_v54, %s18209_s27  ;;  %v18006_v43 = vpop.eup %18005  ;;  %v24620_v54 = vld [vmem:[#allocation140_spill] sm:$0xff] }
 0xb6d   :  { %17334 = vmatpush3.msra.mxu0 %v22845_v29  ;;  %v18008_v10 = vpop.eup %18007  ;;  %v12844_v8 = vmul.f32 %v18006_v43, %v22918_v1 }
 0xb6e   :  { %17345 = vmatprep.subr.mxu0 %v22843_v11  ;;  %v12749_v32 = vpop.xlane.xlu1 %12748  ;;  %v12779_v27 = vpop.xlane.xlu0 %12778  ;;  %v12855_v12 = vmul.f32 %v18008_v10, %v22915_v35 }
 0xb6f   :  { %14348 = vrot.lane.b32.xlu1 %v24611_v36, %s18209_s27  ;;  %18019 = vrcp.f32 %v12749_v32  ;;  %v12876_v38 = vmax.f32 %v12844_v8, 1e-08  ;;  %v24621_v32 = vld [vmem:[#allocation49_spill] sm:$0xff] }
 0xb70   :  { %14474 = vrot.lane.b32.xlu0 %v22611_v22, %s18217_s21  ;;  %v18010_v24 = vpop.eup %18009  ;;  %18021 = vrcp.f32 %v12779_v27  ;;  %v24612_v22 = vld [vmem:[#allocation144_spill] sm:$0xff]  ;;  %v12887_v13 = vmax.f32 %v12855_v12, 1e-08  ;;  %v24623_v36 = vld [vmem:[#allocation41_spill] sm:$0xff] }
 0xb71   :  { %17300 = vmatprep.mubr.msk.f32.mxu1 %vm2889_vm2, %v12876_v38  ;;  %v12854_v59 = vmul.f32 %v18010_v24, %v22928_v46  ;;  %v24622_v27 = vld [vmem:[#allocation44_spill] sm:$0xff]  ;;  %v24626_v12 = vld [vmem:[#allocation65_spill] sm:$0xff] }
 0xb72   :  { %v12776_v29 = vpop.xlane.xlu1 %12775  ;;  %v12746_v0 = vpop.xlane.xlu0 %12745  ;;  %17301 = vmatmul.mubr.msk.f32.vlgmr.msra.gmra.mxu1 %vm2889_vm2, %v12877_v49  ;;  %v24625_v49 = vld [vmem:[#allocation161_spill] sm:$0xff] }
 0xb73   :  { %18023 = vrcp.f32 %v12776_v29  ;;  %14476 = vrot.lane.b32.xlu1 %v22607_v55, %s18217_s21  ;;  %17311 = vmatpush3.msra.mxu1 %v22596_v45  ;;  %v12886_v35 = vmax.f32 %v12854_v59, 1e-08 }
 0xb74   :  { %18025 = vrcp.f32 %v12746_v0  ;;  %14350 = vrot.lane.b32.xlu0 %v24612_v22, %s18209_s27  ;;  %v18012_v1 = vpop.eup %18011  ;;  %17312 = vmatprep.subr.mxu1 %v22833_v48 }
 0xb75   :  { %v18014_v17 = vpop.eup %18013  ;;  %17313 = vmatpush3.msra.mxu1 %v22833_v48  ;;  %17335 = vmatprep.mubr.msk.f32.mxu0 %vm2889_vm2, %v12886_v35  ;;  %v12859_v55 = vmul.f32 %v18012_v1, %v22935_v56 }
 0xb76   :  { %v12761_v46 = vpop.xlane.xlu1 %12760  ;;  %v12791_v5 = vpop.xlane.xlu0 %12790  ;;  %17324 = vmatprep.subr.mxu1 %v24613_v63  ;;  %17336 = vmatmul.mubr.msk.f32.vlgmr.msra.gmra.mxu0 %vm2889_vm2, %v12887_v13  ;;  %v12849_v48 = vmul.f32 %v18014_v17, %v22925_v61  ;;  %v24618_v61 = vld [vmem:[#allocation78_spill] sm:$0xff]  ;;  %v24628_v17 = vld [vmem:[#allocation147_spill] sm:$0xff] }
 0xb77   :  { %18027 = vrcp.f32 %v12761_v46  ;;  %17346 = vmatpush3.msra.mxu0 %v22843_v11  ;;  %14352 = vrot.lane.b32.xlu1 %v24614_v15, %s18209_s27  ;;  %v24617_v11 = vld [vmem:[#allocation79_spill] sm:$0xff]  ;;  %v12891_v26 = vmax.f32 %v12859_v55, 1e-08  ;;  %v24629_v46 = vld [vmem:[#allocation154_spill] sm:$0xff] }
 0xb78   :  { %v18016_v45 = vpop.eup %18015  ;;  %17347 = vmatprep.subr.mxu0 %v24615_v51  ;;  %14478 = vrot.lane.b32.xlu0 %v24616_v21, %s18217_s21  ;;  %v12881_v39 = vmax.f32 %v12849_v48, 1e-08  ;;  %v24632_v21 = vld [vmem:[#allocation99_spill] sm:$0xff] }
 0xb79   :  { %v18018_v7 = vpop.eup %18017  ;;  %v12858_v40 = vmul.f32 %v18016_v45, %v22944_v3  ;;  %17348 = vmatpush3.msra.mxu0 %v24615_v51  ;;  %v24631_v45 = vld [vmem:[#allocation82_spill] sm:$0xff] }
 0xb7a   :  { %v12758_v20 = vpop.xlane.xlu1 %12757  ;;  %v12773_v56 = vpop.xlane.xlu0 %12772  ;;  %v12848_v60 = vmul.f32 %v18018_v7, %v22938_v53  ;;  %17359 = vmatprep.subr.mxu0 %v24617_v11 }
 0xb7b   :  { %18029 = vrcp.f32 %v12758_v20  ;;  %v12890_v25 = vmax.f32 %v12858_v40, 1e-08  ;;  %14480 = vrot.lane.b32.xlu1 %v24618_v61, %s18217_s21  ;;  %v24636_v61 = vld [vmem:[#allocation145_spill] sm:$0xff] }
 0xb7c   :  { %v12880_v31 = vmax.f32 %v12848_v60, 1e-08  ;;  %v18020_v57 = vpop.eup %18019  ;;  %14354 = vrot.lane.b32.xlu0 %v24619_v19, %s18209_s27  ;;  %18031 = vrcp.f32 %v12791_v5 }
 0xb7d   :  { %17349 = vmatprep.mubr.msk.f32.mxu0 %vm2889_vm2, %v12890_v25  ;;  %v18022_v3 = vpop.eup %18021  ;;  %v12853_v23 = vmul.f32 %v18020_v57, %v22948_v30  ;;  %v24624_v30 = vld [vmem:[#allocation97_spill] sm:$0xff]  ;;  %v24637_v57 = vld [vmem:[#allocation51_spill] sm:$0xff] }
 0xb7e   :  { %17314 = vmatprep.mubr.msk.f32.mxu1 %vm2889_vm2, %v12880_v31  ;;  %v12788_v53 = vpop.xlane.xlu1 %12787  ;;  %17350 = vmatmul.mubr.msk.f32.vlgmr.msra.gmra.mxu0 %vm2889_vm2, %v12891_v26  ;;  %v12803_v47 = vpop.xlane.xlu0 %12802  ;;  %v12863_v10 = vmul.f32 %v18022_v3, %v22953_v4  ;;  %v24635_v26 = vld [vmem:[#allocation157_spill] sm:$0xff] }
 0xb7f   :  { %18033 = vrcp.f32 %v12788_v53  ;;  %17315 = vmatmul.mubr.msk.f32.vlgmr.msra.gmra.mxu1 %vm2889_vm2, %v12881_v39  ;;  %17360 = vmatpush3.msra.mxu0 %v24617_v11  ;;  %v12885_v0 = vmax.f32 %v12853_v23, 1e-08  ;;  %v24638_v39 = vld [vmem:[#allocation59_spill] sm:$0xff] }
 0xb80   :  { %v18024_v52 = vpop.eup %18023  ;;  %17325 = vmatpush3.msra.mxu1 %v24613_v63  ;;  %14356 = vrot.lane.b32.xlu1 %v24620_v54, %s18209_s27  ;;  %18035 = vrcp.f32 %v12773_v56  ;;  %v12895_v59 = vmax.f32 %v12863_v10, 1e-08  ;;  %v24630_v63 = vld [vmem:[#allocation46_spill] sm:$0xff]  ;;  %v24640_v23 = vld [vmem:[#allocation155_spill] sm:$0xff] }
 0xb81   :  { %v18026_v43 = vpop.eup %18025  ;;  %17326 = vmatprep.subr.mxu1 %v24621_v32  ;;  %17361 = vmatprep.subr.mxu0 %v24622_v27  ;;  %v12862_v8 = vmul.f32 %v18024_v52, %v22964_v42  ;;  %v24634_v56 = vld [vmem:[#allocation146_spill] sm:$0xff] }
 0xb82   :  { %14482 = vrot.lane.b32.xlu0 %v24623_v36, %s18217_s21  ;;  %17327 = vmatpush3.msra.mxu1 %v24621_v32  ;;  %v12770_v38 = vpop.xlane.xlu1 %12769  ;;  %v12852_v24 = vmul.f32 %v18026_v43, %v22958_v14  ;;  %v12785_v22 = vpop.xlane.xlu0 %12784  ;;  %v24627_v14 = vld [vmem:[#allocation150_spill] sm:$0xff]  ;;  %v24642_v36 = vld [vmem:[#allocation148_spill] sm:$0xff] }
 0xb83   :  { %17362 = vmatpush3.msra.mxu0 %v24622_v27  ;;  %17338 = vmatprep.subr.mxu1 %v24624_v30  ;;  %18037 = vrcp.f32 %v12770_v38  ;;  %v12894_v4 = vmax.f32 %v12862_v8, 1e-08  ;;  %v24643_v38 = vld [vmem:[#allocation58_spill] sm:$0xff] }
 0xb84   :  { %17373 = vmatprep.subr.mxu0 %v24625_v49  ;;  %14484 = vrot.lane.b32.xlu1 %v24626_v12, %s18217_s21  ;;  %v12884_v42 = vmax.f32 %v12852_v24, 1e-08  ;;  %v18028_v29 = vpop.eup %18027  ;;  %18039 = vrcp.f32 %v12803_v47  ;;  %v24648_v12 = vld [vmem:[#allocation149_spill] sm:$0xff] }
 0xb85   :  { %17363 = vmatprep.mubr.msk.f32.mxu0 %vm2889_vm2, %v12894_v4  ;;  %v12857_v13 = vmul.f32 %v18028_v29, %v22966_v28  ;;  %v24645_v4 = vld [vmem:[#allocation86_spill] sm:$0xff]  ;;  %v24650_v29 = vld [vmem:[#allocation52_spill] sm:$0xff] }
 0xb86   :  { %14358 = vrot.lane.b32.xlu0 %v24627_v14, %s18209_s27  ;;  %17328 = vmatprep.mubr.msk.f32.mxu1 %vm2889_vm2, %v12884_v42  ;;  %v12800_v35 = vpop.xlane.xlu1 %12799  ;;  %v14127_v28 = vpop.permute.xlu0 %14126  ;;  %v24649_v42 = vld [vmem:[#allocation85_spill] sm:$0xff]  ;;  %v24654_v14 = vld [vmem:[#allocation63_spill] sm:$0xff] }
 0xb87   :  { %18041 = vrcp.f32 %v12800_v35  ;;  %17329 = vmatmul.mubr.msk.f32.vlgmr.msra.gmra.mxu1 %vm2889_vm2, %v12885_v0  ;;  %17364 = vmatmul.mubr.msk.f32.vlgmr.msra.gmra.mxu0 %vm2889_vm2, %v12895_v59  ;;  %v12889_v51 = vmax.f32 %v12857_v13, 1e-08  ;;  %v24651_v0 = vld [vmem:[#allocation159_spill] sm:$0xff]  ;;  %v24652_v59 = vld [vmem:[#allocation156_spill] sm:$0xff]  ;;  %v24657_v13 = vld [vmem:[#allocation61_spill] sm:$0xff] }
 0xb88   :  { %v18030_v1 = vpop.eup %18029  ;;  %18043 = vrcp.f32 %v12785_v22  ;;  %17339 = vmatpush3.msra.mxu1 %v24624_v30  ;;  %17374 = vmatpush3.msra.mxu0 %v24625_v49  ;;  %v24644_v30 = vld [vmem:[#allocation64_spill] sm:$0xff]  ;;  %v24647_v49 = vld [vmem:[#allocation21_spill] sm:$0xff]  ;;  %v24653_v22 = vld [vmem:[#allocation95_spill] sm:$0xff] }
 0xb89   :  { %14360 = vrot.lane.b32.xlu1 %v24628_v17, %s18209_s27  ;;  %17340 = vmatprep.subr.mxu1 %v24629_v46  ;;  %v12856_v5 = vmul.f32 %v18030_v1, %v22975_v37  ;;  %v18032_v15 = vpop.eup %18031  ;;  %v24633_v37 = vld [vmem:[#allocation53_spill] sm:$0xff]  ;;  %v24655_v35 = vld [vmem:[#allocation19_spill] sm:$0xff]  ;;  %v24656_v1 = vld [vmem:[#allocation152_spill] sm:$0xff] }
 0xb8a   :  { %17375 = vmatprep.subr.mxu0 %v24630_v63  ;;  %14486 = vrot.lane.b32.xlu0 %v24631_v45, %s18217_s21  ;;  %v12782_v55 = vpop.xlane.xlu1 %12781  ;;  %v12867_v20 = vmul.f32 %v18032_v15, %v22972_v2  ;;  %v24658_v17 = vld [vmem:[#allocation87_spill] sm:$0xff]  ;;  %v24661_v45 = vld [vmem:[#allocation94_spill] sm:$0xff] }
 0xb8b   :  { %17341 = vmatpush3.msra.mxu1 %v24629_v46  ;;  %17376 = vmatpush3.msra.mxu0 %v24630_v63  ;;  %18045 = vrcp.f32 %v12782_v55  ;;  %v12888_v7 = vmax.f32 %v12856_v5, 1e-08  ;;  %v24659_v46 = vld [vmem:[#allocation166_spill] sm:$0xff] }
 0xb8c   :  { %v18034_v48 = vpop.eup %18033  ;;  %17352 = vmatprep.subr.mxu1 %v24632_v21  ;;  %17387 = vmatprep.subr.mxu0 %v14127_v28  ;;  %v12899_v2 = vmax.f32 %v12867_v20, 1e-08  ;;  %v24660_v63 = vld [vmem:[#allocation22_spill] sm:$0xff] }
 0xb8d   :  { %14488 = vrot.lane.b32.xlu1 %v24633_v37, %s18217_s21  ;;  %17342 = vmatprep.mubr.msk.f32.mxu1 %vm2889_vm2, %v12888_v7  ;;  %v12866_v40 = vmul.f32 %v18034_v48, %v22983_v58  ;;  %v18036_v60 = vpop.eup %18035  ;;  %v24662_v15 = vld [vmem:[#allocation90_spill] sm:$0xff] }
 0xb8e   :  { %14362 = vrot.lane.b32.xlu0 %v24634_v56, %s18209_s27  ;;  %17343 = vmatmul.mubr.msk.f32.vlgmr.msra.gmra.mxu1 %vm2889_vm2, %v12889_v51  ;;  %v12861_v31 = vmul.f32 %v18036_v60, %v22981_v33  ;;  %v14125_v52 = vpop.permute.xlu1 %14124  ;;  %v24664_v51 = vld [vmem:[#allocation158_spill] sm:$0xff]  ;;  %v24667_v56 = vld [vmem:[#allocation101_spill] sm:$0xff] }
 0xb8f   :  { %17353 = vmatpush3.msra.mxu1 %v24632_v21  ;;  %v12898_v11 = vmax.f32 %v12866_v40, 1e-08  ;;  %v24665_v21 = vld [vmem:[#allocation93_spill] sm:$0xff]  ;;  %v24666_v20 = vld [vmem:[#allocation62_spill] sm:$0xff] }
 0xb90   :  { %v18038_v25 = vpop.eup %18037  ;;  %17354 = vmatprep.subr.mxu1 %v24635_v26  ;;  %v12893_v54 = vmax.f32 %v12861_v31, 1e-08 }
 0xb91   :  { %14364 = vrot.lane.b32.xlu1 %v24636_v61, %s18209_s27  ;;  %17355 = vmatpush3.msra.mxu1 %v24635_v26  ;;  %v12860_v58 = vmul.f32 %v18038_v25, %v22991_v44  ;;  %v18040_v19 = vpop.eup %18039  ;;  %v24639_v44 = vld [vmem:[#allocation75_spill] sm:$0xff] }
 0xb92   :  { %14490 = vrot.lane.b32.xlu0 %v24637_v57, %s18217_s21  ;;  %17366 = vmatprep.subr.mxu1 %v24638_v39  ;;  %v12871_v43 = vmul.f32 %v18040_v19, %v22989_v9 }
 0xb93   :  { %17377 = vmatprep.mubr.msk.f32.mxu0 %vm2889_vm2, %v12898_v11  ;;  %v12892_v3 = vmax.f32 %v12860_v58, 1e-08 }
 0xb94   :  { %v18042_v53 = vpop.eup %18041  ;;  %17378 = vmatmul.mubr.msk.f32.vlgmr.msra.gmra.mxu0 %vm2889_vm2, %v12899_v2  ;;  %v12903_v8 = vmax.f32 %v12871_v43, 1e-08 }
 0xb95   :  { %v18044_v47 = vpop.eup %18043  ;;  %17388 = vmatpush3.msra.mxu0 %v14127_v28  ;;  %14492 = vrot.lane.b32.xlu1 %v24639_v44, %s18217_s21  ;;  %v12870_v33 = vmul.f32 %v18042_v53, %v23003_v62  ;;  %v24641_v62 = vld [vmem:[#allocation153_spill] sm:$0xff]  ;;  %v24663_v28 = vld [vmem:[#allocation163_spill] sm:$0xff] }
 0xb96   :  { %17389 = vmatprep.subr.mxu0 %v14125_v52  ;;  %14366 = vrot.lane.b32.xlu0 %v24640_v23, %s18209_s27  ;;  %v12865_v27 = vmul.f32 %v18044_v47, %v22997_v18  ;;  %v24669_v47 = vld [vmem:[#allocation119_spill] sm:$0xff] }
 0xb97   :  { %17390 = vmatpush3.msra.mxu0 %v14125_v52  ;;  %17356 = vmatprep.mubr.msk.f32.mxu1 %vm2889_vm2, %v12892_v3  ;;  %v12902_v10 = vmax.f32 %v12870_v33, 1e-08  ;;  %v24668_v3 = vld [vmem:[#allocation114_spill] sm:$0xff] }
 0xb98   :  { %v18046_v32 = vpop.eup %18045  ;;  %17357 = vmatmul.mubr.msk.f32.vlgmr.msra.gmra.mxu1 %vm2889_vm2, %v12893_v54  ;;  %v12897_v24 = vmax.f32 %v12865_v27, 1e-08 }
 0xb99   :  { %17367 = vmatpush3.msra.mxu1 %v24638_v39  ;;  %14368 = vrot.lane.b32.xlu1 %v24641_v62, %s18209_s27  ;;  %v12864_v9 = vmul.f32 %v18046_v32, %v23007_v6  ;;  %v24646_v6 = vld [vmem:[#allocation151_spill] sm:$0xff] }
 0xb9a   :  { %17368 = vmatprep.subr.mxu1 %v24642_v36  ;;  %14494 = vrot.lane.b32.xlu0 %v24643_v38, %s18217_s21 }
 0xb9b   :  { %17369 = vmatpush3.msra.mxu1 %v24642_v36  ;;  %17391 = vmatprep.mubr.msk.f32.mxu0 %vm2889_vm2, %v12902_v10  ;;  %v12896_v18 = vmax.f32 %v12864_v9, 1e-08  ;;  %v24670_v36 = vld [vmem:[#allocation104_spill] sm:$0xff] }
 0xb9c   :  { %17380 = vmatprep.subr.mxu1 %v24644_v30  ;;  %17392 = vmatmul.mubr.msk.f32.vlgmr.msra.gmra.mxu0 %vm2889_vm2, %v12903_v8 }
 0xb9d   :  { %14496 = vrot.lane.b32.xlu1 %v24645_v4, %s18217_s21  ;;  %17370 = vmatprep.mubr.msk.f32.mxu1 %vm2889_vm2, %v12896_v18  ;;  %v24671_v18 = vld [vmem:[#allocation116_spill] sm:$0xff] }
 0xb9e   :  { %14370 = vrot.lane.b32.xlu0 %v24646_v6, %s18209_s27  ;;  %17371 = vmatmul.mubr.msk.f32.vlgmr.msra.gmra.mxu1 %vm2889_vm2, %v12897_v24 }
 0xb9f   :  { %17381 = vmatpush3.msra.mxu1 %v24644_v30 }
 0xba0   :  { %17382 = vmatprep.subr.mxu1 %v24647_v49 }
 0xba1   :  { %14372 = vrot.lane.b32.xlu1 %v24648_v12, %s18209_s27  ;;  %17383 = vmatpush3.msra.mxu1 %v24647_v49  ;;  %v24672_v12 = vld [vmem:[#allocation118_spill] sm:$0xff] }
 0xba2   :  { %14498 = vrot.lane.b32.xlu0 %v24649_v42, %s18217_s21 }
 0xba5   :  { %14500 = vrot.lane.b32.xlu1 %v24650_v29, %s18217_s21  ;;  %v24673_v29 = vld [vmem:[#allocation120_spill] sm:$0xff] }
 0xba6   :  { %14374 = vrot.lane.b32.xlu0 %v24651_v0, %s18209_s27 }
 0xba9   :  { %14376 = vrot.lane.b32.xlu1 %v24652_v59, %s18209_s27 }
 0xbaa   :  { %14502 = vrot.lane.b32.xlu0 %v24653_v22, %s18217_s21 }
 0xbad   :  { %14504 = vrot.lane.b32.xlu1 %v24654_v14, %s18217_s21 }
 0xbae   :  { %14378 = vrot.lane.b32.xlu0 %v24655_v35, %s18209_s27 }
 0xbb1   :  { %14380 = vrot.lane.b32.xlu1 %v24656_v1, %s18209_s27 }
 0xbb2   :  { %14506 = vrot.lane.b32.xlu0 %v24657_v13, %s18217_s21 }
 0xbb5   :  { %14508 = vrot.lane.b32.xlu1 %v24658_v17, %s18217_s21  ;;  %v24674_v17 = vld [vmem:[#allocation122_spill] sm:$0xff] }
 0xbb6   :  { %14382 = vrot.lane.b32.xlu0 %v24659_v46, %s18209_s27 }
 0xbb7   :  { %v12797_v5 = vpop.xlane.xlu0 %12796 }
 0xbb8   :  { %18047 = vrcp.f32 %v12797_v5  ;;  %v24675_v5 = vld [vmem:[#allocation121_spill] sm:$0xff] }
 0xbb9   :  { %14384 = vrot.lane.b32.xlu1 %v24660_v63, %s18209_s27 }
 0xbba   :  { %14510 = vrot.lane.b32.xlu0 %v24661_v45, %s18217_s21 }
 0xbbb   :  { %v12809_v55 = vpop.xlane.xlu0 %12808 }
 0xbbd   :  { %14512 = vrot.lane.b32.xlu1 %v24662_v15, %s18217_s21  ;;  %v14782_v15 = vld [vmem:[#allocation10 + $0x18] sm:$0xff] }
 0xbbe   :  { %14386 = vrot.lane.b32.xlu0 %v24663_v28, %s18209_s27  ;;  %v14781_v28 = vld [vmem:[#allocation10 + $0x10] sm:$0xff]  ;;  %17401 = vmatprep.subr.mxu0 %v14782_v15 }
 0xbbf   :  { %v12794_v7 = vpop.xlane.xlu1 %12793  ;;  %v14214_v48 = vpop.permute.xlu0 %14213  ;;  %17402 = vmatpush3.msra.mxu0 %v14782_v15 }
 0xbc0   :  { %18049 = vrcp.f32 %v12794_v7  ;;  %17394 = vmatprep.subr.mxu1 %v14214_v48  ;;  %17403 = vmatprep.subr.mxu0 %v14781_v28 }
 0xbc1   :  { %18051 = vrcp.f32 %v12809_v55  ;;  %14388 = vrot.lane.b32.xlu1 %v24664_v51, %s18209_s27  ;;  %17404 = vmatpush3.msra.mxu0 %v14781_v28  ;;  %v24686_v28 = vld [vmem:[#allocation111_spill] sm:$0xff] }
 0xbc2   :  { %14514 = vrot.lane.b32.xlu0 %v24665_v21, %s18217_s21 }
 0xbc3   :  { %v12806_v37 = vpop.xlane.xlu1 %12805  ;;  %v14331_v40 = vpop.permute.xlu0 %14330 }
 0xbc4   :  { %18053 = vrcp.f32 %v12806_v37  ;;  %v14682_v60 = vsel %vm1496_vm1, %v24667_v56, %v14331_v40  ;;  %v24676_v37 = vld [vmem:[#allocation105_spill] sm:$0xff] }
 0xbc5   :  { %14516 = vrot.lane.b32.xlu1 %v24666_v20, %s18217_s21  ;;  %v18048_v61 = vpop.eup %18047  ;;  %v24677_v20 = vld [vmem:[#allocation106_spill] sm:$0xff] }
 0xbc6   :  { %v12869_v57 = vmul.f32 %v18048_v61, %v23019_v16 }
 0xbc7   :  { %v14212_v11 = vpop.permute.xlu1 %14211  ;;  %v14459_v25 = vpop.permute.xlu0 %14458 }
 0xbc8   :  { %v23264_v26 = vsel %vm2889_vm2, %v14682_v60, %v14459_v25  ;;  %v12901_v16 = vmax.f32 %v12869_v57, 1e-08 }
 0xbcb   :  { %v14333_v58 = vpop.permute.xlu1 %14332  ;;  %v14335_v2 = vpop.permute.xlu0 %14334 }
 0xbcc   :  { %v14683_v53 = vsel %vm1496_vm1, %v24668_v3, %v14333_v58  ;;  %v14684_v52 = vsel %vm1496_vm1, %v24669_v47, %v14335_v2 }
 0xbcd   :  { %v18050_v31 = vpop.eup %18049 }
 0xbce   :  { %v18052_v39 = vpop.eup %18051  ;;  %v12868_v19 = vmul.f32 %v18050_v31, %v23027_v34  ;;  %v24678_v31 = vld [vmem:[#allocation108_spill] sm:$0xff] }
 0xbcf   :  { %v14461_v44 = vpop.permute.xlu1 %14460  ;;  %v14463_v33 = vpop.permute.xlu0 %14462  ;;  %v12873_v32 = vmul.f32 %v18052_v39, %v23023_v41  ;;  %v24679_v39 = vld [vmem:[#allocation109_spill] sm:$0xff] }
 0xbd0   :  { %v23273_v54 = vsel %vm2889_vm2, %v14683_v53, %v14461_v44  ;;  %v23276_v43 = vsel %vm2889_vm2, %v14684_v52, %v14463_v33  ;;  %v12900_v23 = vmax.f32 %v12868_v19, 1e-08 }
 0xbd1   :  { %v18054_v10 = vpop.eup %18053  ;;  %v12905_v8 = vmax.f32 %v12873_v32, 1e-08 }
 0xbd2   :  { %17384 = vmatprep.mubr.msk.f32.mxu1 %vm2889_vm2, %v12900_v23  ;;  %v12872_v34 = vmul.f32 %v18054_v10, %v23031_v50  ;;  %v24680_v23 = vld [vmem:[#allocation103_spill] sm:$0xff] }
 0xbd3   :  { %v14337_v27 = vpop.permute.xlu1 %14336  ;;  %17385 = vmatmul.mubr.msk.f32.vlgmr.msra.gmra.mxu1 %vm2889_vm2, %v12901_v16  ;;  %v14339_v62 = vpop.permute.xlu0 %14338  ;;  %v24681_v16 = vld [vmem:[#allocation112_spill] sm:$0xff] }
 0xbd4   :  { %17395 = vmatpush3.msra.mxu1 %v14214_v48  ;;  %v12904_v9 = vmax.f32 %v12872_v34, 1e-08  ;;  %v14685_v38 = vsel %vm1496_vm1, %v24670_v36, %v14337_v27  ;;  %v14686_v41 = vsel %vm1496_vm1, %v24671_v18, %v14339_v62 }
 0xbd5   :  { %17396 = vmatprep.subr.mxu1 %v14212_v11 }
 0xbd6   :  { %17397 = vmatpush3.msra.mxu1 %v14212_v11  ;;  %17398 = vmatprep.mubr.msk.f32.mxu1 %vm2889_vm2, %v12904_v9 }
 0xbd7   :  { %v14465_v24 = vpop.permute.xlu1 %14464  ;;  %17399 = vmatmul.mubr.msk.f32.vlgmr.msra.gmra.mxu1 %vm2889_vm2, %v12905_v8  ;;  %v14467_v50 = vpop.permute.xlu0 %14466 }
 0xbd8   :  { %v23289_v30 = vsel %vm2889_vm2, %v14685_v38, %v14465_v24  ;;  %v23292_v4 = vsel %vm2889_vm2, %v14686_v41, %v14467_v50  ;;  %v24682_v38 = vld [vmem:[#allocation123_spill] sm:$0xff]  ;;  %v24683_v41 = vld [vmem:[#allocation125_spill] sm:$0xff] }
 0xbdb   :  { %v14341_v6 = vpop.permute.xlu1 %14340  ;;  %v14343_v49 = vpop.permute.xlu0 %14342 }
 0xbdc   :  { %v14687_v42 = vsel %vm1496_vm1, %v24672_v12, %v14341_v6  ;;  %v14688_v0 = vsel %vm1496_vm1, %v24673_v29, %v14343_v49 }
 0xbdf   :  { %v14469_v59 = vpop.permute.xlu1 %14468  ;;  %v14471_v22 = vpop.permute.xlu0 %14470 }
 0xbe0   :  { %v23299_v14 = vsel %vm2889_vm2, %v14687_v42, %v14469_v59  ;;  %v23302_v35 = vsel %vm2889_vm2, %v14688_v0, %v14471_v22  ;;  %v14780_v0 = vld [vmem:[#allocation10 + $0x8] sm:$0xff]  ;;  %v24684_v59 = vld [vmem:[#allocation107_spill] sm:$0xff] }
 0xbe1   :  { %17405 = vmatprep.subr.mxu0 %v14780_v0 }
 0xbe2   :  { %17406 = vmatpush3.msra.mxu0 %v14780_v0 }
 0xbe3   :  { %v14345_v1 = vpop.permute.xlu1 %14344  ;;  %v14347_v13 = vpop.permute.xlu0 %14346 }
 0xbe4   :  { %v14689_v46 = vsel %vm1496_vm1, %v24674_v17, %v14345_v1  ;;  %v14690_v63 = vsel %vm1496_vm1, %v24675_v5, %v14347_v13  ;;  %v24685_v1 = vld [vmem:[#allocation127_spill] sm:$0xff] }
 0xbe7   :  { %v14473_v45 = vpop.permute.xlu1 %14472  ;;  %v14475_v55 = vpop.permute.xlu0 %14474 }
 0xbe8   :  { %v23309_v7 = vsel %vm2889_vm2, %v14689_v46, %v14473_v45  ;;  %v23312_v48 = vsel %vm2889_vm2, %v14690_v63, %v14475_v55  ;;  %v14779_v45 = vld [vmem:[#allocation10] sm:$0xff] }
 0xbe9   :  { %17407 = vmatprep.subr.mxu0 %v14779_v45 }
 0xbea   :  { %17408 = vmatpush3.msra.mxu0 %v14779_v45 }
 0xbeb   :  { %v14349_v51 = vpop.permute.xlu1 %14348  ;;  %v14351_v21 = vpop.permute.xlu0 %14350 }
 0xbec   :  { %v14691_v40 = vsel %vm1496_vm1, %v24676_v37, %v14349_v51  ;;  %v14692_v56 = vsel %vm1496_vm1, %v24677_v20, %v14351_v21  ;;  %v24687_v21 = vld [vmem:[#allocation113_spill] sm:$0xff] }
 0xbef   :  { %v14477_v60 = vpop.permute.xlu1 %14476  ;;  %v14479_v11 = vpop.permute.xlu0 %14478 }
 0xbf0   :  { %v23319_v25 = vsel %vm2889_vm2, %v14691_v40, %v14477_v60  ;;  %v23322_v61 = vsel %vm2889_vm2, %v14692_v56, %v14479_v11 }
 0xbf3   :  { %v14353_v58 = vpop.permute.xlu1 %14352  ;;  %v14355_v2 = vpop.permute.xlu0 %14354 }
 0xbf4   :  { %v14693_v57 = vsel %vm1496_vm1, %v24678_v31, %v14353_v58  ;;  %v14694_v19 = vsel %vm1496_vm1, %v24679_v39, %v14355_v2 }
 0xbf7   :  { %v14481_v3 = vpop.permute.xlu1 %14480  ;;  %v14483_v53 = vpop.permute.xlu0 %14482 }
 0xbf8   :  { %v23329_v47 = vsel %vm2889_vm2, %v14693_v57, %v14481_v3  ;;  %v23332_v52 = vsel %vm2889_vm2, %v14694_v19, %v14483_v53  ;;  %v24688_v57 = vld [vmem:[#allocation126_spill] sm:$0xff]  ;;  %v24689_v19 = vld [vmem:[#allocation133_spill] sm:$0xff] }
 0xbfb   :  { %v14357_v44 = vpop.permute.xlu1 %14356  ;;  %v14359_v33 = vpop.permute.xlu0 %14358 }
 0xbfc   :  { %v14695_v10 = vsel %vm1496_vm1, %v24680_v23, %v14357_v44  ;;  %v14696_v32 = vsel %vm1496_vm1, %v24681_v16, %v14359_v33 }
 0xbff   :  { %v14485_v34 = vpop.permute.xlu1 %14484  ;;  %v14487_v27 = vpop.permute.xlu0 %14486 }
 0xc00   :  { %v23339_v62 = vsel %vm2889_vm2, %v14695_v10, %v14485_v34  ;;  %v23342_v9 = vsel %vm2889_vm2, %v14696_v32, %v14487_v27  ;;  %v24690_v27 = vld [vmem:[#allocation115_spill] sm:$0xff] }
 0xc03   :  { %v14361_v8 = vpop.permute.xlu1 %14360  ;;  %v14363_v36 = vpop.permute.xlu0 %14362 }
 0xc04   :  { %v14697_v18 = vsel %vm1496_vm1, %v24682_v38, %v14361_v8  ;;  %v14698_v24 = vsel %vm1496_vm1, %v24683_v41, %v14363_v36  ;;  %v24691_v36 = vld [vmem:[#allocation128_spill] sm:$0xff] }
 0xc07   :  { %v14489_v50 = vpop.permute.xlu1 %14488  ;;  %v14491_v6 = vpop.permute.xlu0 %14490 }
 0xc08   :  { %v23349_v49 = vsel %vm2889_vm2, %v14697_v18, %v14489_v50  ;;  %v23352_v12 = vsel %vm2889_vm2, %v14698_v24, %v14491_v6 }
 0xc0b   :  { %v14365_v42 = vpop.permute.xlu1 %14364  ;;  %v14367_v29 = vpop.permute.xlu0 %14366 }
 0xc0c   :  { %v14699_v22 = vsel %vm1496_vm1, %v24684_v59, %v14365_v42  ;;  %v14700_v13 = vsel %vm1496_vm1, %v24685_v1, %v14367_v29  ;;  %v24692_v59 = vld [vmem:[#allocation129_spill] sm:$0xff]  ;;  %v24693_v1 = vld [vmem:[#allocation138_spill] sm:$0xff] }
 0xc0f   :  { %v14493_v17 = vpop.permute.xlu1 %14492  ;;  %v14495_v46 = vpop.permute.xlu0 %14494 }
 0xc10   :  { %v23359_v5 = vsel %vm2889_vm2, %v14699_v22, %v14493_v17  ;;  %v23362_v63 = vsel %vm2889_vm2, %v14700_v13, %v14495_v46 }
 0xc13   :  { %v14369_v55 = vpop.permute.xlu1 %14368  ;;  %v14371_v15 = vpop.permute.xlu0 %14370 }
 0xc14   :  { %v14701_v51 = vsel %vm1496_vm1, %v24686_v28, %v14369_v55  ;;  %v14702_v37 = vsel %vm1496_vm1, %v24687_v21, %v14371_v15  ;;  %v24694_v21 = vld [vmem:[#allocation135_spill] sm:$0xff] }
 0xc17   :  { %v14497_v40 = vpop.permute.xlu1 %14496  ;;  %v14499_v20 = vpop.permute.xlu0 %14498 }
 0xc18   :  { %v23369_v56 = vsel %vm2889_vm2, %v14701_v51, %v14497_v40  ;;  %v23372_v60 = vsel %vm2889_vm2, %v14702_v37, %v14499_v20 }
 0xc1a   :  { %v17295_v11 = vpop.f32.mrf.mxu0 }
 0xc1b   :  { %v14373_v58 = vpop.permute.xlu1 %14372  ;;  %14588 = vrot.lane.b32.xlu1 %v17295_v11, %s18218_s22  ;;  %v14375_v2 = vpop.permute.xlu0 %14374 }
 0xc1c   :  { %v12984_v31 = vpop.f32.mrf.mxu0  ;;  %v14703_v39 = vsel %vm1496_vm1, %v24688_v57, %v14373_v58  ;;  %v14704_v3 = vsel %vm1496_vm1, %v24689_v19, %v14375_v2 }
 0xc1d   :  { %14586 = vrot.lane.b32.xlu0 %v12984_v31, %s18218_s22 }
 0xc1f   :  { %v14501_v53 = vpop.permute.xlu1 %14500  ;;  %v14503_v44 = vpop.permute.xlu0 %14502 }
 0xc20   :  { %v23381_v33 = vsel %vm2889_vm2, %v14703_v39, %v14501_v53  ;;  %v23384_v23 = vsel %vm2889_vm2, %v14704_v3, %v14503_v44 }
 0xc22   :  { %v17309_v10 = vpop.f32.mrf.mxu0 }
 0xc23   :  { %v14377_v16 = vpop.permute.xlu1 %14376  ;;  %14596 = vrot.lane.b32.xlu1 %v17309_v10, %s18218_s22  ;;  %v14379_v32 = vpop.permute.xlu0 %14378 }
 0xc24   :  { %v13158_v34 = vpop.f32.mrf.mxu0  ;;  %v14705_v8 = vsel %vm1496_vm1, %v24690_v27, %v14377_v16  ;;  %v14706_v38 = vsel %vm1496_vm1, %v24691_v36, %v14379_v32 }
 0xc25   :  { %14594 = vrot.lane.b32.xlu0 %v13158_v34, %s18218_s22 }
 0xc27   :  { %v14505_v18 = vpop.permute.xlu1 %14504  ;;  %v14507_v41 = vpop.permute.xlu0 %14506 }
 0xc28   :  { %v23393_v24 = vsel %vm2889_vm2, %v14705_v8, %v14505_v18  ;;  %v23396_v50 = vsel %vm2889_vm2, %v14706_v38, %v14507_v41 }
 0xc2a   :  { %v17323_v6 = vpop.f32.mrf.mxu0 }
 0xc2b   :  { %v14381_v42 = vpop.permute.xlu1 %14380  ;;  %14604 = vrot.lane.b32.xlu1 %v17323_v6, %s18218_s22  ;;  %v14383_v29 = vpop.permute.xlu0 %14382  ;;  %v24695_v6 = vld [vmem:[#allocation162_spill] sm:$0xff] }
 0xc2c   :  { %v13332_v0 = vpop.f32.mrf.mxu0  ;;  %v14707_v22 = vsel %vm1496_vm1, %v24692_v59, %v14381_v42  ;;  %v14708_v13 = vsel %vm1496_vm1, %v24693_v1, %v14383_v29  ;;  %v24696_v42 = vld [vmem:[#allocation24_spill] sm:$0xff] }
 0xc2d   :  { %14602 = vrot.lane.b32.xlu0 %v13332_v0, %s18218_s22 }
 0xc2f   :  { %v14509_v17 = vpop.permute.xlu1 %14508  ;;  %v14511_v46 = vpop.permute.xlu0 %14510 }
 0xc30   :  { %v23405_v45 = vsel %vm2889_vm2, %v14707_v22, %v14509_v17  ;;  %v23408_v55 = vsel %vm2889_vm2, %v14708_v13, %v14511_v46 }
 0xc32   :  { %v17302_v15 = vpop.f32.mrf.mxu1 }
 0xc33   :  { %v14385_v28 = vpop.permute.xlu1 %14384  ;;  %14592 = vrot.lane.b32.xlu1 %v17302_v15, %s18218_s22  ;;  %v23443_v0 = vpop.permute.xlu0 %14386 }
 0xc34   :  { %v13071_v51 = vpop.f32.mrf.mxu1  ;;  %v14709_v37 = vsel %vm1496_vm1, %v24694_v21, %v14385_v28 }
 0xc35   :  { %14590 = vrot.lane.b32.xlu0 %v13071_v51, %s18218_s22  ;;  %v24697_v51 = vld [vmem:[#allocation74_spill] sm:$0xff] }
 0xc36   :  { %v17337_v40 = vpop.f32.mrf.mxu0 }
 0xc37   :  { %v14513_v20 = vpop.permute.xlu1 %14512  ;;  %14612 = vrot.lane.b32.xlu1 %v17337_v40, %s18218_s22  ;;  %v23447_v22 = vpop.permute.xlu0 %14514 }
 0xc38   :  { %v23415_v11 = vsel %vm2889_vm2, %v14709_v37, %v14513_v20  ;;  %v13506_v58 = vpop.f32.mrf.mxu0  ;;  %v24698_v37 = vld [vmem:[#allocation68_spill] sm:$0xff] }
 0xc39   :  { %14610 = vrot.lane.b32.xlu0 %v13506_v58, %s18218_s22 }
 0xc3b   :  { %v23441_v29 = vpop.permute.xlu1 %14388 }
 0xc3e   :  { %v17351_v31 = vpop.f32.mrf.mxu0 }
 0xc3f   :  { %v17316_v2 = vpop.f32.mrf.mxu1  ;;  %v23445_v59 = vpop.permute.xlu1 %14516 }
 0xc40   :  { %14600 = vrot.lane.b32.xlu1 %v17316_v2, %s18218_s22  ;;  %v13680_v39 = vpop.f32.mrf.mxu0 }
 0xc41   :  { %v13245_v57 = vpop.f32.mrf.mxu1 }
 0xc42   :  { %14598 = vrot.lane.b32.xlu0 %v13245_v57, %s18218_s22 }
 0xc44   :  { %14620 = vrot.lane.b32.xlu1 %v17351_v31, %s18218_s22 }
 0xc46   :  { %14618 = vrot.lane.b32.xlu0 %v13680_v39, %s18218_s22 }
 0xc47   :  { %v17330_v19 = vpop.f32.mrf.mxu1  ;;  %v17365_v3 = vpop.f32.mrf.mxu0 }
 0xc48   :  { %14608 = vrot.lane.b32.xlu1 %v17330_v19, %s18218_s22 }
 0xc49   :  { %v13419_v53 = vpop.f32.mrf.mxu1  ;;  %v13854_v44 = vpop.f32.mrf.mxu0 }
 0xc4a   :  { %14606 = vrot.lane.b32.xlu0 %v13419_v53, %s18218_s22 }
 0xc4c   :  { %14628 = vrot.lane.b32.xlu1 %v17365_v3, %s18218_s22 }
 0xc4e   :  { %14626 = vrot.lane.b32.xlu0 %v13854_v44, %s18218_s22  ;;  %v17344_v10 = vpop.f32.mrf.mxu1 }
 0xc50   :  { %14616 = vrot.lane.b32.xlu1 %v17344_v10, %s18218_s22  ;;  %v13593_v16 = vpop.f32.mrf.mxu1 }
 0xc52   :  { %14614 = vrot.lane.b32.xlu0 %v13593_v16, %s18218_s22 }
 0xc54   :  { %v17379_v32 = vpop.f32.mrf.mxu0 }
 0xc55   :  { %14636 = vrot.lane.b32.xlu1 %v17379_v32, %s18218_s22 }
 0xc56   :  { %v14028_v34 = vpop.f32.mrf.mxu0 }
 0xc57   :  { %14634 = vrot.lane.b32.xlu0 %v14028_v34, %s18218_s22 }
 0xc58   :  { %v17358_v27 = vpop.f32.mrf.mxu1 }
 0xc59   :  { %14624 = vrot.lane.b32.xlu1 %v17358_v27, %s18218_s22 }
 0xc5a   :  { %v13767_v8 = vpop.f32.mrf.mxu1 }
 0xc5b   :  { %14622 = vrot.lane.b32.xlu0 %v13767_v8, %s18218_s22 }
 0xc5c   :  { %v17393_v36 = vpop.f32.mrf.mxu0 }
 0xc5d   :  { %14644 = vrot.lane.b32.xlu1 %v17393_v36, %s18218_s22 }
 0xc5e   :  { %v14202_v38 = vpop.f32.mrf.mxu0  ;;  %v17372_v18 = vpop.f32.mrf.mxu1 }
 0xc5f   :  { %14642 = vrot.lane.b32.xlu0 %v14202_v38, %s18218_s22 }
 0xc60   :  { %v13941_v41 = vpop.f32.mrf.mxu1 }
 0xc61   :  { %14632 = vrot.lane.b32.xlu1 %v17372_v18, %s18218_s22 }
 0xc63   :  { %14630 = vrot.lane.b32.xlu0 %v13941_v41, %s18218_s22 }
 0xc65   :  { %14392 = vrot.lane.b32.xlu1 %v24695_v6, %s18209_s27 }
 0xc67   :  { %14390 = vrot.lane.b32.xlu0 %v24696_v42, %s18209_s27 }
 0xc8d   :  { %v14589_v1 = vpop.permute.xlu1 %14588 }
 0xc8e   :  { %v14748_v46 = vsel %vm14746_vm3, %v23273_v54, %v14589_v1 }
 0xc8f   :  { %v14587_v13 = vpop.permute.xlu0 %14586 }
 0xc90   :  { %v14747_v17 = vsel %vm14746_vm3, %v23264_v26, %v14587_v13 }
 0xc91   :  { %17409 = vmatprep.mubr.msk.f32.mxu0 %vm156_vm0, %v14747_v17 }
 0xc92   :  { %17410 = vmatmul.mubr.msk.f32.vlgmr.msra.gmra.mxu0 %vm156_vm0, %v14748_v46 }
 0xc93   :  { %v17386_v15 = vpop.f32.mrf.mxu1 }
 0xc94   :  { %14640 = vrot.lane.b32.xlu1 %v17386_v15, %s18218_s22 }
 0xc95   :  { %v14115_v28 = vpop.f32.mrf.mxu1  ;;  %v14597_v54 = vpop.permute.xlu1 %14596 }
 0xc96   :  { %14638 = vrot.lane.b32.xlu0 %v14115_v28, %s18218_s22  ;;  %v14752_v3 = vsel %vm14746_vm3, %v23299_v14, %v14597_v54 }
 0xc97   :  { %v17400_v21 = vpop.f32.mrf.mxu1  ;;  %v14595_v40 = vpop.permute.xlu0 %14594 }
 0xc98   :  { %14520 = vrot.lane.b32.xlu1 %v24697_v51, %s18217_s21  ;;  %v14751_v19 = vsel %vm14746_vm3, %v23292_v4, %v14595_v40 }
 0xc99   :  { %v14289_v26 = vpop.f32.mrf.mxu1 }
 0xc9a   :  { %14518 = vrot.lane.b32.xlu0 %v24698_v37, %s18217_s21 }
 0xc9c   :  { %14648 = vrot.lane.b32.xlu1 %v17400_v21, %s18218_s22 }
 0xc9d   :  { %v14605_v20 = vpop.permute.xlu1 %14604 }
 0xc9e   :  { %14646 = vrot.lane.b32.xlu0 %v14289_v26, %s18218_s22  ;;  %v14756_v34 = vsel %vm14746_vm3, %v23319_v25, %v14605_v20 }
 0xc9f   :  { %v14603_v58 = vpop.permute.xlu0 %14602 }
 0xca0   :  { %v14755_v32 = vsel %vm14746_vm3, %v23312_v48, %v14603_v58  ;;  %v24700_v58 = vld [vmem:[#allocation132_spill] sm:$0xff] }
 0xca5   :  { %v14593_v2 = vpop.permute.xlu1 %14592 }
 0xca6   :  { %v14750_v39 = vsel %vm14746_vm3, %v23289_v30, %v14593_v2 }
 0xca7   :  { %v14591_v31 = vpop.permute.xlu0 %14590 }
 0xca8   :  { %v14749_v57 = vsel %vm14746_vm3, %v23276_v43, %v14591_v31 }
 0xca9   :  { %17412 = vmatprep.mubr.msk.f32.mxu0 %vm156_vm0, %v14749_v57  ;;  %v14613_v53 = vpop.permute.xlu1 %14612 }
 0xcaa   :  { %17413 = vmatmul.mubr.msk.f32.gmra.mxu0 %vm156_vm0, %v14750_v39  ;;  %v14760_v38 = vsel %vm14746_vm3, %v23339_v62, %v14613_v53  ;;  %v24702_v39 = vld [vmem:[#allocation139_spill] sm:$0xff] }
 0xcab   :  { %17415 = vmatprep.mubr.msk.f32.mxu0 %vm156_vm0, %v14751_v19  ;;  %v14611_v44 = vpop.permute.xlu0 %14610 }
 0xcac   :  { %v14759_v48 = vsel %vm14746_vm3, %v23332_v52, %v14611_v44 }
 0xcae   :  { %17416 = vmatmul.mubr.msk.f32.gmra.mxu0 %vm156_vm0, %v14752_v3 }
 0xcb2   :  { %v14601_v43 = vpop.permute.xlu1 %14600 }
 0xcb3   :  { %v14754_v16 = vsel %vm14746_vm3, %v23309_v7, %v14601_v43  ;;  %v23568_v43 = vld [vmem:[%s23650_s10] ss:$0 sm:$0xff]  ;;  %s18219_s10 = smov [#allocation13]  }
 0xcb4   :  { %v14599_v10 = vpop.permute.xlu0 %14598  ;;  %s15148_s25 = sshll.u32 %s18219_s10, 4  ;;  %s15149_s25 = int_to_ptr.vmem [resolvable:$true] %s15148_s25 }
 0xcb5   :  { %v14753_v30 = vsel %vm14746_vm3, %v23302_v35, %v14599_v10  ;;  %s18176_s28 = scalar_lea.vmem %s15149_s25, 4096  ;;  %p18181_p3 = scmp.lt.s32.totalorder %s15149_s25, %s15149_s25 }
 0xcb6   :  { %v14621_v4 = vpop.permute.xlu1 %14620  ;;  %17418 = vmatprep.mubr.msk.f32.mxu0 %vm156_vm0, %v14753_v30  ;;  %p18177_p2 = scmp.ne.s32.totalorder %s15149_s25, %s18176_s28  ;;  %p18182_p4 = scmp.lt.s32.totalorder %s18176_s28, %s18176_s28 }
 0xcb7   :  { %17419 = vmatmul.mubr.msk.f32.gmra.mxu0 %vm156_vm0, %v14754_v16  ;;  %v14764_v42 = vsel %vm14746_vm3, %v23359_v5, %v14621_v4 }
 0xcb8   :  { %17421 = vmatprep.mubr.msk.f32.mxu0 %vm156_vm0, %v14755_v32  ;;  %v14619_v14 = vpop.permute.xlu0 %14618  ;;  %p18183_p5 = por %p18182_p4, %p18181_p3 }
 0xcb9   :  { %v14763_v52 = vsel %vm14746_vm3, %v23352_v12, %v14619_v14 }
 0xcba   :  { %v14609_v27 = vpop.permute.xlu1 %14608  ;;  %p18184_p6 = pnand %p18183_p5, %p18177_p2 }
 0xcbb   :  { %17422 = vmatmul.mubr.msk.f32.gmra.mxu0 %vm156_vm0, %v14756_v34  ;;  %v14758_v8 = vsel %vm14746_vm3, %v23329_v47, %v14609_v27 }
 0xcbc   :  { %v14607_v35 = vpop.permute.xlu0 %14606 }
 0xcbd   :  { %v14757_v7 = vsel %vm14746_vm3, %v23322_v61, %v14607_v35 }
 0xcbe   :  { %v14629_v36 = vpop.permute.xlu1 %14628  ;;  %17424 = vmatprep.mubr.msk.f32.mxu0 %vm156_vm0, %v14757_v7 }
 0xcbf   :  { %17425 = vmatmul.mubr.msk.f32.gmra.mxu0 %vm156_vm0, %v14758_v8  ;;  %v14768_v46 = vsel %vm14746_vm3, %v23381_v33, %v14629_v36 }
 0xcc0   :  { %17427 = vmatprep.mubr.msk.f32.mxu0 %vm156_vm0, %v14759_v48  ;;  %v14627_v25 = vpop.permute.xlu0 %14626 }
 0xcc1   :  { %v14767_v17 = vsel %vm14746_vm3, %v23372_v60, %v14627_v25 }
 0xcc2   :  { %v14617_v18 = vpop.permute.xlu1 %14616 }
 0xcc3   :  { %17428 = vmatmul.mubr.msk.f32.gmra.mxu0 %vm156_vm0, %v14760_v38  ;;  %v14762_v41 = vsel %vm14746_vm3, %v23349_v49, %v14617_v18 }
 0xcc4   :  { %v14615_v61 = vpop.permute.xlu0 %14614 }
 0xcc5   :  { %v14761_v47 = vsel %vm14746_vm3, %v23342_v9, %v14615_v61 }
 0xcc6   :  { %17430 = vmatprep.mubr.msk.f32.mxu0 %vm156_vm0, %v14761_v47 }
 0xcc7   :  { %v14637_v6 = vpop.permute.xlu1 %14636  ;;  %17431 = vmatmul.mubr.msk.f32.gmra.mxu0 %vm156_vm0, %v14762_v41 }
 0xcc8   :  { %17433 = vmatprep.mubr.msk.f32.mxu0 %vm156_vm0, %v14763_v52  ;;  %v14772_v33 = vsel %vm14746_vm3, %v23405_v45, %v14637_v6 }
 0xcc9   :  { %v14635_v62 = vpop.permute.xlu0 %14634 }
 0xcca   :  { %v14771_v60 = vsel %vm14746_vm3, %v23396_v50, %v14635_v62 }
 0xccb   :  { %v14625_v1 = vpop.permute.xlu1 %14624  ;;  %17434 = vmatmul.mubr.msk.f32.gmra.mxu0 %vm156_vm0, %v14764_v42 }
 0xccc   :  { %v14766_v13 = vsel %vm14746_vm3, %v23369_v56, %v14625_v1 }
 0xccd   :  { %v14623_v9 = vpop.permute.xlu0 %14622 }
 0xcce   :  { %v14765_v49 = vsel %vm14746_vm3, %v23362_v63, %v14623_v9 }
 0xccf   :  { %v14645_v12 = vpop.permute.xlu1 %14644  ;;  %17436 = vmatprep.mubr.msk.f32.mxu0 %vm156_vm0, %v14765_v49 }
 0xcd0   :  { %17437 = vmatmul.mubr.msk.f32.gmra.mxu0 %vm156_vm0, %v14766_v13 }
 0xcd1   :  { %17439 = vmatprep.mubr.msk.f32.mxu0 %vm156_vm0, %v14767_v17  ;;  %v14643_v5 = vpop.permute.xlu0 %14642 }
 0xcd3   :  { %v14633_v15 = vpop.permute.xlu1 %14632 }
 0xcd4   :  { %17440 = vmatmul.mubr.msk.f32.gmra.mxu0 %vm156_vm0, %v14768_v46  ;;  %v14770_v28 = vsel %vm14746_vm3, %v23393_v24, %v14633_v15  ;;  %v24699_v24 = vld [vmem:[#allocation134_spill] sm:$0xff] }
 0xcd5   :  { %v14631_v63 = vpop.permute.xlu0 %14630  ;;  %v14710_v26 = vsel %vm1496_vm1, %v24699_v24, %v23443_v0  ;;  %v14711_v0 = vsel %vm1496_vm1, %v24700_v58, %v23441_v29 }
 0xcd6   :  { %v14769_v56 = vsel %vm14746_vm3, %v23384_v23, %v14631_v63  ;;  %v14742_v54 = vsel %vm2889_vm2, %v14710_v26, %v23447_v22  ;;  %v14743_v22 = vsel %vm2889_vm2, %v14711_v0, %v23445_v59 }
 0xcd7   :  { %17442 = vmatprep.mubr.msk.f32.mxu0 %vm156_vm0, %v14769_v56  ;;  %v14393_v51 = vpop.permute.xlu1 %14392  ;;  %v14775_v20 = vsel %vm14746_vm3, %v14742_v54, %v14643_v5  ;;  %v14776_v2 = vsel %vm14746_vm3, %v14743_v22, %v14645_v12 }
 0xcd8   :  { %17443 = vmatmul.mubr.msk.f32.gmra.mxu0 %vm156_vm0, %v14770_v28  ;;  %v14713_v19 = vsel %vm1496_vm1, %v24702_v39, %v14393_v51 }
 0xcd9   :  { %17445 = vmatprep.mubr.msk.f32.mxu0 %vm156_vm0, %v14771_v60  ;;  %v14391_v21 = vpop.permute.xlu0 %14390 }
 0xcdc   :  { %17446 = vmatmul.mubr.msk.f32.gmra.mxu0 %vm156_vm0, %v14772_v33 }
 0xd06   :  { %v14641_v23 = vpop.permute.xlu1 %14640 }
 0xd07   :  { %v14774_v40 = vsel %vm14746_vm3, %v23415_v11, %v14641_v23  ;;  %v24701_v11 = vld [vmem:[#allocation142_spill] sm:$0xff] }
 0xd08   :  { %v14639_v37 = vpop.permute.xlu0 %14638  ;;  %v14712_v31 = vsel %vm1496_vm1, %v24701_v11, %v14391_v21 }
 0xd09   :  { %v14773_v50 = vsel %vm14746_vm3, %v23408_v55, %v14639_v37 }
 0xd0a   :  { %v14521_v45 = vpop.permute.xlu1 %14520  ;;  %17448 = vmatprep.mubr.msk.f32.mxu0 %vm156_vm0, %v14773_v50 }
 0xd0b   :  { %17449 = vmatmul.mubr.msk.f32.gmra.mxu0 %vm156_vm0, %v14774_v40  ;;  %v14745_v53 = vsel %vm2889_vm2, %v14713_v19, %v14521_v45 }
 0xd0c   :  { %17451 = vmatprep.mubr.msk.f32.mxu0 %vm156_vm0, %v14775_v20  ;;  %v14519_v55 = vpop.permute.xlu0 %14518 }
 0xd0d   :  { %v14744_v3 = vsel %vm2889_vm2, %v14712_v31, %v14519_v55 }
 0xd0e   :  { %v14649_v57 = vpop.permute.xlu1 %14648 }
 0xd0f   :  { %17452 = vmatmul.mubr.msk.f32.gmra.mxu0 %vm156_vm0, %v14776_v2  ;;  %v14778_v59 = vsel %vm14746_vm3, %v14745_v53, %v14649_v57 }
 0xd10   :  { %v14647_v29 = vpop.permute.xlu0 %14646 }
 0xd11   :  { %v14777_v44 = vsel %vm14746_vm3, %v14744_v3, %v14647_v29 }
 0xd12   :  { %17454 = vmatprep.mubr.msk.f32.mxu0 %vm156_vm0, %v14777_v44 }
 0xd13   :  { %17455 = vmatmul.mubr.msk.f32.gmra.mxu0 %vm156_vm0, %v14778_v59 }
 0xd52   :  { %v17411_v10 = vpop.f32.mrf.mxu0 }
 0xd53   :  { %v14958_v30 = vadd.f32 %v17411_v10, %v23568_v43 }
 0xd54   :  { %v14952_v16 = vpop.f32.mrf.mxu0 }
 0xd55   :  { %15112 = vst.msk [vmem:[#allocation13 + $0x8] sm:$0xff] %vm156_vm0, %v14958_v30  ;;  %v14953_v4 = vadd.f32 %v23568_v43, %v14952_v16 }
 0xd57   :  { %15111 = vst.msk [vmem:[#allocation13] sm:$0xff] %vm156_vm0, %v14953_v4 }
 0xd6a   :  { %v17414_v32 = vpop.f32.mrf.mxu0 }
 0xd6b   :  { %v14968_v14 = vadd.f32 %v17414_v32, %v23568_v43 }
 0xd6c   :  { %v14962_v34 = vpop.f32.mrf.mxu0 }
 0xd6d   :  { %15114 = vst.msk [vmem:[#allocation13 + $0x18] sm:$0xff] %vm156_vm0, %v14968_v14  ;;  %v14963_v27 = vadd.f32 %v23568_v43, %v14962_v34 }
 0xd6e   :  { %v17417_v35 = vpop.f32.mrf.mxu0 }
 0xd6f   :  { %15113 = vst.msk [vmem:[#allocation13 + $0x10] sm:$0xff] %vm156_vm0, %v14963_v27  ;;  %v14978_v7 = vadd.f32 %v17417_v35, %v23568_v43 }
 0xd70   :  { %v14972_v8 = vpop.f32.mrf.mxu0 }
 0xd71   :  { %15116 = vst.msk [vmem:[#allocation13 + $0x28] sm:$0xff] %vm156_vm0, %v14978_v7  ;;  %v14973_v36 = vadd.f32 %v23568_v43, %v14972_v8 }
 0xd73   :  { %15115 = vst.msk [vmem:[#allocation13 + $0x20] sm:$0xff] %vm156_vm0, %v14973_v36 }
 0xd77   :  { %v17420_v48 = vpop.f32.mrf.mxu0 }
 0xd78   :  { %v14988_v25 = vadd.f32 %v17420_v48, %v23568_v43 }
 0xd79   :  { %v14982_v38 = vpop.f32.mrf.mxu0 }
 0xd7a   :  { %15118 = vst.msk [vmem:[#allocation13 + $0x38] sm:$0xff] %vm156_vm0, %v14988_v25  ;;  %v14983_v18 = vadd.f32 %v23568_v43, %v14982_v38 }
 0xd7b   :  { %v17423_v61 = vpop.f32.mrf.mxu0 }
 0xd7c   :  { %15117 = vst.msk [vmem:[#allocation13 + $0x30] sm:$0xff] %vm156_vm0, %v14983_v18  ;;  %v14998_v47 = vadd.f32 %v17423_v61, %v23568_v43 }
 0xd7d   :  { %v14992_v41 = vpop.f32.mrf.mxu0 }
 0xd7e   :  { %15120 = vst.msk [vmem:[#allocation13 + $0x48] sm:$0xff] %vm156_vm0, %v14998_v47  ;;  %v14993_v52 = vadd.f32 %v23568_v43, %v14992_v41 }
 0xd7f   :  { %v17426_v6 = vpop.f32.mrf.mxu0 }
 0xd80   :  { %15119 = vst.msk [vmem:[#allocation13 + $0x40] sm:$0xff] %vm156_vm0, %v14993_v52  ;;  %v15008_v62 = vadd.f32 %v17426_v6, %v23568_v43 }
 0xd81   :  { %v15002_v42 = vpop.f32.mrf.mxu0 }
 0xd82   :  { %15122 = vst.msk [vmem:[#allocation13 + $0x58] sm:$0xff] %vm156_vm0, %v15008_v62  ;;  %v15003_v1 = vadd.f32 %v23568_v43, %v15002_v42 }
 0xd83   :  { %v17429_v9 = vpop.f32.mrf.mxu0 }
 0xd84   :  { %15121 = vst.msk [vmem:[#allocation13 + $0x50] sm:$0xff] %vm156_vm0, %v15003_v1  ;;  %v15018_v49 = vadd.f32 %v17429_v9, %v23568_v43 }
 0xd85   :  { %v15012_v13 = vpop.f32.mrf.mxu0 }
 0xd86   :  { %15124 = vst.msk [vmem:[#allocation13 + $0x68] sm:$0xff] %vm156_vm0, %v15018_v49  ;;  %v15013_v12 = vadd.f32 %v23568_v43, %v15012_v13 }
 0xd87   :  { %v17432_v17 = vpop.f32.mrf.mxu0 }
 0xd88   :  { %15123 = vst.msk [vmem:[#allocation13 + $0x60] sm:$0xff] %vm156_vm0, %v15013_v12  ;;  %v15028_v5 = vadd.f32 %v17432_v17, %v23568_v43 }
 0xd89   :  { %v15022_v46 = vpop.f32.mrf.mxu0 }
 0xd8a   :  { %15126 = vst.msk [vmem:[#allocation13 + $0x78] sm:$0xff] %vm156_vm0, %v15028_v5  ;;  %v15023_v15 = vadd.f32 %v23568_v43, %v15022_v46 }
 0xd8b   :  { %v17435_v63 = vpop.f32.mrf.mxu0 }
 0xd8c   :  { %15125 = vst.msk [vmem:[#allocation13 + $0x70] sm:$0xff] %vm156_vm0, %v15023_v15  ;;  %v15038_v56 = vadd.f32 %v17435_v63, %v23568_v43 }
 0xd8d   :  { %v15032_v28 = vpop.f32.mrf.mxu0 }
 0xd8e   :  { %15128 = vst.msk [vmem:[#allocation13 + $0x88] sm:$0xff] %vm156_vm0, %v15038_v56  ;;  %v15033_v60 = vadd.f32 %v23568_v43, %v15032_v28 }
 0xd90   :  { %15127 = vst.msk [vmem:[#allocation13 + $0x80] sm:$0xff] %vm156_vm0, %v15033_v60  ;;  %v17438_v33 = vpop.f32.mrf.mxu0 }
 0xd91   :  { %v15048_v51 = vadd.f32 %v17438_v33, %v23568_v43 }
 0xd92   :  { %v15042_v21 = vpop.f32.mrf.mxu0 }
 0xd93   :  { %15130 = vst.msk [vmem:[#allocation13 + $0x98] sm:$0xff] %vm156_vm0, %v15048_v51  ;;  %v15043_v23 = vadd.f32 %v23568_v43, %v15042_v21 }
 0xd94   :  { %v17441_v37 = vpop.f32.mrf.mxu0 }
 0xd95   :  { %15129 = vst.msk [vmem:[#allocation13 + $0x90] sm:$0xff] %vm156_vm0, %v15043_v23  ;;  %v15058_v24 = vadd.f32 %v17441_v37, %v23568_v43 }
 0xd96   :  { %v15052_v26 = vpop.f32.mrf.mxu0 }
 0xd97   :  { %15132 = vst.msk [vmem:[#allocation13 + $0xa8] sm:$0xff] %vm156_vm0, %v15058_v24  ;;  %v15053_v50 = vadd.f32 %v23568_v43, %v15052_v26 }
 0xd98   :  { %v17444_v54 = vpop.f32.mrf.mxu0 }
 0xd99   :  { %15131 = vst.msk [vmem:[#allocation13 + $0xa0] sm:$0xff] %vm156_vm0, %v15053_v50  ;;  %v15068_v40 = vadd.f32 %v17444_v54, %v23568_v43 }
 0xd9a   :  { %v15062_v45 = vpop.f32.mrf.mxu0 }
 0xd9b   :  { %15134 = vst.msk [vmem:[#allocation13 + $0xb8] sm:$0xff] %vm156_vm0, %v15068_v40  ;;  %v15063_v20 = vadd.f32 %v23568_v43, %v15062_v45 }
 0xd9c   :  { %v17447_v58 = vpop.f32.mrf.mxu0 }
 0xd9d   :  { %15133 = vst.msk [vmem:[#allocation13 + $0xb0] sm:$0xff] %vm156_vm0, %v15063_v20  ;;  %v15078_v0 = vadd.f32 %v17447_v58, %v23568_v43 }
 0xd9e   :  { %v15072_v55 = vpop.f32.mrf.mxu0 }
 0xd9f   :  { %15136 = vst.msk [vmem:[#allocation13 + $0xc8] sm:$0xff] %vm156_vm0, %v15078_v0  ;;  %v15073_v22 = vadd.f32 %v23568_v43, %v15072_v55 }
 0xda1   :  { %15135 = vst.msk [vmem:[#allocation13 + $0xc0] sm:$0xff] %vm156_vm0, %v15073_v22 }
 0xdcb   :  { %v17450_v2 = vpop.f32.mrf.mxu0 }
 0xdcc   :  { %v15088_v11 = vadd.f32 %v17450_v2, %v23568_v43 }
 0xdcd   :  { %v15082_v31 = vpop.f32.mrf.mxu0 }
 0xdce   :  { %15138 = vst.msk [vmem:[#allocation13 + $0xd8] sm:$0xff] %vm156_vm0, %v15088_v11  ;;  %v15083_v57 = vadd.f32 %v23568_v43, %v15082_v31 }
 0xdcf   :  { %v17453_v39 = vpop.f32.mrf.mxu0 }
 0xdd0   :  { %15137 = vst.msk [vmem:[#allocation13 + $0xd0] sm:$0xff] %vm156_vm0, %v15083_v57  ;;  %v15098_v19 = vadd.f32 %v17453_v39, %v23568_v43 }
 0xdd1   :  { %v15092_v3 = vpop.f32.mrf.mxu0 }
 0xdd2   :  { %15140 = vst.msk [vmem:[#allocation13 + $0xe8] sm:$0xff] %vm156_vm0, %v15098_v19  ;;  %v15093_v29 = vadd.f32 %v23568_v43, %v15092_v3 }
 0xdd3   :  { %v17456_v53 = vpop.f32.mrf.mxu0 }
 0xdd4   :  { %15139 = vst.msk [vmem:[#allocation13 + $0xe0] sm:$0xff] %vm156_vm0, %v15093_v29  ;;  %v15108_v44 = vadd.f32 %v17456_v53, %v23568_v43 }
 0xdd5   :  { %v15102_v59 = vpop.f32.mrf.mxu0 }
 0xdd6   :  { %15142 = vst.msk [vmem:[#allocation13 + $0xf8] sm:$0xff] %vm156_vm0, %v15108_v44  ;;  %v15103_v10 = vadd.f32 %v23568_v43, %v15102_v59 }
 0xdd8   :  { %15141 = vst.msk [vmem:[#allocation13 + $0xf0] sm:$0xff] %vm156_vm0, %v15103_v10 }
 0xdd9   :  { %18187 = shalt.err (!%p18184_p6)
}
 0xdda   :  { %15154 = dma.vmem_to_hbm [thread:$0]  %s15149_s25, 4096, %s23652_s12, [#allocation4], %s18208_s26, %s18208_s26, %s18209_s27  }
 0xddb   :  { %18204 = dma.done.wait [#allocation4], 4096  }
 0xddc   :  { %18205 = vsyncadd [#allocation4], 4294963200 }
 0xddd   :  { %15158 = vsyncpa [#allocation3], 1 }
 0xdde   :  { %15159 = vsyncpa [#allocation6], 1 }
 0xddf   :  { %15160 = vsyncpa [#allocation9], 1 }
 0xde0   :  { %15161 = vsyncpa [#allocation12], 1 }
 0xde1   :  { %15162 = vsyncpa [#allocation4], 1 }

</bundles_post_ra>
